<compile_context>
chip_gen: v7x
topology: tpu7x:2x2x1
jax: 0.10.0
libtpu: 0.0.40
codegen_flags: <defaults>
</compile_context>

<pallas_src>
import functools
import math

import jax
import jax.numpy as jnp
from jax import lax
from jax.experimental import pallas as pl
from jax.experimental.pallas import tpu as pltpu

EPS = 1e-4     # CLN eps
DROP = 0.5     # stochastic_drop: eval-mode output scale (folded into conv3 W)
_LM = 8        # aligned left margin of the padded 3x3 halo scratch


# ---------------------------------------------------------------------------
# In-kernel math helpers (operate on VMEM values / scratch refs)
# ---------------------------------------------------------------------------
def _cln(x, cp, cc, eps):
  """Complex layer norm (2x2 covariance whitening), packed channels [r | i].

  x  : (M, 2*cc) activations (real channels 0..cc-1, imag cc..2cc-1).
  cp : (3, 2*cc) packed params:
         row0 = [gamma_rr | gamma_ii], row1 = [gamma_ri | gamma_ri],
         row2 = [beta_r   | beta_i  ].
  Statistics are taken jointly over all rows and all complex channels
  (one 2x2 covariance per sample).  Raw-moment form in f32; fine at these
  activation scales (see review note on cancellation).
  """
  m = x.shape[0]
  twocc = 2 * cc
  inv_n = 1.0 / float(m * cc)               # elements per (real / imag) half

  # ---- stats: column sums first (cheap sublane reductions), then tiny work
  cs = jnp.sum(x, axis=0, keepdims=True)          # (1, 2cc)
  cq = jnp.sum(x * x, axis=0, keepdims=True)      # (1, 2cc)
  xr = x[:, :cc]
  xi = x[:, cc:]
  s_ri = jnp.sum(xr * xi)                         # cross raw moment sum

  s_r = jnp.sum(cs[:, :cc])
  s_i = jnp.sum(cs[:, cc:])
  q_r = jnp.sum(cq[:, :cc])
  q_i = jnp.sum(cq[:, cc:])

  mu_r = s_r * inv_n
  mu_i = s_i * inv_n
  vrr = q_r * inv_n - mu_r * mu_r + eps
  vii = q_i * inv_n - mu_i * mu_i + eps
  vri = s_ri * inv_n - mu_r * mu_i

  # inverse square root of the 2x2 covariance matrix (no extra det guard,
  # matching the reference; eps keeps it SPD)
  s = jnp.sqrt(vrr * vii - vri * vri)
  t = jnp.sqrt(vrr + vii + 2.0 * s)
  inv = 1.0 / (s * t)
  wrr = (vii + s) * inv
  wii = (vrr + s) * inv
  wri = -vri * inv

  # ---- fold whitening (scalars) + gamma/beta (per lane) + mean subtraction
  # into out = x @ M + bias : one small matmul on the otherwise-idle MXU,
  # zero full-tensor VPU ops besides the bias add.
  lane = lax.broadcasted_iota(jnp.int32, (1, twocc), 1)
  is_real = lane < cc
  g_diag = cp[0:1, :]
  g_off = cp[1:2, :]
  beta = cp[2:3, :]
  w_diag = jnp.where(is_real, wrr, wii)
  w_diag_sw = jnp.where(is_real, wii, wrr)
  mu = jnp.where(is_real, mu_r, mu_i)
  mu_sw = jnp.where(is_real, mu_i, mu_r)
  a = g_diag * w_diag + g_off * wri          # coeff on own lane
  b = g_diag * wri + g_off * w_diag_sw       # coeff on swapped lane
  bias = beta - a * mu - b * mu_sw

  row = lax.broadcasted_iota(jnp.int32, (twocc, twocc), 0)
  col = lax.broadcasted_iota(jnp.int32, (twocc, twocc), 1)
  swap_col = col + jnp.where(col < cc, cc, -cc)
  m_mat = (jnp.where(row == col, a, 0.0) +
           jnp.where(row == swap_col, b, 0.0))

  return jnp.dot(x, m_mat, preferred_element_type=jnp.float32) + bias


def _conv3x3_same(t2d, w9_ref, pad_ref, h, w):
  """3x3 'same' convolution via 9 tap matmuls from a zero-bordered VMEM halo.

  t2d     : (h*w, cin) input, row-major over (h, w).
  w9_ref  : VMEM ref (9, cin, cout) taps, tap t -> (kh, kw) = divmod(t, 3).
  pad_ref : VMEM scratch (h+2, w+2*_LM, cin); interior stored at the
            sublane-tile-aligned column offset _LM (no unaligned big stores).
            Only the border cells the taps read are zeroed, every iteration
            (megacore-safe: each core owns its own scratch).
  """
  cin = t2d.shape[-1]
  zrow = jnp.zeros((1, w + 2, cin), jnp.float32)
  zcol = jnp.zeros((h, 1, cin), jnp.float32)
  pad_ref[0:1, _LM - 1:_LM + w + 1, :] = zrow          # top halo row
  pad_ref[h + 1:h + 2, _LM - 1:_LM + w + 1, :] = zrow  # bottom halo row
  pad_ref[1:h + 1, _LM - 1:_LM, :] = zcol              # left halo column
  pad_ref[1:h + 1, _LM + w:_LM + w + 1, :] = zcol      # right halo column
  pad_ref[1:h + 1, _LM:_LM + w, :] = t2d.reshape(h, w, cin)

  acc = None
  for tap in range(9):                                  # stream per-tap loads
    kh, kw = divmod(tap, 3)
    j0 = _LM - 1 + kw
    patch = pad_ref[kh:kh + h, j0:j0 + w, :].reshape(h * w, cin)
    d = jnp.dot(patch, w9_ref[tap], preferred_element_type=jnp.float32)
    acc = d if acc is None else acc + d
  return acc


# ---------------------------------------------------------------------------
# Fused Bottleneck kernel (one grid step per batch sample)
# ---------------------------------------------------------------------------
def _bottleneck_kernel(x_ref, w1_ref, w2_ref, w3_ref, c1_ref, c2_ref, c3_ref,
                       o_ref, pad1_ref, pad2_ref, *, eps):
  _, h, w, c0 = x_ref.shape
  hw = h * w
  x = x_ref[0].reshape(hw, c0)                        # residual, (hw, 2*inpl)

  # bn1 (CLN) -> relu -> conv1 (3x3, c0 -> c0)
  t = jnp.maximum(_cln(x, c1_ref[...], c0 // 2, eps), 0.0)
  y = _conv3x3_same(t, w1_ref, pad1_ref, h, w)

  # bn2 (CLN) -> relu -> conv2 (1x1, c0 -> c2)
  t = jnp.maximum(_cln(y, c2_ref[...], c0 // 2, eps), 0.0)
  y = jnp.dot(t, w2_ref[...], preferred_element_type=jnp.float32)

  # bn3 (CLN) -> conv3 (3x3, c2 -> c0); DROP is pre-folded into w3
  t = _cln(y, c3_ref[...], y.shape[-1] // 2, eps)
  y = _conv3x3_same(t, w3_ref, pad2_ref, h, w)

  # residual add (downsample is None)
  o_ref[0] = (y + x).reshape(h, w, c0)


# ---------------------------------------------------------------------------
# Public wrapper (NCHW in / NCHW out)
# ---------------------------------------------------------------------------
def bottleneck_forward(x_nchw, params):
  x = jnp.transpose(x_nchw, (0, 2, 3, 1)).astype(jnp.float32)    # NCHW -> NHWC
  n, h, w, c0 = x.shape
  c2 = params["w2"].shape[-1]
  w3_scaled = params["w3"] * DROP      # fold eval-mode stochastic-depth scale

  def _const(a):
    nd = a.ndim
    return pl.BlockSpec(a.shape, lambda i, _nd=nd: (0,) * _nd)

  # Scratch footprint per core: (H+2)*(W+2*_LM)*(c0+c2)*4 B  (~55 KiB here);
  # re-derive against v7x's 64 MiB VMEM before reusing at larger H/W.
  out = pl.pallas_call(
      functools.partial(_bottleneck_kernel, eps=EPS),
      out_shape=jax.ShapeDtypeStruct((n, h, w, c0), jnp.float32),
      grid=(n,),
      in_specs=[pl.BlockSpec((1, h, w, c0), lambda i: (i, 0, 0, 0)),
                _const(params["w1"]), _const(params["w2"]),
                _const(w3_scaled), _const(params["c1"]),
                _const(params["c2"]), _const(params["c3"])],
      out_specs=pl.BlockSpec((1, h, w, c0), lambda i: (i, 0, 0, 0)),
      scratch_shapes=[pltpu.VMEM((h + 2, w + 2 * _LM, c0), jnp.float32),
                      pltpu.VMEM((h + 2, w + 2 * _LM, c2), jnp.float32)],
      compiler_params=pltpu.CompilerParams(
          dimension_semantics=("parallel",)),        # batch split on v7x TCs
  )(x, params["w1"], params["w2"], w3_scaled,
    params["c1"], params["c2"], params["c3"])
  return jnp.transpose(out, (0, 3, 1, 2))                        # NHWC -> NCHW


# ---------------------------------------------------------------------------
# Deterministic parameter construction
# ---------------------------------------------------------------------------
def make_complex_conv_weight(key, in_c, out_c, kh, kw):
  """Concatenated real-valued HWIO kernel of a ComplexConv, channels packed
  [real | imag] on both input and output axes."""
  kr, ki = jax.random.split(key)
  fan_in = in_c * kh * kw
  std = 1.0 / math.sqrt(2.0 * fan_in)
  wr = jax.random.normal(kr, (kh, kw, in_c, out_c), jnp.float32) * std
  wi = jax.random.normal(ki, (kh, kw, in_c, out_c), jnp.float32) * std
  top = jnp.concatenate([wr, wi], axis=-1)      # rows fed by real input
  bot = jnp.concatenate([-wi, wr], axis=-1)     # rows fed by imag input
  return jnp.concatenate([top, bot], axis=-2)   # (kh, kw, 2*in_c, 2*out_c)


def make_cln_params(cc):
  g = jnp.stack([
      jnp.full((cc,), 1.0 / math.sqrt(2.0), jnp.float32),   # gamma_rr
      jnp.zeros((cc,), jnp.float32),                        # gamma_ri
      jnp.full((cc,), 1.0 / math.sqrt(2.0), jnp.float32),   # gamma_ii
  ])
  b = jnp.zeros((2, cc), jnp.float32)                       # beta_r, beta_i
  return g, b


def pack_cln_params(g, b):
  """(3, cc) gamma + (2, cc) beta -> (3, 2cc) packed kernel params."""
  return jnp.stack([
      jnp.concatenate([g[0], g[2]]),     # [gamma_rr | gamma_ii]
      jnp.concatenate([g[1], g[1]]),     # [gamma_ri | gamma_ri]
      jnp.concatenate([b[0], b[1]]),     # [beta_r   | beta_i  ]
  ])


# ---------------------------------------------------------------------------
# Pure-JAX reference (same math, straightforward form) for validation
# ---------------------------------------------------------------------------
def _cln_ref(x_hwc, g, b, eps):
  cc = x_hwc.shape[-1] // 2
  r, i = x_hwc[..., :cc], x_hwc[..., cc:]
  mu_r, mu_i = jnp.mean(r), jnp.mean(i)
  rc, ic = r - mu_r, i - mu_i
  vrr = jnp.mean(rc * rc) + eps
  vii = jnp.mean(ic * ic) + eps
  vri = jnp.mean(rc * ic)
  s = jnp.sqrt(vrr * vii - vri * vri)
  t = jnp.sqrt(vrr + vii + 2.0 * s)
  inv = 1.0 / (s * t)
  wrr, wii, wri = (vii + s) * inv, (vrr + s) * inv, -vri * inv
  rh = wrr * rc + wri * ic
  ih = wri * rc + wii * ic
  out_r = g[0] * rh + g[1] * ih + b[0]
  out_i = g[1] * rh + g[2] * ih + b[1]
  return jnp.concatenate([out_r, out_i], axis=-1)


def _conv3x3_ref(x_hwc, w9):
  h, w, _ = x_hwc.shape
  xp = jnp.pad(x_hwc, ((1, 1), (1, 1), (0, 0)))
  out = jnp.zeros((h, w, w9.shape[-1]), jnp.float32)
  for tap in range(9):
    kh, kw = divmod(tap, 3)
    out = out + jnp.einsum("hwc,cd->hwd", xp[kh:kh + h, kw:kw + w, :], w9[tap])
  return out


def bottleneck_ref(x_nchw, raw):
  x = jnp.transpose(x_nchw, (0, 2, 3, 1)).astype(jnp.float32)

  def one(xs):
    t = jax.nn.relu(_cln_ref(xs, raw["g1"], raw["b1"], EPS))
    y = _conv3x3_ref(t, raw["w1"])
    t = jax.nn.relu(_cln_ref(y, raw["g2"], raw["b2"], EPS))
    y = jnp.einsum("hwc,cd->hwd", t, raw["w2"])
    t = _cln_ref(y, raw["g3"], raw["b3"], EPS)
    y = _conv3x3_ref(t, raw["w3"])
    return y * DROP + xs

  return jnp.transpose(jax.vmap(one)(x), (0, 3, 1, 2))


# ---------------------------------------------------------------------------
if __name__ == "__main__":
  inplanes, planes, expansion = 4, 4, 2
  bottleneck_size = planes * expansion
  N, H, W = 2, 16, 16

  key = jax.random.PRNGKey(0)
  kx, k1, k2, k3 = jax.random.split(key, 4)

  # input: NCHW, C = 2*inplanes complex-packed channels
  x = jax.random.normal(kx, (N, 2 * inplanes, H, W), jnp.float32)

  w1 = make_complex_conv_weight(k1, inplanes, inplanes, 3, 3)
  w2 = make_complex_conv_weight(k2, inplanes, bottleneck_size, 1, 1)[0, 0]
  w3 = make_complex_conv_weight(k3, bottleneck_size, planes, 3, 3)
  g1, b1 = make_cln_params(inplanes)
  g2, b2 = make_cln_params(inplanes)
  g3, b3 = make_cln_params(bottleneck_size)

  params = {
      "w1": w1.reshape(9, 2 * inplanes, 2 * inplanes),
      "w2": w2,
      "w3": w3.reshape(9, 2 * bottleneck_size, 2 * planes),
      "c1": pack_cln_params(g1, b1),
      "c2": pack_cln_params(g2, b2),
      "c3": pack_cln_params(g3, b3),
  }
  raw = {"w1": params["w1"], "w2": w2, "w3": params["w3"],
         "g1": g1, "b1": b1, "g2": g2, "b2": b2, "g3": g3, "b3": b3}

  out = jax.jit(bottleneck_forward)(x, params)
  out = jax.block_until_ready(out)
  assert out.shape == (N, 2 * planes, H, W), out.shape
  assert bool(jnp.all(jnp.isfinite(out)))

  ref = jax.block_until_ready(jax.jit(bottleneck_ref)(x, raw))
  err = float(jnp.max(jnp.abs(out - ref)))
  assert err < 5e-3, f"max abs error vs pure-JAX reference: {err}"

  print("KERNEL_OK")
</pallas_src>

<mosaic_0001>
module attributes {stable_mosaic.version = 11 : i64} {
  func.func @_bottleneck_kernel(%arg0: i32, %arg1: memref<1x16x16x8xf32, #tpu.memory_space<vmem>>, %arg2: memref<9x8x8xf32, #tpu.memory_space<vmem>>, %arg3: memref<8x16xf32, #tpu.memory_space<vmem>>, %arg4: memref<9x16x8xf32, #tpu.memory_space<vmem>>, %arg5: memref<3x8xf32, #tpu.memory_space<vmem>>, %arg6: memref<3x8xf32, #tpu.memory_space<vmem>>, %arg7: memref<3x16xf32, #tpu.memory_space<vmem>>, %arg8: memref<1x16x16x8xf32, #tpu.memory_space<vmem>>, %arg9: memref<18x32x8xf32, #tpu.memory_space<vmem>>, %arg10: memref<18x32x16xf32, #tpu.memory_space<vmem>>) attributes {dimension_semantics = [#tpu.dimension_semantics<parallel>], iteration_bounds = array<i64: 2>, scalar_prefetch = 0 : i64, scratch_operands = 2 : i64, tpu.core_type = #tpu.core_type<tc>, window_params = [{transform_indices = @transform_0, window_bounds = array<i64: 1, 16, 16, 8>}, {pipeline_mode = #tpu.pipeline_mode<synchronous>, transform_indices = @transform_1, window_bounds = array<i64: 9, 8, 8>}, {pipeline_mode = #tpu.pipeline_mode<synchronous>, transform_indices = @transform_2, window_bounds = array<i64: 8, 16>}, {pipeline_mode = #tpu.pipeline_mode<synchronous>, transform_indices = @transform_3, window_bounds = array<i64: 9, 16, 8>}, {pipeline_mode = #tpu.pipeline_mode<synchronous>, transform_indices = @transform_4, window_bounds = array<i64: 3, 8>}, {pipeline_mode = #tpu.pipeline_mode<synchronous>, transform_indices = @transform_5, window_bounds = array<i64: 3, 8>}, {pipeline_mode = #tpu.pipeline_mode<synchronous>, transform_indices = @transform_6, window_bounds = array<i64: 3, 16>}, {transform_indices = @transform_7, window_bounds = array<i64: 1, 16, 16, 8>}]} {
    %c0 = arith.constant 0 : index
    %c0_0 = arith.constant 0 : index
    %c0_1 = arith.constant 0 : index
    %c0_2 = arith.constant 0 : index
    %0 = vector.load %arg1[%c0, %c0_0, %c0_1, %c0_2] : memref<1x16x16x8xf32, #tpu.memory_space<vmem>>, vector<1x16x16x8xf32>
    %1 = vector.shape_cast %0 : vector<1x16x16x8xf32> to vector<16x16x8xf32>
    %2 = vector.shape_cast %1 : vector<16x16x8xf32> to vector<256x8xf32>
    %c0_3 = arith.constant 0 : index
    %c0_4 = arith.constant 0 : index
    %3 = vector.load %arg5[%c0_3, %c0_4] : memref<3x8xf32, #tpu.memory_space<vmem>>, vector<3x8xf32>
    %cst = arith.constant dense<0.000000e+00> : vector<8xf32>
    %4 = vector.multi_reduction <add>, %2, %cst [0] : vector<256x8xf32> to vector<8xf32>
    %5 = vector.shape_cast %4 : vector<8xf32> to vector<1x8xf32>
    %6 = arith.mulf %2, %2 : vector<256x8xf32>
    %cst_5 = arith.constant dense<0.000000e+00> : vector<8xf32>
    %7 = vector.multi_reduction <add>, %6, %cst_5 [0] : vector<256x8xf32> to vector<8xf32>
    %8 = vector.shape_cast %7 : vector<8xf32> to vector<1x8xf32>
    %9 = vector.extract_strided_slice %2 {offsets = [0, 0], sizes = [256, 4], strides = [1, 1]} : vector<256x8xf32> to vector<256x4xf32>
    %10 = vector.extract_strided_slice %2 {offsets = [0, 4], sizes = [256, 4], strides = [1, 1]} : vector<256x8xf32> to vector<256x4xf32>
    %11 = arith.mulf %9, %10 : vector<256x4xf32>
    %12 = vector.shape_cast %11 : vector<256x4xf32> to vector<1x256x4xf32>
    %cst_6 = arith.constant dense<0.000000e+00> : vector<1xf32>
    %13 = vector.multi_reduction <add>, %12, %cst_6 [1, 2] : vector<1x256x4xf32> to vector<1xf32>
    %14 = vector.shape_cast %13 : vector<1xf32> to vector<1x1x1xf32>
    %15 = vector.extract %14[0, 0, 0] : f32 from vector<1x1x1xf32>
    %16 = vector.extract_strided_slice %5 {offsets = [0, 0], sizes = [1, 4], strides = [1, 1]} : vector<1x8xf32> to vector<1x4xf32>
    %17 = vector.shape_cast %16 : vector<1x4xf32> to vector<1x1x4xf32>
    %cst_7 = arith.constant dense<0.000000e+00> : vector<1xf32>
    %18 = vector.multi_reduction <add>, %17, %cst_7 [1, 2] : vector<1x1x4xf32> to vector<1xf32>
    %19 = vector.shape_cast %18 : vector<1xf32> to vector<1x1x1xf32>
    %20 = vector.extract %19[0, 0, 0] : f32 from vector<1x1x1xf32>
    %21 = vector.extract_strided_slice %5 {offsets = [0, 4], sizes = [1, 4], strides = [1, 1]} : vector<1x8xf32> to vector<1x4xf32>
    %22 = vector.shape_cast %21 : vector<1x4xf32> to vector<1x1x4xf32>
    %cst_8 = arith.constant dense<0.000000e+00> : vector<1xf32>
    %23 = vector.multi_reduction <add>, %22, %cst_8 [1, 2] : vector<1x1x4xf32> to vector<1xf32>
    %24 = vector.shape_cast %23 : vector<1xf32> to vector<1x1x1xf32>
    %25 = vector.extract %24[0, 0, 0] : f32 from vector<1x1x1xf32>
    %26 = vector.extract_strided_slice %8 {offsets = [0, 0], sizes = [1, 4], strides = [1, 1]} : vector<1x8xf32> to vector<1x4xf32>
    %27 = vector.shape_cast %26 : vector<1x4xf32> to vector<1x1x4xf32>
    %cst_9 = arith.constant dense<0.000000e+00> : vector<1xf32>
    %28 = vector.multi_reduction <add>, %27, %cst_9 [1, 2] : vector<1x1x4xf32> to vector<1xf32>
    %29 = vector.shape_cast %28 : vector<1xf32> to vector<1x1x1xf32>
    %30 = vector.extract %29[0, 0, 0] : f32 from vector<1x1x1xf32>
    %31 = vector.extract_strided_slice %8 {offsets = [0, 4], sizes = [1, 4], strides = [1, 1]} : vector<1x8xf32> to vector<1x4xf32>
    %32 = vector.shape_cast %31 : vector<1x4xf32> to vector<1x1x4xf32>
    %cst_10 = arith.constant dense<0.000000e+00> : vector<1xf32>
    %33 = vector.multi_reduction <add>, %32, %cst_10 [1, 2] : vector<1x1x4xf32> to vector<1xf32>
    %34 = vector.shape_cast %33 : vector<1xf32> to vector<1x1x1xf32>
    %35 = vector.extract %34[0, 0, 0] : f32 from vector<1x1x1xf32>
    %cst_11 = arith.constant 9.765625E-4 : f32
    %36 = arith.mulf %20, %cst_11 : f32
    %cst_12 = arith.constant 9.765625E-4 : f32
    %37 = arith.mulf %25, %cst_12 : f32
    %cst_13 = arith.constant 9.765625E-4 : f32
    %38 = arith.mulf %30, %cst_13 : f32
    %39 = arith.mulf %36, %36 : f32
    %40 = arith.subf %38, %39 : f32
    %cst_14 = arith.constant 9.99999974E-5 : f32
    %41 = arith.addf %40, %cst_14 : f32
    %cst_15 = arith.constant 9.765625E-4 : f32
    %42 = arith.mulf %35, %cst_15 : f32
    %43 = arith.mulf %37, %37 : f32
    %44 = arith.subf %42, %43 : f32
    %cst_16 = arith.constant 9.99999974E-5 : f32
    %45 = arith.addf %44, %cst_16 : f32
    %cst_17 = arith.constant 9.765625E-4 : f32
    %46 = arith.mulf %15, %cst_17 : f32
    %47 = arith.mulf %36, %37 : f32
    %48 = arith.subf %46, %47 : f32
    %49 = arith.mulf %41, %45 : f32
    %50 = arith.mulf %48, %48 : f32
    %51 = arith.subf %49, %50 : f32
    %52 = math.sqrt %51 : f32
    %53 = arith.addf %41, %45 : f32
    %cst_18 = arith.constant 2.000000e+00 : f32
    %54 = arith.mulf %cst_18, %52 : f32
    %55 = arith.addf %53, %54 : f32
    %56 = math.sqrt %55 : f32
    %57 = arith.mulf %52, %56 : f32
    %cst_19 = arith.constant 1.000000e+00 : f32
    %58 = arith.divf %cst_19, %57 : f32
    %59 = arith.addf %45, %52 : f32
    %60 = arith.mulf %59, %58 : f32
    %61 = arith.addf %41, %52 : f32
    %62 = arith.mulf %61, %58 : f32
    %cst_20 = arith.constant 0.000000e+00 : f32
    %63 = arith.subf %cst_20, %48 : f32
    %64 = arith.mulf %63, %58 : f32
    %65 = tpu.iota {dimensions = array<i32: 1>} : vector<1x8xi32>
    %c4_i32 = arith.constant 4 : i32
    %66 = vector.broadcast %c4_i32 : i32 to vector<1x8xi32>
    %67 = arith.cmpi slt, %65, %66 : vector<1x8xi32>
    %68 = vector.extract_strided_slice %3 {offsets = [0, 0], sizes = [1, 8], strides = [1, 1]} : vector<3x8xf32> to vector<1x8xf32>
    %69 = vector.extract_strided_slice %3 {offsets = [1, 0], sizes = [1, 8], strides = [1, 1]} : vector<3x8xf32> to vector<1x8xf32>
    %70 = vector.extract_strided_slice %3 {offsets = [2, 0], sizes = [1, 8], strides = [1, 1]} : vector<3x8xf32> to vector<1x8xf32>
    %71 = vector.broadcast %60 : f32 to vector<1x8xf32>
    %72 = vector.broadcast %62 : f32 to vector<1x8xf32>
    %73 = arith.select %67, %71, %72 : vector<1x8xi1>, vector<1x8xf32>
    %74 = vector.broadcast %62 : f32 to vector<1x8xf32>
    %75 = vector.broadcast %60 : f32 to vector<1x8xf32>
    %76 = arith.select %67, %74, %75 : vector<1x8xi1>, vector<1x8xf32>
    %77 = vector.broadcast %36 : f32 to vector<1x8xf32>
    %78 = vector.broadcast %37 : f32 to vector<1x8xf32>
    %79 = arith.select %67, %77, %78 : vector<1x8xi1>, vector<1x8xf32>
    %80 = vector.broadcast %37 : f32 to vector<1x8xf32>
    %81 = vector.broadcast %36 : f32 to vector<1x8xf32>
    %82 = arith.select %67, %80, %81 : vector<1x8xi1>, vector<1x8xf32>
    %83 = arith.mulf %68, %73 : vector<1x8xf32>
    %84 = vector.broadcast %64 : f32 to vector<1x8xf32>
    %85 = arith.mulf %69, %84 : vector<1x8xf32>
    %86 = arith.addf %83, %85 : vector<1x8xf32>
    %87 = vector.broadcast %64 : f32 to vector<1x8xf32>
    %88 = arith.mulf %68, %87 : vector<1x8xf32>
    %89 = arith.mulf %69, %76 : vector<1x8xf32>
    %90 = arith.addf %88, %89 : vector<1x8xf32>
    %91 = arith.mulf %86, %79 : vector<1x8xf32>
    %92 = arith.subf %70, %91 : vector<1x8xf32>
    %93 = arith.mulf %90, %82 : vector<1x8xf32>
    %94 = arith.subf %92, %93 : vector<1x8xf32>
    %95 = tpu.iota {dimensions = array<i32: 0>} : vector<8x8xi32>
    %96 = tpu.iota {dimensions = array<i32: 1>} : vector<8x8xi32>
    %c4_i32_21 = arith.constant 4 : i32
    %97 = vector.broadcast %c4_i32_21 : i32 to vector<8x8xi32>
    %98 = arith.cmpi slt, %96, %97 : vector<8x8xi32>
    %c4_i32_22 = arith.constant 4 : i32
    %c-4_i32 = arith.constant -4 : i32
    %99 = vector.broadcast %c4_i32_22 : i32 to vector<8x8xi32>
    %100 = vector.broadcast %c-4_i32 : i32 to vector<8x8xi32>
    %101 = arith.select %98, %99, %100 : vector<8x8xi1>, vector<8x8xi32>
    %102 = arith.addi %96, %101 : vector<8x8xi32>
    %103 = arith.cmpi eq, %95, %96 : vector<8x8xi32>
    %cst_23 = arith.constant 0.000000e+00 : f32
    %104 = vector.shape_cast %86 : vector<1x8xf32> to vector<1x8xf32>
    %105 = vector.broadcast %104 : vector<1x8xf32> to vector<8x8xf32>
    %106 = vector.broadcast %cst_23 : f32 to vector<8x8xf32>
    %107 = arith.select %103, %105, %106 : vector<8x8xi1>, vector<8x8xf32>
    %108 = arith.cmpi eq, %95, %102 : vector<8x8xi32>
    %cst_24 = arith.constant 0.000000e+00 : f32
    %109 = vector.shape_cast %90 : vector<1x8xf32> to vector<1x8xf32>
    %110 = vector.broadcast %109 : vector<1x8xf32> to vector<8x8xf32>
    %111 = vector.broadcast %cst_24 : f32 to vector<8x8xf32>
    %112 = arith.select %108, %110, %111 : vector<8x8xi1>, vector<8x8xf32>
    %113 = arith.addf %107, %112 : vector<8x8xf32>
    %cst_25 = arith.constant dense<0.000000e+00> : vector<256x8xf32>
    %114 = tpu.matmul %2, %113, %cst_25 {dimension_numbers = #tpu.dot_dimension_numbers<[1], [0], [0], [1], [0, 0, 1, 1], [], []>} : vector<256x8xf32>, vector<8x8xf32>, vector<256x8xf32> -> vector<256x8xf32>
    %115 = vector.broadcast %94 : vector<1x8xf32> to vector<256x8xf32>
    %116 = arith.addf %114, %115 : vector<256x8xf32>
    %cst_26 = arith.constant 0.000000e+00 : f32
    %117 = vector.broadcast %cst_26 : f32 to vector<256x8xf32>
    %118 = arith.maximumf %116, %117 : vector<256x8xf32>
    %cst_27 = arith.constant 0.000000e+00 : f32
    %119 = vector.broadcast %cst_27 : f32 to vector<1x18x8xf32>
    %cst_28 = arith.constant 0.000000e+00 : f32
    %120 = vector.broadcast %cst_28 : f32 to vector<16x1x8xf32>
    %c0_29 = arith.constant 0 : index
    %c7 = arith.constant 7 : index
    %c0_30 = arith.constant 0 : index
    %121 = vector.load %arg9[%c0_29, %c7, %c0_30] : memref<18x32x8xf32, #tpu.memory_space<vmem>>, vector<1x18x8xf32>
    tpu.vector_store %arg9[%c0_29, %c7, %c0_30], %119 {strides = array<i32>} : memref<18x32x8xf32, #tpu.memory_space<vmem>>, vector<1x18x8xf32>,
    %c17 = arith.constant 17 : index
    %c7_31 = arith.constant 7 : index
    %c0_32 = arith.constant 0 : index
    %122 = vector.load %arg9[%c17, %c7_31, %c0_32] : memref<18x32x8xf32, #tpu.memory_space<vmem>>, vector<1x18x8xf32>
    tpu.vector_store %arg9[%c17, %c7_31, %c0_32], %119 {strides = array<i32>} : memref<18x32x8xf32, #tpu.memory_space<vmem>>, vector<1x18x8xf32>,
    %c1 = arith.constant 1 : index
    %c7_33 = arith.constant 7 : index
    %c0_34 = arith.constant 0 : index
    %123 = vector.load %arg9[%c1, %c7_33, %c0_34] : memref<18x32x8xf32, #tpu.memory_space<vmem>>, vector<16x1x8xf32>
    tpu.vector_store %arg9[%c1, %c7_33, %c0_34], %120 {strides = array<i32>} : memref<18x32x8xf32, #tpu.memory_space<vmem>>, vector<16x1x8xf32>,
    %c1_35 = arith.constant 1 : index
    %c24 = arith.constant 24 : index
    %c0_36 = arith.constant 0 : index
    %124 = vector.load %arg9[%c1_35, %c24, %c0_36] : memref<18x32x8xf32, #tpu.memory_space<vmem>>, vector<16x1x8xf32>
    tpu.vector_store %arg9[%c1_35, %c24, %c0_36], %120 {strides = array<i32>} : memref<18x32x8xf32, #tpu.memory_space<vmem>>, vector<16x1x8xf32>,
    %125 = vector.shape_cast %118 : vector<256x8xf32> to vector<16x16x8xf32>
    %c1_37 = arith.constant 1 : index
    %c8 = arith.constant 8 : index
    %c0_38 = arith.constant 0 : index
    %126 = vector.load %arg9[%c1_37, %c8, %c0_38] : memref<18x32x8xf32, #tpu.memory_space<vmem>>, vector<16x16x8xf32>
    tpu.vector_store %arg9[%c1_37, %c8, %c0_38], %125 {strides = array<i32>} : memref<18x32x8xf32, #tpu.memory_space<vmem>>, vector<16x16x8xf32>,
    %c0_39 = arith.constant 0 : index
    %c7_40 = arith.constant 7 : index
    %c0_41 = arith.constant 0 : index
    %127 = vector.load %arg9[%c0_39, %c7_40, %c0_41] : memref<18x32x8xf32, #tpu.memory_space<vmem>>, vector<16x16x8xf32>
    %128 = vector.shape_cast %127 : vector<16x16x8xf32> to vector<256x8xf32>
    %c0_42 = arith.constant 0 : index
    %c0_43 = arith.constant 0 : index
    %c0_44 = arith.constant 0 : index
    %129 = vector.load %arg2[%c0_42, %c0_43, %c0_44] : memref<9x8x8xf32, #tpu.memory_space<vmem>>, vector<1x8x8xf32>
    %130 = vector.shape_cast %129 : vector<1x8x8xf32> to vector<8x8xf32>
    %cst_45 = arith.constant dense<0.000000e+00> : vector<256x8xf32>
    %131 = tpu.matmul %128, %130, %cst_45 {dimension_numbers = #tpu.dot_dimension_numbers<[1], [0], [0], [1], [0, 0, 1, 1], [], []>} : vector<256x8xf32>, vector<8x8xf32>, vector<256x8xf32> -> vector<256x8xf32>
    %c0_46 = arith.constant 0 : index
    %c8_47 = arith.constant 8 : index
    %c0_48 = arith.constant 0 : index
    %132 = vector.load %arg9[%c0_46, %c8_47, %c0_48] : memref<18x32x8xf32, #tpu.memory_space<vmem>>, vector<16x16x8xf32>
    %133 = vector.shape_cast %132 : vector<16x16x8xf32> to vector<256x8xf32>
    %c1_49 = arith.constant 1 : index
    %c0_50 = arith.constant 0 : index
    %c0_51 = arith.constant 0 : index
    %134 = vector.load %arg2[%c1_49, %c0_50, %c0_51] : memref<9x8x8xf32, #tpu.memory_space<vmem>>, vector<1x8x8xf32>
    %135 = vector.shape_cast %134 : vector<1x8x8xf32> to vector<8x8xf32>
    %cst_52 = arith.constant dense<0.000000e+00> : vector<256x8xf32>
    %136 = tpu.matmul %133, %135, %cst_52 {dimension_numbers = #tpu.dot_dimension_numbers<[1], [0], [0], [1], [0, 0, 1, 1], [], []>} : vector<256x8xf32>, vector<8x8xf32>, vector<256x8xf32> -> vector<256x8xf32>
    %137 = arith.addf %131, %136 : vector<256x8xf32>
    %c0_53 = arith.constant 0 : index
    %c9 = arith.constant 9 : index
    %c0_54 = arith.constant 0 : index
    %138 = vector.load %arg9[%c0_53, %c9, %c0_54] : memref<18x32x8xf32, #tpu.memory_space<vmem>>, vector<16x16x8xf32>
    %139 = vector.shape_cast %138 : vector<16x16x8xf32> to vector<256x8xf32>
    %c2 = arith.constant 2 : index
    %c0_55 = arith.constant 0 : index
    %c0_56 = arith.constant 0 : index
    %140 = vector.load %arg2[%c2, %c0_55, %c0_56] : memref<9x8x8xf32, #tpu.memory_space<vmem>>, vector<1x8x8xf32>
    %141 = vector.shape_cast %140 : vector<1x8x8xf32> to vector<8x8xf32>
    %cst_57 = arith.constant dense<0.000000e+00> : vector<256x8xf32>
    %142 = tpu.matmul %139, %141, %cst_57 {dimension_numbers = #tpu.dot_dimension_numbers<[1], [0], [0], [1], [0, 0, 1, 1], [], []>} : vector<256x8xf32>, vector<8x8xf32>, vector<256x8xf32> -> vector<256x8xf32>
    %143 = arith.addf %137, %142 : vector<256x8xf32>
    %c1_58 = arith.constant 1 : index
    %c7_59 = arith.constant 7 : index
    %c0_60 = arith.constant 0 : index
    %144 = vector.load %arg9[%c1_58, %c7_59, %c0_60] : memref<18x32x8xf32, #tpu.memory_space<vmem>>, vector<16x16x8xf32>
    %145 = vector.shape_cast %144 : vector<16x16x8xf32> to vector<256x8xf32>
    %c3 = arith.constant 3 : index
    %c0_61 = arith.constant 0 : index
    %c0_62 = arith.constant 0 : index
    %146 = vector.load %arg2[%c3, %c0_61, %c0_62] : memref<9x8x8xf32, #tpu.memory_space<vmem>>, vector<1x8x8xf32>
    %147 = vector.shape_cast %146 : vector<1x8x8xf32> to vector<8x8xf32>
    %cst_63 = arith.constant dense<0.000000e+00> : vector<256x8xf32>
    %148 = tpu.matmul %145, %147, %cst_63 {dimension_numbers = #tpu.dot_dimension_numbers<[1], [0], [0], [1], [0, 0, 1, 1], [], []>} : vector<256x8xf32>, vector<8x8xf32>, vector<256x8xf32> -> vector<256x8xf32>
    %149 = arith.addf %143, %148 : vector<256x8xf32>
    %c1_64 = arith.constant 1 : index
    %c8_65 = arith.constant 8 : index
    %c0_66 = arith.constant 0 : index
    %150 = vector.load %arg9[%c1_64, %c8_65, %c0_66] : memref<18x32x8xf32, #tpu.memory_space<vmem>>, vector<16x16x8xf32>
    %151 = vector.shape_cast %150 : vector<16x16x8xf32> to vector<256x8xf32>
    %c4 = arith.constant 4 : index
    %c0_67 = arith.constant 0 : index
    %c0_68 = arith.constant 0 : index
    %152 = vector.load %arg2[%c4, %c0_67, %c0_68] : memref<9x8x8xf32, #tpu.memory_space<vmem>>, vector<1x8x8xf32>
    %153 = vector.shape_cast %152 : vector<1x8x8xf32> to vector<8x8xf32>
    %cst_69 = arith.constant dense<0.000000e+00> : vector<256x8xf32>
    %154 = tpu.matmul %151, %153, %cst_69 {dimension_numbers = #tpu.dot_dimension_numbers<[1], [0], [0], [1], [0, 0, 1, 1], [], []>} : vector<256x8xf32>, vector<8x8xf32>, vector<256x8xf32> -> vector<256x8xf32>
    %155 = arith.addf %149, %154 : vector<256x8xf32>
    %c1_70 = arith.constant 1 : index
    %c9_71 = arith.constant 9 : index
    %c0_72 = arith.constant 0 : index
    %156 = vector.load %arg9[%c1_70, %c9_71, %c0_72] : memref<18x32x8xf32, #tpu.memory_space<vmem>>, vector<16x16x8xf32>
    %157 = vector.shape_cast %156 : vector<16x16x8xf32> to vector<256x8xf32>
    %c5 = arith.constant 5 : index
    %c0_73 = arith.constant 0 : index
    %c0_74 = arith.constant 0 : index
    %158 = vector.load %arg2[%c5, %c0_73, %c0_74] : memref<9x8x8xf32, #tpu.memory_space<vmem>>, vector<1x8x8xf32>
    %159 = vector.shape_cast %158 : vector<1x8x8xf32> to vector<8x8xf32>
    %cst_75 = arith.constant dense<0.000000e+00> : vector<256x8xf32>
    %160 = tpu.matmul %157, %159, %cst_75 {dimension_numbers = #tpu.dot_dimension_numbers<[1], [0], [0], [1], [0, 0, 1, 1], [], []>} : vector<256x8xf32>, vector<8x8xf32>, vector<256x8xf32> -> vector<256x8xf32>
    %161 = arith.addf %155, %160 : vector<256x8xf32>
    %c2_76 = arith.constant 2 : index
    %c7_77 = arith.constant 7 : index
    %c0_78 = arith.constant 0 : index
    %162 = vector.load %arg9[%c2_76, %c7_77, %c0_78] : memref<18x32x8xf32, #tpu.memory_space<vmem>>, vector<16x16x8xf32>
    %163 = vector.shape_cast %162 : vector<16x16x8xf32> to vector<256x8xf32>
    %c6 = arith.constant 6 : index
    %c0_79 = arith.constant 0 : index
    %c0_80 = arith.constant 0 : index
    %164 = vector.load %arg2[%c6, %c0_79, %c0_80] : memref<9x8x8xf32, #tpu.memory_space<vmem>>, vector<1x8x8xf32>
    %165 = vector.shape_cast %164 : vector<1x8x8xf32> to vector<8x8xf32>
    %cst_81 = arith.constant dense<0.000000e+00> : vector<256x8xf32>
    %166 = tpu.matmul %163, %165, %cst_81 {dimension_numbers = #tpu.dot_dimension_numbers<[1], [0], [0], [1], [0, 0, 1, 1], [], []>} : vector<256x8xf32>, vector<8x8xf32>, vector<256x8xf32> -> vector<256x8xf32>
    %167 = arith.addf %161, %166 : vector<256x8xf32>
    %c2_82 = arith.constant 2 : index
    %c8_83 = arith.constant 8 : index
    %c0_84 = arith.constant 0 : index
    %168 = vector.load %arg9[%c2_82, %c8_83, %c0_84] : memref<18x32x8xf32, #tpu.memory_space<vmem>>, vector<16x16x8xf32>
    %169 = vector.shape_cast %168 : vector<16x16x8xf32> to vector<256x8xf32>
    %c7_85 = arith.constant 7 : index
    %c0_86 = arith.constant 0 : index
    %c0_87 = arith.constant 0 : index
    %170 = vector.load %arg2[%c7_85, %c0_86, %c0_87] : memref<9x8x8xf32, #tpu.memory_space<vmem>>, vector<1x8x8xf32>
    %171 = vector.shape_cast %170 : vector<1x8x8xf32> to vector<8x8xf32>
    %cst_88 = arith.constant dense<0.000000e+00> : vector<256x8xf32>
    %172 = tpu.matmul %169, %171, %cst_88 {dimension_numbers = #tpu.dot_dimension_numbers<[1], [0], [0], [1], [0, 0, 1, 1], [], []>} : vector<256x8xf32>, vector<8x8xf32>, vector<256x8xf32> -> vector<256x8xf32>
    %173 = arith.addf %167, %172 : vector<256x8xf32>
    %c2_89 = arith.constant 2 : index
    %c9_90 = arith.constant 9 : index
    %c0_91 = arith.constant 0 : index
    %174 = vector.load %arg9[%c2_89, %c9_90, %c0_91] : memref<18x32x8xf32, #tpu.memory_space<vmem>>, vector<16x16x8xf32>
    %175 = vector.shape_cast %174 : vector<16x16x8xf32> to vector<256x8xf32>
    %c8_92 = arith.constant 8 : index
    %c0_93 = arith.constant 0 : index
    %c0_94 = arith.constant 0 : index
    %176 = vector.load %arg2[%c8_92, %c0_93, %c0_94] : memref<9x8x8xf32, #tpu.memory_space<vmem>>, vector<1x8x8xf32>
    %177 = vector.shape_cast %176 : vector<1x8x8xf32> to vector<8x8xf32>
    %cst_95 = arith.constant dense<0.000000e+00> : vector<256x8xf32>
    %178 = tpu.matmul %175, %177, %cst_95 {dimension_numbers = #tpu.dot_dimension_numbers<[1], [0], [0], [1], [0, 0, 1, 1], [], []>} : vector<256x8xf32>, vector<8x8xf32>, vector<256x8xf32> -> vector<256x8xf32>
    %179 = arith.addf %173, %178 : vector<256x8xf32>
    %c0_96 = arith.constant 0 : index
    %c0_97 = arith.constant 0 : index
    %180 = vector.load %arg6[%c0_96, %c0_97] : memref<3x8xf32, #tpu.memory_space<vmem>>, vector<3x8xf32>
    %cst_98 = arith.constant dense<0.000000e+00> : vector<8xf32>
    %181 = vector.multi_reduction <add>, %179, %cst_98 [0] : vector<256x8xf32> to vector<8xf32>
    %182 = vector.shape_cast %181 : vector<8xf32> to vector<1x8xf32>
    %183 = arith.mulf %179, %179 : vector<256x8xf32>
    %cst_99 = arith.constant dense<0.000000e+00> : vector<8xf32>
    %184 = vector.multi_reduction <add>, %183, %cst_99 [0] : vector<256x8xf32> to vector<8xf32>
    %185 = vector.shape_cast %184 : vector<8xf32> to vector<1x8xf32>
    %186 = vector.extract_strided_slice %179 {offsets = [0, 0], sizes = [256, 4], strides = [1, 1]} : vector<256x8xf32> to vector<256x4xf32>
    %187 = vector.extract_strided_slice %179 {offsets = [0, 4], sizes = [256, 4], strides = [1, 1]} : vector<256x8xf32> to vector<256x4xf32>
    %188 = arith.mulf %186, %187 : vector<256x4xf32>
    %189 = vector.shape_cast %188 : vector<256x4xf32> to vector<1x256x4xf32>
    %cst_100 = arith.constant dense<0.000000e+00> : vector<1xf32>
    %190 = vector.multi_reduction <add>, %189, %cst_100 [1, 2] : vector<1x256x4xf32> to vector<1xf32>
    %191 = vector.shape_cast %190 : vector<1xf32> to vector<1x1x1xf32>
    %192 = vector.extract %191[0, 0, 0] : f32 from vector<1x1x1xf32>
    %193 = vector.extract_strided_slice %182 {offsets = [0, 0], sizes = [1, 4], strides = [1, 1]} : vector<1x8xf32> to vector<1x4xf32>
    %194 = vector.shape_cast %193 : vector<1x4xf32> to vector<1x1x4xf32>
    %cst_101 = arith.constant dense<0.000000e+00> : vector<1xf32>
    %195 = vector.multi_reduction <add>, %194, %cst_101 [1, 2] : vector<1x1x4xf32> to vector<1xf32>
    %196 = vector.shape_cast %195 : vector<1xf32> to vector<1x1x1xf32>
    %197 = vector.extract %196[0, 0, 0] : f32 from vector<1x1x1xf32>
    %198 = vector.extract_strided_slice %182 {offsets = [0, 4], sizes = [1, 4], strides = [1, 1]} : vector<1x8xf32> to vector<1x4xf32>
    %199 = vector.shape_cast %198 : vector<1x4xf32> to vector<1x1x4xf32>
    %cst_102 = arith.constant dense<0.000000e+00> : vector<1xf32>
    %200 = vector.multi_reduction <add>, %199, %cst_102 [1, 2] : vector<1x1x4xf32> to vector<1xf32>
    %201 = vector.shape_cast %200 : vector<1xf32> to vector<1x1x1xf32>
    %202 = vector.extract %201[0, 0, 0] : f32 from vector<1x1x1xf32>
    %203 = vector.extract_strided_slice %185 {offsets = [0, 0], sizes = [1, 4], strides = [1, 1]} : vector<1x8xf32> to vector<1x4xf32>
    %204 = vector.shape_cast %203 : vector<1x4xf32> to vector<1x1x4xf32>
    %cst_103 = arith.constant dense<0.000000e+00> : vector<1xf32>
    %205 = vector.multi_reduction <add>, %204, %cst_103 [1, 2] : vector<1x1x4xf32> to vector<1xf32>
    %206 = vector.shape_cast %205 : vector<1xf32> to vector<1x1x1xf32>
    %207 = vector.extract %206[0, 0, 0] : f32 from vector<1x1x1xf32>
    %208 = vector.extract_strided_slice %185 {offsets = [0, 4], sizes = [1, 4], strides = [1, 1]} : vector<1x8xf32> to vector<1x4xf32>
    %209 = vector.shape_cast %208 : vector<1x4xf32> to vector<1x1x4xf32>
    %cst_104 = arith.constant dense<0.000000e+00> : vector<1xf32>
    %210 = vector.multi_reduction <add>, %209, %cst_104 [1, 2] : vector<1x1x4xf32> to vector<1xf32>
    %211 = vector.shape_cast %210 : vector<1xf32> to vector<1x1x1xf32>
    %212 = vector.extract %211[0, 0, 0] : f32 from vector<1x1x1xf32>
    %cst_105 = arith.constant 9.765625E-4 : f32
    %213 = arith.mulf %197, %cst_105 : f32
    %cst_106 = arith.constant 9.765625E-4 : f32
    %214 = arith.mulf %202, %cst_106 : f32
    %cst_107 = arith.constant 9.765625E-4 : f32
    %215 = arith.mulf %207, %cst_107 : f32
    %216 = arith.mulf %213, %213 : f32
    %217 = arith.subf %215, %216 : f32
    %cst_108 = arith.constant 9.99999974E-5 : f32
    %218 = arith.addf %217, %cst_108 : f32
    %cst_109 = arith.constant 9.765625E-4 : f32
    %219 = arith.mulf %212, %cst_109 : f32
    %220 = arith.mulf %214, %214 : f32
    %221 = arith.subf %219, %220 : f32
    %cst_110 = arith.constant 9.99999974E-5 : f32
    %222 = arith.addf %221, %cst_110 : f32
    %cst_111 = arith.constant 9.765625E-4 : f32
    %223 = arith.mulf %192, %cst_111 : f32
    %224 = arith.mulf %213, %214 : f32
    %225 = arith.subf %223, %224 : f32
    %226 = arith.mulf %218, %222 : f32
    %227 = arith.mulf %225, %225 : f32
    %228 = arith.subf %226, %227 : f32
    %229 = math.sqrt %228 : f32
    %230 = arith.addf %218, %222 : f32
    %cst_112 = arith.constant 2.000000e+00 : f32
    %231 = arith.mulf %cst_112, %229 : f32
    %232 = arith.addf %230, %231 : f32
    %233 = math.sqrt %232 : f32
    %234 = arith.mulf %229, %233 : f32
    %cst_113 = arith.constant 1.000000e+00 : f32
    %235 = arith.divf %cst_113, %234 : f32
    %236 = arith.addf %222, %229 : f32
    %237 = arith.mulf %236, %235 : f32
    %238 = arith.addf %218, %229 : f32
    %239 = arith.mulf %238, %235 : f32
    %cst_114 = arith.constant 0.000000e+00 : f32
    %240 = arith.subf %cst_114, %225 : f32
    %241 = arith.mulf %240, %235 : f32
    %242 = tpu.iota {dimensions = array<i32: 1>} : vector<1x8xi32>
    %c4_i32_115 = arith.constant 4 : i32
    %243 = vector.broadcast %c4_i32_115 : i32 to vector<1x8xi32>
    %244 = arith.cmpi slt, %242, %243 : vector<1x8xi32>
    %245 = vector.extract_strided_slice %180 {offsets = [0, 0], sizes = [1, 8], strides = [1, 1]} : vector<3x8xf32> to vector<1x8xf32>
    %246 = vector.extract_strided_slice %180 {offsets = [1, 0], sizes = [1, 8], strides = [1, 1]} : vector<3x8xf32> to vector<1x8xf32>
    %247 = vector.extract_strided_slice %180 {offsets = [2, 0], sizes = [1, 8], strides = [1, 1]} : vector<3x8xf32> to vector<1x8xf32>
    %248 = vector.broadcast %237 : f32 to vector<1x8xf32>
    %249 = vector.broadcast %239 : f32 to vector<1x8xf32>
    %250 = arith.select %244, %248, %249 : vector<1x8xi1>, vector<1x8xf32>
    %251 = vector.broadcast %239 : f32 to vector<1x8xf32>
    %252 = vector.broadcast %237 : f32 to vector<1x8xf32>
    %253 = arith.select %244, %251, %252 : vector<1x8xi1>, vector<1x8xf32>
    %254 = vector.broadcast %213 : f32 to vector<1x8xf32>
    %255 = vector.broadcast %214 : f32 to vector<1x8xf32>
    %256 = arith.select %244, %254, %255 : vector<1x8xi1>, vector<1x8xf32>
    %257 = vector.broadcast %214 : f32 to vector<1x8xf32>
    %258 = vector.broadcast %213 : f32 to vector<1x8xf32>
    %259 = arith.select %244, %257, %258 : vector<1x8xi1>, vector<1x8xf32>
    %260 = arith.mulf %245, %250 : vector<1x8xf32>
    %261 = vector.broadcast %241 : f32 to vector<1x8xf32>
    %262 = arith.mulf %246, %261 : vector<1x8xf32>
    %263 = arith.addf %260, %262 : vector<1x8xf32>
    %264 = vector.broadcast %241 : f32 to vector<1x8xf32>
    %265 = arith.mulf %245, %264 : vector<1x8xf32>
    %266 = arith.mulf %246, %253 : vector<1x8xf32>
    %267 = arith.addf %265, %266 : vector<1x8xf32>
    %268 = arith.mulf %263, %256 : vector<1x8xf32>
    %269 = arith.subf %247, %268 : vector<1x8xf32>
    %270 = arith.mulf %267, %259 : vector<1x8xf32>
    %271 = arith.subf %269, %270 : vector<1x8xf32>
    %272 = tpu.iota {dimensions = array<i32: 0>} : vector<8x8xi32>
    %273 = tpu.iota {dimensions = array<i32: 1>} : vector<8x8xi32>
    %c4_i32_116 = arith.constant 4 : i32
    %274 = vector.broadcast %c4_i32_116 : i32 to vector<8x8xi32>
    %275 = arith.cmpi slt, %273, %274 : vector<8x8xi32>
    %c4_i32_117 = arith.constant 4 : i32
    %c-4_i32_118 = arith.constant -4 : i32
    %276 = vector.broadcast %c4_i32_117 : i32 to vector<8x8xi32>
    %277 = vector.broadcast %c-4_i32_118 : i32 to vector<8x8xi32>
    %278 = arith.select %275, %276, %277 : vector<8x8xi1>, vector<8x8xi32>
    %279 = arith.addi %273, %278 : vector<8x8xi32>
    %280 = arith.cmpi eq, %272, %273 : vector<8x8xi32>
    %cst_119 = arith.constant 0.000000e+00 : f32
    %281 = vector.shape_cast %263 : vector<1x8xf32> to vector<1x8xf32>
    %282 = vector.broadcast %281 : vector<1x8xf32> to vector<8x8xf32>
    %283 = vector.broadcast %cst_119 : f32 to vector<8x8xf32>
    %284 = arith.select %280, %282, %283 : vector<8x8xi1>, vector<8x8xf32>
    %285 = arith.cmpi eq, %272, %279 : vector<8x8xi32>
    %cst_120 = arith.constant 0.000000e+00 : f32
    %286 = vector.shape_cast %267 : vector<1x8xf32> to vector<1x8xf32>
    %287 = vector.broadcast %286 : vector<1x8xf32> to vector<8x8xf32>
    %288 = vector.broadcast %cst_120 : f32 to vector<8x8xf32>
    %289 = arith.select %285, %287, %288 : vector<8x8xi1>, vector<8x8xf32>
    %290 = arith.addf %284, %289 : vector<8x8xf32>
    %cst_121 = arith.constant dense<0.000000e+00> : vector<256x8xf32>
    %291 = tpu.matmul %179, %290, %cst_121 {dimension_numbers = #tpu.dot_dimension_numbers<[1], [0], [0], [1], [0, 0, 1, 1], [], []>} : vector<256x8xf32>, vector<8x8xf32>, vector<256x8xf32> -> vector<256x8xf32>
    %292 = vector.broadcast %271 : vector<1x8xf32> to vector<256x8xf32>
    %293 = arith.addf %291, %292 : vector<256x8xf32>
    %cst_122 = arith.constant 0.000000e+00 : f32
    %294 = vector.broadcast %cst_122 : f32 to vector<256x8xf32>
    %295 = arith.maximumf %293, %294 : vector<256x8xf32>
    %c0_123 = arith.constant 0 : index
    %c0_124 = arith.constant 0 : index
    %296 = vector.load %arg3[%c0_123, %c0_124] : memref<8x16xf32, #tpu.memory_space<vmem>>, vector<8x16xf32>
    %cst_125 = arith.constant dense<0.000000e+00> : vector<256x16xf32>
    %297 = tpu.matmul %295, %296, %cst_125 {dimension_numbers = #tpu.dot_dimension_numbers<[1], [0], [0], [1], [0, 0, 1, 1], [], []>} : vector<256x8xf32>, vector<8x16xf32>, vector<256x16xf32> -> vector<256x16xf32>
    %c0_126 = arith.constant 0 : index
    %c0_127 = arith.constant 0 : index
    %298 = vector.load %arg7[%c0_126, %c0_127] : memref<3x16xf32, #tpu.memory_space<vmem>>, vector<3x16xf32>
    %cst_128 = arith.constant dense<0.000000e+00> : vector<16xf32>
    %299 = vector.multi_reduction <add>, %297, %cst_128 [0] : vector<256x16xf32> to vector<16xf32>
    %300 = vector.shape_cast %299 : vector<16xf32> to vector<1x16xf32>
    %301 = arith.mulf %297, %297 : vector<256x16xf32>
    %cst_129 = arith.constant dense<0.000000e+00> : vector<16xf32>
    %302 = vector.multi_reduction <add>, %301, %cst_129 [0] : vector<256x16xf32> to vector<16xf32>
    %303 = vector.shape_cast %302 : vector<16xf32> to vector<1x16xf32>
    %304 = vector.extract_strided_slice %297 {offsets = [0, 0], sizes = [256, 8], strides = [1, 1]} : vector<256x16xf32> to vector<256x8xf32>
    %305 = vector.extract_strided_slice %297 {offsets = [0, 8], sizes = [256, 8], strides = [1, 1]} : vector<256x16xf32> to vector<256x8xf32>
    %306 = arith.mulf %304, %305 : vector<256x8xf32>
    %307 = vector.shape_cast %306 : vector<256x8xf32> to vector<1x256x8xf32>
    %cst_130 = arith.constant dense<0.000000e+00> : vector<1xf32>
    %308 = vector.multi_reduction <add>, %307, %cst_130 [1, 2] : vector<1x256x8xf32> to vector<1xf32>
    %309 = vector.shape_cast %308 : vector<1xf32> to vector<1x1x1xf32>
    %310 = vector.extract %309[0, 0, 0] : f32 from vector<1x1x1xf32>
    %311 = vector.extract_strided_slice %300 {offsets = [0, 0], sizes = [1, 8], strides = [1, 1]} : vector<1x16xf32> to vector<1x8xf32>
    %312 = vector.shape_cast %311 : vector<1x8xf32> to vector<1x1x8xf32>
    %cst_131 = arith.constant dense<0.000000e+00> : vector<1xf32>
    %313 = vector.multi_reduction <add>, %312, %cst_131 [1, 2] : vector<1x1x8xf32> to vector<1xf32>
    %314 = vector.shape_cast %313 : vector<1xf32> to vector<1x1x1xf32>
    %315 = vector.extract %314[0, 0, 0] : f32 from vector<1x1x1xf32>
    %316 = vector.extract_strided_slice %300 {offsets = [0, 8], sizes = [1, 8], strides = [1, 1]} : vector<1x16xf32> to vector<1x8xf32>
    %317 = vector.shape_cast %316 : vector<1x8xf32> to vector<1x1x8xf32>
    %cst_132 = arith.constant dense<0.000000e+00> : vector<1xf32>
    %318 = vector.multi_reduction <add>, %317, %cst_132 [1, 2] : vector<1x1x8xf32> to vector<1xf32>
    %319 = vector.shape_cast %318 : vector<1xf32> to vector<1x1x1xf32>
    %320 = vector.extract %319[0, 0, 0] : f32 from vector<1x1x1xf32>
    %321 = vector.extract_strided_slice %303 {offsets = [0, 0], sizes = [1, 8], strides = [1, 1]} : vector<1x16xf32> to vector<1x8xf32>
    %322 = vector.shape_cast %321 : vector<1x8xf32> to vector<1x1x8xf32>
    %cst_133 = arith.constant dense<0.000000e+00> : vector<1xf32>
    %323 = vector.multi_reduction <add>, %322, %cst_133 [1, 2] : vector<1x1x8xf32> to vector<1xf32>
    %324 = vector.shape_cast %323 : vector<1xf32> to vector<1x1x1xf32>
    %325 = vector.extract %324[0, 0, 0] : f32 from vector<1x1x1xf32>
    %326 = vector.extract_strided_slice %303 {offsets = [0, 8], sizes = [1, 8], strides = [1, 1]} : vector<1x16xf32> to vector<1x8xf32>
    %327 = vector.shape_cast %326 : vector<1x8xf32> to vector<1x1x8xf32>
    %cst_134 = arith.constant dense<0.000000e+00> : vector<1xf32>
    %328 = vector.multi_reduction <add>, %327, %cst_134 [1, 2] : vector<1x1x8xf32> to vector<1xf32>
    %329 = vector.shape_cast %328 : vector<1xf32> to vector<1x1x1xf32>
    %330 = vector.extract %329[0, 0, 0] : f32 from vector<1x1x1xf32>
    %cst_135 = arith.constant 4.8828125E-4 : f32
    %331 = arith.mulf %315, %cst_135 : f32
    %cst_136 = arith.constant 4.8828125E-4 : f32
    %332 = arith.mulf %320, %cst_136 : f32
    %cst_137 = arith.constant 4.8828125E-4 : f32
    %333 = arith.mulf %325, %cst_137 : f32
    %334 = arith.mulf %331, %331 : f32
    %335 = arith.subf %333, %334 : f32
    %cst_138 = arith.constant 9.99999974E-5 : f32
    %336 = arith.addf %335, %cst_138 : f32
    %cst_139 = arith.constant 4.8828125E-4 : f32
    %337 = arith.mulf %330, %cst_139 : f32
    %338 = arith.mulf %332, %332 : f32
    %339 = arith.subf %337, %338 : f32
    %cst_140 = arith.constant 9.99999974E-5 : f32
    %340 = arith.addf %339, %cst_140 : f32
    %cst_141 = arith.constant 4.8828125E-4 : f32
    %341 = arith.mulf %310, %cst_141 : f32
    %342 = arith.mulf %331, %332 : f32
    %343 = arith.subf %341, %342 : f32
    %344 = arith.mulf %336, %340 : f32
    %345 = arith.mulf %343, %343 : f32
    %346 = arith.subf %344, %345 : f32
    %347 = math.sqrt %346 : f32
    %348 = arith.addf %336, %340 : f32
    %cst_142 = arith.constant 2.000000e+00 : f32
    %349 = arith.mulf %cst_142, %347 : f32
    %350 = arith.addf %348, %349 : f32
    %351 = math.sqrt %350 : f32
    %352 = arith.mulf %347, %351 : f32
    %cst_143 = arith.constant 1.000000e+00 : f32
    %353 = arith.divf %cst_143, %352 : f32
    %354 = arith.addf %340, %347 : f32
    %355 = arith.mulf %354, %353 : f32
    %356 = arith.addf %336, %347 : f32
    %357 = arith.mulf %356, %353 : f32
    %cst_144 = arith.constant 0.000000e+00 : f32
    %358 = arith.subf %cst_144, %343 : f32
    %359 = arith.mulf %358, %353 : f32
    %360 = tpu.iota {dimensions = array<i32: 1>} : vector<1x16xi32>
    %c8_i32 = arith.constant 8 : i32
    %361 = vector.broadcast %c8_i32 : i32 to vector<1x16xi32>
    %362 = arith.cmpi slt, %360, %361 : vector<1x16xi32>
    %363 = vector.extract_strided_slice %298 {offsets = [0, 0], sizes = [1, 16], strides = [1, 1]} : vector<3x16xf32> to vector<1x16xf32>
    %364 = vector.extract_strided_slice %298 {offsets = [1, 0], sizes = [1, 16], strides = [1, 1]} : vector<3x16xf32> to vector<1x16xf32>
    %365 = vector.extract_strided_slice %298 {offsets = [2, 0], sizes = [1, 16], strides = [1, 1]} : vector<3x16xf32> to vector<1x16xf32>
    %366 = vector.broadcast %355 : f32 to vector<1x16xf32>
    %367 = vector.broadcast %357 : f32 to vector<1x16xf32>
    %368 = arith.select %362, %366, %367 : vector<1x16xi1>, vector<1x16xf32>
    %369 = vector.broadcast %357 : f32 to vector<1x16xf32>
    %370 = vector.broadcast %355 : f32 to vector<1x16xf32>
    %371 = arith.select %362, %369, %370 : vector<1x16xi1>, vector<1x16xf32>
    %372 = vector.broadcast %331 : f32 to vector<1x16xf32>
    %373 = vector.broadcast %332 : f32 to vector<1x16xf32>
    %374 = arith.select %362, %372, %373 : vector<1x16xi1>, vector<1x16xf32>
    %375 = vector.broadcast %332 : f32 to vector<1x16xf32>
    %376 = vector.broadcast %331 : f32 to vector<1x16xf32>
    %377 = arith.select %362, %375, %376 : vector<1x16xi1>, vector<1x16xf32>
    %378 = arith.mulf %363, %368 : vector<1x16xf32>
    %379 = vector.broadcast %359 : f32 to vector<1x16xf32>
    %380 = arith.mulf %364, %379 : vector<1x16xf32>
    %381 = arith.addf %378, %380 : vector<1x16xf32>
    %382 = vector.broadcast %359 : f32 to vector<1x16xf32>
    %383 = arith.mulf %363, %382 : vector<1x16xf32>
    %384 = arith.mulf %364, %371 : vector<1x16xf32>
    %385 = arith.addf %383, %384 : vector<1x16xf32>
    %386 = arith.mulf %381, %374 : vector<1x16xf32>
    %387 = arith.subf %365, %386 : vector<1x16xf32>
    %388 = arith.mulf %385, %377 : vector<1x16xf32>
    %389 = arith.subf %387, %388 : vector<1x16xf32>
    %390 = tpu.iota {dimensions = array<i32: 0>} : vector<16x16xi32>
    %391 = tpu.iota {dimensions = array<i32: 1>} : vector<16x16xi32>
    %c8_i32_145 = arith.constant 8 : i32
    %392 = vector.broadcast %c8_i32_145 : i32 to vector<16x16xi32>
    %393 = arith.cmpi slt, %391, %392 : vector<16x16xi32>
    %c8_i32_146 = arith.constant 8 : i32
    %c-8_i32 = arith.constant -8 : i32
    %394 = vector.broadcast %c8_i32_146 : i32 to vector<16x16xi32>
    %395 = vector.broadcast %c-8_i32 : i32 to vector<16x16xi32>
    %396 = arith.select %393, %394, %395 : vector<16x16xi1>, vector<16x16xi32>
    %397 = arith.addi %391, %396 : vector<16x16xi32>
    %398 = arith.cmpi eq, %390, %391 : vector<16x16xi32>
    %cst_147 = arith.constant 0.000000e+00 : f32
    %399 = vector.shape_cast %381 : vector<1x16xf32> to vector<1x16xf32>
    %400 = vector.broadcast %399 : vector<1x16xf32> to vector<16x16xf32>
    %401 = vector.broadcast %cst_147 : f32 to vector<16x16xf32>
    %402 = arith.select %398, %400, %401 : vector<16x16xi1>, vector<16x16xf32>
    %403 = arith.cmpi eq, %390, %397 : vector<16x16xi32>
    %cst_148 = arith.constant 0.000000e+00 : f32
    %404 = vector.shape_cast %385 : vector<1x16xf32> to vector<1x16xf32>
    %405 = vector.broadcast %404 : vector<1x16xf32> to vector<16x16xf32>
    %406 = vector.broadcast %cst_148 : f32 to vector<16x16xf32>
    %407 = arith.select %403, %405, %406 : vector<16x16xi1>, vector<16x16xf32>
    %408 = arith.addf %402, %407 : vector<16x16xf32>
    %cst_149 = arith.constant dense<0.000000e+00> : vector<256x16xf32>
    %409 = tpu.matmul %297, %408, %cst_149 {dimension_numbers = #tpu.dot_dimension_numbers<[1], [0], [0], [1], [0, 0, 1, 1], [], []>} : vector<256x16xf32>, vector<16x16xf32>, vector<256x16xf32> -> vector<256x16xf32>
    %410 = vector.broadcast %389 : vector<1x16xf32> to vector<256x16xf32>
    %411 = arith.addf %409, %410 : vector<256x16xf32>
    %cst_150 = arith.constant 0.000000e+00 : f32
    %412 = vector.broadcast %cst_150 : f32 to vector<1x18x16xf32>
    %cst_151 = arith.constant 0.000000e+00 : f32
    %413 = vector.broadcast %cst_151 : f32 to vector<16x1x16xf32>
    %c0_152 = arith.constant 0 : index
    %c7_153 = arith.constant 7 : index
    %c0_154 = arith.constant 0 : index
    %414 = vector.load %arg10[%c0_152, %c7_153, %c0_154] : memref<18x32x16xf32, #tpu.memory_space<vmem>>, vector<1x18x16xf32>
    tpu.vector_store %arg10[%c0_152, %c7_153, %c0_154], %412 {strides = array<i32>} : memref<18x32x16xf32, #tpu.memory_space<vmem>>, vector<1x18x16xf32>,
    %c17_155 = arith.constant 17 : index
    %c7_156 = arith.constant 7 : index
    %c0_157 = arith.constant 0 : index
    %415 = vector.load %arg10[%c17_155, %c7_156, %c0_157] : memref<18x32x16xf32, #tpu.memory_space<vmem>>, vector<1x18x16xf32>
    tpu.vector_store %arg10[%c17_155, %c7_156, %c0_157], %412 {strides = array<i32>} : memref<18x32x16xf32, #tpu.memory_space<vmem>>, vector<1x18x16xf32>,
    %c1_158 = arith.constant 1 : index
    %c7_159 = arith.constant 7 : index
    %c0_160 = arith.constant 0 : index
    %416 = vector.load %arg10[%c1_158, %c7_159, %c0_160] : memref<18x32x16xf32, #tpu.memory_space<vmem>>, vector<16x1x16xf32>
    tpu.vector_store %arg10[%c1_158, %c7_159, %c0_160], %413 {strides = array<i32>} : memref<18x32x16xf32, #tpu.memory_space<vmem>>, vector<16x1x16xf32>,
    %c1_161 = arith.constant 1 : index
    %c24_162 = arith.constant 24 : index
    %c0_163 = arith.constant 0 : index
    %417 = vector.load %arg10[%c1_161, %c24_162, %c0_163] : memref<18x32x16xf32, #tpu.memory_space<vmem>>, vector<16x1x16xf32>
    tpu.vector_store %arg10[%c1_161, %c24_162, %c0_163], %413 {strides = array<i32>} : memref<18x32x16xf32, #tpu.memory_space<vmem>>, vector<16x1x16xf32>,
    %418 = vector.shape_cast %411 : vector<256x16xf32> to vector<16x16x16xf32>
    %c1_164 = arith.constant 1 : index
    %c8_165 = arith.constant 8 : index
    %c0_166 = arith.constant 0 : index
    %419 = vector.load %arg10[%c1_164, %c8_165, %c0_166] : memref<18x32x16xf32, #tpu.memory_space<vmem>>, vector<16x16x16xf32>
    tpu.vector_store %arg10[%c1_164, %c8_165, %c0_166], %418 {strides = array<i32>} : memref<18x32x16xf32, #tpu.memory_space<vmem>>, vector<16x16x16xf32>,
    %c0_167 = arith.constant 0 : index
    %c7_168 = arith.constant 7 : index
    %c0_169 = arith.constant 0 : index
    %420 = vector.load %arg10[%c0_167, %c7_168, %c0_169] : memref<18x32x16xf32, #tpu.memory_space<vmem>>, vector<16x16x16xf32>
    %421 = vector.shape_cast %420 : vector<16x16x16xf32> to vector<256x16xf32>
    %c0_170 = arith.constant 0 : index
    %c0_171 = arith.constant 0 : index
    %c0_172 = arith.constant 0 : index
    %422 = vector.load %arg4[%c0_170, %c0_171, %c0_172] : memref<9x16x8xf32, #tpu.memory_space<vmem>>, vector<1x16x8xf32>
    %423 = vector.shape_cast %422 : vector<1x16x8xf32> to vector<16x8xf32>
    %cst_173 = arith.constant dense<0.000000e+00> : vector<256x8xf32>
    %424 = tpu.matmul %421, %423, %cst_173 {dimension_numbers = #tpu.dot_dimension_numbers<[1], [0], [0], [1], [0, 0, 1, 1], [], []>} : vector<256x16xf32>, vector<16x8xf32>, vector<256x8xf32> -> vector<256x8xf32>
    %c0_174 = arith.constant 0 : index
    %c8_175 = arith.constant 8 : index
    %c0_176 = arith.constant 0 : index
    %425 = vector.load %arg10[%c0_174, %c8_175, %c0_176] : memref<18x32x16xf32, #tpu.memory_space<vmem>>, vector<16x16x16xf32>
    %426 = vector.shape_cast %425 : vector<16x16x16xf32> to vector<256x16xf32>
    %c1_177 = arith.constant 1 : index
    %c0_178 = arith.constant 0 : index
    %c0_179 = arith.constant 0 : index
    %427 = vector.load %arg4[%c1_177, %c0_178, %c0_179] : memref<9x16x8xf32, #tpu.memory_space<vmem>>, vector<1x16x8xf32>
    %428 = vector.shape_cast %427 : vector<1x16x8xf32> to vector<16x8xf32>
    %cst_180 = arith.constant dense<0.000000e+00> : vector<256x8xf32>
    %429 = tpu.matmul %426, %428, %cst_180 {dimension_numbers = #tpu.dot_dimension_numbers<[1], [0], [0], [1], [0, 0, 1, 1], [], []>} : vector<256x16xf32>, vector<16x8xf32>, vector<256x8xf32> -> vector<256x8xf32>
    %430 = arith.addf %424, %429 : vector<256x8xf32>
    %c0_181 = arith.constant 0 : index
    %c9_182 = arith.constant 9 : index
    %c0_183 = arith.constant 0 : index
    %431 = vector.load %arg10[%c0_181, %c9_182, %c0_183] : memref<18x32x16xf32, #tpu.memory_space<vmem>>, vector<16x16x16xf32>
    %432 = vector.shape_cast %431 : vector<16x16x16xf32> to vector<256x16xf32>
    %c2_184 = arith.constant 2 : index
    %c0_185 = arith.constant 0 : index
    %c0_186 = arith.constant 0 : index
    %433 = vector.load %arg4[%c2_184, %c0_185, %c0_186] : memref<9x16x8xf32, #tpu.memory_space<vmem>>, vector<1x16x8xf32>
    %434 = vector.shape_cast %433 : vector<1x16x8xf32> to vector<16x8xf32>
    %cst_187 = arith.constant dense<0.000000e+00> : vector<256x8xf32>
    %435 = tpu.matmul %432, %434, %cst_187 {dimension_numbers = #tpu.dot_dimension_numbers<[1], [0], [0], [1], [0, 0, 1, 1], [], []>} : vector<256x16xf32>, vector<16x8xf32>, vector<256x8xf32> -> vector<256x8xf32>
    %436 = arith.addf %430, %435 : vector<256x8xf32>
    %c1_188 = arith.constant 1 : index
    %c7_189 = arith.constant 7 : index
    %c0_190 = arith.constant 0 : index
    %437 = vector.load %arg10[%c1_188, %c7_189, %c0_190] : memref<18x32x16xf32, #tpu.memory_space<vmem>>, vector<16x16x16xf32>
    %438 = vector.shape_cast %437 : vector<16x16x16xf32> to vector<256x16xf32>
    %c3_191 = arith.constant 3 : index
    %c0_192 = arith.constant 0 : index
    %c0_193 = arith.constant 0 : index
    %439 = vector.load %arg4[%c3_191, %c0_192, %c0_193] : memref<9x16x8xf32, #tpu.memory_space<vmem>>, vector<1x16x8xf32>
    %440 = vector.shape_cast %439 : vector<1x16x8xf32> to vector<16x8xf32>
    %cst_194 = arith.constant dense<0.000000e+00> : vector<256x8xf32>
    %441 = tpu.matmul %438, %440, %cst_194 {dimension_numbers = #tpu.dot_dimension_numbers<[1], [0], [0], [1], [0, 0, 1, 1], [], []>} : vector<256x16xf32>, vector<16x8xf32>, vector<256x8xf32> -> vector<256x8xf32>
    %442 = arith.addf %436, %441 : vector<256x8xf32>
    %c1_195 = arith.constant 1 : index
    %c8_196 = arith.constant 8 : index
    %c0_197 = arith.constant 0 : index
    %443 = vector.load %arg10[%c1_195, %c8_196, %c0_197] : memref<18x32x16xf32, #tpu.memory_space<vmem>>, vector<16x16x16xf32>
    %444 = vector.shape_cast %443 : vector<16x16x16xf32> to vector<256x16xf32>
    %c4_198 = arith.constant 4 : index
    %c0_199 = arith.constant 0 : index
    %c0_200 = arith.constant 0 : index
    %445 = vector.load %arg4[%c4_198, %c0_199, %c0_200] : memref<9x16x8xf32, #tpu.memory_space<vmem>>, vector<1x16x8xf32>
    %446 = vector.shape_cast %445 : vector<1x16x8xf32> to vector<16x8xf32>
    %cst_201 = arith.constant dense<0.000000e+00> : vector<256x8xf32>
    %447 = tpu.matmul %444, %446, %cst_201 {dimension_numbers = #tpu.dot_dimension_numbers<[1], [0], [0], [1], [0, 0, 1, 1], [], []>} : vector<256x16xf32>, vector<16x8xf32>, vector<256x8xf32> -> vector<256x8xf32>
    %448 = arith.addf %442, %447 : vector<256x8xf32>
    %c1_202 = arith.constant 1 : index
    %c9_203 = arith.constant 9 : index
    %c0_204 = arith.constant 0 : index
    %449 = vector.load %arg10[%c1_202, %c9_203, %c0_204] : memref<18x32x16xf32, #tpu.memory_space<vmem>>, vector<16x16x16xf32>
    %450 = vector.shape_cast %449 : vector<16x16x16xf32> to vector<256x16xf32>
    %c5_205 = arith.constant 5 : index
    %c0_206 = arith.constant 0 : index
    %c0_207 = arith.constant 0 : index
    %451 = vector.load %arg4[%c5_205, %c0_206, %c0_207] : memref<9x16x8xf32, #tpu.memory_space<vmem>>, vector<1x16x8xf32>
    %452 = vector.shape_cast %451 : vector<1x16x8xf32> to vector<16x8xf32>
    %cst_208 = arith.constant dense<0.000000e+00> : vector<256x8xf32>
    %453 = tpu.matmul %450, %452, %cst_208 {dimension_numbers = #tpu.dot_dimension_numbers<[1], [0], [0], [1], [0, 0, 1, 1], [], []>} : vector<256x16xf32>, vector<16x8xf32>, vector<256x8xf32> -> vector<256x8xf32>
    %454 = arith.addf %448, %453 : vector<256x8xf32>
    %c2_209 = arith.constant 2 : index
    %c7_210 = arith.constant 7 : index
    %c0_211 = arith.constant 0 : index
    %455 = vector.load %arg10[%c2_209, %c7_210, %c0_211] : memref<18x32x16xf32, #tpu.memory_space<vmem>>, vector<16x16x16xf32>
    %456 = vector.shape_cast %455 : vector<16x16x16xf32> to vector<256x16xf32>
    %c6_212 = arith.constant 6 : index
    %c0_213 = arith.constant 0 : index
    %c0_214 = arith.constant 0 : index
    %457 = vector.load %arg4[%c6_212, %c0_213, %c0_214] : memref<9x16x8xf32, #tpu.memory_space<vmem>>, vector<1x16x8xf32>
    %458 = vector.shape_cast %457 : vector<1x16x8xf32> to vector<16x8xf32>
    %cst_215 = arith.constant dense<0.000000e+00> : vector<256x8xf32>
    %459 = tpu.matmul %456, %458, %cst_215 {dimension_numbers = #tpu.dot_dimension_numbers<[1], [0], [0], [1], [0, 0, 1, 1], [], []>} : vector<256x16xf32>, vector<16x8xf32>, vector<256x8xf32> -> vector<256x8xf32>
    %460 = arith.addf %454, %459 : vector<256x8xf32>
    %c2_216 = arith.constant 2 : index
    %c8_217 = arith.constant 8 : index
    %c0_218 = arith.constant 0 : index
    %461 = vector.load %arg10[%c2_216, %c8_217, %c0_218] : memref<18x32x16xf32, #tpu.memory_space<vmem>>, vector<16x16x16xf32>
    %462 = vector.shape_cast %461 : vector<16x16x16xf32> to vector<256x16xf32>
    %c7_219 = arith.constant 7 : index
    %c0_220 = arith.constant 0 : index
    %c0_221 = arith.constant 0 : index
    %463 = vector.load %arg4[%c7_219, %c0_220, %c0_221] : memref<9x16x8xf32, #tpu.memory_space<vmem>>, vector<1x16x8xf32>
    %464 = vector.shape_cast %463 : vector<1x16x8xf32> to vector<16x8xf32>
    %cst_222 = arith.constant dense<0.000000e+00> : vector<256x8xf32>
    %465 = tpu.matmul %462, %464, %cst_222 {dimension_numbers = #tpu.dot_dimension_numbers<[1], [0], [0], [1], [0, 0, 1, 1], [], []>} : vector<256x16xf32>, vector<16x8xf32>, vector<256x8xf32> -> vector<256x8xf32>
    %466 = arith.addf %460, %465 : vector<256x8xf32>
    %c2_223 = arith.constant 2 : index
    %c9_224 = arith.constant 9 : index
    %c0_225 = arith.constant 0 : index
    %467 = vector.load %arg10[%c2_223, %c9_224, %c0_225] : memref<18x32x16xf32, #tpu.memory_space<vmem>>, vector<16x16x16xf32>
    %468 = vector.shape_cast %467 : vector<16x16x16xf32> to vector<256x16xf32>
    %c8_226 = arith.constant 8 : index
    %c0_227 = arith.constant 0 : index
    %c0_228 = arith.constant 0 : index
    %469 = vector.load %arg4[%c8_226, %c0_227, %c0_228] : memref<9x16x8xf32, #tpu.memory_space<vmem>>, vector<1x16x8xf32>
    %470 = vector.shape_cast %469 : vector<1x16x8xf32> to vector<16x8xf32>
    %cst_229 = arith.constant dense<0.000000e+00> : vector<256x8xf32>
    %471 = tpu.matmul %468, %470, %cst_229 {dimension_numbers = #tpu.dot_dimension_numbers<[1], [0], [0], [1], [0, 0, 1, 1], [], []>} : vector<256x16xf32>, vector<16x8xf32>, vector<256x8xf32> -> vector<256x8xf32>
    %472 = arith.addf %466, %471 : vector<256x8xf32>
    %473 = arith.addf %472, %2 : vector<256x8xf32>
    %474 = vector.shape_cast %473 : vector<256x8xf32> to vector<16x16x8xf32>
    %c0_230 = arith.constant 0 : index
    %c0_231 = arith.constant 0 : index
    %c0_232 = arith.constant 0 : index
    %c0_233 = arith.constant 0 : index
    %475 = vector.load %arg8[%c0_230, %c0_231, %c0_232, %c0_233] : memref<1x16x16x8xf32, #tpu.memory_space<vmem>>, vector<1x16x16x8xf32>
    %476 = vector.shape_cast %475 : vector<1x16x16x8xf32> to vector<16x16x8xf32>
    %477 = vector.shape_cast %474 : vector<16x16x8xf32> to vector<1x16x16x8xf32>
    tpu.vector_store %arg8[%c0_230, %c0_231, %c0_232, %c0_233], %477 {strides = array<i32>} : memref<1x16x16x8xf32, #tpu.memory_space<vmem>>, vector<1x16x16x8xf32>,
    return
  }
  func.func @transform_0(%arg0: i32) -> (i32, i32, i32, i32) {
    %c0_i32 = arith.constant 0 : i32
    %c0_i32_0 = arith.constant 0 : i32
    %c0_i32_1 = arith.constant 0 : i32
    %c0_i32_2 = arith.constant 0 : i32
    return %arg0, %c0_i32, %c0_i32_0, %c0_i32_1 : i32, i32, i32, i32
  }
  func.func @transform_1(%arg0: i32) -> (i32, i32, i32) {
    %c0_i32 = arith.constant 0 : i32
    %c0_i32_0 = arith.constant 0 : i32
    %c0_i32_1 = arith.constant 0 : i32
    %c0_i32_2 = arith.constant 0 : i32
    return %c0_i32, %c0_i32_0, %c0_i32_1 : i32, i32, i32
  }
  func.func @transform_2(%arg0: i32) -> (i32, i32) {
    %c0_i32 = arith.constant 0 : i32
    %c0_i32_0 = arith.constant 0 : i32
    %c0_i32_1 = arith.constant 0 : i32
    return %c0_i32, %c0_i32_0 : i32, i32
  }
  func.func @transform_3(%arg0: i32) -> (i32, i32, i32) {
    %c0_i32 = arith.constant 0 : i32
    %c0_i32_0 = arith.constant 0 : i32
    %c0_i32_1 = arith.constant 0 : i32
    %c0_i32_2 = arith.constant 0 : i32
    return %c0_i32, %c0_i32_0, %c0_i32_1 : i32, i32, i32
  }
  func.func @transform_4(%arg0: i32) -> (i32, i32) {
    %c0_i32 = arith.constant 0 : i32
    %c0_i32_0 = arith.constant 0 : i32
    %c0_i32_1 = arith.constant 0 : i32
    return %c0_i32, %c0_i32_0 : i32, i32
  }
  func.func @transform_5(%arg0: i32) -> (i32, i32) {
    %c0_i32 = arith.constant 0 : i32
    %c0_i32_0 = arith.constant 0 : i32
    %c0_i32_1 = arith.constant 0 : i32
    return %c0_i32, %c0_i32_0 : i32, i32
  }
  func.func @transform_6(%arg0: i32) -> (i32, i32) {
    %c0_i32 = arith.constant 0 : i32
    %c0_i32_0 = arith.constant 0 : i32
    %c0_i32_1 = arith.constant 0 : i32
    return %c0_i32, %c0_i32_0 : i32, i32
  }
  func.func @transform_7(%arg0: i32) -> (i32, i32, i32, i32) {
    %c0_i32 = arith.constant 0 : i32
    %c0_i32_0 = arith.constant 0 : i32
    %c0_i32_1 = arith.constant 0 : i32
    %c0_i32_2 = arith.constant 0 : i32
    return %arg0, %c0_i32, %c0_i32_0, %c0_i32_1 : i32, i32, i32, i32
  }
}

</mosaic_0001>

<bundles_post_ra>
// kernel: bottleneck_forward.1
= control target key start
LH: loop header
LB: loop body
LE: loop exit
PB: predicated region body
PF: predicated region fallthrough
CT: control target
= control target key end

     0   :  { %s13645_s24 = smov 0   ;;  %s17157_s0 = inlined_call_operand.vmem [shape: f32[2,16,16,8], index: 0, kind: input, shape index: {}]   ;;  %s17158_s1 = inlined_call_operand.vmem [shape: f32[9,8,8], index: 1, kind: input, shape index: {}]   ;;  %s17159_s2 = inlined_call_operand.vmem [shape: f32[8,16], index: 2, kind: input, shape index: {}]   ;;  %s17160_s3 = inlined_call_operand.vmem [shape: f32[9,16,8], index: 3, kind: input, shape index: {}]   ;;  %s17161_s4 = inlined_call_operand.vmem [shape: f32[3,8], index: 4, kind: input, shape index: {}]   ;;  %s17162_s5 = inlined_call_operand.vmem [shape: f32[3,8], index: 5, kind: input, shape index: {}]   ;;  %s17163_s6 = inlined_call_operand.vmem [shape: f32[3,16], index: 6, kind: input, shape index: {}]   ;;  %s17164_s7 = inlined_call_operand.vmem [shape: f32[2,16,16,8], index: 7, kind: output, shape index: {}]  }
   0x1 LB: > { %s10330_s25 = sadd.s32 4294967295, %s13598_s24   ;;  %p10334_p0 = scmp.ge.s32.totalorder %s13598_s24, 1  ;;  %s13598_s24 = sphi %s13645_s24, %s17_s24  }
   0x2   : > { %p237_p1 = scmp.lt.s32.totalorder %s13598_s24, 3 }
   0x4   : > { %p238_p2 = pnand %p10334_p0, %p237_p1 }
   0x6   : > { %241 = sbr.rel (%p238_p2) target bundleno = 4299 (0x10cb), region = 48 }
   0xd   : > { %p269_p3 = scmp.lt.s32.totalorder %s10330_s25, 1  ;;  %vm312_vm0 = vcmask 64512   ;;  %s13600_s30 = smov 124   ;;  %vm716_vm1 = vcmask 24576   ;;  %vm643_vm2 = vcmask 31744   ;;  %vm1189_vm10 = vcmask 58368  }
   0xe   : > { %vm1196_vm11 = vcmask 57344  }
   0xf   : > { %s17440_s25 = smov (!%p269_p3, %s10330_s25), 1 }
  0x10   : > { %s11069_s26 = sshll.u32 %s17440_s25, 8 }
  0x11   : > { %s13661_s29 = scalar_lea.vmem %s17157_s0, %s11069_s26 }
  0x12   : > { %v13664_v0 = vld [vmem:[%s13661_s29] sm:$0xff]  ;;  %v13667_v1 = vld [vmem:[%s13661_s29 + $0x10] sm:$0xff]  ;;  %v13670_v2 = vld [vmem:[%s13661_s29 + $0x8] sm:$0xff] }
  0x13   : > { %515 = vrot.lane.b32.xlu0 %v13664_v0, %s13600_s30  ;;  %v313_v3 = vsel %vm312_vm0, %v13664_v0, 0.0  ;;  %v382_v4 = vmul.f32 %v13664_v0, %v13664_v0  ;;  %519 = vrot.lane.b32.xlu1 %v13667_v1, %s13600_s30  ;;  %v384_v5 = vmul.f32 %v13667_v1, %v13667_v1  ;;  %v13683_v6 = vld [vmem:[%s13661_s29 + $0x18] sm:$0xff]  ;;  %v13686_v7 = vld [vmem:[%s13661_s29 + $0x20] sm:$0xff]  ;;  %v316_v8 = vsel %vm312_vm0, %v13667_v1, 0.0 }
  0x14   : > { %v314_v9 = vsel %vm312_vm0, %v13670_v2, 0.0  ;;  %v383_v10 = vmul.f32 %v13670_v2, %v13670_v2  ;;  %v385_v11 = vmul.f32 %v13683_v6, %v13683_v6  ;;  %11809 = vmatprep.mubr.msk.f32.mxu1 %vm312_vm0, %v13664_v0  ;;  %v13700_v14 = vld [vmem:[%s13661_s29 + $0x28] sm:$0xff]  ;;  %v318_v17 = vsel %vm312_vm0, %v13683_v6, 0.0  ;;  %v13713_v21 = vld [vmem:[%s13661_s29 + $0x30] sm:$0xff]  ;;  %v13721_v27 = vld [vmem:[%s13661_s29 + $0x38] sm:$0xff] }
  0x15   : > { %v414_v12 = vsel %vm312_vm0, %v382_v4, 0.0  ;;  %v315_v13 = vadd.f32 %v314_v9, %v313_v3  ;;  %v417_v15 = vsel %vm312_vm0, %v384_v5, 0.0  ;;  %v386_v18 = vmul.f32 %v13686_v7, %v13686_v7  ;;  %v13733_v33 = vld [vmem:[%s13661_s29 + $0x40] sm:$0xff]  ;;  %v13741_v39 = vld [vmem:[%s13661_s29 + $0x48] sm:$0xff]  ;;  %v13753_v45 = vld [vmem:[%s13661_s29 + $0x50] sm:$0xff] }
  0x16   : > { %v415_v16 = vsel %vm312_vm0, %v383_v10, 0.0  ;;  %v419_v22 = vsel %vm312_vm0, %v385_v11, 0.0  ;;  %v320_v23 = vsel %vm312_vm0, %v13686_v7, 0.0  ;;  %v387_v24 = vmul.f32 %v13700_v14, %v13700_v14  ;;  %v13761_v51 = vld [vmem:[%s13661_s29 + $0x58] sm:$0xff]  ;;  %v13773_v57 = vld [vmem:[%s13661_s29 + $0x60] sm:$0xff]  ;;  %v13781_v63 = vld [vmem:[%s13661_s29 + $0x68] sm:$0xff] }
  0x17   : > { %517 = vrot.lane.b32.xlu0 %v13670_v2, %s13600_s30  ;;  %v416_v19 = vadd.f32 %v415_v16, %v414_v12  ;;  %521 = vrot.lane.b32.xlu1 %v13683_v6, %s13600_s30  ;;  %v317_v20 = vadd.f32 %v316_v8, %v315_v13  ;;  %v421_v28 = vsel %vm312_vm0, %v386_v18, 0.0  ;;  %v322_v29 = vsel %vm312_vm0, %v13700_v14, 0.0  ;;  %v13793_v10 = vld [vmem:[%s13661_s29 + $0x70] sm:$0xff] }
  0x18   : > { %v388_v30 = vmul.f32 %v13713_v21, %v13713_v21  ;;  %v423_v34 = vsel %vm312_vm0, %v387_v24, 0.0  ;;  %v324_v35 = vsel %vm312_vm0, %v13713_v21, 0.0  ;;  %v389_v36 = vmul.f32 %v13721_v27, %v13721_v27  ;;  %v13813_v24 = vld [vmem:[%s13661_s29 + $0x80] sm:$0xff] }
  0x19   : > { %v319_v25 = vadd.f32 %v318_v17, %v317_v20  ;;  %v418_v26 = vadd.f32 %v417_v15, %v416_v19  ;;  %v326_v41 = vsel %vm312_vm0, %v13721_v27, 0.0  ;;  %v390_v42 = vmul.f32 %v13733_v33, %v13733_v33  ;;  %v13801_v17 = vld [vmem:[%s13661_s29 + $0x78] sm:$0xff] }
  0x1a   : > { %v425_v40 = vsel %vm312_vm0, %v388_v30, 0.0  ;;  %v427_v46 = vsel %vm312_vm0, %v389_v36, 0.0  ;;  %v328_v47 = vsel %vm312_vm0, %v13733_v33, 0.0  ;;  %v391_v48 = vmul.f32 %v13741_v39, %v13741_v39 }
  0x1b   : > { %v420_v31 = vadd.f32 %v419_v22, %v418_v26  ;;  %523 = vrot.lane.b32.xlu0 %v13686_v7, %s13600_s30  ;;  %v321_v32 = vadd.f32 %v320_v23, %v319_v25  ;;  %525 = vrot.lane.b32.xlu1 %v13700_v14, %s13600_s30  ;;  %v429_v52 = vsel %vm312_vm0, %v390_v42, 0.0  ;;  %v330_v53 = vsel %vm312_vm0, %v13741_v39, 0.0 }
  0x1c   : > { %v392_v54 = vmul.f32 %v13753_v45, %v13753_v45  ;;  %v431_v58 = vsel %vm312_vm0, %v391_v48, 0.0  ;;  %v332_v59 = vsel %vm312_vm0, %v13753_v45, 0.0  ;;  %v393_v60 = vmul.f32 %v13761_v51, %v13761_v51 }
  0x1d   : > { %v422_v37 = vadd.f32 %v421_v28, %v420_v31  ;;  %v323_v38 = vadd.f32 %v322_v29, %v321_v32  ;;  %v334_v4 = vsel %vm312_vm0, %v13761_v51, 0.0  ;;  %v394_v5 = vmul.f32 %v13773_v57, %v13773_v57  ;;  %v13821_v31 = vld [vmem:[%s13661_s29 + $0x88] sm:$0xff] }
  0x1e   : > { %v433_v3 = vsel %vm312_vm0, %v392_v54, 0.0  ;;  %v435_v11 = vsel %vm312_vm0, %v393_v60, 0.0  ;;  %v336_v12 = vsel %vm312_vm0, %v13773_v57, 0.0  ;;  %v395_v13 = vmul.f32 %v13781_v63, %v13781_v63  ;;  %v13861_v60 = vld [vmem:[%s13661_s29 + $0xa8] sm:$0xff] }
  0x1f   : > { %v424_v43 = vadd.f32 %v423_v34, %v422_v37  ;;  %527 = vrot.lane.b32.xlu0 %v13713_v21, %s13600_s30  ;;  %v325_v44 = vadd.f32 %v324_v35, %v323_v38  ;;  %529 = vrot.lane.b32.xlu1 %v13721_v27, %s13600_s30  ;;  %v437_v18 = vsel %vm312_vm0, %v394_v5, 0.0  ;;  %v338_v19 = vsel %vm312_vm0, %v13781_v63, 0.0  ;;  %v13833_v38 = vld [vmem:[%s13661_s29 + $0x90] sm:$0xff] }
  0x20   : > { %v396_v20 = vmul.f32 %v13793_v10, %v13793_v10  ;;  %v439_v25 = vsel %vm312_vm0, %v395_v13, 0.0  ;;  %v340_v26 = vsel %vm312_vm0, %v13793_v10, 0.0  ;;  %v397_v28 = vmul.f32 %v13801_v17, %v13801_v17 }
  0x21   : > { %v426_v49 = vadd.f32 %v425_v40, %v424_v43  ;;  %v327_v50 = vadd.f32 %v326_v41, %v325_v44  ;;  %v342_v34 = vsel %vm312_vm0, %v13801_v17, 0.0  ;;  %v398_v35 = vmul.f32 %v13813_v24, %v13813_v24 }
  0x22   : > { %v441_v32 = vsel %vm312_vm0, %v396_v20, 0.0  ;;  %v443_v40 = vsel %vm312_vm0, %v397_v28, 0.0  ;;  %v344_v41 = vsel %vm312_vm0, %v13813_v24, 0.0  ;;  %v399_v42 = vmul.f32 %v13821_v31, %v13821_v31 }
  0x23   : > { %v428_v55 = vadd.f32 %v427_v46, %v426_v49  ;;  %531 = vrot.lane.b32.xlu0 %v13733_v33, %s13600_s30  ;;  %v329_v56 = vadd.f32 %v328_v47, %v327_v50  ;;  %533 = vrot.lane.b32.xlu1 %v13741_v39, %s13600_s30  ;;  %v13841_v46 = vld [vmem:[%s13661_s29 + $0x98] sm:$0xff]  ;;  %v445_v47 = vsel %vm312_vm0, %v398_v35, 0.0  ;;  %v346_v48 = vsel %vm312_vm0, %v13821_v31, 0.0 }
  0x24   : > { %v400_v49 = vmul.f32 %v13833_v38, %v13833_v38  ;;  %v447_v54 = vsel %vm312_vm0, %v399_v42, 0.0  ;;  %v13913_v42 = vld [vmem:[%s13661_s29 + $0xd0] sm:$0xff] }
  0x25   : > { %v430_v61 = vadd.f32 %v429_v52, %v428_v55  ;;  %v331_v62 = vadd.f32 %v330_v53, %v329_v56  ;;  %v13853_v53 = vld [vmem:[%s13661_s29 + $0xa0] sm:$0xff]  ;;  %v348_v55 = vsel %vm312_vm0, %v13833_v38, 0.0  ;;  %v401_v56 = vmul.f32 %v13841_v46, %v13841_v46 }
  0x27   : > { %v432_v8 = vadd.f32 %v431_v58, %v430_v61  ;;  %535 = vrot.lane.b32.xlu0 %v13753_v45, %s13600_s30  ;;  %v333_v9 = vadd.f32 %v332_v59, %v331_v62  ;;  %537 = vrot.lane.b32.xlu1 %v13761_v51, %s13600_s30  ;;  %v449_v61 = vsel %vm312_vm0, %v400_v49, 0.0  ;;  %v350_v62 = vsel %vm312_vm0, %v13841_v46, 0.0 }
  0x29   : > { %v434_v15 = vadd.f32 %v433_v3, %v432_v8  ;;  %v335_v16 = vadd.f32 %v334_v4, %v333_v9  ;;  %v402_v3 = vmul.f32 %v13853_v53, %v13853_v53  ;;  %v13873_v8 = vld [vmem:[%s13661_s29 + $0xb0] sm:$0xff]  ;;  %v451_v9 = vsel %vm312_vm0, %v401_v56, 0.0 }
  0x2a   : > { %v404_v20 = vmul.f32 %v13873_v8, %v13873_v8  ;;  %v356_v28 = vsel %vm312_vm0, %v13873_v8, 0.0 }
  0x2b   : > { %v436_v22 = vadd.f32 %v435_v11, %v434_v15  ;;  %539 = vrot.lane.b32.xlu0 %v13773_v57, %s13600_s30  ;;  %v337_v23 = vadd.f32 %v336_v12, %v335_v16  ;;  %541 = vrot.lane.b32.xlu1 %v13781_v63, %s13600_s30  ;;  %v352_v11 = vsel %vm312_vm0, %v13853_v53, 0.0  ;;  %v403_v12 = vmul.f32 %v13861_v60, %v13861_v60  ;;  %v13881_v16 = vld [vmem:[%s13661_s29 + $0xb8] sm:$0xff] }
  0x2c   : > { %v457_v35 = vsel %vm312_vm0, %v404_v20, 0.0 }
  0x2d   : > { %v438_v29 = vadd.f32 %v437_v18, %v436_v22  ;;  %v339_v30 = vadd.f32 %v338_v19, %v337_v23  ;;  %v453_v18 = vsel %vm312_vm0, %v402_v3, 0.0  ;;  %v354_v19 = vsel %vm312_vm0, %v13861_v60, 0.0 }
  0x2f   : > { %v440_v36 = vadd.f32 %v439_v25, %v438_v29  ;;  %543 = vrot.lane.b32.xlu0 %v13793_v10, %s13600_s30  ;;  %v341_v37 = vadd.f32 %v340_v26, %v339_v30  ;;  %545 = vrot.lane.b32.xlu1 %v13801_v17, %s13600_s30  ;;  %v13893_v25 = vld [vmem:[%s13661_s29 + $0xc0] sm:$0xff]  ;;  %v455_v26 = vsel %vm312_vm0, %v403_v12, 0.0  ;;  %v405_v29 = vmul.f32 %v13881_v16, %v13881_v16 }
  0x31   : > { %v442_v43 = vadd.f32 %v441_v32, %v440_v36  ;;  %v343_v44 = vadd.f32 %v342_v34, %v341_v37  ;;  %v13901_v34 = vld [vmem:[%s13661_s29 + $0xc8] sm:$0xff]  ;;  %v358_v36 = vsel %vm312_vm0, %v13881_v16, 0.0  ;;  %v406_v37 = vmul.f32 %v13893_v25, %v13893_v25 }
  0x33   : > { %v444_v50 = vadd.f32 %v443_v40, %v442_v43  ;;  %547 = vrot.lane.b32.xlu0 %v13813_v24, %s13600_s30  ;;  %v345_v52 = vadd.f32 %v344_v41, %v343_v44  ;;  %549 = vrot.lane.b32.xlu1 %v13821_v31, %s13600_s30  ;;  %v459_v43 = vsel %vm312_vm0, %v405_v29, 0.0  ;;  %v360_v44 = vsel %vm312_vm0, %v13893_v25, 0.0 }
  0x35   : > { %v446_v58 = vadd.f32 %v445_v47, %v444_v50  ;;  %v347_v59 = vadd.f32 %v346_v48, %v345_v52  ;;  %v407_v47 = vmul.f32 %v13901_v34, %v13901_v34  ;;  %v13921_v50 = vld [vmem:[%s13661_s29 + $0xd8] sm:$0xff]  ;;  %v461_v52 = vsel %vm312_vm0, %v406_v37, 0.0 }
  0x36   : > { %v409_v3 = vmul.f32 %v13921_v50, %v13921_v50  ;;  %v366_v12 = vsel %vm312_vm0, %v13921_v50, 0.0 }
  0x37   : > { %v448_v4 = vadd.f32 %v447_v54, %v446_v58  ;;  %551 = vrot.lane.b32.xlu0 %v13833_v38, %s13600_s30  ;;  %v349_v5 = vadd.f32 %v348_v55, %v347_v59  ;;  %553 = vrot.lane.b32.xlu1 %v13841_v46, %s13600_s30  ;;  %v362_v54 = vsel %vm312_vm0, %v13901_v34, 0.0  ;;  %v408_v55 = vmul.f32 %v13913_v42, %v13913_v42  ;;  %v13933_v59 = vld [vmem:[%s13661_s29 + $0xe0] sm:$0xff] }
  0x38   : > { %v368_v20 = vsel %vm312_vm0, %v13933_v59, 0.0 }
  0x39   : > { %v450_v13 = vadd.f32 %v449_v61, %v448_v4  ;;  %v351_v15 = vadd.f32 %v350_v62, %v349_v5  ;;  %v463_v61 = vsel %vm312_vm0, %v407_v47, 0.0  ;;  %v364_v62 = vsel %vm312_vm0, %v13913_v42, 0.0 }
  0x3b   : > { %v452_v22 = vadd.f32 %v451_v9, %v450_v13  ;;  %555 = vrot.lane.b32.xlu0 %v13853_v53, %s13600_s30  ;;  %v353_v23 = vadd.f32 %v352_v11, %v351_v15  ;;  %557 = vrot.lane.b32.xlu1 %v13861_v60, %s13600_s30  ;;  %v13941_v9 = vld [vmem:[%s13661_s29 + $0xe8] sm:$0xff]  ;;  %v465_v11 = vsel %vm312_vm0, %v408_v55, 0.0  ;;  %v410_v13 = vmul.f32 %v13933_v59, %v13933_v59 }
  0x3d   : > { %v454_v30 = vadd.f32 %v453_v18, %v452_v22  ;;  %v355_v32 = vadd.f32 %v354_v19, %v353_v23  ;;  %v13953_v19 = vld [vmem:[%s13661_s29 + $0xf0] sm:$0xff]  ;;  %v411_v22 = vmul.f32 %v13941_v9, %v13941_v9  ;;  %v467_v23 = vsel %vm312_vm0, %v409_v3, 0.0 }
  0x3f   : > { %v456_v40 = vadd.f32 %v455_v26, %v454_v30  ;;  %559 = vrot.lane.b32.xlu0 %v13873_v8, %s13600_s30  ;;  %v357_v41 = vadd.f32 %v356_v28, %v355_v32  ;;  %561 = vrot.lane.b32.xlu1 %v13881_v16, %s13600_s30  ;;  %v13961_v26 = vld [vmem:[%s13661_s29 + $0xf8] sm:$0xff]  ;;  %v370_v30 = vsel %vm312_vm0, %v13941_v9, 0.0  ;;  %v412_v32 = vmul.f32 %v13953_v19, %v13953_v19 }
  0x41   : > { %v458_v48 = vadd.f32 %v457_v35, %v456_v40  ;;  %v359_v49 = vadd.f32 %v358_v36, %v357_v41  ;;  %v469_v35 = vsel %vm312_vm0, %v410_v13, 0.0  ;;  %v372_v40 = vsel %vm312_vm0, %v13953_v19, 0.0 }
  0x42   : > { %v413_v41 = vmul.f32 %v13961_v26, %v13961_v26 }
  0x43   : > { %v460_v56 = vadd.f32 %v459_v43, %v458_v48  ;;  %563 = vrot.lane.b32.xlu0 %v13893_v25, %s13600_s30  ;;  %v361_v58 = vadd.f32 %v360_v44, %v359_v49  ;;  %565 = vrot.lane.b32.xlu1 %v13901_v34, %s13600_s30  ;;  %v471_v43 = vsel %vm312_vm0, %v411_v22, 0.0  ;;  %v374_v48 = vsel %vm312_vm0, %v13961_v26, 0.0 }
  0x44   : > { %v473_v49 = vsel %vm312_vm0, %v412_v32, 0.0  ;;  %v475_v55 = vsel %vm312_vm0, %v413_v41, 0.0 }
  0x45   : > { %v462_v4 = vadd.f32 %v461_v52, %v460_v56  ;;  %v363_v5 = vadd.f32 %v362_v54, %v361_v58 }
  0x47   : > { %v464_v15 = vadd.f32 %v463_v61, %v462_v4  ;;  %567 = vrot.lane.b32.xlu0 %v13913_v42, %s13600_s30  ;;  %v365_v18 = vadd.f32 %v364_v62, %v363_v5  ;;  %569 = vrot.lane.b32.xlu1 %v13921_v50, %s13600_s30 }
  0x49   : > { %v367_v28 = vadd.f32 %v366_v12, %v365_v18  ;;  %v466_v29 = vadd.f32 %v465_v11, %v464_v15 }
  0x4b   : > { %571 = vrot.lane.b32.xlu0 %v13933_v59, %s13600_s30  ;;  %573 = vrot.lane.b32.xlu1 %v13941_v9, %s13600_s30  ;;  %v369_v36 = vadd.f32 %v368_v20, %v367_v28  ;;  %v468_v37 = vadd.f32 %v467_v23, %v466_v29 }
  0x4d   : > { %v371_v44 = vadd.f32 %v370_v30, %v369_v36  ;;  %v470_v47 = vadd.f32 %v469_v35, %v468_v37 }
  0x4f   : > { %575 = vrot.lane.b32.xlu0 %v13953_v19, %s13600_s30  ;;  %577 = vrot.lane.b32.xlu1 %v13961_v26, %s13600_s30  ;;  %v373_v52 = vadd.f32 %v372_v40, %v371_v44  ;;  %v472_v54 = vadd.f32 %v471_v43, %v470_v47 }
  0x51   : > { %v375_v56 = vadd.f32 %v374_v48, %v373_v52  ;;  %v474_v58 = vadd.f32 %v473_v49, %v472_v54 }
  0x53   : > { %v376_v61 = vrot.slane %v375_v56, 4  ;;  %v476_v62 = vadd.f32 %v475_v55, %v474_v58 }
  0x55   : > { %v377_v3 = vadd.f32 %v376_v61, %v375_v56  ;;  %v477_v4 = vrot.slane %v476_v62, 4 }
  0x57   : > { %v378_v5 = vrot.slane %v377_v3, 2  ;;  %v478_v11 = vadd.f32 %v477_v4, %v476_v62 }
  0x59   : > { %v379_v12 = vadd.f32 %v378_v5, %v377_v3  ;;  %v479_v13 = vrot.slane %v478_v11, 2 }
  0x5b   : > { %v380_v15 = vrot.slane %v379_v12, 1  ;;  %v480_v18 = vadd.f32 %v479_v13, %v478_v11 }
  0x5d   : > { %v381_v20 = vadd.f32 %v380_v15, %v379_v12  ;;  %v481_v22 = vrot.slane %v480_v18, 1 }
  0x5f   : > { %728 = vrot.lane.b32.xlu0 %v381_v20, %s13600_s30  ;;  %v13986_v23 = vadd.f32 %v481_v22, %v480_v18  ;;  %v717_v28 = vsel %vm716_vm1, %v381_v20, 0.0 }
  0x61   : > { %752 = vrot.lane.b32.xlu1 %v13986_v23, %s13600_s30 }
  0x85   : > { %v516_v29 = vpop.permute.xlu0 %515  ;;  %v520_v30 = vpop.permute.xlu1 %519  ;;  %718 = vadd.xlane.f32.xlu1 %v717_v28 }
  0x86   : > { %v611_v32 = vmul.f32 %v516_v29, %v13664_v0  ;;  %v613_v35 = vmul.f32 %v520_v30, %v13667_v1 }
  0x88   : > { %v644_v40 = vsel %vm643_vm2, %v611_v32, 0.0  ;;  %v647_v44 = vsel %vm643_vm2, %v613_v35, 0.0 }
  0x89   : > { %v518_v36 = vpop.permute.xlu0 %517  ;;  %v522_v37 = vpop.permute.xlu1 %521 }
  0x8a   : > { %v612_v41 = vmul.f32 %v518_v36, %v13670_v2  ;;  %v614_v43 = vmul.f32 %v522_v37, %v13683_v6 }
  0x8c   : > { %v645_v47 = vsel %vm643_vm2, %v612_v41, 0.0  ;;  %v649_v0 = vsel %vm643_vm2, %v614_v43, 0.0 }
  0x8d   : > { %v646_v48 = vadd.f32 %v645_v47, %v644_v40  ;;  %v524_v49 = vpop.permute.xlu0 %523  ;;  %v526_v52 = vpop.permute.xlu1 %525 }
  0x8e   : > { %v615_v54 = vmul.f32 %v524_v49, %v13686_v7  ;;  %v616_v1 = vmul.f32 %v526_v52, %v13700_v14 }
  0x8f   : > { %v648_v55 = vadd.f32 %v647_v44, %v646_v48 }
  0x90   : > { %v651_v56 = vsel %vm643_vm2, %v615_v54, 0.0  ;;  %v653_v62 = vsel %vm643_vm2, %v616_v1, 0.0 }
  0x91   : > { %v650_v58 = vadd.f32 %v649_v0, %v648_v55  ;;  %v528_v2 = vpop.permute.xlu0 %527  ;;  %v530_v61 = vpop.permute.xlu1 %529 }
  0x92   : > { %v617_v3 = vmul.f32 %v528_v2, %v13713_v21  ;;  %v618_v4 = vmul.f32 %v530_v61, %v13721_v27 }
  0x93   : > { %v652_v5 = vadd.f32 %v651_v56, %v650_v58 }
  0x94   : > { %v655_v11 = vsel %vm643_vm2, %v617_v3, 0.0  ;;  %v657_v18 = vsel %vm643_vm2, %v618_v4, 0.0 }
  0x95   : > { %v654_v12 = vadd.f32 %v653_v62, %v652_v5  ;;  %v532_v13 = vpop.permute.xlu0 %531  ;;  %v534_v15 = vpop.permute.xlu1 %533 }
  0x96   : > { %v619_v20 = vmul.f32 %v532_v13, %v13733_v33  ;;  %v620_v22 = vmul.f32 %v534_v15, %v13741_v39 }
  0x97   : > { %v656_v28 = vadd.f32 %v655_v11, %v654_v12 }
  0x98   : > { %v659_v29 = vsel %vm643_vm2, %v619_v20, 0.0  ;;  %v661_v36 = vsel %vm643_vm2, %v620_v22, 0.0 }
  0x99   : > { %v658_v30 = vadd.f32 %v657_v18, %v656_v28  ;;  %v536_v32 = vpop.permute.xlu0 %535  ;;  %v538_v35 = vpop.permute.xlu1 %537 }
  0x9a   : > { %v621_v37 = vmul.f32 %v536_v32, %v13753_v45  ;;  %v622_v40 = vmul.f32 %v538_v35, %v13761_v51 }
  0x9b   : > { %v660_v41 = vadd.f32 %v659_v29, %v658_v30 }
  0x9c   : > { %v663_v43 = vsel %vm643_vm2, %v621_v37, 0.0  ;;  %v665_v49 = vsel %vm643_vm2, %v622_v40, 0.0 }
  0x9d   : > { %v662_v44 = vadd.f32 %v661_v36, %v660_v41  ;;  %v540_v47 = vpop.permute.xlu0 %539  ;;  %v542_v48 = vpop.permute.xlu1 %541 }
  0x9e   : > { %v623_v52 = vmul.f32 %v540_v47, %v13773_v57  ;;  %v624_v0 = vmul.f32 %v542_v48, %v13781_v63 }
  0x9f   : > { %v664_v54 = vadd.f32 %v663_v43, %v662_v44 }
  0xa0   : > { %v667_v1 = vsel %vm643_vm2, %v623_v52, 0.0  ;;  %v669_v2 = vsel %vm643_vm2, %v624_v0, 0.0 }
  0xa1   : > { %v666_v55 = vadd.f32 %v665_v49, %v664_v54  ;;  %v544_v56 = vpop.permute.xlu0 %543  ;;  %v546_v58 = vpop.permute.xlu1 %545 }
  0xa2   : > { %v625_v61 = vmul.f32 %v544_v56, %v13793_v10  ;;  %v626_v62 = vmul.f32 %v546_v58, %v13801_v17 }
  0xa3   : > { %v668_v3 = vadd.f32 %v667_v1, %v666_v55 }
  0xa4   : > { %v671_v4 = vsel %vm643_vm2, %v625_v61, 0.0  ;;  %v673_v13 = vsel %vm643_vm2, %v626_v62, 0.0 }
  0xa5   : > { %v670_v5 = vadd.f32 %v669_v2, %v668_v3  ;;  %v548_v11 = vpop.permute.xlu0 %547  ;;  %v550_v12 = vpop.permute.xlu1 %549 }
  0xa6   : > { %v627_v15 = vmul.f32 %v548_v11, %v13813_v24  ;;  %v628_v18 = vmul.f32 %v550_v12, %v13821_v31 }
  0xa7   : > { %v672_v20 = vadd.f32 %v671_v4, %v670_v5 }
  0xa8   : > { %v675_v22 = vsel %vm643_vm2, %v627_v15, 0.0  ;;  %v677_v32 = vsel %vm643_vm2, %v628_v18, 0.0 }
  0xa9   : > { %v674_v28 = vadd.f32 %v673_v13, %v672_v20  ;;  %v552_v29 = vpop.permute.xlu0 %551  ;;  %v554_v30 = vpop.permute.xlu1 %553 }
  0xaa   : > { %v629_v35 = vmul.f32 %v552_v29, %v13833_v38  ;;  %v630_v36 = vmul.f32 %v554_v30, %v13841_v46 }
  0xab   : > { %v676_v37 = vadd.f32 %v675_v22, %v674_v28 }
  0xac   : > { %v679_v40 = vsel %vm643_vm2, %v629_v35, 0.0  ;;  %v681_v47 = vsel %vm643_vm2, %v630_v36, 0.0 }
  0xad   : > { %v678_v41 = vadd.f32 %v677_v32, %v676_v37  ;;  %v556_v43 = vpop.permute.xlu0 %555  ;;  %v558_v44 = vpop.permute.xlu1 %557 }
  0xae   : > { %v631_v48 = vmul.f32 %v556_v43, %v13853_v53  ;;  %v632_v49 = vmul.f32 %v558_v44, %v13861_v60 }
  0xaf   : > { %v680_v52 = vadd.f32 %v679_v40, %v678_v41 }
  0xb0   : > { %v683_v0 = vsel %vm643_vm2, %v631_v48, 0.0  ;;  %v685_v56 = vsel %vm643_vm2, %v632_v49, 0.0 }
  0xb1   : > { %v682_v54 = vadd.f32 %v681_v47, %v680_v52  ;;  %v560_v1 = vpop.permute.xlu0 %559  ;;  %v562_v55 = vpop.permute.xlu1 %561 }
  0xb2   : > { %v633_v58 = vmul.f32 %v560_v1, %v13873_v8  ;;  %v634_v2 = vmul.f32 %v562_v55, %v13881_v16 }
  0xb3   : > { %v684_v61 = vadd.f32 %v683_v0, %v682_v54 }
  0xb4   : > { %v687_v62 = vsel %vm643_vm2, %v633_v58, 0.0  ;;  %v689_v11 = vsel %vm643_vm2, %v634_v2, 0.0 }
  0xb5   : > { %v686_v3 = vadd.f32 %v685_v56, %v684_v61  ;;  %v564_v4 = vpop.permute.xlu0 %563  ;;  %v566_v5 = vpop.permute.xlu1 %565 }
  0xb6   : > { %v635_v12 = vmul.f32 %v564_v4, %v13893_v25  ;;  %v636_v13 = vmul.f32 %v566_v5, %v13901_v34 }
  0xb7   : > { %v688_v15 = vadd.f32 %v687_v62, %v686_v3 }
  0xb8   : > { %v691_v18 = vsel %vm643_vm2, %v635_v12, 0.0  ;;  %v693_v29 = vsel %vm643_vm2, %v636_v13, 0.0 }
  0xb9   : > { %v690_v20 = vadd.f32 %v689_v11, %v688_v15  ;;  %v568_v22 = vpop.permute.xlu0 %567  ;;  %v570_v28 = vpop.permute.xlu1 %569  ;;  %v741_v15 = vsel %vm716_vm1, %v13986_v23, 0.0 }
  0xba   : > { %v637_v30 = vmul.f32 %v568_v22, %v13913_v42  ;;  %v638_v32 = vmul.f32 %v570_v28, %v13921_v50 }
  0xbb   : > { %v692_v35 = vadd.f32 %v691_v18, %v690_v20 }
  0xbc   : > { %v695_v36 = vsel %vm643_vm2, %v637_v30, 0.0  ;;  %v697_v43 = vsel %vm643_vm2, %v638_v32, 0.0 }
  0xbd   : > { %v694_v37 = vadd.f32 %v693_v29, %v692_v35  ;;  %v572_v40 = vpop.permute.xlu0 %571  ;;  %v574_v41 = vpop.permute.xlu1 %573 }
  0xbe   : > { %v639_v44 = vmul.f32 %v572_v40, %v13933_v59  ;;  %v640_v47 = vmul.f32 %v574_v41, %v13941_v9 }
  0xbf   : > { %v696_v48 = vadd.f32 %v695_v36, %v694_v37 }
  0xc0   : > { %v699_v49 = vsel %vm643_vm2, %v639_v44, 0.0  ;;  %v701_v1 = vsel %vm643_vm2, %v640_v47, 0.0 }
  0xc1   : > { %v698_v52 = vadd.f32 %v697_v43, %v696_v48  ;;  %v576_v0 = vpop.permute.xlu0 %575  ;;  %v578_v54 = vpop.permute.xlu1 %577 }
  0xc2   : > { %v641_v55 = vmul.f32 %v576_v0, %v13953_v19  ;;  %v642_v56 = vmul.f32 %v578_v54, %v13961_v26 }
  0xc3   : > { %v700_v58 = vadd.f32 %v699_v49, %v698_v52 }
  0xc4   : > { %v703_v2 = vsel %vm643_vm2, %v641_v55, 0.0  ;;  %v705_v62 = vsel %vm643_vm2, %v642_v56, 0.0 }
  0xc5   : > { %v702_v61 = vadd.f32 %v701_v1, %v700_v58 }
  0xc7   : > { %v704_v3 = vadd.f32 %v703_v2, %v702_v61 }
  0xc9   : > { %v706_v4 = vadd.f32 %v705_v62, %v704_v3 }
  0xcb   : > { %707 = vadd.xlane.f32.xlu0 %v706_v4 }
  0xd1   : > { %v729_v5 = vpop.permute.xlu0 %728 }
  0xd2   : > { %v731_v11 = vsel %vm716_vm1, %v729_v5, 0.0 }
  0xd3   : > { %v753_v12 = vpop.permute.xlu1 %752  ;;  %732 = vadd.xlane.f32.xlu0 %v731_v11 }
  0xd4   : > { %v755_v13 = vsel %vm716_vm1, %v753_v12, 0.0 }
  0xd5   : > { %756 = vadd.xlane.f32.xlu1 %v755_v13 }
  0xd7   : > { %742 = vadd.xlane.f32.xlu0 %v741_v15 }
 0x112   : > { %v719_v18 = vpop.xlane.xlu1 %718 }
 0x113   : > { %v720_v20 = vrot.slane %v719_v18, 4 }
 0x115   : > { %v721_v22 = vadd.f32 %v720_v20, %v719_v18  ;;  %v812_v18 = vlaneseq }
 0x117   : > { %v722_v28 = vrot.slane %v721_v22, 2  ;;  %v14060_v20 = vand.u32 127, %v812_v18 }
 0x119   : > { %v723_v32 = vadd.f32 %v722_v28, %v721_v22  ;;  %17292 = vst [vmem:[#allocation4_spill] sm:$0xff] %v14060_v20  ;;  %vm814_vm3 = vcmp.lt.s32.totalorder %v14060_v20, 4 }
 0x11b   : > { %v724_v37 = vrot.slane %v723_v32, 1 }
 0x11d   : > { %v725_v48 = vadd.f32 %v724_v37, %v723_v32 }
 0x158   : > { %v708_v29 = vpop.xlane.xlu0 %707 }
 0x159   : > { %v709_v30 = vrot.slane %v708_v29, 4 }
 0x15b   : > { %v710_v35 = vadd.f32 %v709_v30, %v708_v29 }
 0x15d   : > { %v711_v36 = vrot.slane %v710_v35, 2 }
 0x15f   : > { %v712_v40 = vadd.f32 %v711_v36, %v710_v35 }
 0x160   : > { %v733_v41 = vpop.xlane.xlu0 %732 }
 0x161   : > { %v734_v43 = vrot.slane %v733_v41, 4  ;;  %v713_v44 = vrot.slane %v712_v40, 1 }
 0x162   : > { %v757_v47 = vpop.xlane.xlu1 %756 }
 0x163   : > { %v735_v49 = vadd.f32 %v734_v43, %v733_v41  ;;  %v758_v23 = vrot.slane %v757_v47, 4  ;;  %v714_v52 = vadd.f32 %v713_v44, %v712_v40 }
 0x164   : > { %v743_v0 = vpop.xlane.xlu0 %742 }
 0x165   : > { %v736_v54 = vrot.slane %v735_v49, 2  ;;  %v759_v1 = vadd.f32 %v758_v23, %v757_v47  ;;  %v744_v55 = vrot.slane %v743_v0, 4  ;;  %13479 = vpush %v714_v52 }
 0x166   : > { %13481 = vpush %v725_v48 }
 0x167   : > { %v760_v56 = vrot.slane %v759_v1, 2  ;;  %v745_v58 = vadd.f32 %v744_v55, %v743_v0  ;;  %v737_v2 = vadd.f32 %v736_v54, %v735_v49  ;;  %v311_v54 = vld [vmem:[%s17161_s4] sm:$0x7] }
 0x169   : > { %v746_v61 = vrot.slane %v745_v58, 2  ;;  %v738_v62 = vrot.slane %v737_v2, 1  ;;  %v761_v3 = vadd.f32 %v760_v56, %v759_v1  ;;  %v14090_v56 = vshrl.u32 %v812_v18, 7 }
 0x16b   : > { %v739_v4 = vadd.f32 %v738_v62, %v737_v2  ;;  %v747_v5 = vadd.f32 %v746_v61, %v745_v58  ;;  %v762_v11 = vrot.slane %v761_v3, 1  ;;  %17293 = vst [vmem:[#allocation5_spill] sm:$0xff] %v14090_v56  ;;  %v13601_v58 = vmov 4294967292  }
 0x16c   : > { %v847_v2 = vsel %vm814_vm3, 4, %v13601_v58  ;;  %v14102_v18 = vsub.s32 0, %v14090_v56  ;;  %vm849_vm8 = vcmp.eq.s32.totalorder %v14090_v56, %v14060_v20 }
 0x16d   : > { %13483 = vpush %v739_v4  ;;  %v748_v12 = vrot.slane %v747_v5, 1  ;;  %v763_v15 = vadd.f32 %v762_v11, %v761_v3 }
 0x16e   : > { %17295 = vst [vmem:[#allocation7_spill] sm:$0xff] %v14102_v18 }
 0x16f   : > { %v749_v13 = vadd.f32 %v748_v12, %v747_v5  ;;  %v14099_v12 = vadd.s32 %v847_v2, %v14060_v20  ;;  %v14594_v20 = vld [vmem:[%s17158_s1 + $0x20] sm:$0xff] }
 0x171   : > { %13485 = vpush %v749_v13  ;;  %17294 = vst [vmem:[#allocation6_spill] sm:$0xff] %v14099_v12  ;;  %vm855_vm9 = vcmp.eq.s32.totalorder %v14090_v56, %v14099_v12 }
 0x172   : > { %13487 = vpush %v763_v15 }
 0x196   : > { %s13480_s8 = spop %13479 }
 0x197   : > { %s13482_s9 = spop %13481  ;;  %s775_s17 = smul.f32 0.0009765625, %s13480_s8 }
 0x198   : > { %s765_s10 = smul.f32 0.0009765625, %s13482_s9 }
 0x19a   : > { %v819_v22 = vstv %s765_s10  ;;  %s768_s13 = smul.f32 %s765_s10, %s765_s10 }
 0x19e   : > { %s13484_s11 = spop %13483 }
 0x19f   : > { %s766_s12 = smul.f32 0.0009765625, %s13484_s11 }
 0x1a1   : > { %v820_v28 = vstv %s766_s12  ;;  %s776_s14 = smul.f32 %s766_s12, %s765_s10 }
 0x1a2   : > { %v14065_v29 = vsel %vm814_vm3, %v819_v22, %v820_v28  ;;  %v14069_v30 = vsel %vm814_vm3, %v820_v28, %v819_v22  ;;  %s13486_s15 = spop %13485  ;;  %s772_s20 = smul.f32 %s766_s12, %s766_s12 }
 0x1a3   : > { %s767_s16 = smul.f32 0.0009765625, %s13486_s15  ;;  %s13488_s18 = spop %13487 }
 0x1a4   : > { %s14071_s21 = ssub.f32 %s775_s17, %s776_s14  ;;  %s771_s22 = smul.f32 0.0009765625, %s13488_s18 }
 0x1a5   : > { %s769_s19 = ssub.f32 %s767_s16, %s768_s13 }
 0x1a6   : > { %s773_s27 = ssub.f32 %s771_s22, %s772_s20  ;;  %s779_s9 = smul.f32 %s14071_s21, %s14071_s21 }
 0x1a7   : > { %s14073_s23 = sadd.f32 0.0001, %s769_s19 }
 0x1a8   : > { %s14075_s28 = sadd.f32 0.0001, %s773_s27 }
 0x1a9   : > { %s810_s22 = ssub.f32 0.0, %s14071_s21 }
 0x1aa   : > { %s778_s10 = smul.f32 %s14075_s28, %s14073_s23  ;;  %s790_s12 = sadd.f32 %s14075_s28, %s14073_s23 }
 0x1ac   : > { %s780_s8 = ssub.f32 %s778_s10, %s779_s9 }
 0x1ae   : > { %v781_v32 = vstv %s780_s8 }
 0x1af   : > { %13540 = vrsqrt.f32 %v781_v32  ;;  %vm784_vm4 = vcmp.eq.f32.partialorder %v781_v32, inf  ;;  %v787_v37 = vand.u32 2147483648, %v781_v32  ;;  %vm786_vm5 = vcmp.eq.f32.partialorder %v781_v32, 0.0 }
 0x1b9   : > { %v13541_v35 = vpop.eup %13540 }
 0x1ba   : > { %v783_v36 = vmul.f32 %v13541_v35, %v781_v32 }
 0x1bc   : > { %v785_v40 = vsel %vm784_vm4, %v781_v32, %v783_v36 }
 0x1bd   : > { %v788_v41 = vsel %vm786_vm5, %v787_v37, %v785_v40 }
 0x1be   : > { %13489 = vpush %v788_v41 }
 0x1ef   : > { %s13490_s11 = spop %13489 }
 0x1f0   : > { %s791_s13 = smul.f32 2.0, %s13490_s11  ;;  %s806_s17 = sadd.f32 %s13490_s11, %s14075_s28 }
 0x1f1   : > { %s808_s19 = sadd.f32 %s13490_s11, %s14073_s23 }
 0x1f2   : > { %s792_s14 = sadd.f32 %s791_s13, %s790_s12 }
 0x1f4   : > { %v793_v43 = vstv %s792_s14 }
 0x1f5   : > { %13542 = vrsqrt.f32 %v793_v43  ;;  %vm796_vm6 = vcmp.eq.f32.partialorder %v793_v43, inf  ;;  %v799_v48 = vand.u32 2147483648, %v793_v43  ;;  %vm798_vm7 = vcmp.eq.f32.partialorder %v793_v43, 0.0 }
 0x1ff   : > { %v13543_v44 = vpop.eup %13542 }
 0x200   : > { %v795_v47 = vmul.f32 %v13543_v44, %v793_v43 }
 0x202   : > { %v797_v49 = vsel %vm796_vm6, %v793_v43, %v795_v47 }
 0x203   : > { %v800_v23 = vsel %vm798_vm7, %v799_v48, %v797_v49  ;;  %v13559_v49 = vld [vmem:[%s13661_s29 + $0x10] sm:$0xff] }
 0x204   : > { %13491 = vpush %v800_v23 }
 0x235   : > { %s13492_s15 = spop %13491 }
 0x236   : > { %s802_s16 = smul.f32 %s13492_s15, %s13490_s11 }
 0x238   : > { %v803_v52 = vstv %s802_s16 }
 0x239   : > { %13544 = vrcp.f32 %v803_v52 }
 0x243   : > { %v13545_v0 = vpop.eup %13544 }
 0x244   : > { %13493 = vpush %v13545_v0 }
 0x275   : > { %s13494_s18 = spop %13493 }
 0x276   : > { %s807_s20 = smul.f32 %s13494_s18, %s806_s17 }
 0x277   : > { %s809_s27 = smul.f32 %s13494_s18, %s808_s19 }
 0x278   : > { %s811_s8 = smul.f32 %s13494_s18, %s810_s22  ;;  %v815_v1 = vstv %s807_s20 }
 0x279   : > { %v816_v55 = vstv %s809_s27 }
 0x27a   : > { %v817_v61 = vsel %vm814_vm3, %v815_v1, %v816_v55  ;;  %v818_v62 = vsel %vm814_vm3, %v816_v55, %v815_v1  ;;  %v824_v3 = vstv %s811_s8 }
 0x27b   : > { %v823_v4 = vmul.f32 %v817_v61, %v311_v54  ;;  %v825_v5 = vmul.f32 %v824_v3, %v311_v54  ;;  %v830_v11 = vmul.f32 %v818_v62, %v311_v54 }
 0x27d   : > { %v827_v13 = vrot.slane %v825_v5, 1  ;;  %v832_v15 = vrot.slane %v830_v11, 1 }
 0x27f   : > { %v829_v22 = vadd.f32 %v827_v13, %v823_v4  ;;  %v834_v28 = vadd.f32 %v832_v15, %v825_v5 }
 0x281   : > { %v835_v32 = vmul.f32 %v829_v22, %v14065_v29  ;;  %v840_v35 = vmul.f32 %v834_v28, %v14069_v30  ;;  %v853_v36 = vrot.slane %v829_v22, %v14102_v18  ;;  %v859_v37 = vrot.slane %v834_v28, %v14102_v18  ;;  %v13558_v30 = vld [vmem:[%s13661_s29 + $0x8] sm:$0xff] }
 0x283   : > { %v837_v40 = vrot.slane %v835_v32, 6  ;;  %v842_v41 = vrot.slane %v840_v35, 6  ;;  %v854_v43 = vsel %vm849_vm8, %v853_v36, 0.0  ;;  %v860_v44 = vsel %vm855_vm9, %v859_v37, 0.0 }
 0x284   : > { %v861_v47 = vadd.f32 %v860_v44, %v854_v43 }
 0x285   : > { %v839_v48 = vsub.f32 %v311_v54, %v837_v40 }
 0x286   : > { %11807 = vmatprep.subr.mxu1 %v861_v47 }
 0x287   : > { %v14118_v29 = vsub.f32 %v839_v48, %v842_v41  ;;  %11808 = vmatpush3.msra.mxu1 %v861_v47 }
 0x288   : > { %11810 = vmatmul.mubr.msk.f32.vlgmr.msra.gmra.mrb[0].mxu1 %vm312_vm0, %v13558_v30 }
 0x289   : > { %11812 = vmatprep.mubr.msk.f32.mxu1 %vm312_vm0, %v13559_v49 }
 0x28c   : > { %11813 = vmatmul.mubr.msk.f32.gmra.mrb[2].mxu1 %vm312_vm0, %v13683_v6  ;;  %v17165_v6 = vmov 0.0  }
 0x28d   : > { %11815 = vmatprep.mubr.msk.f32.mxu1 %vm312_vm0, %v13686_v7  ;;  %1187 = vst.msk [vmem:[#allocation2 + $0x7] sm:$0xff] %vm312_vm0, %v17165_v6  ;;  %1188 = vst.msk [vmem:[#allocation2 + $0xf] sm:$0xff] %vm312_vm0, %v17165_v6  ;;  %v10371_v7 = vld [vmem:[%s17158_s1 + $0x8] sm:$0xff] }
 0x28e   : > { %1192 = vst.msk [vmem:[#allocation2 + $0x227] sm:$0xff] %vm312_vm0, %v17165_v6  ;;  %1193 = vst.msk [vmem:[#allocation2 + $0x22f] sm:$0xff] %vm312_vm0, %v17165_v6  ;;  %11857 = vmatprep.subr.mxu1 %v10371_v7 }
 0x28f   : > { %1190 = vst.msk [vmem:[#allocation2 + $0x17] sm:$0x3] %vm1189_vm10, %v17165_v6  ;;  %1194 = vst.msk [vmem:[#allocation2 + $0x237] sm:$0x3] %vm1189_vm10, %v17165_v6  ;;  %11858 = vmatpush3.msra.mxu1 %v10371_v7 }
 0x290   : > { %11816 = vmatmul.mubr.msk.f32.gmra.mrb[4].mxu1 %vm312_vm0, %v13700_v14  ;;  %1197 = vst.msk [vmem:[#allocation2 + $0x27] sm:$0x1] %vm1196_vm11, %v17165_v6  ;;  %1198 = vst.msk [vmem:[#allocation2 + $0x47] sm:$0x1] %vm1196_vm11, %v17165_v6 }
 0x291   : > { %11818 = vmatprep.mubr.msk.f32.mxu1 %vm312_vm0, %v13713_v21  ;;  %1199 = vst.msk [vmem:[#allocation2 + $0x67] sm:$0x1] %vm1196_vm11, %v17165_v6  ;;  %1200 = vst.msk [vmem:[#allocation2 + $0x87] sm:$0x1] %vm1196_vm11, %v17165_v6 }
 0x292   : > { %1201 = vst.msk [vmem:[#allocation2 + $0xa7] sm:$0x1] %vm1196_vm11, %v17165_v6  ;;  %1202 = vst.msk [vmem:[#allocation2 + $0xc7] sm:$0x1] %vm1196_vm11, %v17165_v6 }
 0x293   : > { %1203 = vst.msk [vmem:[#allocation2 + $0xe7] sm:$0x1] %vm1196_vm11, %v17165_v6  ;;  %1204 = vst.msk [vmem:[#allocation2 + $0x107] sm:$0x1] %vm1196_vm11, %v17165_v6 }
 0x294   : > { %11819 = vmatmul.mubr.msk.f32.gmra.mrb[6].mxu1 %vm312_vm0, %v13721_v27  ;;  %1205 = vst.msk [vmem:[#allocation2 + $0x127] sm:$0x1] %vm1196_vm11, %v17165_v6  ;;  %1206 = vst.msk [vmem:[#allocation2 + $0x147] sm:$0x1] %vm1196_vm11, %v17165_v6  ;;  %v1294_v14 = vld [vmem:[#allocation2 + $0x8] sm:$0xff]  ;;  %v1293_v27 = vld [vmem:[%s17158_s1] sm:$0xff] }
 0x295   : > { %11821 = vmatprep.mubr.msk.f32.mxu1 %vm312_vm0, %v13733_v33  ;;  %1207 = vst.msk [vmem:[#allocation2 + $0x167] sm:$0x1] %vm1196_vm11, %v17165_v6  ;;  %1208 = vst.msk [vmem:[#allocation2 + $0x187] sm:$0x1] %vm1196_vm11, %v17165_v6  ;;  %11907 = vmatprep.subr.mxu1 %v1293_v27  ;;  %v14265_v33 = vsub.s32 2, %v14090_v56  ;;  %v1970_v12 = vld [vmem:[#allocation2 + $0x9] sm:$0xff] }
 0x296   : > { %1209 = vst.msk [vmem:[#allocation2 + $0x1a7] sm:$0x1] %vm1196_vm11, %v17165_v6  ;;  %1210 = vst.msk [vmem:[#allocation2 + $0x1c7] sm:$0x1] %vm1196_vm11, %v17165_v6  ;;  %v1295_v21 = vld [vmem:[#allocation2 + $0x10] sm:$0xff] }
 0x297   : > { %1211 = vst.msk [vmem:[#allocation2 + $0x1e7] sm:$0x1] %vm1196_vm11, %v17165_v6  ;;  %1212 = vst.msk [vmem:[#allocation2 + $0x207] sm:$0x1] %vm1196_vm11, %v17165_v6  ;;  %v1971_v18 = vld [vmem:[#allocation2 + $0x11] sm:$0xff] }
 0x298   : > { %11822 = vmatmul.mubr.msk.f32.gmra.mrb[8].mxu1 %vm312_vm0, %v13741_v39  ;;  %1213 = vst.msk [vmem:[#allocation2 + $0x38] sm:$0x1] %vm1196_vm11, %v17165_v6  ;;  %1214 = vst.msk [vmem:[#allocation2 + $0x58] sm:$0x1] %vm1196_vm11, %v17165_v6  ;;  %v14269_v39 = vrot.slane %v14118_v29, %v14265_v33 }
 0x299   : > { %11824 = vmatprep.mubr.msk.f32.mxu1 %vm312_vm0, %v13753_v45  ;;  %1215 = vst.msk [vmem:[#allocation2 + $0x78] sm:$0x1] %vm1196_vm11, %v17165_v6  ;;  %1216 = vst.msk [vmem:[#allocation2 + $0x98] sm:$0x1] %vm1196_vm11, %v17165_v6 }
 0x29a   : > { %1217 = vst.msk [vmem:[#allocation2 + $0xb8] sm:$0x1] %vm1196_vm11, %v17165_v6  ;;  %1218 = vst.msk [vmem:[#allocation2 + $0xd8] sm:$0x1] %vm1196_vm11, %v17165_v6 }
 0x29b   : > { %1219 = vst.msk [vmem:[#allocation2 + $0xf8] sm:$0x1] %vm1196_vm11, %v17165_v6  ;;  %1220 = vst.msk [vmem:[#allocation2 + $0x118] sm:$0x1] %vm1196_vm11, %v17165_v6 }
 0x29c   : > { %11825 = vmatmul.mubr.msk.f32.gmra.mrb[10].mxu1 %vm312_vm0, %v13761_v51  ;;  %1221 = vst.msk [vmem:[#allocation2 + $0x138] sm:$0x1] %vm1196_vm11, %v17165_v6  ;;  %1222 = vst.msk [vmem:[#allocation2 + $0x158] sm:$0x1] %vm1196_vm11, %v17165_v6 }
 0x29d   : > { %11827 = vmatprep.mubr.msk.f32.mxu1 %vm312_vm0, %v13773_v57  ;;  %1223 = vst.msk [vmem:[#allocation2 + $0x178] sm:$0x1] %vm1196_vm11, %v17165_v6  ;;  %1224 = vst.msk [vmem:[#allocation2 + $0x198] sm:$0x1] %vm1196_vm11, %v17165_v6 }
 0x29e   : > { %1225 = vst.msk [vmem:[#allocation2 + $0x1b8] sm:$0x1] %vm1196_vm11, %v17165_v6  ;;  %1226 = vst.msk [vmem:[#allocation2 + $0x1d8] sm:$0x1] %vm1196_vm11, %v17165_v6 }
 0x29f   : > { %1227 = vst.msk [vmem:[#allocation2 + $0x1f8] sm:$0x1] %vm1196_vm11, %v17165_v6  ;;  %1228 = vst.msk [vmem:[#allocation2 + $0x218] sm:$0x1] %vm1196_vm11, %v17165_v6 }
 0x2a0   : > { %11828 = vmatmul.mubr.msk.f32.gmra.mrb[12].mxu1 %vm312_vm0, %v13781_v63  ;;  %17296 = vst [vmem:[#allocation8_spill] sm:$0xff] %v14265_v33 }
 0x2a1   : > { %11830 = vmatprep.mubr.msk.f32.mxu1 %vm312_vm0, %v13793_v10 }
 0x2a4   : > { %11831 = vmatmul.mubr.msk.f32.gmra.mrb[14].mxu1 %vm312_vm0, %v13801_v17 }
 0x2a5   : > { %11833 = vmatprep.mubr.msk.f32.mxu1 %vm312_vm0, %v13813_v24 }
 0x2a8   : > { %11834 = vmatmul.mubr.msk.f32.gmra.mrb[16].mxu1 %vm312_vm0, %v13821_v31 }
 0x2a9   : > { %11836 = vmatprep.mubr.msk.f32.mxu1 %vm312_vm0, %v13833_v38 }
 0x2ac   : > { %11837 = vmatmul.mubr.msk.f32.gmra.mrb[18].mxu1 %vm312_vm0, %v13841_v46 }
 0x2ad   : > { %11839 = vmatprep.mubr.msk.f32.mxu1 %vm312_vm0, %v13853_v53 }
 0x2b0   : > { %11840 = vmatmul.mubr.msk.f32.gmra.mrb[20].mxu1 %vm312_vm0, %v13861_v60  ;;  %v14280_v60 = vld [vmem:[%s17158_s1 + $0x10] sm:$0xff] }
 0x2b1   : > { %11842 = vmatprep.mubr.msk.f32.mxu1 %vm312_vm0, %v13873_v8 }
 0x2b4   : > { %11843 = vmatmul.mubr.msk.f32.gmra.mrb[22].mxu1 %vm312_vm0, %v13881_v16 }
 0x2b5   : > { %11845 = vmatprep.mubr.msk.f32.mxu1 %vm312_vm0, %v13893_v25 }
 0x2b8   : > { %11846 = vmatmul.mubr.msk.f32.gmra.mrb[24].mxu1 %vm312_vm0, %v13901_v34 }
 0x2b9   : > { %11848 = vmatprep.mubr.msk.f32.mxu1 %vm312_vm0, %v13913_v42 }
 0x2bc   : > { %11849 = vmatmul.mubr.msk.f32.gmra.mrb[26].mxu1 %vm312_vm0, %v13921_v50 }
 0x2bd   : > { %11851 = vmatprep.mubr.msk.f32.mxu1 %vm312_vm0, %v13933_v59 }
 0x2c0   : > { %11852 = vmatmul.mubr.msk.f32.gmra.mrb[28].mxu1 %vm312_vm0, %v13941_v9 }
 0x2c1   : > { %11854 = vmatprep.mubr.msk.f32.mxu1 %vm312_vm0, %v13953_v19 }
 0x2c4   : > { %11855 = vmatmul.mubr.msk.f32.gmra.mrb[30].mxu1 %vm312_vm0, %v13961_v26 }
 0x2c5   : > { %11859 = vmatprep.mubr.msk.f32.mxu1 %vm312_vm0, %v1294_v14 }
 0x2c8   : > { %11860 = vmatmul.mubr.msk.f32.vlgmr.msra.gmra.mrb[32].mxu1 %vm312_vm0, %v1295_v21 }
 0x2c9   : > { %11908 = vmatpush3.msra.mxu1 %v1293_v27 }
 0x2ca   : > { %11957 = vmatprep.subr.mxu1 %v14280_v60 }
 0x35b   : > { %v11811_v45 = vpop.f32.mrb[0].mxu1 }
 0x35c   : > { %v1002_v51 = vadd.f32 %v11811_v45, %v14269_v39  ;;  %v996_v57 = vpop.f32.mrb[1].mxu1 }
 0x35d   : > { %v997_v63 = vadd.f32 %v996_v57, %v14269_v39 }
 0x35e   : > { %v1156_v10 = vmax.f32 %v1002_v51, 0.0 }
 0x35f   : > { %v1155_v17 = vmax.f32 %v997_v63, 0.0  ;;  %v11814_v24 = vpop.f32.mrb[2].mxu1 }
 0x360   : > { %1230 = vst.msk [vmem:[#allocation2 + $0x30] sm:$0xff] %vm312_vm0, %v1156_v10  ;;  %v1012_v31 = vadd.f32 %v11814_v24, %v14269_v39  ;;  %v1006_v38 = vpop.f32.mrb[3].mxu1 }
 0x361   : > { %1229 = vst.msk [vmem:[#allocation2 + $0x28] sm:$0xff] %vm312_vm0, %v1155_v17  ;;  %v1007_v46 = vadd.f32 %v1006_v38, %v14269_v39 }
 0x362   : > { %v1158_v53 = vmax.f32 %v1012_v31, 0.0 }
 0x363   : > { %v1157_v8 = vmax.f32 %v1007_v46, 0.0  ;;  %v11817_v16 = vpop.f32.mrb[4].mxu1 }
 0x364   : > { %1232 = vst.msk [vmem:[#allocation2 + $0x50] sm:$0xff] %vm312_vm0, %v1158_v53  ;;  %v1022_v25 = vadd.f32 %v11817_v16, %v14269_v39  ;;  %v1016_v34 = vpop.f32.mrb[5].mxu1 }
 0x365   : > { %1231 = vst.msk [vmem:[#allocation2 + $0x48] sm:$0xff] %vm312_vm0, %v1157_v8  ;;  %v1017_v42 = vadd.f32 %v1016_v34, %v14269_v39 }
 0x366   : > { %v1160_v50 = vmax.f32 %v1022_v25, 0.0 }
 0x367   : > { %v1159_v59 = vmax.f32 %v1017_v42, 0.0  ;;  %v11820_v9 = vpop.f32.mrb[6].mxu1  ;;  %v14295_v0 = vld [vmem:[#allocation2 + $0x30] sm:$0xff] }
 0x368   : > { %1234 = vst.msk [vmem:[#allocation2 + $0x70] sm:$0xff] %vm312_vm0, %v1160_v50  ;;  %v1032_v19 = vadd.f32 %v11820_v9, %v14269_v39  ;;  %v1026_v26 = vpop.f32.mrb[7].mxu1  ;;  %v14289_v23 = vld [vmem:[#allocation2 + $0x28] sm:$0xff] }
 0x369   : > { %1233 = vst.msk [vmem:[#allocation2 + $0x68] sm:$0xff] %vm312_vm0, %v1159_v59  ;;  %v1027_v52 = vadd.f32 %v1026_v26, %v14269_v39  ;;  %11862 = vmatprep.mubr.msk.f32.mxu1 %vm312_vm0, %v14289_v23 }
 0x36a   : > { %v1162_v54 = vmax.f32 %v1032_v19, 0.0  ;;  %11863 = vmatmul.mubr.msk.f32.gmra.mrb[34].mxu1 %vm312_vm0, %v14295_v0 }
 0x36b   : > { %v1161_v1 = vmax.f32 %v1027_v52, 0.0  ;;  %v11823_v55 = vpop.f32.mrb[8].mxu1  ;;  %v14307_v3 = vld [vmem:[#allocation2 + $0x50] sm:$0xff] }
 0x36c   : > { %1236 = vst.msk [vmem:[#allocation2 + $0x90] sm:$0xff] %vm312_vm0, %v1162_v54  ;;  %v1042_v58 = vadd.f32 %v11823_v55, %v14269_v39  ;;  %v1036_v2 = vpop.f32.mrb[9].mxu1  ;;  %v14301_v61 = vld [vmem:[#allocation2 + $0x48] sm:$0xff] }
 0x36d   : > { %1235 = vst.msk [vmem:[#allocation2 + $0x88] sm:$0xff] %vm312_vm0, %v1161_v1  ;;  %v1037_v62 = vadd.f32 %v1036_v2, %v14269_v39  ;;  %11865 = vmatprep.mubr.msk.f32.mxu1 %vm312_vm0, %v14301_v61 }
 0x36e   : > { %v1164_v4 = vmax.f32 %v1042_v58, 0.0  ;;  %11866 = vmatmul.mubr.msk.f32.gmra.mrb[36].mxu1 %vm312_vm0, %v14307_v3 }
 0x36f   : > { %v1163_v5 = vmax.f32 %v1037_v62, 0.0  ;;  %v11826_v11 = vpop.f32.mrb[10].mxu1  ;;  %v14319_v32 = vld [vmem:[#allocation2 + $0x70] sm:$0xff] }
 0x370   : > { %1238 = vst.msk [vmem:[#allocation2 + $0xb0] sm:$0xff] %vm312_vm0, %v1164_v4  ;;  %v1052_v13 = vadd.f32 %v11826_v11, %v14269_v39  ;;  %v1046_v15 = vpop.f32.mrb[11].mxu1  ;;  %v14313_v22 = vld [vmem:[#allocation2 + $0x68] sm:$0xff] }
 0x371   : > { %1237 = vst.msk [vmem:[#allocation2 + $0xa8] sm:$0xff] %vm312_vm0, %v1163_v5  ;;  %v1047_v28 = vadd.f32 %v1046_v15, %v14269_v39  ;;  %11868 = vmatprep.mubr.msk.f32.mxu1 %vm312_vm0, %v14313_v22 }
 0x372   : > { %v1166_v35 = vmax.f32 %v1052_v13, 0.0  ;;  %11869 = vmatmul.mubr.msk.f32.gmra.mrb[38].mxu1 %vm312_vm0, %v14319_v32 }
 0x373   : > { %v1165_v36 = vmax.f32 %v1047_v28, 0.0  ;;  %v11829_v37 = vpop.f32.mrb[12].mxu1  ;;  %v14331_v47 = vld [vmem:[#allocation2 + $0x90] sm:$0xff] }
 0x374   : > { %1240 = vst.msk [vmem:[#allocation2 + $0xd0] sm:$0xff] %vm312_vm0, %v1166_v35  ;;  %v1062_v40 = vadd.f32 %v11829_v37, %v14269_v39  ;;  %v1056_v41 = vpop.f32.mrb[13].mxu1  ;;  %v14325_v43 = vld [vmem:[#allocation2 + $0x88] sm:$0xff] }
 0x375   : > { %1239 = vst.msk [vmem:[#allocation2 + $0xc8] sm:$0xff] %vm312_vm0, %v1165_v36  ;;  %v1057_v44 = vadd.f32 %v1056_v41, %v14269_v39  ;;  %11871 = vmatprep.mubr.msk.f32.mxu1 %vm312_vm0, %v14325_v43 }
 0x376   : > { %v1168_v48 = vmax.f32 %v1062_v40, 0.0  ;;  %11872 = vmatmul.mubr.msk.f32.gmra.mrb[40].mxu1 %vm312_vm0, %v14331_v47 }
 0x377   : > { %v1167_v29 = vmax.f32 %v1057_v44, 0.0  ;;  %v11832_v30 = vpop.f32.mrb[14].mxu1  ;;  %v14343_v27 = vld [vmem:[#allocation2 + $0xb0] sm:$0xff] }
 0x378   : > { %1242 = vst.msk [vmem:[#allocation2 + $0xf0] sm:$0xff] %vm312_vm0, %v1168_v48  ;;  %v1072_v49 = vadd.f32 %v11832_v30, %v14269_v39  ;;  %v1066_v7 = vpop.f32.mrb[15].mxu1  ;;  %v14337_v14 = vld [vmem:[#allocation2 + $0xa8] sm:$0xff] }
 0x379   : > { %1241 = vst.msk [vmem:[#allocation2 + $0xe8] sm:$0xff] %vm312_vm0, %v1167_v29  ;;  %v1067_v21 = vadd.f32 %v1066_v7, %v14269_v39  ;;  %11874 = vmatprep.mubr.msk.f32.mxu1 %vm312_vm0, %v14337_v14 }
 0x37a   : > { %v1170_v45 = vmax.f32 %v1072_v49, 0.0  ;;  %11875 = vmatmul.mubr.msk.f32.gmra.mrb[42].mxu1 %vm312_vm0, %v14343_v27 }
 0x37b   : > { %v1169_v51 = vmax.f32 %v1067_v21, 0.0  ;;  %v11835_v57 = vpop.f32.mrb[16].mxu1  ;;  %v14355_v31 = vld [vmem:[#allocation2 + $0xd0] sm:$0xff] }
 0x37c   : > { %1244 = vst.msk [vmem:[#allocation2 + $0x110] sm:$0xff] %vm312_vm0, %v1170_v45  ;;  %v1082_v63 = vadd.f32 %v11835_v57, %v14269_v39  ;;  %v1076_v10 = vpop.f32.mrb[17].mxu1  ;;  %v14349_v17 = vld [vmem:[#allocation2 + $0xc8] sm:$0xff] }
 0x37d   : > { %1243 = vst.msk [vmem:[#allocation2 + $0x108] sm:$0xff] %vm312_vm0, %v1169_v51  ;;  %v1077_v24 = vadd.f32 %v1076_v10, %v14269_v39  ;;  %11877 = vmatprep.mubr.msk.f32.mxu1 %vm312_vm0, %v14349_v17 }
 0x37e   : > { %v1172_v38 = vmax.f32 %v1082_v63, 0.0  ;;  %11878 = vmatmul.mubr.msk.f32.gmra.mrb[44].mxu1 %vm312_vm0, %v14355_v31 }
 0x37f   : > { %v1171_v46 = vmax.f32 %v1077_v24, 0.0  ;;  %v11838_v53 = vpop.f32.mrb[18].mxu1  ;;  %v14367_v42 = vld [vmem:[#allocation2 + $0xf0] sm:$0xff] }
 0x380   : > { %1246 = vst.msk [vmem:[#allocation2 + $0x130] sm:$0xff] %vm312_vm0, %v1172_v38  ;;  %v1092_v8 = vadd.f32 %v11838_v53, %v14269_v39  ;;  %v1086_v16 = vpop.f32.mrb[19].mxu1  ;;  %v14361_v25 = vld [vmem:[#allocation2 + $0xe8] sm:$0xff] }
 0x381   : > { %1245 = vst.msk [vmem:[#allocation2 + $0x128] sm:$0xff] %vm312_vm0, %v1171_v46  ;;  %v1087_v34 = vadd.f32 %v1086_v16, %v14269_v39  ;;  %11880 = vmatprep.mubr.msk.f32.mxu1 %vm312_vm0, %v14361_v25 }
 0x382   : > { %v1174_v50 = vmax.f32 %v1092_v8, 0.0  ;;  %11881 = vmatmul.mubr.msk.f32.gmra.mrb[46].mxu1 %vm312_vm0, %v14367_v42 }
 0x383   : > { %v1173_v59 = vmax.f32 %v1087_v34, 0.0  ;;  %v11841_v9 = vpop.f32.mrb[20].mxu1  ;;  %v14379_v1 = vld [vmem:[#allocation2 + $0x110] sm:$0xff] }
 0x384   : > { %1248 = vst.msk [vmem:[#allocation2 + $0x150] sm:$0xff] %vm312_vm0, %v1174_v50  ;;  %v1102_v19 = vadd.f32 %v11841_v9, %v14269_v39  ;;  %v1096_v26 = vpop.f32.mrb[21].mxu1  ;;  %v14373_v52 = vld [vmem:[#allocation2 + $0x108] sm:$0xff] }
 0x385   : > { %1247 = vst.msk [vmem:[#allocation2 + $0x148] sm:$0xff] %vm312_vm0, %v1173_v59  ;;  %v1097_v54 = vadd.f32 %v1096_v26, %v14269_v39  ;;  %11883 = vmatprep.mubr.msk.f32.mxu1 %vm312_vm0, %v14373_v52 }
 0x386   : > { %v1176_v55 = vmax.f32 %v1102_v19, 0.0  ;;  %11884 = vmatmul.mubr.msk.f32.gmra.mrb[48].mxu1 %vm312_vm0, %v14379_v1 }
 0x387   : > { %v1175_v58 = vmax.f32 %v1097_v54, 0.0  ;;  %v11844_v2 = vpop.f32.mrb[22].mxu1  ;;  %v14391_v13 = vld [vmem:[#allocation2 + $0x130] sm:$0xff] }
 0x388   : > { %1250 = vst.msk [vmem:[#allocation2 + $0x170] sm:$0xff] %vm312_vm0, %v1176_v55  ;;  %v1112_v62 = vadd.f32 %v11844_v2, %v14269_v39  ;;  %v1106_v4 = vpop.f32.mrb[23].mxu1  ;;  %v14385_v5 = vld [vmem:[#allocation2 + $0x128] sm:$0xff] }
 0x389   : > { %1249 = vst.msk [vmem:[#allocation2 + $0x168] sm:$0xff] %vm312_vm0, %v1175_v58  ;;  %v1107_v11 = vadd.f32 %v1106_v4, %v14269_v39  ;;  %11886 = vmatprep.mubr.msk.f32.mxu1 %vm312_vm0, %v14385_v5  ;;  %v1261_v4 = vld [vmem:[#allocation2 + $0x7] sm:$0xff] }
 0x38a   : > { %v1178_v15 = vmax.f32 %v1112_v62, 0.0  ;;  %11887 = vmatmul.mubr.msk.f32.gmra.mrb[50].mxu1 %vm312_vm0, %v14391_v13 }
 0x38b   : > { %v1177_v28 = vmax.f32 %v1107_v11, 0.0  ;;  %v11847_v35 = vpop.f32.mrb[24].mxu1  ;;  %v14403_v44 = vld [vmem:[#allocation2 + $0x150] sm:$0xff] }
 0x38c   : > { %1252 = vst.msk [vmem:[#allocation2 + $0x190] sm:$0xff] %vm312_vm0, %v1178_v15  ;;  %v1122_v36 = vadd.f32 %v11847_v35, %v14269_v39  ;;  %v1116_v37 = vpop.f32.mrb[25].mxu1  ;;  %v14397_v40 = vld [vmem:[#allocation2 + $0x148] sm:$0xff] }
 0x38d   : > { %1251 = vst.msk [vmem:[#allocation2 + $0x188] sm:$0xff] %vm312_vm0, %v1177_v28  ;;  %v1117_v41 = vadd.f32 %v1116_v37, %v14269_v39  ;;  %11889 = vmatprep.mubr.msk.f32.mxu1 %vm312_vm0, %v14397_v40  ;;  %v1262_v15 = vld [vmem:[#allocation2 + $0xf] sm:$0xff]  ;;  %v14465_v28 = vld [vmem:[%s17158_s1 + $0x18] sm:$0xff]  ;;  %v14468_v35 = vld [vmem:[#allocation2 + $0x27] sm:$0xff] }
 0x38e   : > { %v1180_v48 = vmax.f32 %v1122_v36, 0.0  ;;  %11890 = vmatmul.mubr.msk.f32.gmra.mrb[52].mxu1 %vm312_vm0, %v14403_v44  ;;  %v14474_v36 = vld [vmem:[#allocation2 + $0x2f] sm:$0xff]  ;;  %v14478_v37 = vld [vmem:[#allocation2 + $0x47] sm:$0xff] }
 0x38f   : > { %v1179_v29 = vmax.f32 %v1117_v41, 0.0  ;;  %v11850_v30 = vpop.f32.mrb[26].mxu1  ;;  %v14415_v51 = vld [vmem:[#allocation2 + $0x170] sm:$0xff] }
 0x390   : > { %1254 = vst.msk [vmem:[#allocation2 + $0x1b0] sm:$0xff] %vm312_vm0, %v1180_v48  ;;  %v1132_v49 = vadd.f32 %v11850_v30, %v14269_v39  ;;  %v1126_v7 = vpop.f32.mrb[27].mxu1  ;;  %v14409_v21 = vld [vmem:[#allocation2 + $0x168] sm:$0xff] }
 0x391   : > { %1253 = vst.msk [vmem:[#allocation2 + $0x1a8] sm:$0xff] %vm312_vm0, %v1179_v29  ;;  %v1127_v45 = vadd.f32 %v1126_v7, %v14269_v39  ;;  %11892 = vmatprep.mubr.msk.f32.mxu1 %vm312_vm0, %v14409_v21  ;;  %v14482_v41 = vld [vmem:[#allocation2 + $0x4f] sm:$0xff]  ;;  %v14486_v48 = vld [vmem:[#allocation2 + $0x67] sm:$0xff] }
 0x392   : > { %v1182_v57 = vmax.f32 %v1132_v49, 0.0  ;;  %11893 = vmatmul.mubr.msk.f32.gmra.mrb[54].mxu1 %vm312_vm0, %v14415_v51  ;;  %v14494_v29 = vld [vmem:[#allocation2 + $0x87] sm:$0xff]  ;;  %v14498_v30 = vld [vmem:[#allocation2 + $0x8f] sm:$0xff] }
 0x393   : > { %v1181_v63 = vmax.f32 %v1127_v45, 0.0  ;;  %v11853_v10 = vpop.f32.mrb[28].mxu1  ;;  %v14427_v8 = vld [vmem:[#allocation2 + $0x190] sm:$0xff]  ;;  %v14502_v49 = vld [vmem:[#allocation2 + $0xa7] sm:$0xff] }
 0x394   : > { %1256 = vst.msk [vmem:[#allocation2 + $0x1d0] sm:$0xff] %vm312_vm0, %v1182_v57  ;;  %v1142_v24 = vadd.f32 %v11853_v10, %v14269_v39  ;;  %v1136_v38 = vpop.f32.mrb[29].mxu1  ;;  %v14421_v46 = vld [vmem:[#allocation2 + $0x188] sm:$0xff] }
 0x395   : > { %1255 = vst.msk [vmem:[#allocation2 + $0x1c8] sm:$0xff] %vm312_vm0, %v1181_v63  ;;  %v1137_v53 = vadd.f32 %v1136_v38, %v14269_v39  ;;  %11895 = vmatprep.mubr.msk.f32.mxu1 %vm312_vm0, %v14421_v46  ;;  %v14506_v7 = vld [vmem:[#allocation2 + $0xaf] sm:$0xff]  ;;  %v14510_v45 = vld [vmem:[#allocation2 + $0xc7] sm:$0xff] }
 0x396   : > { %v1184_v16 = vmax.f32 %v1142_v24, 0.0  ;;  %11896 = vmatmul.mubr.msk.f32.gmra.mrb[56].mxu1 %vm312_vm0, %v14427_v8  ;;  %v14514_v57 = vld [vmem:[#allocation2 + $0xcf] sm:$0xff]  ;;  %v14518_v63 = vld [vmem:[#allocation2 + $0xe7] sm:$0xff] }
 0x397   : > { %v1183_v34 = vmax.f32 %v1137_v53, 0.0  ;;  %v11856_v50 = vpop.f32.mrb[30].mxu1  ;;  %v14439_v54 = vld [vmem:[#allocation2 + $0x1b0] sm:$0xff]  ;;  %v14526_v24 = vld [vmem:[#allocation2 + $0x107] sm:$0xff] }
 0x398   : > { %1258 = vst.msk [vmem:[#allocation2 + $0x1f0] sm:$0xff] %vm312_vm0, %v1184_v16  ;;  %v1152_v59 = vadd.f32 %v11856_v50, %v14269_v39  ;;  %v1146_v9 = vpop.f32.mrb[31].mxu1  ;;  %v14433_v19 = vld [vmem:[#allocation2 + $0x1a8] sm:$0xff] }
 0x399   : > { %1257 = vst.msk [vmem:[#allocation2 + $0x1e8] sm:$0xff] %vm312_vm0, %v1183_v34  ;;  %v1147_v26 = vadd.f32 %v1146_v9, %v14269_v39  ;;  %11898 = vmatprep.mubr.msk.f32.mxu1 %vm312_vm0, %v14433_v19  ;;  %v14522_v10 = vld [vmem:[#allocation2 + $0xef] sm:$0xff]  ;;  %v14534_v53 = vld [vmem:[#allocation2 + $0x127] sm:$0xff] }
 0x39a   : > { %v1186_v55 = vmax.f32 %v1152_v59, 0.0  ;;  %11899 = vmatmul.mubr.msk.f32.gmra.mrb[58].mxu1 %vm312_vm0, %v14439_v54  ;;  %v14530_v38 = vld [vmem:[#allocation2 + $0x10f] sm:$0xff]  ;;  %v14542_v34 = vld [vmem:[#allocation2 + $0x147] sm:$0xff] }
 0x39b   : > { %v1185_v58 = vmax.f32 %v1147_v26, 0.0  ;;  %v14449_v39 = vld [vmem:[#allocation2 + $0x1d0] sm:$0xff]  ;;  %v14550_v59 = vld [vmem:[#allocation2 + $0x167] sm:$0xff] }
 0x39c   : > { %1260 = vst.msk [vmem:[#allocation2 + $0x210] sm:$0xff] %vm312_vm0, %v1186_v55  ;;  %v14444_v2 = vld [vmem:[#allocation2 + $0x1c8] sm:$0xff] }
 0x39d   : > { %1259 = vst.msk [vmem:[#allocation2 + $0x208] sm:$0xff] %vm312_vm0, %v1185_v58  ;;  %11901 = vmatprep.mubr.msk.f32.mxu1 %vm312_vm0, %v14444_v2  ;;  %v14538_v16 = vld [vmem:[#allocation2 + $0x12f] sm:$0xff]  ;;  %v14558_v26 = vld [vmem:[#allocation2 + $0x187] sm:$0xff] }
 0x39e   : > { %11902 = vmatmul.mubr.msk.f32.gmra.mrb[60].mxu1 %vm312_vm0, %v14449_v39  ;;  %v14546_v50 = vld [vmem:[#allocation2 + $0x14f] sm:$0xff]  ;;  %v14566_v58 = vld [vmem:[#allocation2 + $0x1a7] sm:$0xff] }
 0x39f   : > { %v14457_v11 = vld [vmem:[#allocation2 + $0x1f0] sm:$0xff] }
 0x3a0   : > { %v14453_v62 = vld [vmem:[#allocation2 + $0x1e8] sm:$0xff]  ;;  %17298 = vst [vmem:[#allocation10_spill] sm:$0xff] %v14457_v11 }
 0x3a1   : > { %17297 = vst [vmem:[#allocation9_spill] sm:$0xff] %v14453_v62  ;;  %11904 = vmatprep.mubr.msk.f32.mxu1 %vm312_vm0, %v14453_v62  ;;  %v14554_v9 = vld [vmem:[#allocation2 + $0x16f] sm:$0xff]  ;;  %v14582_v33 = vld [vmem:[#allocation2 + $0x1e7] sm:$0xff] }
 0x3a2   : > { %11905 = vmatmul.mubr.msk.f32.gmra.mrb[62].mxu1 %vm312_vm0, %v14457_v11  ;;  %v14562_v55 = vld [vmem:[#allocation2 + $0x18f] sm:$0xff] }
 0x3a3   : > { %11909 = vmatprep.mubr.msk.f32.mxu1 %vm312_vm0, %v1261_v4  ;;  %v14570_v4 = vld [vmem:[#allocation2 + $0x1af] sm:$0xff] }
 0x3a4   : > { %v14578_v6 = vld [vmem:[#allocation2 + $0x1cf] sm:$0xff] }
 0x3a5   : > { %v14586_v56 = vld [vmem:[#allocation2 + $0x1ef] sm:$0xff] }
 0x3a6   : > { %11910 = vmatmul.mubr.msk.f32.vlgmr.msra.gmra.mrb[32].mxu1 %vm312_vm0, %v1262_v15  ;;  %v14574_v15 = vld [vmem:[#allocation2 + $0x1c7] sm:$0xff]  ;;  %v14603_v62 = vld [vmem:[#allocation2 + $0x31] sm:$0xff] }
 0x3a7   : > { %11912 = vmatprep.mubr.msk.f32.mxu1 %vm312_vm0, %v14468_v35  ;;  %11958 = vmatpush3.msra.mxu1 %v14280_v60  ;;  %v14490_v60 = vld [vmem:[#allocation2 + $0x6f] sm:$0xff]  ;;  %17300 = vst [vmem:[#allocation12_spill] sm:$0xff] %v14603_v62 }
 0x3a8   : > { %12007 = vmatprep.subr.mxu1 %v14465_v28  ;;  %v14597_v11 = vld [vmem:[#allocation2 + $0x29] sm:$0xff] }
 0x3a9   : > { %17299 = vst [vmem:[#allocation11_spill] sm:$0xff] %v14597_v11 }
 0x3aa   : > { %11913 = vmatmul.mubr.msk.f32.gmra.mrb[34].mxu1 %vm312_vm0, %v14474_v36 }
 0x3ab   : > { %11915 = vmatprep.mubr.msk.f32.mxu1 %vm312_vm0, %v14478_v37 }
 0x3ae   : > { %11916 = vmatmul.mubr.msk.f32.gmra.mrb[36].mxu1 %vm312_vm0, %v14482_v41 }
 0x3af   : > { %11918 = vmatprep.mubr.msk.f32.mxu1 %vm312_vm0, %v14486_v48 }
 0x3b2   : > { %11919 = vmatmul.mubr.msk.f32.gmra.mrb[38].mxu1 %vm312_vm0, %v14490_v60 }
 0x3b3   : > { %11921 = vmatprep.mubr.msk.f32.mxu1 %vm312_vm0, %v14494_v29 }
 0x3b6   : > { %11922 = vmatmul.mubr.msk.f32.gmra.mrb[40].mxu1 %vm312_vm0, %v14498_v30 }
 0x3b7   : > { %11924 = vmatprep.mubr.msk.f32.mxu1 %vm312_vm0, %v14502_v49 }
 0x3ba   : > { %11925 = vmatmul.mubr.msk.f32.gmra.mrb[42].mxu1 %vm312_vm0, %v14506_v7 }
 0x3bb   : > { %11927 = vmatprep.mubr.msk.f32.mxu1 %vm312_vm0, %v14510_v45 }
 0x3be   : > { %11928 = vmatmul.mubr.msk.f32.gmra.mrb[44].mxu1 %vm312_vm0, %v14514_v57 }
 0x3bf   : > { %11930 = vmatprep.mubr.msk.f32.mxu1 %vm312_vm0, %v14518_v63 }
 0x3c2   : > { %11931 = vmatmul.mubr.msk.f32.gmra.mrb[46].mxu1 %vm312_vm0, %v14522_v10 }
 0x3c3   : > { %11933 = vmatprep.mubr.msk.f32.mxu1 %vm312_vm0, %v14526_v24 }
 0x3c6   : > { %11934 = vmatmul.mubr.msk.f32.gmra.mrb[48].mxu1 %vm312_vm0, %v14530_v38 }
 0x3c7   : > { %11936 = vmatprep.mubr.msk.f32.mxu1 %vm312_vm0, %v14534_v53 }
 0x3ca   : > { %11937 = vmatmul.mubr.msk.f32.gmra.mrb[50].mxu1 %vm312_vm0, %v14538_v16 }
 0x3cb   : > { %11939 = vmatprep.mubr.msk.f32.mxu1 %vm312_vm0, %v14542_v34 }
 0x3ce   : > { %11940 = vmatmul.mubr.msk.f32.gmra.mrb[52].mxu1 %vm312_vm0, %v14546_v50 }
 0x3cf   : > { %11942 = vmatprep.mubr.msk.f32.mxu1 %vm312_vm0, %v14550_v59 }
 0x3d2   : > { %11943 = vmatmul.mubr.msk.f32.gmra.mrb[54].mxu1 %vm312_vm0, %v14554_v9 }
 0x3d3   : > { %11945 = vmatprep.mubr.msk.f32.mxu1 %vm312_vm0, %v14558_v26 }
 0x3d6   : > { %11946 = vmatmul.mubr.msk.f32.gmra.mrb[56].mxu1 %vm312_vm0, %v14562_v55 }
 0x3d7   : > { %11948 = vmatprep.mubr.msk.f32.mxu1 %vm312_vm0, %v14566_v58 }
 0x3da   : > { %11949 = vmatmul.mubr.msk.f32.gmra.mrb[58].mxu1 %vm312_vm0, %v14570_v4 }
 0x3db   : > { %11951 = vmatprep.mubr.msk.f32.mxu1 %vm312_vm0, %v14574_v15 }
 0x3de   : > { %11952 = vmatmul.mubr.msk.f32.gmra.mrb[60].mxu1 %vm312_vm0, %v14578_v6 }
 0x3df   : > { %11954 = vmatprep.mubr.msk.f32.mxu1 %vm312_vm0, %v14582_v33 }
 0x3e2   : > { %11955 = vmatmul.mubr.msk.f32.gmra.mrb[62].mxu1 %vm312_vm0, %v14586_v56 }
 0x3e3   : > { %11959 = vmatprep.mubr.msk.f32.mxu1 %vm312_vm0, %v1970_v12  ;;  %v14607_v12 = vld [vmem:[#allocation2 + $0x49] sm:$0xff] }
 0x3e4   : > { %17301 = vst [vmem:[#allocation13_spill] sm:$0xff] %v14607_v12 }
 0x3e6   : > { %11960 = vmatmul.mubr.msk.f32.vlgmr.msra.gmra.mrb[32].mxu1 %vm312_vm0, %v1971_v18  ;;  %v14611_v18 = vld [vmem:[#allocation2 + $0x51] sm:$0xff] }
 0x3e7   : > { %11962 = vmatprep.mubr.msk.f32.mxu1 %vm312_vm0, %v14597_v11  ;;  %12008 = vmatpush3.msra.mxu1 %v14465_v28  ;;  %17302 = vst [vmem:[#allocation14_spill] sm:$0xff] %v14611_v18  ;;  %v14615_v11 = vld [vmem:[#allocation2 + $0x69] sm:$0xff]  ;;  %v14619_v28 = vld [vmem:[#allocation2 + $0x71] sm:$0xff] }
 0x3e8   : > { %12057 = vmatprep.subr.mxu1 %v14594_v20  ;;  %17303 = vst [vmem:[#allocation15_spill] sm:$0xff] %v14615_v11  ;;  %17304 = vst [vmem:[#allocation16_spill] sm:$0xff] %v14619_v28 }
 0x3ea   : > { %11963 = vmatmul.mubr.msk.f32.gmra.mrb[34].mxu1 %vm312_vm0, %v14603_v62  ;;  %v14623_v62 = vld [vmem:[#allocation2 + $0x89] sm:$0xff] }
 0x3eb   : > { %11965 = vmatprep.mubr.msk.f32.mxu1 %vm312_vm0, %v14607_v12  ;;  %17305 = vst [vmem:[#allocation17_spill] sm:$0xff] %v14623_v62  ;;  %v14627_v12 = vld [vmem:[#allocation2 + $0x91] sm:$0xff] }
 0x3ec   : > { %17306 = vst [vmem:[#allocation18_spill] sm:$0xff] %v14627_v12 }
 0x3ee   : > { %11966 = vmatmul.mubr.msk.f32.gmra.mrb[36].mxu1 %vm312_vm0, %v14611_v18  ;;  %v14631_v18 = vld [vmem:[#allocation2 + $0xa9] sm:$0xff] }
 0x3ef   : > { %11968 = vmatprep.mubr.msk.f32.mxu1 %vm312_vm0, %v14615_v11  ;;  %17307 = vst [vmem:[#allocation19_spill] sm:$0xff] %v14631_v18  ;;  %v14635_v11 = vld [vmem:[#allocation2 + $0xb1] sm:$0xff] }
 0x3f0   : > { %17308 = vst [vmem:[#allocation20_spill] sm:$0xff] %v14635_v11 }
 0x3f2   : > { %11969 = vmatmul.mubr.msk.f32.gmra.mrb[38].mxu1 %vm312_vm0, %v14619_v28  ;;  %v14639_v28 = vld [vmem:[#allocation2 + $0xc9] sm:$0xff] }
 0x3f3   : > { %11971 = vmatprep.mubr.msk.f32.mxu1 %vm312_vm0, %v14623_v62  ;;  %17309 = vst [vmem:[#allocation21_spill] sm:$0xff] %v14639_v28  ;;  %v14643_v62 = vld [vmem:[#allocation2 + $0xd1] sm:$0xff] }
 0x3f4   : > { %17310 = vst [vmem:[#allocation22_spill] sm:$0xff] %v14643_v62 }
 0x3f6   : > { %11972 = vmatmul.mubr.msk.f32.gmra.mrb[40].mxu1 %vm312_vm0, %v14627_v12  ;;  %v14647_v12 = vld [vmem:[#allocation2 + $0xe9] sm:$0xff] }
 0x3f7   : > { %11974 = vmatprep.mubr.msk.f32.mxu1 %vm312_vm0, %v14631_v18  ;;  %17311 = vst [vmem:[#allocation23_spill] sm:$0xff] %v14647_v12  ;;  %v14651_v18 = vld [vmem:[#allocation2 + $0xf1] sm:$0xff] }
 0x3f8   : > { %17312 = vst [vmem:[#allocation24_spill] sm:$0xff] %v14651_v18 }
 0x3fa   : > { %11975 = vmatmul.mubr.msk.f32.gmra.mrb[42].mxu1 %vm312_vm0, %v14635_v11  ;;  %v14655_v11 = vld [vmem:[#allocation2 + $0x109] sm:$0xff] }
 0x3fb   : > { %11977 = vmatprep.mubr.msk.f32.mxu1 %vm312_vm0, %v14639_v28  ;;  %17313 = vst [vmem:[#allocation25_spill] sm:$0xff] %v14655_v11  ;;  %v14659_v28 = vld [vmem:[#allocation2 + $0x111] sm:$0xff] }
 0x3fc   : > { %17314 = vst [vmem:[#allocation26_spill] sm:$0xff] %v14659_v28 }
 0x3fe   : > { %11978 = vmatmul.mubr.msk.f32.gmra.mrb[44].mxu1 %vm312_vm0, %v14643_v62  ;;  %v14663_v62 = vld [vmem:[#allocation2 + $0x129] sm:$0xff] }
 0x3ff   : > { %11980 = vmatprep.mubr.msk.f32.mxu1 %vm312_vm0, %v14647_v12  ;;  %17315 = vst [vmem:[#allocation27_spill] sm:$0xff] %v14663_v62  ;;  %v14667_v12 = vld [vmem:[#allocation2 + $0x131] sm:$0xff] }
 0x400   : > { %17316 = vst [vmem:[#allocation28_spill] sm:$0xff] %v14667_v12 }
 0x402   : > { %11981 = vmatmul.mubr.msk.f32.gmra.mrb[46].mxu1 %vm312_vm0, %v14651_v18  ;;  %v14671_v18 = vld [vmem:[#allocation2 + $0x149] sm:$0xff] }
 0x403   : > { %11983 = vmatprep.mubr.msk.f32.mxu1 %vm312_vm0, %v14655_v11  ;;  %17317 = vst [vmem:[#allocation29_spill] sm:$0xff] %v14671_v18  ;;  %v14675_v11 = vld [vmem:[#allocation2 + $0x151] sm:$0xff] }
 0x404   : > { %17318 = vst [vmem:[#allocation30_spill] sm:$0xff] %v14675_v11 }
 0x406   : > { %11984 = vmatmul.mubr.msk.f32.gmra.mrb[48].mxu1 %vm312_vm0, %v14659_v28  ;;  %v14679_v28 = vld [vmem:[#allocation2 + $0x169] sm:$0xff] }
 0x407   : > { %11986 = vmatprep.mubr.msk.f32.mxu1 %vm312_vm0, %v14663_v62  ;;  %17319 = vst [vmem:[#allocation31_spill] sm:$0xff] %v14679_v28  ;;  %v14683_v62 = vld [vmem:[#allocation2 + $0x171] sm:$0xff] }
 0x408   : > { %17320 = vst [vmem:[#allocation32_spill] sm:$0xff] %v14683_v62 }
 0x40a   : > { %11987 = vmatmul.mubr.msk.f32.gmra.mrb[50].mxu1 %vm312_vm0, %v14667_v12  ;;  %v14687_v12 = vld [vmem:[#allocation2 + $0x189] sm:$0xff] }
 0x40b   : > { %11989 = vmatprep.mubr.msk.f32.mxu1 %vm312_vm0, %v14671_v18  ;;  %17321 = vst [vmem:[#allocation33_spill] sm:$0xff] %v14687_v12  ;;  %v14691_v18 = vld [vmem:[#allocation2 + $0x191] sm:$0xff] }
 0x40c   : > { %17322 = vst [vmem:[#allocation34_spill] sm:$0xff] %v14691_v18 }
 0x40e   : > { %11990 = vmatmul.mubr.msk.f32.gmra.mrb[52].mxu1 %vm312_vm0, %v14675_v11  ;;  %v14695_v11 = vld [vmem:[#allocation2 + $0x1a9] sm:$0xff] }
 0x40f   : > { %11992 = vmatprep.mubr.msk.f32.mxu1 %vm312_vm0, %v14679_v28  ;;  %17323 = vst [vmem:[#allocation35_spill] sm:$0xff] %v14695_v11  ;;  %v14699_v28 = vld [vmem:[#allocation2 + $0x1b1] sm:$0xff] }
 0x412   : > { %11993 = vmatmul.mubr.msk.f32.gmra.mrb[54].mxu1 %vm312_vm0, %v14683_v62  ;;  %v14703_v62 = vld [vmem:[#allocation2 + $0x1c9] sm:$0xff] }
 0x413   : > { %11995 = vmatprep.mubr.msk.f32.mxu1 %vm312_vm0, %v14687_v12  ;;  %17324 = vst [vmem:[#allocation36_spill] sm:$0xff] %v14703_v62  ;;  %v14707_v12 = vld [vmem:[#allocation2 + $0x1d1] sm:$0xff] }
 0x416   : > { %11996 = vmatmul.mubr.msk.f32.gmra.mrb[56].mxu1 %vm312_vm0, %v14691_v18  ;;  %v14711_v18 = vld [vmem:[#allocation2 + $0x1e9] sm:$0xff] }
 0x417   : > { %11998 = vmatprep.mubr.msk.f32.mxu1 %vm312_vm0, %v14695_v11  ;;  %17325 = vst [vmem:[#allocation37_spill] sm:$0xff] %v14711_v18  ;;  %v14715_v11 = vld [vmem:[#allocation2 + $0x1f1] sm:$0xff] }
 0x41a   : > { %11999 = vmatmul.mubr.msk.f32.gmra.mrb[58].mxu1 %vm312_vm0, %v14699_v28 }
 0x41b   : > { %12001 = vmatprep.mubr.msk.f32.mxu1 %vm312_vm0, %v14703_v62  ;;  %v10535_v62 = vld [vmem:[%s17158_s1 + $0x28] sm:$0xff] }
 0x41e   : > { %12002 = vmatmul.mubr.msk.f32.gmra.mrb[60].mxu1 %vm312_vm0, %v14707_v12 }
 0x41f   : > { %12004 = vmatprep.mubr.msk.f32.mxu1 %vm312_vm0, %v14711_v18 }
 0x422   : > { %12005 = vmatmul.mubr.msk.f32.gmra.mrb[62].mxu1 %vm312_vm0, %v14715_v11 }
 0x423   : > { %12009 = vmatprep.mubr.msk.f32.mxu1 %vm312_vm0, %v14468_v35  ;;  %v14787_v35 = vld [vmem:[#allocation2 + $0x20f] sm:$0xff] }
 0x426   : > { %12010 = vmatmul.mubr.msk.f32.vlgmr.msra.gmra.mrb[32].mxu1 %vm312_vm0, %v14474_v36  ;;  %v10568_v36 = vld [vmem:[%s17158_s1 + $0x30] sm:$0xff] }
 0x427   : > { %12012 = vmatprep.mubr.msk.f32.mxu1 %vm312_vm0, %v14478_v37  ;;  %12058 = vmatpush3.msra.mxu1 %v14594_v20  ;;  %v14783_v20 = vld [vmem:[#allocation2 + $0x207] sm:$0xff] }
 0x428   : > { %12107 = vmatprep.subr.mxu1 %v10535_v62 }
 0x42a   : > { %12013 = vmatmul.mubr.msk.f32.gmra.mrb[34].mxu1 %vm312_vm0, %v14482_v41 }
 0x42b   : > { %12015 = vmatprep.mubr.msk.f32.mxu1 %vm312_vm0, %v14486_v48 }
 0x42e   : > { %12016 = vmatmul.mubr.msk.f32.gmra.mrb[36].mxu1 %vm312_vm0, %v14490_v60 }
 0x42f   : > { %12018 = vmatprep.mubr.msk.f32.mxu1 %vm312_vm0, %v14494_v29 }
 0x432   : > { %12019 = vmatmul.mubr.msk.f32.gmra.mrb[38].mxu1 %vm312_vm0, %v14498_v30 }
 0x433   : > { %12021 = vmatprep.mubr.msk.f32.mxu1 %vm312_vm0, %v14502_v49 }
 0x436   : > { %12022 = vmatmul.mubr.msk.f32.gmra.mrb[40].mxu1 %vm312_vm0, %v14506_v7 }
 0x437   : > { %12024 = vmatprep.mubr.msk.f32.mxu1 %vm312_vm0, %v14510_v45 }
 0x43a   : > { %12025 = vmatmul.mubr.msk.f32.gmra.mrb[42].mxu1 %vm312_vm0, %v14514_v57 }
 0x43b   : > { %12027 = vmatprep.mubr.msk.f32.mxu1 %vm312_vm0, %v14518_v63 }
 0x43e   : > { %12028 = vmatmul.mubr.msk.f32.gmra.mrb[44].mxu1 %vm312_vm0, %v14522_v10 }
 0x43f   : > { %12030 = vmatprep.mubr.msk.f32.mxu1 %vm312_vm0, %v14526_v24 }
 0x442   : > { %12031 = vmatmul.mubr.msk.f32.gmra.mrb[46].mxu1 %vm312_vm0, %v14530_v38 }
 0x443   : > { %12033 = vmatprep.mubr.msk.f32.mxu1 %vm312_vm0, %v14534_v53 }
 0x446   : > { %12034 = vmatmul.mubr.msk.f32.gmra.mrb[48].mxu1 %vm312_vm0, %v14538_v16 }
 0x447   : > { %12036 = vmatprep.mubr.msk.f32.mxu1 %vm312_vm0, %v14542_v34 }
 0x44a   : > { %12037 = vmatmul.mubr.msk.f32.gmra.mrb[50].mxu1 %vm312_vm0, %v14546_v50 }
 0x44b   : > { %12039 = vmatprep.mubr.msk.f32.mxu1 %vm312_vm0, %v14550_v59 }
 0x44e   : > { %12040 = vmatmul.mubr.msk.f32.gmra.mrb[52].mxu1 %vm312_vm0, %v14554_v9 }
 0x44f   : > { %12042 = vmatprep.mubr.msk.f32.mxu1 %vm312_vm0, %v14558_v26 }
 0x452   : > { %12043 = vmatmul.mubr.msk.f32.gmra.mrb[54].mxu1 %vm312_vm0, %v14562_v55 }
 0x453   : > { %12045 = vmatprep.mubr.msk.f32.mxu1 %vm312_vm0, %v14566_v58 }
 0x456   : > { %12046 = vmatmul.mubr.msk.f32.gmra.mrb[56].mxu1 %vm312_vm0, %v14570_v4 }
 0x457   : > { %12048 = vmatprep.mubr.msk.f32.mxu1 %vm312_vm0, %v14574_v15 }
 0x45a   : > { %12049 = vmatmul.mubr.msk.f32.gmra.mrb[58].mxu1 %vm312_vm0, %v14578_v6 }
 0x45b   : > { %12051 = vmatprep.mubr.msk.f32.mxu1 %vm312_vm0, %v14582_v33 }
 0x45e   : > { %12052 = vmatmul.mubr.msk.f32.gmra.mrb[60].mxu1 %vm312_vm0, %v14586_v56 }
 0x45f   : > { %12054 = vmatprep.mubr.msk.f32.mxu1 %vm312_vm0, %v14783_v20 }
 0x462   : > { %12055 = vmatmul.mubr.msk.f32.gmra.mrb[62].mxu1 %vm312_vm0, %v14787_v35 }
 0x463   : > { %12059 = vmatprep.mubr.msk.f32.mxu1 %vm312_vm0, %v14289_v23  ;;  %v17326_v23 = vld [vmem:[#allocation9_spill] sm:$0xff] }
 0x466   : > { %12060 = vmatmul.mubr.msk.f32.vlgmr.msra.gmra.mrb[32].mxu1 %vm312_vm0, %v14295_v0  ;;  %v17327_v0 = vld [vmem:[#allocation10_spill] sm:$0xff] }
 0x467   : > { %12062 = vmatprep.mubr.msk.f32.mxu1 %vm312_vm0, %v14301_v61  ;;  %12108 = vmatpush3.msra.mxu1 %v10535_v62  ;;  %v14854_v61 = vld [vmem:[#allocation2 + $0x208] sm:$0xff]  ;;  %v17343_v62 = vld [vmem:[#allocation26_spill] sm:$0xff] }
 0x468   : > { %12157 = vmatprep.subr.mxu1 %v10568_v36 }
 0x46a   : > { %12063 = vmatmul.mubr.msk.f32.gmra.mrb[34].mxu1 %vm312_vm0, %v14307_v3  ;;  %v14858_v3 = vld [vmem:[#allocation2 + $0x210] sm:$0xff] }
 0x46b   : > { %12065 = vmatprep.mubr.msk.f32.mxu1 %vm312_vm0, %v14313_v22  ;;  %v17328_v22 = vld [vmem:[#allocation11_spill] sm:$0xff] }
 0x46e   : > { %12066 = vmatmul.mubr.msk.f32.gmra.mrb[36].mxu1 %vm312_vm0, %v14319_v32  ;;  %v10601_v32 = vld [vmem:[%s17158_s1 + $0x38] sm:$0xff] }
 0x46f   : > { %12068 = vmatprep.mubr.msk.f32.mxu1 %vm312_vm0, %v14325_v43  ;;  %v17329_v43 = vld [vmem:[#allocation12_spill] sm:$0xff] }
 0x472   : > { %12069 = vmatmul.mubr.msk.f32.gmra.mrb[38].mxu1 %vm312_vm0, %v14331_v47  ;;  %v17330_v47 = vld [vmem:[#allocation13_spill] sm:$0xff] }
 0x473   : > { %12071 = vmatprep.mubr.msk.f32.mxu1 %vm312_vm0, %v14337_v14  ;;  %v17331_v14 = vld [vmem:[#allocation14_spill] sm:$0xff] }
 0x476   : > { %12072 = vmatmul.mubr.msk.f32.gmra.mrb[40].mxu1 %vm312_vm0, %v14343_v27  ;;  %v17332_v27 = vld [vmem:[#allocation15_spill] sm:$0xff] }
 0x477   : > { %12074 = vmatprep.mubr.msk.f32.mxu1 %vm312_vm0, %v14349_v17  ;;  %v17333_v17 = vld [vmem:[#allocation16_spill] sm:$0xff] }
 0x47a   : > { %12075 = vmatmul.mubr.msk.f32.gmra.mrb[42].mxu1 %vm312_vm0, %v14355_v31  ;;  %v17334_v31 = vld [vmem:[#allocation17_spill] sm:$0xff] }
 0x47b   : > { %12077 = vmatprep.mubr.msk.f32.mxu1 %vm312_vm0, %v14361_v25  ;;  %v17335_v25 = vld [vmem:[#allocation18_spill] sm:$0xff] }
 0x47e   : > { %12078 = vmatmul.mubr.msk.f32.gmra.mrb[44].mxu1 %vm312_vm0, %v14367_v42  ;;  %v17336_v42 = vld [vmem:[#allocation19_spill] sm:$0xff] }
 0x47f   : > { %12080 = vmatprep.mubr.msk.f32.mxu1 %vm312_vm0, %v14373_v52  ;;  %v17337_v52 = vld [vmem:[#allocation20_spill] sm:$0xff] }
 0x482   : > { %12081 = vmatmul.mubr.msk.f32.gmra.mrb[46].mxu1 %vm312_vm0, %v14379_v1  ;;  %v17338_v1 = vld [vmem:[#allocation21_spill] sm:$0xff] }
 0x483   : > { %12083 = vmatprep.mubr.msk.f32.mxu1 %vm312_vm0, %v14385_v5  ;;  %v17339_v5 = vld [vmem:[#allocation22_spill] sm:$0xff] }
 0x486   : > { %12084 = vmatmul.mubr.msk.f32.gmra.mrb[48].mxu1 %vm312_vm0, %v14391_v13  ;;  %v17340_v13 = vld [vmem:[#allocation23_spill] sm:$0xff] }
 0x487   : > { %12086 = vmatprep.mubr.msk.f32.mxu1 %vm312_vm0, %v14397_v40  ;;  %v17341_v40 = vld [vmem:[#allocation24_spill] sm:$0xff] }
 0x48a   : > { %12087 = vmatmul.mubr.msk.f32.gmra.mrb[50].mxu1 %vm312_vm0, %v14403_v44  ;;  %v17342_v44 = vld [vmem:[#allocation25_spill] sm:$0xff] }
 0x48b   : > { %12089 = vmatprep.mubr.msk.f32.mxu1 %vm312_vm0, %v14409_v21 }
 0x48e   : > { %12090 = vmatmul.mubr.msk.f32.gmra.mrb[52].mxu1 %vm312_vm0, %v14415_v51 }
 0x48f   : > { %12092 = vmatprep.mubr.msk.f32.mxu1 %vm312_vm0, %v14421_v46 }
 0x492   : > { %12093 = vmatmul.mubr.msk.f32.gmra.mrb[54].mxu1 %vm312_vm0, %v14427_v8 }
 0x493   : > { %12095 = vmatprep.mubr.msk.f32.mxu1 %vm312_vm0, %v14433_v19 }
 0x496   : > { %12096 = vmatmul.mubr.msk.f32.gmra.mrb[56].mxu1 %vm312_vm0, %v14439_v54 }
 0x497   : > { %12098 = vmatprep.mubr.msk.f32.mxu1 %vm312_vm0, %v14444_v2 }
 0x49a   : > { %12099 = vmatmul.mubr.msk.f32.gmra.mrb[58].mxu1 %vm312_vm0, %v14449_v39 }
 0x49b   : > { %12101 = vmatprep.mubr.msk.f32.mxu1 %vm312_vm0, %v17326_v23 }
 0x49e   : > { %12102 = vmatmul.mubr.msk.f32.gmra.mrb[60].mxu1 %vm312_vm0, %v17327_v0 }
 0x49f   : > { %12104 = vmatprep.mubr.msk.f32.mxu1 %vm312_vm0, %v14854_v61 }
 0x4a2   : > { %12105 = vmatmul.mubr.msk.f32.gmra.mrb[62].mxu1 %vm312_vm0, %v14858_v3 }
 0x4a3   : > { %12109 = vmatprep.mubr.msk.f32.mxu1 %vm312_vm0, %v17328_v22  ;;  %v17345_v22 = vld [vmem:[#allocation28_spill] sm:$0xff] }
 0x4a6   : > { %12110 = vmatmul.mubr.msk.f32.vlgmr.msra.gmra.mrb[32].mxu1 %vm312_vm0, %v17329_v43  ;;  %v17346_v43 = vld [vmem:[#allocation29_spill] sm:$0xff] }
 0x4a7   : > { %12112 = vmatprep.mubr.msk.f32.mxu1 %vm312_vm0, %v17330_v47  ;;  %12158 = vmatpush3.msra.mxu1 %v10568_v36  ;;  %v17344_v36 = vld [vmem:[#allocation27_spill] sm:$0xff] }
 0x4a8   : > { %12207 = vmatprep.subr.mxu1 %v10601_v32 }
 0x4aa   : > { %12113 = vmatmul.mubr.msk.f32.gmra.mrb[34].mxu1 %vm312_vm0, %v17331_v14 }
 0x4ab   : > { %12115 = vmatprep.mubr.msk.f32.mxu1 %vm312_vm0, %v17332_v27 }
 0x4ae   : > { %12116 = vmatmul.mubr.msk.f32.gmra.mrb[36].mxu1 %vm312_vm0, %v17333_v17 }
 0x4af   : > { %12118 = vmatprep.mubr.msk.f32.mxu1 %vm312_vm0, %v17334_v31 }
 0x4b2   : > { %12119 = vmatmul.mubr.msk.f32.gmra.mrb[38].mxu1 %vm312_vm0, %v17335_v25 }
 0x4b3   : > { %12121 = vmatprep.mubr.msk.f32.mxu1 %vm312_vm0, %v17336_v42 }
 0x4b6   : > { %12122 = vmatmul.mubr.msk.f32.gmra.mrb[40].mxu1 %vm312_vm0, %v17337_v52 }
 0x4b7   : > { %12124 = vmatprep.mubr.msk.f32.mxu1 %vm312_vm0, %v17338_v1 }
 0x4ba   : > { %12125 = vmatmul.mubr.msk.f32.gmra.mrb[42].mxu1 %vm312_vm0, %v17339_v5  ;;  %v17347_v5 = vld [vmem:[#allocation30_spill] sm:$0xff] }
 0x4bb   : > { %12127 = vmatprep.mubr.msk.f32.mxu1 %vm312_vm0, %v17340_v13  ;;  %v17348_v13 = vld [vmem:[#allocation31_spill] sm:$0xff] }
 0x4be   : > { %12128 = vmatmul.mubr.msk.f32.gmra.mrb[44].mxu1 %vm312_vm0, %v17341_v40  ;;  %v17349_v40 = vld [vmem:[#allocation32_spill] sm:$0xff] }
 0x4bf   : > { %12130 = vmatprep.mubr.msk.f32.mxu1 %vm312_vm0, %v17342_v44  ;;  %v17350_v44 = vld [vmem:[#allocation33_spill] sm:$0xff] }
 0x4c2   : > { %12131 = vmatmul.mubr.msk.f32.gmra.mrb[46].mxu1 %vm312_vm0, %v17343_v62  ;;  %v17351_v62 = vld [vmem:[#allocation34_spill] sm:$0xff] }
 0x4c3   : > { %12133 = vmatprep.mubr.msk.f32.mxu1 %vm312_vm0, %v17344_v36  ;;  %v17352_v36 = vld [vmem:[#allocation35_spill] sm:$0xff] }
 0x4c6   : > { %12134 = vmatmul.mubr.msk.f32.gmra.mrb[48].mxu1 %vm312_vm0, %v17345_v22 }
 0x4c7   : > { %12136 = vmatprep.mubr.msk.f32.mxu1 %vm312_vm0, %v17346_v43  ;;  %v17353_v43 = vld [vmem:[#allocation36_spill] sm:$0xff] }
 0x4ca   : > { %12137 = vmatmul.mubr.msk.f32.gmra.mrb[50].mxu1 %vm312_vm0, %v17347_v5 }
 0x4cb   : > { %12139 = vmatprep.mubr.msk.f32.mxu1 %vm312_vm0, %v17348_v13 }
 0x4ce   : > { %12140 = vmatmul.mubr.msk.f32.gmra.mrb[52].mxu1 %vm312_vm0, %v17349_v40 }
 0x4cf   : > { %12142 = vmatprep.mubr.msk.f32.mxu1 %vm312_vm0, %v17350_v44  ;;  %v14925_v44 = vld [vmem:[#allocation2 + $0x209] sm:$0xff] }
 0x4d2   : > { %12143 = vmatmul.mubr.msk.f32.gmra.mrb[54].mxu1 %vm312_vm0, %v17351_v62 }
 0x4d3   : > { %12145 = vmatprep.mubr.msk.f32.mxu1 %vm312_vm0, %v17352_v36  ;;  %v14929_v36 = vld [vmem:[#allocation2 + $0x211] sm:$0xff] }
 0x4d6   : > { %12146 = vmatmul.mubr.msk.f32.gmra.mrb[56].mxu1 %vm312_vm0, %v14699_v28 }
 0x4d7   : > { %12148 = vmatprep.mubr.msk.f32.mxu1 %vm312_vm0, %v17353_v43 }
 0x4da   : > { %12149 = vmatmul.mubr.msk.f32.gmra.mrb[58].mxu1 %vm312_vm0, %v14707_v12 }
 0x4db   : > { %12151 = vmatprep.mubr.msk.f32.mxu1 %vm312_vm0, %v14711_v18  ;;  %v10634_v18 = vld [vmem:[%s17158_s1 + $0x40] sm:$0xff] }
 0x4de   : > { %12152 = vmatmul.mubr.msk.f32.gmra.mrb[60].mxu1 %vm312_vm0, %v14715_v11 }
 0x4df   : > { %12154 = vmatprep.mubr.msk.f32.mxu1 %vm312_vm0, %v14925_v44 }
 0x4e2   : > { %12155 = vmatmul.mubr.msk.f32.gmra.mrb[62].mxu1 %vm312_vm0, %v14929_v36 }
 0x4e3   : > { %12159 = vmatprep.mubr.msk.f32.mxu1 %vm312_vm0, %v14478_v37  ;;  %v3549_v37 = vld [vmem:[#allocation2 + $0x227] sm:$0xff] }
 0x4e6   : > { %12160 = vmatmul.mubr.msk.f32.vlgmr.msra.gmra.mrb[32].mxu1 %vm312_vm0, %v14482_v41  ;;  %v3550_v41 = vld [vmem:[#allocation2 + $0x22f] sm:$0xff] }
 0x4e7   : > { %12162 = vmatprep.mubr.msk.f32.mxu1 %vm312_vm0, %v14486_v48  ;;  %12208 = vmatpush3.msra.mxu1 %v10601_v32  ;;  %v3906_v48 = vld [vmem:[#allocation2 + $0x48] sm:$0xff] }
 0x4e8   : > { %12257 = vmatprep.subr.mxu1 %v10634_v18 }
 0x4ea   : > { %12163 = vmatmul.mubr.msk.f32.gmra.mrb[34].mxu1 %vm312_vm0, %v14490_v60  ;;  %v3910_v60 = vld [vmem:[#allocation2 + $0x88] sm:$0xff] }
 0x4eb   : > { %12165 = vmatprep.mubr.msk.f32.mxu1 %vm312_vm0, %v14494_v29  ;;  %v3911_v29 = vld [vmem:[#allocation2 + $0x90] sm:$0xff] }
 0x4ee   : > { %12166 = vmatmul.mubr.msk.f32.gmra.mrb[36].mxu1 %vm312_vm0, %v14498_v30  ;;  %v3912_v30 = vld [vmem:[#allocation2 + $0xa8] sm:$0xff] }
 0x4ef   : > { %12168 = vmatprep.mubr.msk.f32.mxu1 %vm312_vm0, %v14502_v49  ;;  %v3913_v49 = vld [vmem:[#allocation2 + $0xb0] sm:$0xff] }
 0x4f2   : > { %12169 = vmatmul.mubr.msk.f32.gmra.mrb[38].mxu1 %vm312_vm0, %v14506_v7  ;;  %v3914_v7 = vld [vmem:[#allocation2 + $0xc8] sm:$0xff] }
 0x4f3   : > { %12171 = vmatprep.mubr.msk.f32.mxu1 %vm312_vm0, %v14510_v45  ;;  %v3915_v45 = vld [vmem:[#allocation2 + $0xd0] sm:$0xff] }
 0x4f6   : > { %12172 = vmatmul.mubr.msk.f32.gmra.mrb[40].mxu1 %vm312_vm0, %v14514_v57  ;;  %v3916_v57 = vld [vmem:[#allocation2 + $0xe8] sm:$0xff] }
 0x4f7   : > { %12174 = vmatprep.mubr.msk.f32.mxu1 %vm312_vm0, %v14518_v63  ;;  %v3917_v63 = vld [vmem:[#allocation2 + $0xf0] sm:$0xff] }
 0x4fa   : > { %12175 = vmatmul.mubr.msk.f32.gmra.mrb[42].mxu1 %vm312_vm0, %v14522_v10  ;;  %v3918_v10 = vld [vmem:[#allocation2 + $0x108] sm:$0xff] }
 0x4fb   : > { %12177 = vmatprep.mubr.msk.f32.mxu1 %vm312_vm0, %v14526_v24  ;;  %v3919_v24 = vld [vmem:[#allocation2 + $0x110] sm:$0xff] }
 0x4fe   : > { %12178 = vmatmul.mubr.msk.f32.gmra.mrb[44].mxu1 %vm312_vm0, %v14530_v38  ;;  %v3920_v38 = vld [vmem:[#allocation2 + $0x128] sm:$0xff] }
 0x4ff   : > { %12180 = vmatprep.mubr.msk.f32.mxu1 %vm312_vm0, %v14534_v53  ;;  %v3921_v53 = vld [vmem:[#allocation2 + $0x130] sm:$0xff] }
 0x502   : > { %12181 = vmatmul.mubr.msk.f32.gmra.mrb[46].mxu1 %vm312_vm0, %v14538_v16  ;;  %v3922_v16 = vld [vmem:[#allocation2 + $0x148] sm:$0xff] }
 0x503   : > { %12183 = vmatprep.mubr.msk.f32.mxu1 %vm312_vm0, %v14542_v34  ;;  %v3923_v34 = vld [vmem:[#allocation2 + $0x150] sm:$0xff] }
 0x506   : > { %12184 = vmatmul.mubr.msk.f32.gmra.mrb[48].mxu1 %vm312_vm0, %v14546_v50  ;;  %v17360_v50 = vld [vmem:[#allocation29_spill] sm:$0xff] }
 0x507   : > { %12186 = vmatprep.mubr.msk.f32.mxu1 %vm312_vm0, %v14550_v59  ;;  %v17361_v59 = vld [vmem:[#allocation33_spill] sm:$0xff] }
 0x50a   : > { %12187 = vmatmul.mubr.msk.f32.gmra.mrb[50].mxu1 %vm312_vm0, %v14554_v9  ;;  %v17362_v9 = vld [vmem:[#allocation35_spill] sm:$0xff] }
 0x50b   : > { %12189 = vmatprep.mubr.msk.f32.mxu1 %vm312_vm0, %v14558_v26  ;;  %v17363_v26 = vld [vmem:[#allocation37_spill] sm:$0xff] }
 0x50e   : > { %12190 = vmatmul.mubr.msk.f32.gmra.mrb[52].mxu1 %vm312_vm0, %v14562_v55  ;;  %v4323_v55 = vld [vmem:[#allocation2 + $0x229] sm:$0xff] }
 0x50f   : > { %12192 = vmatprep.mubr.msk.f32.mxu1 %vm312_vm0, %v14566_v58  ;;  %v4324_v58 = vld [vmem:[#allocation2 + $0x231] sm:$0xff] }
 0x512   : > { %12193 = vmatmul.mubr.msk.f32.gmra.mrb[54].mxu1 %vm312_vm0, %v14570_v4 }
 0x513   : > { %12195 = vmatprep.mubr.msk.f32.mxu1 %vm312_vm0, %v14574_v15 }
 0x516   : > { %12196 = vmatmul.mubr.msk.f32.gmra.mrb[56].mxu1 %vm312_vm0, %v14578_v6  ;;  %v3907_v6 = vld [vmem:[#allocation2 + $0x50] sm:$0xff] }
 0x517   : > { %12198 = vmatprep.mubr.msk.f32.mxu1 %vm312_vm0, %v14582_v33  ;;  %v3908_v33 = vld [vmem:[#allocation2 + $0x68] sm:$0xff] }
 0x51a   : > { %12199 = vmatmul.mubr.msk.f32.gmra.mrb[58].mxu1 %vm312_vm0, %v14586_v56  ;;  %v3909_v56 = vld [vmem:[#allocation2 + $0x70] sm:$0xff] }
 0x51b   : > { %12201 = vmatprep.mubr.msk.f32.mxu1 %vm312_vm0, %v14783_v20 }
 0x51e   : > { %12202 = vmatmul.mubr.msk.f32.gmra.mrb[60].mxu1 %vm312_vm0, %v14787_v35 }
 0x51f   : > { %12204 = vmatprep.mubr.msk.f32.mxu1 %vm312_vm0, %v3549_v37 }
 0x522   : > { %12205 = vmatmul.mubr.msk.f32.gmra.mrb[62].mxu1 %vm312_vm0, %v3550_v41 }
 0x523   : > { %12209 = vmatprep.mubr.msk.f32.mxu1 %vm312_vm0, %v3906_v48 }
 0x526   : > { %12210 = vmatmul.mubr.msk.f32.vlgmr.msra.gmra.mrb[32].mxu1 %vm312_vm0, %v3907_v6 }
 0x527   : > { %12212 = vmatprep.mubr.msk.f32.mxu1 %vm312_vm0, %v3908_v33  ;;  %12258 = vmatpush3.msra.mxu1 %v10634_v18 }
 0x52a   : > { %12213 = vmatmul.mubr.msk.f32.gmra.mrb[34].mxu1 %vm312_vm0, %v3909_v56 }
 0x52b   : > { %12215 = vmatprep.mubr.msk.f32.mxu1 %vm312_vm0, %v3910_v60 }
 0x52e   : > { %12216 = vmatmul.mubr.msk.f32.gmra.mrb[36].mxu1 %vm312_vm0, %v3911_v29 }
 0x52f   : > { %12218 = vmatprep.mubr.msk.f32.mxu1 %vm312_vm0, %v3912_v30 }
 0x532   : > { %12219 = vmatmul.mubr.msk.f32.gmra.mrb[38].mxu1 %vm312_vm0, %v3913_v49 }
 0x533   : > { %12221 = vmatprep.mubr.msk.f32.mxu1 %vm312_vm0, %v3914_v7 }
 0x536   : > { %12222 = vmatmul.mubr.msk.f32.gmra.mrb[40].mxu1 %vm312_vm0, %v3915_v45 }
 0x537   : > { %12224 = vmatprep.mubr.msk.f32.mxu1 %vm312_vm0, %v3916_v57 }
 0x53a   : > { %12225 = vmatmul.mubr.msk.f32.gmra.mrb[42].mxu1 %vm312_vm0, %v3917_v63 }
 0x53b   : > { %12227 = vmatprep.mubr.msk.f32.mxu1 %vm312_vm0, %v3918_v10 }
 0x53e   : > { %12228 = vmatmul.mubr.msk.f32.gmra.mrb[44].mxu1 %vm312_vm0, %v3919_v24 }
 0x53f   : > { %12230 = vmatprep.mubr.msk.f32.mxu1 %vm312_vm0, %v3920_v38 }
 0x542   : > { %12231 = vmatmul.mubr.msk.f32.gmra.mrb[46].mxu1 %vm312_vm0, %v3921_v53 }
 0x543   : > { %12233 = vmatprep.mubr.msk.f32.mxu1 %vm312_vm0, %v3922_v16 }
 0x546   : > { %12234 = vmatmul.mubr.msk.f32.gmra.mrb[48].mxu1 %vm312_vm0, %v3923_v34 }
 0x547   : > { %12236 = vmatprep.mubr.msk.f32.mxu1 %vm312_vm0, %v14409_v21  ;;  %v3936_v21 = vld [vmem:[#allocation2 + $0x228] sm:$0xff] }
 0x54a   : > { %12237 = vmatmul.mubr.msk.f32.gmra.mrb[50].mxu1 %vm312_vm0, %v14415_v51  ;;  %v3937_v51 = vld [vmem:[#allocation2 + $0x230] sm:$0xff] }
 0x54b   : > { %12239 = vmatprep.mubr.msk.f32.mxu1 %vm312_vm0, %v14421_v46  ;;  %v17354_v46 = vld [vmem:[#allocation22_spill] sm:$0xff] }
 0x54e   : > { %12240 = vmatmul.mubr.msk.f32.gmra.mrb[52].mxu1 %vm312_vm0, %v14427_v8  ;;  %v17355_v8 = vld [vmem:[#allocation23_spill] sm:$0xff] }
 0x54f   : > { %12242 = vmatprep.mubr.msk.f32.mxu1 %vm312_vm0, %v14433_v19  ;;  %v17356_v19 = vld [vmem:[#allocation24_spill] sm:$0xff] }
 0x552   : > { %12243 = vmatmul.mubr.msk.f32.gmra.mrb[54].mxu1 %vm312_vm0, %v14439_v54  ;;  %v17357_v54 = vld [vmem:[#allocation25_spill] sm:$0xff] }
 0x553   : > { %12245 = vmatprep.mubr.msk.f32.mxu1 %vm312_vm0, %v14444_v2  ;;  %v17358_v2 = vld [vmem:[#allocation26_spill] sm:$0xff] }
 0x556   : > { %12246 = vmatmul.mubr.msk.f32.gmra.mrb[56].mxu1 %vm312_vm0, %v14449_v39  ;;  %v17359_v39 = vld [vmem:[#allocation27_spill] sm:$0xff] }
 0x557   : > { %12248 = vmatprep.mubr.msk.f32.mxu1 %vm312_vm0, %v17326_v23 }
 0x55a   : > { %12249 = vmatmul.mubr.msk.f32.gmra.mrb[58].mxu1 %vm312_vm0, %v17327_v0 }
 0x55b   : > { %12251 = vmatprep.mubr.msk.f32.mxu1 %vm312_vm0, %v14854_v61 }
 0x55e   : > { %12252 = vmatmul.mubr.msk.f32.gmra.mrb[60].mxu1 %vm312_vm0, %v14858_v3 }
 0x55f   : > { %12254 = vmatprep.mubr.msk.f32.mxu1 %vm312_vm0, %v3936_v21 }
 0x562   : > { %12255 = vmatmul.mubr.msk.f32.gmra.mrb[62].mxu1 %vm312_vm0, %v3937_v51 }
 0x563   : > { %12259 = vmatprep.mubr.msk.f32.mxu1 %vm312_vm0, %v17330_v47 }
 0x566   : > { %12260 = vmatmul.mubr.msk.f32.vlgmr.msra.gmra.mrb[32].mxu1 %vm312_vm0, %v17331_v14 }
 0x567   : > { %12262 = vmatprep.mubr.msk.f32.mxu1 %vm312_vm0, %v17332_v27 }
 0x56a   : > { %12263 = vmatmul.mubr.msk.f32.gmra.mrb[34].mxu1 %vm312_vm0, %v17333_v17 }
 0x56b   : > { %12265 = vmatprep.mubr.msk.f32.mxu1 %vm312_vm0, %v17334_v31 }
 0x56e   : > { %12266 = vmatmul.mubr.msk.f32.gmra.mrb[36].mxu1 %vm312_vm0, %v17335_v25 }
 0x56f   : > { %12268 = vmatprep.mubr.msk.f32.mxu1 %vm312_vm0, %v17336_v42 }
 0x572   : > { %12269 = vmatmul.mubr.msk.f32.gmra.mrb[38].mxu1 %vm312_vm0, %v17337_v52 }
 0x573   : > { %12271 = vmatprep.mubr.msk.f32.mxu1 %vm312_vm0, %v17338_v1 }
 0x576   : > { %12272 = vmatmul.mubr.msk.f32.gmra.mrb[40].mxu1 %vm312_vm0, %v17354_v46 }
 0x577   : > { %12274 = vmatprep.mubr.msk.f32.mxu1 %vm312_vm0, %v17355_v8 }
 0x57a   : > { %12275 = vmatmul.mubr.msk.f32.gmra.mrb[42].mxu1 %vm312_vm0, %v17356_v19 }
 0x57b   : > { %12277 = vmatprep.mubr.msk.f32.mxu1 %vm312_vm0, %v17357_v54 }
 0x57e   : > { %12278 = vmatmul.mubr.msk.f32.gmra.mrb[44].mxu1 %vm312_vm0, %v17358_v2 }
 0x57f   : > { %12280 = vmatprep.mubr.msk.f32.mxu1 %vm312_vm0, %v17359_v39 }
 0x582   : > { %12281 = vmatmul.mubr.msk.f32.gmra.mrb[46].mxu1 %vm312_vm0, %v17345_v22 }
 0x583   : > { %12283 = vmatprep.mubr.msk.f32.mxu1 %vm312_vm0, %v17360_v50 }
 0x586   : > { %12284 = vmatmul.mubr.msk.f32.gmra.mrb[48].mxu1 %vm312_vm0, %v17347_v5 }
 0x587   : > { %12286 = vmatprep.mubr.msk.f32.mxu1 %vm312_vm0, %v17348_v13 }
 0x58a   : > { %12287 = vmatmul.mubr.msk.f32.gmra.mrb[50].mxu1 %vm312_vm0, %v17349_v40 }
 0x58b   : > { %12289 = vmatprep.mubr.msk.f32.mxu1 %vm312_vm0, %v17361_v59 }
 0x58e   : > { %12290 = vmatmul.mubr.msk.f32.gmra.mrb[52].mxu1 %vm312_vm0, %v17351_v62 }
 0x58f   : > { %12292 = vmatprep.mubr.msk.f32.mxu1 %vm312_vm0, %v17362_v9 }
 0x592   : > { %12293 = vmatmul.mubr.msk.f32.gmra.mrb[54].mxu1 %vm312_vm0, %v14699_v28 }
 0x593   : > { %12295 = vmatprep.mubr.msk.f32.mxu1 %vm312_vm0, %v17353_v43 }
 0x596   : > { %12296 = vmatmul.mubr.msk.f32.gmra.mrb[56].mxu1 %vm312_vm0, %v14707_v12 }
 0x597   : > { %12298 = vmatprep.mubr.msk.f32.mxu1 %vm312_vm0, %v17363_v26 }
 0x59a   : > { %12299 = vmatmul.mubr.msk.f32.gmra.mrb[58].mxu1 %vm312_vm0, %v14715_v11 }
 0x59b   : > { %12301 = vmatprep.mubr.msk.f32.mxu1 %vm312_vm0, %v14925_v44 }
 0x59e   : > { %12302 = vmatmul.mubr.msk.f32.gmra.mrb[60].mxu1 %vm312_vm0, %v14929_v36 }
 0x59f   : > { %12304 = vmatprep.mubr.msk.f32.mxu1 %vm312_vm0, %v4323_v55 }
 0x5a2   : > { %12305 = vmatmul.mubr.msk.f32.gmra.mrb[62].mxu1 %vm312_vm0, %v4324_v58 }
 0x639   : > { %v15104_v4 = vpop.f32.mrb[32].mxu1 }
 0x63a   : > { %v4682_v15 = vsel %vm312_vm0, %v15104_v4, 0.0  ;;  %v4751_v11 = vmul.f32 %v15104_v4, %v15104_v4  ;;  %4885 = vrot.lane.b32.xlu1 %v15104_v4, %s13600_s30  ;;  %v15112_v12 = vpop.f32.mrb[33].mxu1 }
 0x63b   : > { %v4681_v18 = vsel %vm312_vm0, %v15112_v12, 0.0  ;;  %v4750_v28 = vmul.f32 %v15112_v12, %v15112_v12  ;;  %4883 = vrot.lane.b32.xlu0 %v15112_v12, %s13600_s30  ;;  %12309 = vmatprep.mubr.msk.f32.mxu1 %vm312_vm0, %v15112_v12 }
 0x63c   : > { %v4783_v20 = vsel %vm312_vm0, %v4751_v11, 0.0  ;;  %v4683_v35 = vadd.f32 %v4682_v15, %v4681_v18 }
 0x63d   : > { %v4782_v23 = vsel %vm312_vm0, %v4750_v28, 0.0  ;;  %v15124_v0 = vpop.f32.mrb[34].mxu1 }
 0x63e   : > { %v4784_v61 = vadd.f32 %v4783_v20, %v4782_v23  ;;  %v15126_v3 = vpop.f32.mrb[35].mxu1  ;;  %v4753_v32 = vmul.f32 %v15124_v0, %v15124_v0  ;;  %v4686_v17 = vsel %vm312_vm0, %v15124_v0, 0.0 }
 0x63f   : > { %v4684_v47 = vsel %vm312_vm0, %v15126_v3, 0.0  ;;  %v4752_v14 = vmul.f32 %v15126_v3, %v15126_v3  ;;  %4889 = vrot.lane.b32.xlu0 %v15124_v0, %s13600_s30  ;;  %4887 = vrot.lane.b32.xlu1 %v15126_v3, %s13600_s30 }
 0x640   : > { %v4685_v27 = vadd.f32 %v4684_v47, %v4683_v35  ;;  %v4787_v5 = vsel %vm312_vm0, %v4753_v32, 0.0 }
 0x641   : > { %v4785_v31 = vsel %vm312_vm0, %v4752_v14, 0.0  ;;  %v15141_v25 = vpop.f32.mrb[36].mxu1 }
 0x642   : > { %v4786_v42 = vadd.f32 %v4785_v31, %v4784_v61  ;;  %v15143_v52 = vpop.f32.mrb[37].mxu1  ;;  %v4687_v1 = vadd.f32 %v4686_v17, %v4685_v27  ;;  %v4755_v13 = vmul.f32 %v15141_v25, %v15141_v25  ;;  %v4690_v22 = vsel %vm312_vm0, %v15141_v25, 0.0 }
 0x643   : > { %v4688_v40 = vsel %vm312_vm0, %v15143_v52, 0.0  ;;  %v4754_v44 = vmul.f32 %v15143_v52, %v15143_v52  ;;  %4893 = vrot.lane.b32.xlu0 %v15141_v25, %s13600_s30  ;;  %4891 = vrot.lane.b32.xlu1 %v15143_v52, %s13600_s30 }
 0x644   : > { %v4689_v62 = vadd.f32 %v4688_v40, %v4687_v1  ;;  %v4788_v36 = vadd.f32 %v4787_v5, %v4786_v42  ;;  %v4791_v33 = vsel %vm312_vm0, %v4755_v13, 0.0 }
 0x645   : > { %v4789_v43 = vsel %vm312_vm0, %v4754_v44, 0.0  ;;  %v15159_v37 = vpop.f32.mrb[38].mxu1 }
 0x646   : > { %v4790_v41 = vadd.f32 %v4789_v43, %v4788_v36  ;;  %v15161_v48 = vpop.f32.mrb[39].mxu1  ;;  %v4691_v6 = vadd.f32 %v4690_v22, %v4689_v62  ;;  %v4757_v56 = vmul.f32 %v15159_v37, %v15159_v37  ;;  %v4694_v7 = vsel %vm312_vm0, %v15159_v37, 0.0 }
 0x647   : > { %v4692_v60 = vsel %vm312_vm0, %v15161_v48, 0.0  ;;  %v4756_v29 = vmul.f32 %v15161_v48, %v15161_v48  ;;  %4897 = vrot.lane.b32.xlu0 %v15159_v37, %s13600_s30  ;;  %4895 = vrot.lane.b32.xlu1 %v15161_v48, %s13600_s30 }
 0x648   : > { %v4693_v30 = vadd.f32 %v4692_v60, %v4691_v6  ;;  %v4792_v49 = vadd.f32 %v4791_v33, %v4790_v41  ;;  %v4795_v38 = vsel %vm312_vm0, %v4757_v56, 0.0 }
 0x649   : > { %v4793_v45 = vsel %vm312_vm0, %v4756_v29, 0.0  ;;  %v15177_v57 = vpop.f32.mrb[40].mxu1 }
 0x64a   : > { %v4794_v63 = vadd.f32 %v4793_v45, %v4792_v49  ;;  %v15179_v10 = vpop.f32.mrb[41].mxu1  ;;  %v4695_v24 = vadd.f32 %v4694_v7, %v4693_v30  ;;  %v4759_v53 = vmul.f32 %v15177_v57, %v15177_v57  ;;  %v4698_v46 = vsel %vm312_vm0, %v15177_v57, 0.0 }
 0x64b   : > { %v4696_v16 = vsel %vm312_vm0, %v15179_v10, 0.0  ;;  %v4758_v34 = vmul.f32 %v15179_v10, %v15179_v10  ;;  %4901 = vrot.lane.b32.xlu0 %v15177_v57, %s13600_s30  ;;  %4899 = vrot.lane.b32.xlu1 %v15179_v10, %s13600_s30 }
 0x64c   : > { %v4697_v21 = vadd.f32 %v4696_v16, %v4695_v24  ;;  %v4796_v51 = vadd.f32 %v4795_v38, %v4794_v63  ;;  %v4799_v50 = vsel %vm312_vm0, %v4759_v53, 0.0 }
 0x64d   : > { %v4797_v8 = vsel %vm312_vm0, %v4758_v34, 0.0  ;;  %v15195_v19 = vpop.f32.mrb[42].mxu1 }
 0x64e   : > { %v4798_v54 = vadd.f32 %v4797_v8, %v4796_v51  ;;  %v15197_v2 = vpop.f32.mrb[43].mxu1  ;;  %v4699_v39 = vadd.f32 %v4698_v46, %v4697_v21  ;;  %v4761_v59 = vmul.f32 %v15195_v19, %v15195_v19  ;;  %v4702_v15 = vsel %vm312_vm0, %v15195_v19, 0.0 }
 0x64f   : > { %v4700_v9 = vsel %vm312_vm0, %v15197_v2, 0.0  ;;  %v4760_v26 = vmul.f32 %v15197_v2, %v15197_v2  ;;  %4905 = vrot.lane.b32.xlu0 %v15195_v19, %s13600_s30  ;;  %4903 = vrot.lane.b32.xlu1 %v15197_v2, %s13600_s30 }
 0x650   : > { %v4701_v55 = vadd.f32 %v4700_v9, %v4699_v39  ;;  %v4800_v58 = vadd.f32 %v4799_v50, %v4798_v54  ;;  %v4803_v23 = vsel %vm312_vm0, %v4761_v59, 0.0 }
 0x651   : > { %v4801_v11 = vsel %vm312_vm0, %v4760_v26, 0.0  ;;  %v15213_v18 = vpop.f32.mrb[44].mxu1 }
 0x652   : > { %v4802_v28 = vadd.f32 %v4801_v11, %v4800_v58  ;;  %v15215_v20 = vpop.f32.mrb[45].mxu1  ;;  %v4703_v35 = vadd.f32 %v4702_v15, %v4701_v55  ;;  %v4763_v61 = vmul.f32 %v15213_v18, %v15213_v18  ;;  %v4706_v17 = vsel %vm312_vm0, %v15213_v18, 0.0 }
 0x653   : > { %v4704_v32 = vsel %vm312_vm0, %v15215_v20, 0.0  ;;  %v4762_v47 = vmul.f32 %v15215_v20, %v15215_v20  ;;  %4909 = vrot.lane.b32.xlu0 %v15213_v18, %s13600_s30  ;;  %4907 = vrot.lane.b32.xlu1 %v15215_v20, %s13600_s30 }
 0x654   : > { %v4705_v14 = vadd.f32 %v4704_v32, %v4703_v35  ;;  %v4804_v27 = vadd.f32 %v4803_v23, %v4802_v28  ;;  %v4807_v40 = vsel %vm312_vm0, %v4763_v61, 0.0 }
 0x655   : > { %v4805_v31 = vsel %vm312_vm0, %v4762_v47, 0.0  ;;  %v15231_v42 = vpop.f32.mrb[46].mxu1 }
 0x656   : > { %v4806_v1 = vadd.f32 %v4805_v31, %v4804_v27  ;;  %v15233_v5 = vpop.f32.mrb[47].mxu1  ;;  %v4707_v13 = vadd.f32 %v4706_v17, %v4705_v14  ;;  %v4765_v44 = vmul.f32 %v15231_v42, %v15231_v42  ;;  %v4710_v41 = vsel %vm312_vm0, %v15231_v42, 0.0 }
 0x657   : > { %v4708_v62 = vsel %vm312_vm0, %v15233_v5, 0.0  ;;  %v4764_v36 = vmul.f32 %v15233_v5, %v15233_v5  ;;  %4913 = vrot.lane.b32.xlu0 %v15231_v42, %s13600_s30  ;;  %4911 = vrot.lane.b32.xlu1 %v15233_v5, %s13600_s30 }
 0x658   : > { %v4709_v22 = vadd.f32 %v4708_v62, %v4707_v13  ;;  %v4808_v43 = vadd.f32 %v4807_v40, %v4806_v1  ;;  %v4811_v30 = vsel %vm312_vm0, %v4765_v44, 0.0 }
 0x659   : > { %v4809_v6 = vsel %vm312_vm0, %v4764_v36, 0.0  ;;  %v15249_v33 = vpop.f32.mrb[48].mxu1 }
 0x65a   : > { %v4810_v56 = vadd.f32 %v4809_v6, %v4808_v43  ;;  %v15251_v60 = vpop.f32.mrb[49].mxu1  ;;  %v4711_v29 = vadd.f32 %v4710_v41, %v4709_v22  ;;  %v4767_v49 = vmul.f32 %v15249_v33, %v15249_v33  ;;  %v4714_v38 = vsel %vm312_vm0, %v15249_v33, 0.0 }
 0x65b   : > { %v4712_v7 = vsel %vm312_vm0, %v15251_v60, 0.0  ;;  %v4766_v45 = vmul.f32 %v15251_v60, %v15251_v60  ;;  %4917 = vrot.lane.b32.xlu0 %v15249_v33, %s13600_s30  ;;  %4915 = vrot.lane.b32.xlu1 %v15251_v60, %s13600_s30 }
 0x65c   : > { %v4713_v63 = vadd.f32 %v4712_v7, %v4711_v29  ;;  %v4812_v24 = vadd.f32 %v4811_v30, %v4810_v56  ;;  %v4815_v46 = vsel %vm312_vm0, %v4767_v49, 0.0 }
 0x65d   : > { %v4813_v53 = vsel %vm312_vm0, %v4766_v45, 0.0  ;;  %v15267_v16 = vpop.f32.mrb[50].mxu1 }
 0x65e   : > { %v4814_v34 = vadd.f32 %v4813_v53, %v4812_v24  ;;  %v15269_v21 = vpop.f32.mrb[51].mxu1  ;;  %v4715_v51 = vadd.f32 %v4714_v38, %v4713_v63  ;;  %v4769_v8 = vmul.f32 %v15267_v16, %v15267_v16  ;;  %v4718_v9 = vsel %vm312_vm0, %v15267_v16, 0.0 }
 0x65f   : > { %v4716_v54 = vsel %vm312_vm0, %v15269_v21, 0.0  ;;  %v4768_v39 = vmul.f32 %v15269_v21, %v15269_v21  ;;  %4921 = vrot.lane.b32.xlu0 %v15267_v16, %s13600_s30  ;;  %4919 = vrot.lane.b32.xlu1 %v15269_v21, %s13600_s30 }
 0x660   : > { %v4717_v50 = vadd.f32 %v4716_v54, %v4715_v51  ;;  %v4816_v59 = vadd.f32 %v4815_v46, %v4814_v34  ;;  %v4819_v28 = vsel %vm312_vm0, %v4769_v8, 0.0 }
 0x661   : > { %v4817_v26 = vsel %vm312_vm0, %v4768_v39, 0.0  ;;  %v15285_v55 = vpop.f32.mrb[52].mxu1 }
 0x662   : > { %v4818_v58 = vadd.f32 %v4817_v26, %v4816_v59  ;;  %v15287_v15 = vpop.f32.mrb[53].mxu1  ;;  %v4719_v11 = vadd.f32 %v4718_v9, %v4717_v50  ;;  %v4771_v35 = vmul.f32 %v15285_v55, %v15285_v55  ;;  %v4722_v14 = vsel %vm312_vm0, %v15285_v55, 0.0 }
 0x663   : > { %v4720_v23 = vsel %vm312_vm0, %v15287_v15, 0.0  ;;  %v4770_v61 = vmul.f32 %v15287_v15, %v15287_v15  ;;  %4925 = vrot.lane.b32.xlu0 %v15285_v55, %s13600_s30  ;;  %4923 = vrot.lane.b32.xlu1 %v15287_v15, %s13600_s30 }
 0x664   : > { %v4721_v32 = vadd.f32 %v4720_v23, %v4719_v11  ;;  %v4820_v47 = vadd.f32 %v4819_v28, %v4818_v58  ;;  %v4823_v40 = vsel %vm312_vm0, %v4771_v35, 0.0 }
 0x665   : > { %v4821_v27 = vsel %vm312_vm0, %v4770_v61, 0.0  ;;  %v15303_v17 = vpop.f32.mrb[54].mxu1 }
 0x666   : > { %v4822_v31 = vadd.f32 %v4821_v27, %v4820_v47  ;;  %v15305_v1 = vpop.f32.mrb[55].mxu1  ;;  %v4723_v13 = vadd.f32 %v4722_v14, %v4721_v32  ;;  %v4773_v44 = vmul.f32 %v15303_v17, %v15303_v17  ;;  %v4726_v41 = vsel %vm312_vm0, %v15303_v17, 0.0 }
 0x667   : > { %v4724_v62 = vsel %vm312_vm0, %v15305_v1, 0.0  ;;  %v4772_v36 = vmul.f32 %v15305_v1, %v15305_v1  ;;  %4929 = vrot.lane.b32.xlu0 %v15303_v17, %s13600_s30  ;;  %4927 = vrot.lane.b32.xlu1 %v15305_v1, %s13600_s30 }
 0x668   : > { %v4725_v22 = vadd.f32 %v4724_v62, %v4723_v13  ;;  %v4824_v43 = vadd.f32 %v4823_v40, %v4822_v31  ;;  %v4827_v7 = vsel %vm312_vm0, %v4773_v44, 0.0 }
 0x669   : > { %v4825_v6 = vsel %vm312_vm0, %v4772_v36, 0.0  ;;  %v15321_v56 = vpop.f32.mrb[56].mxu1 }
 0x66a   : > { %v4826_v29 = vadd.f32 %v4825_v6, %v4824_v43  ;;  %v15323_v30 = vpop.f32.mrb[57].mxu1  ;;  %v4727_v49 = vadd.f32 %v4726_v41, %v4725_v22  ;;  %v4775_v45 = vmul.f32 %v15321_v56, %v15321_v56  ;;  %v4730_v34 = vsel %vm312_vm0, %v15321_v56, 0.0 }
 0x66b   : > { %v4728_v63 = vsel %vm312_vm0, %v15323_v30, 0.0  ;;  %v4774_v24 = vmul.f32 %v15323_v30, %v15323_v30  ;;  %4933 = vrot.lane.b32.xlu0 %v15321_v56, %s13600_s30  ;;  %4931 = vrot.lane.b32.xlu1 %v15323_v30, %s13600_s30 }
 0x66c   : > { %v4729_v38 = vadd.f32 %v4728_v63, %v4727_v49  ;;  %v4828_v53 = vadd.f32 %v4827_v7, %v4826_v29  ;;  %v4831_v50 = vsel %vm312_vm0, %v4775_v45, 0.0 }
 0x66d   : > { %v4829_v51 = vsel %vm312_vm0, %v4774_v24, 0.0  ;;  %v15339_v46 = vpop.f32.mrb[58].mxu1 }
 0x66e   : > { %v4830_v8 = vadd.f32 %v4829_v51, %v4828_v53  ;;  %v15341_v54 = vpop.f32.mrb[59].mxu1  ;;  %v4731_v39 = vadd.f32 %v4730_v34, %v4729_v38  ;;  %v4777_v59 = vmul.f32 %v15339_v46, %v15339_v46  ;;  %v4734_v28 = vsel %vm312_vm0, %v15339_v46, 0.0 }
 0x66f   : > { %v4732_v9 = vsel %vm312_vm0, %v15341_v54, 0.0  ;;  %v4776_v26 = vmul.f32 %v15341_v54, %v15341_v54  ;;  %4937 = vrot.lane.b32.xlu0 %v15339_v46, %s13600_s30  ;;  %4935 = vrot.lane.b32.xlu1 %v15341_v54, %s13600_s30 }
 0x670   : > { %v4733_v58 = vadd.f32 %v4732_v9, %v4731_v39  ;;  %v4832_v11 = vadd.f32 %v4831_v50, %v4830_v8  ;;  %v4835_v14 = vsel %vm312_vm0, %v4777_v59, 0.0 }
 0x671   : > { %v4833_v35 = vsel %vm312_vm0, %v4776_v26, 0.0  ;;  %v15357_v23 = vpop.f32.mrb[60].mxu1 }
 0x672   : > { %v4834_v61 = vadd.f32 %v4833_v35, %v4832_v11  ;;  %v15359_v32 = vpop.f32.mrb[61].mxu1  ;;  %v4735_v47 = vadd.f32 %v4734_v28, %v4733_v58  ;;  %v4779_v27 = vmul.f32 %v15357_v23, %v15357_v23  ;;  %v4738_v62 = vsel %vm312_vm0, %v15357_v23, 0.0 }
 0x673   : > { %v4736_v31 = vsel %vm312_vm0, %v15359_v32, 0.0  ;;  %v4778_v13 = vmul.f32 %v15359_v32, %v15359_v32  ;;  %4941 = vrot.lane.b32.xlu0 %v15357_v23, %s13600_s30  ;;  %4939 = vrot.lane.b32.xlu1 %v15359_v32, %s13600_s30 }
 0x674   : > { %v4737_v40 = vadd.f32 %v4736_v31, %v4735_v47  ;;  %v4836_v44 = vadd.f32 %v4835_v14, %v4834_v61  ;;  %v4839_v29 = vsel %vm312_vm0, %v4779_v27, 0.0 }
 0x675   : > { %v4837_v36 = vsel %vm312_vm0, %v4778_v13, 0.0  ;;  %v15375_v22 = vpop.f32.mrb[62].mxu1 }
 0x676   : > { %v4838_v43 = vadd.f32 %v4837_v36, %v4836_v44  ;;  %v15377_v41 = vpop.f32.mrb[63].mxu1  ;;  %v4739_v6 = vadd.f32 %v4738_v62, %v4737_v40  ;;  %v4781_v49 = vmul.f32 %v15375_v22, %v15375_v22  ;;  %v4742_v38 = vsel %vm312_vm0, %v15375_v22, 0.0 }
 0x677   : > { %v4740_v7 = vsel %vm312_vm0, %v15377_v41, 0.0  ;;  %v4780_v45 = vmul.f32 %v15377_v41, %v15377_v41  ;;  %4945 = vrot.lane.b32.xlu0 %v15375_v22, %s13600_s30  ;;  %4943 = vrot.lane.b32.xlu1 %v15377_v41, %s13600_s30 }
 0x678   : > { %v4741_v63 = vadd.f32 %v4740_v7, %v4739_v6  ;;  %v4840_v24 = vadd.f32 %v4839_v29, %v4838_v43  ;;  %v4843_v8 = vsel %vm312_vm0, %v4781_v49, 0.0 }
 0x679   : > { %v4841_v53 = vsel %vm312_vm0, %v4780_v45, 0.0 }
 0x67a   : > { %v4842_v34 = vadd.f32 %v4841_v53, %v4840_v24  ;;  %v4743_v51 = vadd.f32 %v4742_v38, %v4741_v63 }
 0x67c   : > { %v4744_v39 = vrot.slane %v4743_v51, 4  ;;  %v4844_v50 = vadd.f32 %v4843_v8, %v4842_v34 }
 0x67e   : > { %v4745_v59 = vadd.f32 %v4744_v39, %v4743_v51  ;;  %v4845_v9 = vrot.slane %v4844_v50, 4 }
 0x680   : > { %v4746_v26 = vrot.slane %v4745_v59, 2  ;;  %v4846_v58 = vadd.f32 %v4845_v9, %v4844_v50 }
 0x682   : > { %v4747_v11 = vadd.f32 %v4746_v26, %v4745_v59  ;;  %v4847_v28 = vrot.slane %v4846_v58, 2 }
 0x684   : > { %v4748_v35 = vrot.slane %v4747_v11, 1  ;;  %v4848_v61 = vadd.f32 %v4847_v28, %v4846_v58 }
 0x686   : > { %v4749_v47 = vadd.f32 %v4748_v35, %v4747_v11  ;;  %v4849_v14 = vrot.slane %v4848_v61, 1 }
 0x688   : > { %5094 = vrot.lane.b32.xlu1 %v4749_v47, %s13600_s30  ;;  %v15395_v27 = vadd.f32 %v4849_v14, %v4848_v61  ;;  %v5083_v31 = vsel %vm716_vm1, %v4749_v47, 0.0 }
 0x68a   : > { %5118 = vrot.lane.b32.xlu0 %v15395_v27, %s13600_s30 }
 0x6a9   : > { %5084 = vadd.xlane.f32.xlu0 %v5083_v31 }
 0x6ac   : > { %v4886_v13 = vpop.permute.xlu1 %4885 }
 0x6ad   : > { %v4980_v40 = vmul.f32 %v15104_v4, %v4886_v13  ;;  %v4884_v44 = vpop.permute.xlu0 %4883 }
 0x6ae   : > { %v4979_v62 = vmul.f32 %v4884_v44, %v15112_v12 }
 0x6af   : > { %v5012_v36 = vsel %vm643_vm2, %v4980_v40, 0.0 }
 0x6b0   : > { %v5011_v43 = vsel %vm643_vm2, %v4979_v62, 0.0 }
 0x6b1   : > { %v5013_v6 = vadd.f32 %v5012_v36, %v5011_v43  ;;  %v4890_v29 = vpop.permute.xlu0 %4889  ;;  %v4888_v49 = vpop.permute.xlu1 %4887 }
 0x6b2   : > { %v4982_v7 = vmul.f32 %v15124_v0, %v4890_v29  ;;  %v4981_v45 = vmul.f32 %v4888_v49, %v15126_v3 }
 0x6b4   : > { %v5014_v63 = vsel %vm643_vm2, %v4981_v45, 0.0  ;;  %v5016_v34 = vsel %vm643_vm2, %v4982_v7, 0.0 }
 0x6b5   : > { %v5015_v24 = vadd.f32 %v5014_v63, %v5013_v6  ;;  %v4894_v38 = vpop.permute.xlu0 %4893  ;;  %v4892_v53 = vpop.permute.xlu1 %4891 }
 0x6b6   : > { %v4984_v12 = vmul.f32 %v15141_v25, %v4894_v38  ;;  %v4983_v51 = vmul.f32 %v4892_v53, %v15143_v52 }
 0x6b7   : > { %v5017_v8 = vadd.f32 %v5016_v34, %v5015_v24 }
 0x6b8   : > { %v5018_v39 = vsel %vm643_vm2, %v4983_v51, 0.0  ;;  %v5020_v26 = vsel %vm643_vm2, %v4984_v12, 0.0 }
 0x6b9   : > { %v5019_v50 = vadd.f32 %v5018_v39, %v5017_v8  ;;  %v4898_v59 = vpop.permute.xlu0 %4897  ;;  %v4896_v9 = vpop.permute.xlu1 %4895 }
 0x6ba   : > { %v4986_v58 = vmul.f32 %v15159_v37, %v4898_v59  ;;  %v4985_v11 = vmul.f32 %v4896_v9, %v15161_v48 }
 0x6bb   : > { %v5021_v28 = vadd.f32 %v5020_v26, %v5019_v50 }
 0x6bc   : > { %v5022_v35 = vsel %vm643_vm2, %v4985_v11, 0.0  ;;  %v5024_v31 = vsel %vm643_vm2, %v4986_v58, 0.0 }
 0x6bd   : > { %v5023_v61 = vadd.f32 %v5022_v35, %v5021_v28  ;;  %v4902_v47 = vpop.permute.xlu0 %4901  ;;  %v4900_v14 = vpop.permute.xlu1 %4899 }
 0x6be   : > { %v4988_v13 = vmul.f32 %v15177_v57, %v4902_v47  ;;  %v4987_v40 = vmul.f32 %v4900_v14, %v15179_v10 }
 0x6bf   : > { %v5025_v44 = vadd.f32 %v5024_v31, %v5023_v61 }
 0x6c0   : > { %v5026_v62 = vsel %vm643_vm2, %v4987_v40, 0.0  ;;  %v5028_v29 = vsel %vm643_vm2, %v4988_v13, 0.0 }
 0x6c1   : > { %v5027_v36 = vadd.f32 %v5026_v62, %v5025_v44  ;;  %v4906_v43 = vpop.permute.xlu0 %4905  ;;  %v4904_v6 = vpop.permute.xlu1 %4903 }
 0x6c2   : > { %v4990_v49 = vmul.f32 %v15195_v19, %v4906_v43  ;;  %v4989_v7 = vmul.f32 %v4904_v6, %v15197_v2 }
 0x6c3   : > { %v5029_v45 = vadd.f32 %v5028_v29, %v5027_v36 }
 0x6c4   : > { %v5030_v63 = vsel %vm643_vm2, %v4989_v7, 0.0  ;;  %v5032_v34 = vsel %vm643_vm2, %v4990_v49, 0.0 }
 0x6c5   : > { %v5031_v24 = vadd.f32 %v5030_v63, %v5029_v45  ;;  %v4910_v38 = vpop.permute.xlu0 %4909  ;;  %v4908_v53 = vpop.permute.xlu1 %4907 }
 0x6c6   : > { %v4992_v12 = vmul.f32 %v15213_v18, %v4910_v38  ;;  %v4991_v51 = vmul.f32 %v4908_v53, %v15215_v20 }
 0x6c7   : > { %v5033_v8 = vadd.f32 %v5032_v34, %v5031_v24 }
 0x6c8   : > { %v5034_v39 = vsel %vm643_vm2, %v4991_v51, 0.0  ;;  %v5036_v26 = vsel %vm643_vm2, %v4992_v12, 0.0 }
 0x6c9   : > { %v5035_v50 = vadd.f32 %v5034_v39, %v5033_v8  ;;  %v4914_v59 = vpop.permute.xlu0 %4913  ;;  %v4912_v9 = vpop.permute.xlu1 %4911 }
 0x6ca   : > { %v4994_v58 = vmul.f32 %v15231_v42, %v4914_v59  ;;  %v4993_v11 = vmul.f32 %v4912_v9, %v15233_v5 }
 0x6cb   : > { %v5037_v28 = vadd.f32 %v5036_v26, %v5035_v50 }
 0x6cc   : > { %v5038_v35 = vsel %vm643_vm2, %v4993_v11, 0.0  ;;  %v5040_v31 = vsel %vm643_vm2, %v4994_v58, 0.0 }
 0x6cd   : > { %v5039_v61 = vadd.f32 %v5038_v35, %v5037_v28  ;;  %v4918_v47 = vpop.permute.xlu0 %4917  ;;  %v4916_v14 = vpop.permute.xlu1 %4915 }
 0x6ce   : > { %v4996_v13 = vmul.f32 %v15249_v33, %v4918_v47  ;;  %v4995_v40 = vmul.f32 %v4916_v14, %v15251_v60 }
 0x6cf   : > { %v5041_v44 = vadd.f32 %v5040_v31, %v5039_v61 }
 0x6d0   : > { %v5042_v62 = vsel %vm643_vm2, %v4995_v40, 0.0  ;;  %v5044_v29 = vsel %vm643_vm2, %v4996_v13, 0.0 }
 0x6d1   : > { %v5043_v36 = vadd.f32 %v5042_v62, %v5041_v44  ;;  %v4922_v43 = vpop.permute.xlu0 %4921  ;;  %v4920_v6 = vpop.permute.xlu1 %4919 }
 0x6d2   : > { %v4998_v49 = vmul.f32 %v15267_v16, %v4922_v43  ;;  %v4997_v7 = vmul.f32 %v4920_v6, %v15269_v21 }
 0x6d3   : > { %v5045_v45 = vadd.f32 %v5044_v29, %v5043_v36 }
 0x6d4   : > { %v5046_v63 = vsel %vm643_vm2, %v4997_v7, 0.0  ;;  %v5048_v34 = vsel %vm643_vm2, %v4998_v49, 0.0 }
 0x6d5   : > { %v5047_v24 = vadd.f32 %v5046_v63, %v5045_v45  ;;  %v4926_v38 = vpop.permute.xlu0 %4925  ;;  %v4924_v53 = vpop.permute.xlu1 %4923 }
 0x6d6   : > { %v5000_v12 = vmul.f32 %v15285_v55, %v4926_v38  ;;  %v4999_v51 = vmul.f32 %v4924_v53, %v15287_v15 }
 0x6d7   : > { %v5049_v8 = vadd.f32 %v5048_v34, %v5047_v24 }
 0x6d8   : > { %v5050_v39 = vsel %vm643_vm2, %v4999_v51, 0.0  ;;  %v5052_v26 = vsel %vm643_vm2, %v5000_v12, 0.0 }
 0x6d9   : > { %v5051_v50 = vadd.f32 %v5050_v39, %v5049_v8  ;;  %v4930_v59 = vpop.permute.xlu0 %4929  ;;  %v4928_v9 = vpop.permute.xlu1 %4927 }
 0x6da   : > { %v5002_v58 = vmul.f32 %v15303_v17, %v4930_v59  ;;  %v5001_v11 = vmul.f32 %v4928_v9, %v15305_v1 }
 0x6db   : > { %v5053_v28 = vadd.f32 %v5052_v26, %v5051_v50 }
 0x6dc   : > { %v5054_v35 = vsel %vm643_vm2, %v5001_v11, 0.0  ;;  %v5056_v31 = vsel %vm643_vm2, %v5002_v58, 0.0 }
 0x6dd   : > { %v5055_v61 = vadd.f32 %v5054_v35, %v5053_v28  ;;  %v4934_v47 = vpop.permute.xlu0 %4933  ;;  %v4932_v14 = vpop.permute.xlu1 %4931 }
 0x6de   : > { %v5004_v13 = vmul.f32 %v15321_v56, %v4934_v47  ;;  %v5003_v40 = vmul.f32 %v4932_v14, %v15323_v30 }
 0x6df   : > { %v5057_v44 = vadd.f32 %v5056_v31, %v5055_v61  ;;  %v5107_v31 = vsel %vm716_vm1, %v15395_v27, 0.0 }
 0x6e0   : > { %v5058_v62 = vsel %vm643_vm2, %v5003_v40, 0.0  ;;  %v5060_v29 = vsel %vm643_vm2, %v5004_v13, 0.0 }
 0x6e1   : > { %v5059_v36 = vadd.f32 %v5058_v62, %v5057_v44  ;;  %v4938_v43 = vpop.permute.xlu0 %4937  ;;  %v4936_v6 = vpop.permute.xlu1 %4935 }
 0x6e2   : > { %v5006_v49 = vmul.f32 %v15339_v46, %v4938_v43  ;;  %v5005_v7 = vmul.f32 %v4936_v6, %v15341_v54 }
 0x6e3   : > { %v5061_v45 = vadd.f32 %v5060_v29, %v5059_v36 }
 0x6e4   : > { %v5062_v63 = vsel %vm643_vm2, %v5005_v7, 0.0  ;;  %v5064_v34 = vsel %vm643_vm2, %v5006_v49, 0.0 }
 0x6e5   : > { %v5063_v24 = vadd.f32 %v5062_v63, %v5061_v45  ;;  %v4942_v38 = vpop.permute.xlu0 %4941  ;;  %v4940_v53 = vpop.permute.xlu1 %4939 }
 0x6e6   : > { %v5008_v12 = vmul.f32 %v15357_v23, %v4942_v38  ;;  %v5007_v51 = vmul.f32 %v4940_v53, %v15359_v32 }
 0x6e7   : > { %v5065_v8 = vadd.f32 %v5064_v34, %v5063_v24 }
 0x6e8   : > { %v5066_v39 = vsel %vm643_vm2, %v5007_v51, 0.0  ;;  %v5068_v26 = vsel %vm643_vm2, %v5008_v12, 0.0 }
 0x6e9   : > { %v5067_v50 = vadd.f32 %v5066_v39, %v5065_v8  ;;  %v4946_v59 = vpop.permute.xlu0 %4945  ;;  %v4944_v9 = vpop.permute.xlu1 %4943 }
 0x6ea   : > { %v5010_v58 = vmul.f32 %v15375_v22, %v4946_v59  ;;  %v5009_v11 = vmul.f32 %v4944_v9, %v15377_v41 }
 0x6eb   : > { %v5069_v28 = vadd.f32 %v5068_v26, %v5067_v50 }
 0x6ec   : > { %v5070_v35 = vsel %vm643_vm2, %v5009_v11, 0.0  ;;  %v5072_v47 = vsel %vm643_vm2, %v5010_v58, 0.0 }
 0x6ed   : > { %v5071_v61 = vadd.f32 %v5070_v35, %v5069_v28 }
 0x6ef   : > { %v5073_v14 = vadd.f32 %v5072_v47, %v5071_v61 }
 0x6f1   : > { %5074 = vadd.xlane.f32.xlu1 %v5073_v14 }
 0x6f5   : > { %5108 = vadd.xlane.f32.xlu1 %v5107_v31 }
 0x6fa   : > { %v5095_v13 = vpop.permute.xlu1 %5094 }
 0x6fb   : > { %v5097_v40 = vsel %vm716_vm1, %v5095_v13, 0.0 }
 0x6fc   : > { %v5119_v44 = vpop.permute.xlu0 %5118  ;;  %5098 = vadd.xlane.f32.xlu0 %v5097_v40 }
 0x6fd   : > { %v5121_v62 = vsel %vm716_vm1, %v5119_v44, 0.0  ;;  %vm5867_vm1 = vcmask 130048  }
 0x700   : > { %5122 = vadd.xlane.f32.xlu0 %v5121_v62 }
 0x736   : > { %v5085_v36 = vpop.xlane.xlu0 %5084 }
 0x737   : > { %v5086_v43 = vrot.slane %v5085_v36, 4 }
 0x739   : > { %v5087_v6 = vadd.f32 %v5086_v43, %v5085_v36 }
 0x73b   : > { %v5088_v29 = vrot.slane %v5087_v6, 2 }
 0x73d   : > { %v5089_v24 = vadd.f32 %v5088_v29, %v5087_v6 }
 0x73f   : > { %v5090_v12 = vrot.slane %v5089_v24, 1 }
 0x741   : > { %v5091_v9 = vadd.f32 %v5090_v12, %v5089_v24 }
 0x77e   : > { %v5075_v49 = vpop.xlane.xlu1 %5074 }
 0x77f   : > { %v5076_v7 = vrot.slane %v5075_v49, 4 }
 0x781   : > { %v5077_v45 = vadd.f32 %v5076_v7, %v5075_v49  ;;  %v17364_v49 = vld [vmem:[#allocation4_spill] sm:$0xff] }
 0x782   : > { %v5109_v63 = vpop.xlane.xlu1 %5108  ;;  %vm6365_vm2 = vcmp.lt.s32.totalorder %v17364_v49, 8 }
 0x783   : > { %v5078_v38 = vrot.slane %v5077_v45, 2  ;;  %v5110_v27 = vrot.slane %v5109_v63, 4 }
 0x785   : > { %v5111_v53 = vadd.f32 %v5110_v27, %v5109_v63  ;;  %v5079_v34 = vadd.f32 %v5078_v38, %v5077_v45 }
 0x787   : > { %v5080_v51 = vrot.slane %v5079_v34, 1  ;;  %v5112_v8 = vrot.slane %v5111_v53, 2 }
 0x789   : > { %v5099_v39 = vpop.xlane.xlu0 %5098  ;;  %v5081_v50 = vadd.f32 %v5080_v51, %v5079_v34  ;;  %v5113_v11 = vadd.f32 %v5112_v8, %v5111_v53 }
 0x78a   : > { %v5100_v59 = vrot.slane %v5099_v39, 4 }
 0x78b   : > { %13495 = vpush %v5081_v50  ;;  %v5114_v14 = vrot.slane %v5113_v11, 1 }
 0x78c   : > { %v5101_v26 = vadd.f32 %v5100_v59, %v5099_v39  ;;  %13497 = vpush %v5091_v9 }
 0x78d   : > { %v5123_v58 = vpop.xlane.xlu0 %5122  ;;  %v5115_v62 = vadd.f32 %v5114_v14, %v5113_v11 }
 0x78e   : > { %v5102_v28 = vrot.slane %v5101_v26, 2  ;;  %v5124_v35 = vrot.slane %v5123_v58, 4 }
 0x790   : > { %v5125_v61 = vadd.f32 %v5124_v35, %v5123_v58  ;;  %v5103_v47 = vadd.f32 %v5102_v28, %v5101_v26  ;;  %v4680_v58 = vld [vmem:[%s17162_s5] sm:$0x7] }
 0x792   : > { %v5126_v31 = vrot.slane %v5125_v61, 2  ;;  %v5104_v13 = vrot.slane %v5103_v47, 1 }
 0x794   : > { %v5105_v40 = vadd.f32 %v5104_v13, %v5103_v47  ;;  %v5127_v44 = vadd.f32 %v5126_v31, %v5125_v61 }
 0x796   : > { %13499 = vpush %v5105_v40  ;;  %v5128_v36 = vrot.slane %v5127_v44, 1 }
 0x797   : > { %13501 = vpush %v5115_v62 }
 0x798   : > { %v5129_v43 = vadd.f32 %v5128_v36, %v5127_v44 }
 0x79a   : > { %13503 = vpush %v5129_v43 }
 0x7bc   : > { %s13496_s30 = spop %13495 }
 0x7bd   : > { %s13498_s21 = spop %13497  ;;  %s5141_s16 = smul.f32 0.0009765625, %s13496_s30 }
 0x7be   : > { %s5131_s23 = smul.f32 0.0009765625, %s13498_s21 }
 0x7c0   : > { %s5134_s11 = smul.f32 %s5131_s23, %s5131_s23  ;;  %v5182_v6 = vstv %s5131_s23 }
 0x7c7   : > { %s13500_s28 = spop %13499 }
 0x7c8   : > { %s5132_s12 = smul.f32 0.0009765625, %s13500_s28  ;;  %s13502_s13 = spop %13501 }
 0x7c9   : > { %s5133_s14 = smul.f32 0.0009765625, %s13502_s13 }
 0x7ca   : > { %s5142_s15 = smul.f32 %s5132_s12, %s5131_s23  ;;  %v5183_v29 = vstv %s5132_s12 }
 0x7cb   : > { %v15470_v7 = vsel %vm814_vm3, %v5182_v6, %v5183_v29  ;;  %v5185_v45 = vsel %vm814_vm3, %v5183_v29, %v5182_v6  ;;  %s13504_s17 = spop %13503  ;;  %s5135_s18 = ssub.f32 %s5133_s14, %s5134_s11  ;;  %v17365_v29 = vld [vmem:[#allocation7_spill] sm:$0xff] }
 0x7cc   : > { %s5137_s19 = smul.f32 0.0009765625, %s13504_s17  ;;  %s15474_s22 = ssub.f32 %s5141_s16, %s5142_s15 }
 0x7cd   : > { %s5138_s20 = smul.f32 %s5132_s12, %s5132_s12  ;;  %s15476_s9 = sadd.f32 0.0001, %s5135_s18 }
 0x7ce   : > { %s5145_s8 = smul.f32 %s15474_s22, %s15474_s22 }
 0x7cf   : > { %s5139_s27 = ssub.f32 %s5137_s19, %s5138_s20 }
 0x7d0   : > { %s5176_s19 = ssub.f32 0.0, %s15474_s22 }
 0x7d1   : > { %s15478_s10 = sadd.f32 0.0001, %s5139_s27 }
 0x7d3   : > { %s5144_s30 = smul.f32 %s15478_s10, %s15476_s9  ;;  %s5156_s28 = sadd.f32 %s15478_s10, %s15476_s9 }
 0x7d5   : > { %s5146_s21 = ssub.f32 %s5144_s30, %s5145_s8 }
 0x7d7   : > { %v5147_v63 = vstv %s5146_s21 }
 0x7d8   : > { %13546 = vrsqrt.f32 %v5147_v63  ;;  %vm5150_vm12 = vcmp.eq.f32.partialorder %v5147_v63, inf  ;;  %v5153_v27 = vand.u32 2147483648, %v5147_v63  ;;  %vm5152_vm13 = vcmp.eq.f32.partialorder %v5147_v63, 0.0 }
 0x7e2   : > { %v13547_v24 = vpop.eup %13546 }
 0x7e3   : > { %v5149_v38 = vmul.f32 %v13547_v24, %v5147_v63 }
 0x7e5   : > { %v5151_v53 = vsel %vm5150_vm12, %v5147_v63, %v5149_v38 }
 0x7e6   : > { %v5154_v34 = vsel %vm5152_vm13, %v5153_v27, %v5151_v53  ;;  %v17366_v53 = vld [vmem:[#allocation5_spill] sm:$0xff] }
 0x7e7   : > { %13505 = vpush %v5154_v34 }
 0x818   : > { %s13506_s23 = spop %13505 }
 0x819   : > { %s5157_s11 = smul.f32 2.0, %s13506_s23  ;;  %s5172_s15 = sadd.f32 %s13506_s23, %s15478_s10 }
 0x81a   : > { %s5174_s17 = sadd.f32 %s13506_s23, %s15476_s9  ;;  %s13603_s10 = smov 120  }
 0x81b   : > { %s5158_s12 = sadd.f32 %s5157_s11, %s5156_s28 }
 0x81d   : > { %v5159_v12 = vstv %s5158_s12 }
 0x81e   : > { %13548 = vrsqrt.f32 %v5159_v12  ;;  %vm5162_vm14 = vcmp.eq.f32.partialorder %v5159_v12, inf  ;;  %v5165_v39 = vand.u32 2147483648, %v5159_v12  ;;  %vm5164_vm15 = vcmp.eq.f32.partialorder %v5159_v12, 0.0 }
 0x828   : > { %v13549_v51 = vpop.eup %13548 }
 0x829   : > { %v5161_v8 = vmul.f32 %v13549_v51, %v5159_v12 }
 0x82b   : > { %v5163_v50 = vsel %vm5162_vm14, %v5159_v12, %v5161_v8 }
 0x82c   : > { %v5166_v59 = vsel %vm5164_vm15, %v5165_v39, %v5163_v50 }
 0x82d   : > { %13507 = vpush %v5166_v59 }
 0x85e   : > { %s13508_s13 = spop %13507 }
 0x85f   : > { %s5168_s14 = smul.f32 %s13508_s13, %s13506_s23 }
 0x861   : > { %v5169_v9 = vstv %s5168_s14 }
 0x862   : > { %13550 = vrcp.f32 %v5169_v9 }
 0x86c   : > { %v13551_v26 = vpop.eup %13550 }
 0x86d   : > { %13509 = vpush %v13551_v26 }
 0x89e   : > { %s13510_s16 = spop %13509 }
 0x89f   : > { %s5173_s18 = smul.f32 %s13510_s16, %s5172_s15 }
 0x8a0   : > { %s5175_s20 = smul.f32 %s13510_s16, %s5174_s17 }
 0x8a1   : > { %s5177_s30 = smul.f32 %s13510_s16, %s5176_s19  ;;  %v5178_v11 = vstv %s5173_s18 }
 0x8a2   : > { %v5179_v28 = vstv %s5175_s20 }
 0x8a3   : > { %v5180_v35 = vsel %vm814_vm3, %v5178_v11, %v5179_v28  ;;  %v5181_v61 = vsel %vm814_vm3, %v5179_v28, %v5178_v11  ;;  %v5187_v47 = vstv %s5177_s30 }
 0x8a4   : > { %v5186_v14 = vmul.f32 %v5180_v35, %v4680_v58  ;;  %v5188_v31 = vmul.f32 %v5187_v47, %v4680_v58  ;;  %v5193_v13 = vmul.f32 %v5181_v61, %v4680_v58 }
 0x8a6   : > { %v5190_v40 = vrot.slane %v5188_v31, 1  ;;  %v5195_v44 = vrot.slane %v5193_v13, 1 }
 0x8a8   : > { %v5197_v62 = vadd.f32 %v5195_v44, %v5188_v31  ;;  %v5192_v36 = vadd.f32 %v5190_v40, %v5186_v14 }
 0x8aa   : > { %v5203_v43 = vmul.f32 %v5197_v62, %v5185_v45  ;;  %v5198_v6 = vmul.f32 %v5192_v36, %v15470_v7  ;;  %v5211_v63 = vrot.slane %v5192_v36, %v17365_v29  ;;  %v5216_v24 = vrot.slane %v5197_v62, %v17365_v29 }
 0x8ac   : > { %v5205_v38 = vrot.slane %v5203_v43, 6  ;;  %v5200_v27 = vrot.slane %v5198_v6, 6  ;;  %v5212_v34 = vsel %vm849_vm8, %v5211_v63, 0.0  ;;  %v5217_v51 = vsel %vm855_vm9, %v5216_v24, 0.0 }
 0x8ad   : > { %v5218_v8 = vadd.f32 %v5217_v51, %v5212_v34 }
 0x8ae   : > { %v5202_v39 = vsub.f32 %v4680_v58, %v5200_v27 }
 0x8af   : > { %12307 = vmatprep.subr.mxu1 %v5218_v8 }
 0x8b0   : > { %v5207_v45 = vsub.f32 %v5202_v39, %v5205_v38  ;;  %12308 = vmatpush3.msra.mxu1 %v5218_v8 }
 0x8b1   : > { %12310 = vmatmul.mubr.msk.f32.vlgmr.msra.gmra.mrb[64].mxu1 %vm312_vm0, %v15104_v4  ;;  %v5544_v4 = vld [vmem:[%s17159_s2] sm:$0xff] }
 0x8b2   : > { %12312 = vmatprep.mubr.msk.f32.mxu1 %vm312_vm0, %v15126_v3  ;;  %12357 = vmatprep.subr.mxu0 %v5544_v4 }
 0x8b3   : > { %12358 = vmatpush3.msra.mxu0 %v5544_v4 }
 0x8b5   : > { %12313 = vmatmul.mubr.msk.f32.gmra.mrb[66].mxu1 %vm312_vm0, %v15124_v0  ;;  %v17368_v0 = vld [vmem:[#allocation8_spill] sm:$0xff] }
 0x8b6   : > { %12315 = vmatprep.mubr.msk.f32.mxu1 %vm312_vm0, %v15143_v52  ;;  %v15571_v3 = vrot.slane %v5207_v45, %v17368_v0 }
 0x8b9   : > { %12316 = vmatmul.mubr.msk.f32.gmra.mrb[68].mxu1 %vm312_vm0, %v15141_v25 }
 0x8ba   : > { %12318 = vmatprep.mubr.msk.f32.mxu1 %vm312_vm0, %v15161_v48 }
 0x8bd   : > { %12319 = vmatmul.mubr.msk.f32.gmra.mrb[70].mxu1 %vm312_vm0, %v15159_v37 }
 0x8be   : > { %12321 = vmatprep.mubr.msk.f32.mxu1 %vm312_vm0, %v15179_v10 }
 0x8c1   : > { %12322 = vmatmul.mubr.msk.f32.gmra.mrb[72].mxu1 %vm312_vm0, %v15177_v57 }
 0x8c2   : > { %12324 = vmatprep.mubr.msk.f32.mxu1 %vm312_vm0, %v15197_v2 }
 0x8c5   : > { %12325 = vmatmul.mubr.msk.f32.gmra.mrb[74].mxu1 %vm312_vm0, %v15195_v19 }
 0x8c6   : > { %12327 = vmatprep.mubr.msk.f32.mxu1 %vm312_vm0, %v15215_v20 }
 0x8c9   : > { %12328 = vmatmul.mubr.msk.f32.gmra.mrb[76].mxu1 %vm312_vm0, %v15213_v18 }
 0x8ca   : > { %12330 = vmatprep.mubr.msk.f32.mxu1 %vm312_vm0, %v15233_v5 }
 0x8cd   : > { %12331 = vmatmul.mubr.msk.f32.gmra.mrb[78].mxu1 %vm312_vm0, %v15231_v42 }
 0x8ce   : > { %12333 = vmatprep.mubr.msk.f32.mxu1 %vm312_vm0, %v15251_v60 }
 0x8d1   : > { %12334 = vmatmul.mubr.msk.f32.gmra.mrb[80].mxu1 %vm312_vm0, %v15249_v33 }
 0x8d2   : > { %12336 = vmatprep.mubr.msk.f32.mxu1 %vm312_vm0, %v15269_v21 }
 0x8d5   : > { %12337 = vmatmul.mubr.msk.f32.gmra.mrb[82].mxu1 %vm312_vm0, %v15267_v16 }
 0x8d6   : > { %12339 = vmatprep.mubr.msk.f32.mxu1 %vm312_vm0, %v15287_v15 }
 0x8d9   : > { %12340 = vmatmul.mubr.msk.f32.gmra.mrb[84].mxu1 %vm312_vm0, %v15285_v55 }
 0x8da   : > { %12342 = vmatprep.mubr.msk.f32.mxu1 %vm312_vm0, %v15305_v1 }
 0x8dd   : > { %12343 = vmatmul.mubr.msk.f32.gmra.mrb[86].mxu1 %vm312_vm0, %v15303_v17 }
 0x8de   : > { %12345 = vmatprep.mubr.msk.f32.mxu1 %vm312_vm0, %v15323_v30 }
 0x8e1   : > { %12346 = vmatmul.mubr.msk.f32.gmra.mrb[88].mxu1 %vm312_vm0, %v15321_v56 }
 0x8e2   : > { %12348 = vmatprep.mubr.msk.f32.mxu1 %vm312_vm0, %v15341_v54 }
 0x8e5   : > { %12349 = vmatmul.mubr.msk.f32.gmra.mrb[90].mxu1 %vm312_vm0, %v15339_v46 }
 0x8e6   : > { %12351 = vmatprep.mubr.msk.f32.mxu1 %vm312_vm0, %v15359_v32 }
 0x8e9   : > { %12352 = vmatmul.mubr.msk.f32.gmra.mrb[92].mxu1 %vm312_vm0, %v15357_v23 }
 0x8ea   : > { %12354 = vmatprep.mubr.msk.f32.mxu1 %vm312_vm0, %v15377_v41 }
 0x8ed   : > { %12355 = vmatmul.mubr.msk.f32.gmra.mrb[94].mxu1 %vm312_vm0, %v15375_v22 }
 0x984   : > { %v12311_v25 = vpop.f32.mrb[64].mxu1 }
 0x985   : > { %v5359_v52 = vadd.f32 %v12311_v25, %v15571_v3  ;;  %v5353_v37 = vpop.f32.mrb[65].mxu1 }
 0x986   : > { %v5354_v48 = vadd.f32 %v5353_v37, %v15571_v3 }
 0x987   : > { %v5513_v19 = vmax.f32 %v5359_v52, 0.0 }
 0x988   : > { %v5512_v57 = vmax.f32 %v5354_v48, 0.0  ;;  %v12314_v10 = vpop.f32.mrb[66].mxu1 }
 0x989   : > { %v5369_v2 = vadd.f32 %v12314_v10, %v15571_v3  ;;  %v5363_v18 = vpop.f32.mrb[67].mxu1 }
 0x98a   : > { %v5364_v20 = vadd.f32 %v5363_v18, %v15571_v3  ;;  %12359 = vmatprep.mubr.msk.f32.mxu0 %vm312_vm0, %v5512_v57 }
 0x98b   : > { %12360 = vmatmul.mubr.msk.f32.vlgmr.msra.gmra.mrb[0].mxu0 %vm312_vm0, %v5513_v19  ;;  %v5515_v33 = vmax.f32 %v5369_v2, 0.0 }
 0x98c   : > { %v5514_v42 = vmax.f32 %v5364_v20, 0.0  ;;  %v12317_v5 = vpop.f32.mrb[68].mxu1 }
 0x98d   : > { %v5379_v60 = vadd.f32 %v12317_v5, %v15571_v3  ;;  %v5373_v16 = vpop.f32.mrb[69].mxu1 }
 0x98e   : > { %v5374_v21 = vadd.f32 %v5373_v16, %v15571_v3  ;;  %12362 = vmatprep.mubr.msk.f32.mxu0 %vm312_vm0, %v5514_v42 }
 0x98f   : > { %12363 = vmatmul.mubr.msk.f32.gmra.mrb[2].mxu0 %vm312_vm0, %v5515_v33  ;;  %v5517_v17 = vmax.f32 %v5379_v60, 0.0 }
 0x990   : > { %v5516_v55 = vmax.f32 %v5374_v21, 0.0  ;;  %v12320_v15 = vpop.f32.mrb[70].mxu1 }
 0x991   : > { %v5389_v1 = vadd.f32 %v12320_v15, %v15571_v3  ;;  %v5383_v56 = vpop.f32.mrb[71].mxu1 }
 0x992   : > { %v5384_v30 = vadd.f32 %v5383_v56, %v15571_v3  ;;  %12365 = vmatprep.mubr.msk.f32.mxu0 %vm312_vm0, %v5516_v55 }
 0x993   : > { %12366 = vmatmul.mubr.msk.f32.gmra.mrb[4].mxu0 %vm312_vm0, %v5517_v17  ;;  %v5519_v23 = vmax.f32 %v5389_v1, 0.0 }
 0x994   : > { %v5518_v46 = vmax.f32 %v5384_v30, 0.0  ;;  %v12323_v54 = vpop.f32.mrb[72].mxu1 }
 0x995   : > { %v5399_v32 = vadd.f32 %v12323_v54, %v15571_v3  ;;  %v5393_v22 = vpop.f32.mrb[73].mxu1 }
 0x996   : > { %v5394_v41 = vadd.f32 %v5393_v22, %v15571_v3  ;;  %12368 = vmatprep.mubr.msk.f32.mxu0 %vm312_vm0, %v5518_v46 }
 0x997   : > { %12369 = vmatmul.mubr.msk.f32.gmra.mrb[6].mxu0 %vm312_vm0, %v5519_v23  ;;  %v5521_v59 = vmax.f32 %v5399_v32, 0.0 }
 0x998   : > { %v5520_v7 = vmax.f32 %v5394_v41, 0.0  ;;  %v12326_v50 = vpop.f32.mrb[74].mxu1 }
 0x999   : > { %v5409_v9 = vadd.f32 %v12326_v50, %v15571_v3  ;;  %v5403_v26 = vpop.f32.mrb[75].mxu1 }
 0x99a   : > { %v5404_v58 = vadd.f32 %v5403_v26, %v15571_v3  ;;  %12371 = vmatprep.mubr.msk.f32.mxu0 %vm312_vm0, %v5520_v7 }
 0x99b   : > { %12372 = vmatmul.mubr.msk.f32.gmra.mrb[8].mxu0 %vm312_vm0, %v5521_v59  ;;  %v5523_v35 = vmax.f32 %v5409_v9, 0.0 }
 0x99c   : > { %v5522_v11 = vmax.f32 %v5404_v58, 0.0  ;;  %v12329_v28 = vpop.f32.mrb[76].mxu1 }
 0x99d   : > { %v5419_v61 = vadd.f32 %v12329_v28, %v15571_v3  ;;  %v5413_v47 = vpop.f32.mrb[77].mxu1 }
 0x99e   : > { %v5414_v14 = vadd.f32 %v5413_v47, %v15571_v3  ;;  %12374 = vmatprep.mubr.msk.f32.mxu0 %vm312_vm0, %v5522_v11 }
 0x99f   : > { %12375 = vmatmul.mubr.msk.f32.gmra.mrb[10].mxu0 %vm312_vm0, %v5523_v35  ;;  %v5525_v40 = vmax.f32 %v5419_v61, 0.0  ;;  %v17369_v61 = vmov 0.0  }
 0x9a0   : > { %v5524_v31 = vmax.f32 %v5414_v14, 0.0  ;;  %v12332_v13 = vpop.f32.mrb[78].mxu1  ;;  %6709 = vst.msk [vmem:[#allocation3 + $0x7] sm:$0xff] %vm5867_vm1, %v17369_v61  ;;  %6710 = vst.msk [vmem:[#allocation3 + $0xf] sm:$0xff] %vm5867_vm1, %v17369_v61 }
 0x9a1   : > { %v5429_v44 = vadd.f32 %v12332_v13, %v15571_v3  ;;  %v5423_v62 = vpop.f32.mrb[79].mxu1  ;;  %6714 = vst.msk [vmem:[#allocation3 + $0x227] sm:$0xff] %vm5867_vm1, %v17369_v61  ;;  %6715 = vst.msk [vmem:[#allocation3 + $0x22f] sm:$0xff] %vm5867_vm1, %v17369_v61 }
 0x9a2   : > { %v5424_v36 = vadd.f32 %v5423_v62, %v15571_v3  ;;  %12377 = vmatprep.mubr.msk.f32.mxu0 %vm312_vm0, %v5524_v31 }
 0x9a3   : > { %12378 = vmatmul.mubr.msk.f32.gmra.mrb[12].mxu0 %vm312_vm0, %v5525_v40  ;;  %v5527_v63 = vmax.f32 %v5429_v44, 0.0 }
 0x9a4   : > { %v5526_v43 = vmax.f32 %v5424_v36, 0.0  ;;  %v12335_v6 = vpop.f32.mrb[80].mxu1 }
 0x9a5   : > { %v5439_v24 = vadd.f32 %v12335_v6, %v15571_v3  ;;  %v5433_v38 = vpop.f32.mrb[81].mxu1 }
 0x9a6   : > { %v5434_v27 = vadd.f32 %v5433_v38, %v15571_v3  ;;  %12380 = vmatprep.mubr.msk.f32.mxu0 %vm312_vm0, %v5526_v43 }
 0x9a7   : > { %12381 = vmatmul.mubr.msk.f32.gmra.mrb[14].mxu0 %vm312_vm0, %v5527_v63  ;;  %v5529_v51 = vmax.f32 %v5439_v24, 0.0 }
 0x9a8   : > { %v5528_v34 = vmax.f32 %v5434_v27, 0.0  ;;  %v12338_v12 = vpop.f32.mrb[82].mxu1 }
 0x9a9   : > { %v5449_v8 = vadd.f32 %v12338_v12, %v15571_v3  ;;  %v5443_v39 = vpop.f32.mrb[83].mxu1 }
 0x9aa   : > { %v5444_v45 = vadd.f32 %v5443_v39, %v15571_v3  ;;  %12383 = vmatprep.mubr.msk.f32.mxu0 %vm312_vm0, %v5528_v34 }
 0x9ab   : > { %12384 = vmatmul.mubr.msk.f32.gmra.mrb[16].mxu0 %vm312_vm0, %v5529_v51  ;;  %v5531_v52 = vmax.f32 %v5449_v8, 0.0 }
 0x9ac   : > { %v5530_v4 = vmax.f32 %v5444_v45, 0.0  ;;  %v12341_v25 = vpop.f32.mrb[84].mxu1 }
 0x9ad   : > { %v5459_v37 = vadd.f32 %v12341_v25, %v15571_v3  ;;  %v5453_v48 = vpop.f32.mrb[85].mxu1 }
 0x9ae   : > { %v5454_v57 = vadd.f32 %v5453_v48, %v15571_v3  ;;  %12386 = vmatprep.mubr.msk.f32.mxu0 %vm312_vm0, %v5530_v4 }
 0x9af   : > { %12387 = vmatmul.mubr.msk.f32.gmra.mrb[18].mxu0 %vm312_vm0, %v5531_v52  ;;  %v5533_v2 = vmax.f32 %v5459_v37, 0.0 }
 0x9b0   : > { %v5532_v10 = vmax.f32 %v5454_v57, 0.0  ;;  %v12344_v19 = vpop.f32.mrb[86].mxu1 }
 0x9b1   : > { %v5469_v18 = vadd.f32 %v12344_v19, %v15571_v3  ;;  %v5463_v20 = vpop.f32.mrb[87].mxu1 }
 0x9b2   : > { %v5464_v42 = vadd.f32 %v5463_v20, %v15571_v3  ;;  %12389 = vmatprep.mubr.msk.f32.mxu0 %vm312_vm0, %v5532_v10 }
 0x9b3   : > { %12390 = vmatmul.mubr.msk.f32.gmra.mrb[20].mxu0 %vm312_vm0, %v5533_v2  ;;  %v5535_v60 = vmax.f32 %v5469_v18, 0.0 }
 0x9b4   : > { %v5534_v5 = vmax.f32 %v5464_v42, 0.0  ;;  %v12347_v33 = vpop.f32.mrb[88].mxu1 }
 0x9b5   : > { %v5479_v16 = vadd.f32 %v12347_v33, %v15571_v3  ;;  %v5473_v21 = vpop.f32.mrb[89].mxu1 }
 0x9b6   : > { %v5474_v55 = vadd.f32 %v5473_v21, %v15571_v3  ;;  %12392 = vmatprep.mubr.msk.f32.mxu0 %vm312_vm0, %v5534_v5 }
 0x9b7   : > { %12393 = vmatmul.mubr.msk.f32.gmra.mrb[22].mxu0 %vm312_vm0, %v5535_v60  ;;  %v5537_v1 = vmax.f32 %v5479_v16, 0.0 }
 0x9b8   : > { %v5536_v15 = vmax.f32 %v5474_v55, 0.0  ;;  %v12350_v17 = vpop.f32.mrb[90].mxu1 }
 0x9b9   : > { %v5489_v56 = vadd.f32 %v12350_v17, %v15571_v3  ;;  %v5483_v30 = vpop.f32.mrb[91].mxu1 }
 0x9ba   : > { %v5484_v46 = vadd.f32 %v5483_v30, %v15571_v3  ;;  %12395 = vmatprep.mubr.msk.f32.mxu0 %vm312_vm0, %v5536_v15 }
 0x9bb   : > { %12396 = vmatmul.mubr.msk.f32.gmra.mrb[24].mxu0 %vm312_vm0, %v5537_v1  ;;  %v5539_v32 = vmax.f32 %v5489_v56, 0.0 }
 0x9bc   : > { %v5538_v54 = vmax.f32 %v5484_v46, 0.0  ;;  %v12353_v23 = vpop.f32.mrb[92].mxu1 }
 0x9bd   : > { %v5499_v22 = vadd.f32 %v12353_v23, %v15571_v3  ;;  %v5493_v41 = vpop.f32.mrb[93].mxu1 }
 0x9be   : > { %v5494_v7 = vadd.f32 %v5493_v41, %v15571_v3  ;;  %12398 = vmatprep.mubr.msk.f32.mxu0 %vm312_vm0, %v5538_v54 }
 0x9bf   : > { %12399 = vmatmul.mubr.msk.f32.gmra.mrb[26].mxu0 %vm312_vm0, %v5539_v32  ;;  %v5541_v9 = vmax.f32 %v5499_v22, 0.0 }
 0x9c0   : > { %v5540_v50 = vmax.f32 %v5494_v7, 0.0  ;;  %v12356_v59 = vpop.f32.mrb[94].mxu1 }
 0x9c1   : > { %v5509_v26 = vadd.f32 %v12356_v59, %v15571_v3  ;;  %v5503_v58 = vpop.f32.mrb[95].mxu1 }
 0x9c2   : > { %v5504_v11 = vadd.f32 %v5503_v58, %v15571_v3  ;;  %12401 = vmatprep.mubr.msk.f32.mxu0 %vm312_vm0, %v5540_v50 }
 0x9c3   : > { %12402 = vmatmul.mubr.msk.f32.gmra.mrb[28].mxu0 %vm312_vm0, %v5541_v9  ;;  %v5543_v35 = vmax.f32 %v5509_v26, 0.0 }
 0x9c4   : > { %v5542_v28 = vmax.f32 %v5504_v11, 0.0 }
 0x9c6   : > { %12404 = vmatprep.mubr.msk.f32.mxu0 %vm312_vm0, %v5542_v28 }
 0x9c7   : > { %12405 = vmatmul.mubr.msk.f32.gmra.mrb[30].mxu0 %vm312_vm0, %v5543_v35 }
 0xa5e   : > { %v15645_v3 = vpop.f32.mrb[0].mxu0 }
 0xa5f   : > { %v5869_v47 = vsel %vm5867_vm1, %v15645_v3, 0.0  ;;  %v5938_v14 = vmul.f32 %v15645_v3, %v15645_v3  ;;  %6072 = vrot.lane.b32.xlu0 %v15645_v3, %s13603_s10  ;;  %v15653_v31 = vpop.f32.mrb[1].mxu0 }
 0xa60   : > { %v5868_v13 = vsel %vm5867_vm1, %v15653_v31, 0.0  ;;  %v5937_v40 = vmul.f32 %v15653_v31, %v15653_v31  ;;  %6070 = vrot.lane.b32.xlu1 %v15653_v31, %s13603_s10  ;;  %12411 = vmatprep.mubr.msk.f32.mxu0 %vm5867_vm1, %v15653_v31 }
 0xa61   : > { %v5970_v44 = vsel %vm5867_vm1, %v5938_v14, 0.0  ;;  %v5870_v62 = vadd.f32 %v5869_v47, %v5868_v13 }
 0xa62   : > { %v5969_v36 = vsel %vm5867_vm1, %v5937_v40, 0.0  ;;  %v15665_v43 = vpop.f32.mrb[2].mxu0 }
 0xa63   : > { %v5971_v6 = vadd.f32 %v5970_v44, %v5969_v36  ;;  %v15667_v63 = vpop.f32.mrb[3].mxu0  ;;  %v5940_v24 = vmul.f32 %v15665_v43, %v15665_v43  ;;  %v5873_v12 = vsel %vm5867_vm1, %v15665_v43, 0.0 }
 0xa64   : > { %v5871_v38 = vsel %vm5867_vm1, %v15667_v63, 0.0  ;;  %v5939_v27 = vmul.f32 %v15667_v63, %v15667_v63  ;;  %6074 = vrot.lane.b32.xlu1 %v15667_v63, %s13603_s10 }
 0xa65   : > { %v5872_v34 = vadd.f32 %v5871_v38, %v5870_v62  ;;  %v5974_v25 = vsel %vm5867_vm1, %v5940_v24, 0.0 }
 0xa66   : > { %v5972_v51 = vsel %vm5867_vm1, %v5939_v27, 0.0  ;;  %v15680_v8 = vpop.f32.mrb[4].mxu0 }
 0xa67   : > { %v5973_v39 = vadd.f32 %v5972_v51, %v5971_v6  ;;  %v15682_v45 = vpop.f32.mrb[5].mxu0  ;;  %v5874_v4 = vadd.f32 %v5873_v12, %v5872_v34  ;;  %v5942_v52 = vmul.f32 %v15680_v8, %v15680_v8  ;;  %v5877_v19 = vsel %vm5867_vm1, %v15680_v8, 0.0 }
 0xa68   : > { %v5875_v37 = vsel %vm5867_vm1, %v15682_v45, 0.0  ;;  %v5941_v48 = vmul.f32 %v15682_v45, %v15682_v45  ;;  %6076 = vrot.lane.b32.xlu1 %v15665_v43, %s13603_s10  ;;  %6078 = vrot.lane.b32.xlu0 %v15682_v45, %s13603_s10 }
 0xa69   : > { %v5876_v57 = vadd.f32 %v5875_v37, %v5874_v4  ;;  %v5975_v10 = vadd.f32 %v5974_v25, %v5973_v39  ;;  %v5978_v33 = vsel %vm5867_vm1, %v5942_v52, 0.0 }
 0xa6a   : > { %v5976_v2 = vsel %vm5867_vm1, %v5941_v48, 0.0  ;;  %v15698_v18 = vpop.f32.mrb[6].mxu0 }
 0xa6b   : > { %v5977_v20 = vadd.f32 %v5976_v2, %v5975_v10  ;;  %v15700_v42 = vpop.f32.mrb[7].mxu0  ;;  %v5878_v5 = vadd.f32 %v5877_v19, %v5876_v57  ;;  %v5944_v60 = vmul.f32 %v15698_v18, %v15698_v18  ;;  %v5881_v17 = vsel %vm5867_vm1, %v15698_v18, 0.0 }
 0xa6c   : > { %v5879_v16 = vsel %vm5867_vm1, %v15700_v42, 0.0  ;;  %v5943_v21 = vmul.f32 %v15700_v42, %v15700_v42  ;;  %6080 = vrot.lane.b32.xlu1 %v15680_v8, %s13603_s10  ;;  %6082 = vrot.lane.b32.xlu0 %v15700_v42, %s13603_s10 }
 0xa6d   : > { %v5880_v55 = vadd.f32 %v5879_v16, %v5878_v5  ;;  %v5979_v15 = vadd.f32 %v5978_v33, %v5977_v20  ;;  %v5982_v23 = vsel %vm5867_vm1, %v5944_v60, 0.0 }
 0xa6e   : > { %v5980_v1 = vsel %vm5867_vm1, %v5943_v21, 0.0  ;;  %v15716_v56 = vpop.f32.mrb[8].mxu0 }
 0xa6f   : > { %v5981_v30 = vadd.f32 %v5980_v1, %v5979_v15  ;;  %v15718_v46 = vpop.f32.mrb[9].mxu0  ;;  %v5882_v54 = vadd.f32 %v5881_v17, %v5880_v55  ;;  %v5946_v32 = vmul.f32 %v15716_v56, %v15716_v56  ;;  %v5885_v59 = vsel %vm5867_vm1, %v15716_v56, 0.0 }
 0xa70   : > { %v5883_v22 = vsel %vm5867_vm1, %v15718_v46, 0.0  ;;  %v5945_v41 = vmul.f32 %v15718_v46, %v15718_v46  ;;  %6084 = vrot.lane.b32.xlu1 %v15698_v18, %s13603_s10  ;;  %6086 = vrot.lane.b32.xlu0 %v15718_v46, %s13603_s10 }
 0xa71   : > { %v5884_v7 = vadd.f32 %v5883_v22, %v5882_v54  ;;  %v5983_v50 = vadd.f32 %v5982_v23, %v5981_v30  ;;  %v5986_v35 = vsel %vm5867_vm1, %v5946_v32, 0.0 }
 0xa72   : > { %v5984_v9 = vsel %vm5867_vm1, %v5945_v41, 0.0  ;;  %v15734_v26 = vpop.f32.mrb[10].mxu0 }
 0xa73   : > { %v5985_v58 = vadd.f32 %v5984_v9, %v5983_v50  ;;  %v15736_v11 = vpop.f32.mrb[11].mxu0  ;;  %v5886_v28 = vadd.f32 %v5885_v59, %v5884_v7  ;;  %v5948_v47 = vmul.f32 %v15734_v26, %v15734_v26  ;;  %v5889_v62 = vsel %vm5867_vm1, %v15734_v26, 0.0 }
 0xa74   : > { %v5887_v14 = vsel %vm5867_vm1, %v15736_v11, 0.0  ;;  %v5947_v13 = vmul.f32 %v15736_v11, %v15736_v11  ;;  %6088 = vrot.lane.b32.xlu1 %v15716_v56, %s13603_s10  ;;  %6090 = vrot.lane.b32.xlu0 %v15736_v11, %s13603_s10 }
 0xa75   : > { %v5888_v40 = vadd.f32 %v5887_v14, %v5886_v28  ;;  %v5987_v44 = vadd.f32 %v5986_v35, %v5985_v58  ;;  %v5990_v34 = vsel %vm5867_vm1, %v5948_v47, 0.0 }
 0xa76   : > { %v5988_v36 = vsel %vm5867_vm1, %v5947_v13, 0.0  ;;  %v15752_v6 = vpop.f32.mrb[12].mxu0 }
 0xa77   : > { %v5989_v24 = vadd.f32 %v5988_v36, %v5987_v44  ;;  %v15754_v38 = vpop.f32.mrb[13].mxu0  ;;  %v5890_v27 = vadd.f32 %v5889_v62, %v5888_v40  ;;  %v5950_v12 = vmul.f32 %v15752_v6, %v15752_v6  ;;  %v5893_v52 = vsel %vm5867_vm1, %v15752_v6, 0.0 }
 0xa78   : > { %v5891_v51 = vsel %vm5867_vm1, %v15754_v38, 0.0  ;;  %v5949_v39 = vmul.f32 %v15754_v38, %v15754_v38  ;;  %6092 = vrot.lane.b32.xlu1 %v15734_v26, %s13603_s10  ;;  %6094 = vrot.lane.b32.xlu0 %v15754_v38, %s13603_s10 }
 0xa79   : > { %v5892_v4 = vadd.f32 %v5891_v51, %v5890_v27  ;;  %v5991_v25 = vadd.f32 %v5990_v34, %v5989_v24  ;;  %v5994_v2 = vsel %vm5867_vm1, %v5950_v12, 0.0 }
 0xa7a   : > { %v5992_v37 = vsel %vm5867_vm1, %v5949_v39, 0.0  ;;  %v15770_v48 = vpop.f32.mrb[14].mxu0 }
 0xa7b   : > { %v5993_v57 = vadd.f32 %v5992_v37, %v5991_v25  ;;  %v15772_v10 = vpop.f32.mrb[15].mxu0  ;;  %v5894_v19 = vadd.f32 %v5893_v52, %v5892_v4  ;;  %v5952_v20 = vmul.f32 %v15770_v48, %v15770_v48  ;;  %v5897_v21 = vsel %vm5867_vm1, %v15770_v48, 0.0 }
 0xa7c   : > { %v5895_v5 = vsel %vm5867_vm1, %v15772_v10, 0.0  ;;  %v5951_v33 = vmul.f32 %v15772_v10, %v15772_v10  ;;  %6096 = vrot.lane.b32.xlu1 %v15752_v6, %s13603_s10  ;;  %6098 = vrot.lane.b32.xlu0 %v15772_v10, %s13603_s10 }
 0xa7d   : > { %v5896_v60 = vadd.f32 %v5895_v5, %v5894_v19  ;;  %v5995_v16 = vadd.f32 %v5994_v2, %v5993_v57  ;;  %v5998_v54 = vsel %vm5867_vm1, %v5952_v20, 0.0 }
 0xa7e   : > { %v5996_v55 = vsel %vm5867_vm1, %v5951_v33, 0.0  ;;  %v15788_v15 = vpop.f32.mrb[16].mxu0 }
 0xa7f   : > { %v5997_v17 = vadd.f32 %v5996_v55, %v5995_v16  ;;  %v15790_v1 = vpop.f32.mrb[17].mxu0  ;;  %v5898_v30 = vadd.f32 %v5897_v21, %v5896_v60  ;;  %v5954_v23 = vmul.f32 %v15788_v15, %v15788_v15  ;;  %v5901_v50 = vsel %vm5867_vm1, %v15788_v15, 0.0 }
 0xa80   : > { %v5899_v32 = vsel %vm5867_vm1, %v15790_v1, 0.0  ;;  %v5953_v22 = vmul.f32 %v15790_v1, %v15790_v1  ;;  %6100 = vrot.lane.b32.xlu1 %v15770_v48, %s13603_s10  ;;  %6102 = vrot.lane.b32.xlu0 %v15790_v1, %s13603_s10 }
 0xa81   : > { %v5900_v41 = vadd.f32 %v5899_v32, %v5898_v30  ;;  %v5999_v7 = vadd.f32 %v5998_v54, %v5997_v17  ;;  %v6002_v47 = vsel %vm5867_vm1, %v5954_v23, 0.0 }
 0xa82   : > { %v6000_v59 = vsel %vm5867_vm1, %v5953_v22, 0.0  ;;  %v15806_v9 = vpop.f32.mrb[18].mxu0 }
 0xa83   : > { %v6001_v58 = vadd.f32 %v6000_v59, %v5999_v7  ;;  %v15808_v28 = vpop.f32.mrb[19].mxu0  ;;  %v5902_v35 = vadd.f32 %v5901_v50, %v5900_v41  ;;  %v5956_v14 = vmul.f32 %v15806_v9, %v15806_v9  ;;  %v5905_v36 = vsel %vm5867_vm1, %v15806_v9, 0.0 }
 0xa84   : > { %v5903_v13 = vsel %vm5867_vm1, %v15808_v28, 0.0  ;;  %v5955_v40 = vmul.f32 %v15808_v28, %v15808_v28  ;;  %6104 = vrot.lane.b32.xlu1 %v15788_v15, %s13603_s10  ;;  %6106 = vrot.lane.b32.xlu0 %v15808_v28, %s13603_s10 }
 0xa85   : > { %v5904_v44 = vadd.f32 %v5903_v13, %v5902_v35  ;;  %v6003_v62 = vadd.f32 %v6002_v47, %v6001_v58  ;;  %v6006_v39 = vsel %vm5867_vm1, %v5956_v14, 0.0 }
 0xa86   : > { %v6004_v24 = vsel %vm5867_vm1, %v5955_v40, 0.0  ;;  %v15824_v27 = vpop.f32.mrb[20].mxu0 }
 0xa87   : > { %v6005_v34 = vadd.f32 %v6004_v24, %v6003_v62  ;;  %v15826_v12 = vpop.f32.mrb[21].mxu0  ;;  %v5906_v51 = vadd.f32 %v5905_v36, %v5904_v44  ;;  %v5958_v4 = vmul.f32 %v15824_v27, %v15824_v27  ;;  %v5909_v19 = vsel %vm5867_vm1, %v15824_v27, 0.0 }
 0xa88   : > { %v5907_v25 = vsel %vm5867_vm1, %v15826_v12, 0.0  ;;  %v5957_v52 = vmul.f32 %v15826_v12, %v15826_v12  ;;  %6108 = vrot.lane.b32.xlu1 %v15806_v9, %s13603_s10  ;;  %6110 = vrot.lane.b32.xlu0 %v15826_v12, %s13603_s10 }
 0xa89   : > { %v5908_v37 = vadd.f32 %v5907_v25, %v5906_v51  ;;  %v6007_v57 = vadd.f32 %v6006_v39, %v6005_v34  ;;  %v6010_v16 = vsel %vm5867_vm1, %v5958_v4, 0.0 }
 0xa8a   : > { %v6008_v2 = vsel %vm5867_vm1, %v5957_v52, 0.0  ;;  %v15842_v20 = vpop.f32.mrb[22].mxu0 }
 0xa8b   : > { %v6009_v5 = vadd.f32 %v6008_v2, %v6007_v57  ;;  %v15844_v33 = vpop.f32.mrb[23].mxu0  ;;  %v5910_v60 = vadd.f32 %v5909_v19, %v5908_v37  ;;  %v5960_v21 = vmul.f32 %v15842_v20, %v15842_v20  ;;  %v5913_v23 = vsel %vm5867_vm1, %v15842_v20, 0.0 }
 0xa8c   : > { %v5911_v55 = vsel %vm5867_vm1, %v15844_v33, 0.0  ;;  %v5959_v17 = vmul.f32 %v15844_v33, %v15844_v33  ;;  %6112 = vrot.lane.b32.xlu1 %v15824_v27, %s13603_s10  ;;  %6114 = vrot.lane.b32.xlu0 %v15844_v33, %s13603_s10 }
 0xa8d   : > { %v5912_v30 = vadd.f32 %v5911_v55, %v5910_v60  ;;  %v6011_v54 = vadd.f32 %v6010_v16, %v6009_v5  ;;  %v6014_v59 = vsel %vm5867_vm1, %v5960_v21, 0.0 }
 0xa8e   : > { %v6012_v32 = vsel %vm5867_vm1, %v5959_v17, 0.0  ;;  %v15860_v22 = vpop.f32.mrb[24].mxu0 }
 0xa8f   : > { %v6013_v41 = vadd.f32 %v6012_v32, %v6011_v54  ;;  %v15862_v7 = vpop.f32.mrb[25].mxu0  ;;  %v5914_v50 = vadd.f32 %v5913_v23, %v5912_v30  ;;  %v5962_v58 = vmul.f32 %v15860_v22, %v15860_v22  ;;  %v5917_v40 = vsel %vm5867_vm1, %v15860_v22, 0.0 }
 0xa90   : > { %v5915_v35 = vsel %vm5867_vm1, %v15862_v7, 0.0  ;;  %v5961_v47 = vmul.f32 %v15862_v7, %v15862_v7  ;;  %6116 = vrot.lane.b32.xlu1 %v15842_v20, %s13603_s10  ;;  %6118 = vrot.lane.b32.xlu0 %v15862_v7, %s13603_s10 }
 0xa91   : > { %v5916_v14 = vadd.f32 %v5915_v35, %v5914_v50  ;;  %v6015_v13 = vadd.f32 %v6014_v59, %v6013_v41  ;;  %v6018_v51 = vsel %vm5867_vm1, %v5962_v58, 0.0 }
 0xa92   : > { %v6016_v44 = vsel %vm5867_vm1, %v5961_v47, 0.0  ;;  %v15878_v62 = vpop.f32.mrb[26].mxu0 }
 0xa93   : > { %v6017_v36 = vadd.f32 %v6016_v44, %v6015_v13  ;;  %v15880_v24 = vpop.f32.mrb[27].mxu0  ;;  %v5918_v34 = vadd.f32 %v5917_v40, %v5916_v14  ;;  %v5964_v39 = vmul.f32 %v15878_v62, %v15878_v62  ;;  %v5921_v57 = vsel %vm5867_vm1, %v15878_v62, 0.0 }
 0xa94   : > { %v5919_v4 = vsel %vm5867_vm1, %v15880_v24, 0.0  ;;  %v5963_v25 = vmul.f32 %v15880_v24, %v15880_v24  ;;  %6120 = vrot.lane.b32.xlu1 %v15860_v22, %s13603_s10  ;;  %6122 = vrot.lane.b32.xlu0 %v15880_v24, %s13603_s10 }
 0xa95   : > { %v5920_v52 = vadd.f32 %v5919_v4, %v5918_v34  ;;  %v6019_v37 = vadd.f32 %v6018_v51, %v6017_v36  ;;  %v6022_v21 = vsel %vm5867_vm1, %v5964_v39, 0.0 }
 0xa96   : > { %v6020_v19 = vsel %vm5867_vm1, %v5963_v25, 0.0  ;;  %v15896_v2 = vpop.f32.mrb[28].mxu0 }
 0xa97   : > { %v6021_v5 = vadd.f32 %v6020_v19, %v6019_v37  ;;  %v15898_v60 = vpop.f32.mrb[29].mxu0  ;;  %v5922_v16 = vadd.f32 %v5921_v57, %v5920_v52  ;;  %v5966_v55 = vmul.f32 %v15896_v2, %v15896_v2  ;;  %v5925_v32 = vsel %vm5867_vm1, %v15896_v2, 0.0 }
 0xa98   : > { %v5923_v17 = vsel %vm5867_vm1, %v15898_v60, 0.0  ;;  %v5965_v30 = vmul.f32 %v15898_v60, %v15898_v60  ;;  %6124 = vrot.lane.b32.xlu1 %v15878_v62, %s13603_s10  ;;  %6126 = vrot.lane.b32.xlu0 %v15898_v60, %s13603_s10 }
 0xa99   : > { %v5924_v54 = vadd.f32 %v5923_v17, %v5922_v16  ;;  %v6023_v23 = vadd.f32 %v6022_v21, %v6021_v5  ;;  %v6026_v47 = vsel %vm5867_vm1, %v5966_v55, 0.0 }
 0xa9a   : > { %v6024_v41 = vsel %vm5867_vm1, %v5965_v30, 0.0  ;;  %v15914_v50 = vpop.f32.mrb[30].mxu0 }
 0xa9b   : > { %v6025_v59 = vadd.f32 %v6024_v41, %v6023_v23  ;;  %v15916_v58 = vpop.f32.mrb[31].mxu0  ;;  %v5926_v35 = vadd.f32 %v5925_v32, %v5924_v54  ;;  %v5968_v14 = vmul.f32 %v15914_v50, %v15914_v50  ;;  %v5929_v34 = vsel %vm5867_vm1, %v15914_v50, 0.0 }
 0xa9c   : > { %v5927_v13 = vsel %vm5867_vm1, %v15916_v58, 0.0  ;;  %v5967_v40 = vmul.f32 %v15916_v58, %v15916_v58  ;;  %6128 = vrot.lane.b32.xlu1 %v15896_v2, %s13603_s10  ;;  %6130 = vrot.lane.b32.xlu0 %v15916_v58, %s13603_s10 }
 0xa9d   : > { %v5928_v44 = vadd.f32 %v5927_v13, %v5926_v35  ;;  %v6027_v36 = vadd.f32 %v6026_v47, %v6025_v59  ;;  %v6030_v25 = vsel %vm5867_vm1, %v5968_v14, 0.0 }
 0xa9e   : > { %v6028_v51 = vsel %vm5867_vm1, %v5967_v40, 0.0 }
 0xa9f   : > { %v5930_v39 = vadd.f32 %v5929_v34, %v5928_v44  ;;  %v6029_v4 = vadd.f32 %v6028_v51, %v6027_v36 }
 0xaa0   : > { %6132 = vrot.lane.b32.xlu1 %v15914_v50, %s13603_s10 }
 0xaa1   : > { %v5931_v52 = vrot.slane %v5930_v39, 4  ;;  %v6031_v37 = vadd.f32 %v6030_v25, %v6029_v4 }
 0xaa3   : > { %v5932_v57 = vadd.f32 %v5931_v52, %v5930_v39  ;;  %v6032_v19 = vrot.slane %v6031_v37, 4 }
 0xaa5   : > { %v5933_v5 = vrot.slane %v5932_v57, 2  ;;  %v6033_v16 = vadd.f32 %v6032_v19, %v6031_v37 }
 0xaa7   : > { %v5934_v21 = vadd.f32 %v5933_v5, %v5932_v57  ;;  %v6034_v55 = vrot.slane %v6033_v16, 2 }
 0xaa9   : > { %v5935_v17 = vrot.slane %v5934_v21, 1  ;;  %v6035_v30 = vadd.f32 %v6034_v55, %v6033_v16 }
 0xaab   : > { %v5936_v54 = vadd.f32 %v5935_v17, %v5934_v21  ;;  %v6036_v23 = vrot.slane %v6035_v30, 1 }
 0xaad   : > { %6281 = vrot.lane.b32.xlu0 %v5936_v54, %s13603_s10  ;;  %v15936_v32 = vadd.f32 %v6036_v23, %v6035_v30  ;;  %v6270_v47 = vsel %vm1196_vm11, %v5936_v54, 0.0 }
 0xaaf   : > { %6305 = vrot.lane.b32.xlu1 %v15936_v32, %s13603_s10 }
 0xad1   : > { %v6073_v41 = vpop.permute.xlu0 %6072 }
 0xad2   : > { %v6167_v59 = vmul.f32 %v15645_v3, %v6073_v41  ;;  %v6071_v35 = vpop.permute.xlu1 %6070 }
 0xad3   : > { %v6166_v14 = vmul.f32 %v6071_v35, %v15653_v31  ;;  %6271 = vadd.xlane.f32.xlu1 %v6270_v47 }
 0xad4   : > { %v6199_v13 = vsel %vm312_vm0, %v6167_v59, 0.0 }
 0xad5   : > { %v6198_v40 = vsel %vm312_vm0, %v6166_v14, 0.0 }
 0xad6   : > { %v6200_v44 = vadd.f32 %v6199_v13, %v6198_v40  ;;  %v6075_v36 = vpop.permute.xlu1 %6074 }
 0xad7   : > { %v6168_v34 = vmul.f32 %v6075_v36, %v15667_v63 }
 0xad9   : > { %v6201_v51 = vsel %vm312_vm0, %v6168_v34, 0.0 }
 0xada   : > { %v6202_v39 = vadd.f32 %v6201_v51, %v6200_v44  ;;  %v6077_v4 = vpop.permute.xlu1 %6076  ;;  %v6079_v25 = vpop.permute.xlu0 %6078 }
 0xadb   : > { %v6169_v52 = vmul.f32 %v15665_v43, %v6077_v4  ;;  %v6170_v37 = vmul.f32 %v6079_v25, %v15682_v45 }
 0xadd   : > { %v6203_v31 = vsel %vm312_vm0, %v6169_v52, 0.0  ;;  %v6205_v16 = vsel %vm312_vm0, %v6170_v37, 0.0 }
 0xade   : > { %v6204_v57 = vadd.f32 %v6203_v31, %v6202_v39  ;;  %v6081_v19 = vpop.permute.xlu1 %6080  ;;  %v6083_v5 = vpop.permute.xlu0 %6082 }
 0xadf   : > { %v6171_v21 = vmul.f32 %v15680_v8, %v6081_v19  ;;  %v6172_v55 = vmul.f32 %v6083_v5, %v15700_v42 }
 0xae0   : > { %v6206_v17 = vadd.f32 %v6205_v16, %v6204_v57 }
 0xae1   : > { %v6207_v30 = vsel %vm312_vm0, %v6171_v21, 0.0  ;;  %v6209_v59 = vsel %vm312_vm0, %v6172_v55, 0.0 }
 0xae2   : > { %v6208_v54 = vadd.f32 %v6207_v30, %v6206_v17  ;;  %v6085_v23 = vpop.permute.xlu1 %6084  ;;  %v6087_v41 = vpop.permute.xlu0 %6086 }
 0xae3   : > { %v6173_v35 = vmul.f32 %v15698_v18, %v6085_v23  ;;  %v6174_v47 = vmul.f32 %v6087_v41, %v15718_v46 }
 0xae4   : > { %v6210_v14 = vadd.f32 %v6209_v59, %v6208_v54 }
 0xae5   : > { %v6211_v13 = vsel %vm312_vm0, %v6173_v35, 0.0  ;;  %v6213_v34 = vsel %vm312_vm0, %v6174_v47, 0.0 }
 0xae6   : > { %v6212_v40 = vadd.f32 %v6211_v13, %v6210_v14  ;;  %v6089_v44 = vpop.permute.xlu1 %6088  ;;  %v6091_v36 = vpop.permute.xlu0 %6090 }
 0xae7   : > { %v6175_v51 = vmul.f32 %v15716_v56, %v6089_v44  ;;  %v6176_v39 = vmul.f32 %v6091_v36, %v15736_v11 }
 0xae8   : > { %v6214_v4 = vadd.f32 %v6213_v34, %v6212_v40 }
 0xae9   : > { %v6215_v25 = vsel %vm312_vm0, %v6175_v51, 0.0  ;;  %v6217_v57 = vsel %vm312_vm0, %v6176_v39, 0.0 }
 0xaea   : > { %v6216_v52 = vadd.f32 %v6215_v25, %v6214_v4  ;;  %v6093_v37 = vpop.permute.xlu1 %6092  ;;  %v6095_v31 = vpop.permute.xlu0 %6094 }
 0xaeb   : > { %v6177_v19 = vmul.f32 %v15734_v26, %v6093_v37  ;;  %v6178_v5 = vmul.f32 %v6095_v31, %v15754_v38 }
 0xaec   : > { %v6218_v16 = vadd.f32 %v6217_v57, %v6216_v52 }
 0xaed   : > { %v6219_v21 = vsel %vm312_vm0, %v6177_v19, 0.0  ;;  %v6221_v54 = vsel %vm312_vm0, %v6178_v5, 0.0 }
 0xaee   : > { %v6220_v55 = vadd.f32 %v6219_v21, %v6218_v16  ;;  %v6097_v17 = vpop.permute.xlu1 %6096  ;;  %v6099_v30 = vpop.permute.xlu0 %6098 }
 0xaef   : > { %v6179_v23 = vmul.f32 %v15752_v6, %v6097_v17  ;;  %v6180_v41 = vmul.f32 %v6099_v30, %v15772_v10 }
 0xaf0   : > { %v6222_v59 = vadd.f32 %v6221_v54, %v6220_v55 }
 0xaf1   : > { %v6223_v35 = vsel %vm312_vm0, %v6179_v23, 0.0  ;;  %v6225_v40 = vsel %vm312_vm0, %v6180_v41, 0.0 }
 0xaf2   : > { %v6224_v47 = vadd.f32 %v6223_v35, %v6222_v59  ;;  %v6101_v14 = vpop.permute.xlu1 %6100  ;;  %v6103_v13 = vpop.permute.xlu0 %6102 }
 0xaf3   : > { %v6181_v44 = vmul.f32 %v15770_v48, %v6101_v14  ;;  %v6182_v36 = vmul.f32 %v6103_v13, %v15790_v1 }
 0xaf4   : > { %v6226_v34 = vadd.f32 %v6225_v40, %v6224_v47 }
 0xaf5   : > { %v6227_v51 = vsel %vm312_vm0, %v6181_v44, 0.0  ;;  %v6229_v52 = vsel %vm312_vm0, %v6182_v36, 0.0 }
 0xaf6   : > { %v6228_v39 = vadd.f32 %v6227_v51, %v6226_v34  ;;  %v6105_v4 = vpop.permute.xlu1 %6104  ;;  %v6107_v25 = vpop.permute.xlu0 %6106 }
 0xaf7   : > { %v6183_v37 = vmul.f32 %v15788_v15, %v6105_v4  ;;  %v6184_v31 = vmul.f32 %v6107_v25, %v15808_v28 }
 0xaf8   : > { %v6230_v57 = vadd.f32 %v6229_v52, %v6228_v39 }
 0xaf9   : > { %v6231_v19 = vsel %vm312_vm0, %v6183_v37, 0.0  ;;  %v6233_v55 = vsel %vm312_vm0, %v6184_v31, 0.0 }
 0xafa   : > { %v6232_v5 = vadd.f32 %v6231_v19, %v6230_v57  ;;  %v6109_v16 = vpop.permute.xlu1 %6108  ;;  %v6111_v21 = vpop.permute.xlu0 %6110 }
 0xafb   : > { %v6185_v17 = vmul.f32 %v15806_v9, %v6109_v16  ;;  %v6186_v30 = vmul.f32 %v6111_v21, %v15826_v12 }
 0xafc   : > { %v6234_v54 = vadd.f32 %v6233_v55, %v6232_v5 }
 0xafd   : > { %v6235_v23 = vsel %vm312_vm0, %v6185_v17, 0.0  ;;  %v6237_v47 = vsel %vm312_vm0, %v6186_v30, 0.0 }
 0xafe   : > { %v6236_v41 = vadd.f32 %v6235_v23, %v6234_v54  ;;  %v6113_v59 = vpop.permute.xlu1 %6112  ;;  %v6115_v35 = vpop.permute.xlu0 %6114 }
 0xaff   : > { %v6187_v14 = vmul.f32 %v15824_v27, %v6113_v59  ;;  %v6188_v13 = vmul.f32 %v6115_v35, %v15844_v33 }
 0xb00   : > { %v6238_v40 = vadd.f32 %v6237_v47, %v6236_v41 }
 0xb01   : > { %v6239_v44 = vsel %vm312_vm0, %v6187_v14, 0.0  ;;  %v6241_v39 = vsel %vm312_vm0, %v6188_v13, 0.0 }
 0xb02   : > { %v6240_v36 = vadd.f32 %v6239_v44, %v6238_v40  ;;  %v6117_v34 = vpop.permute.xlu1 %6116  ;;  %v6119_v51 = vpop.permute.xlu0 %6118 }
 0xb03   : > { %v6189_v4 = vmul.f32 %v15842_v20, %v6117_v34  ;;  %v6190_v25 = vmul.f32 %v6119_v51, %v15862_v7 }
 0xb04   : > { %v6242_v52 = vadd.f32 %v6241_v39, %v6240_v36 }
 0xb05   : > { %v6243_v37 = vsel %vm312_vm0, %v6189_v4, 0.0  ;;  %v6245_v5 = vsel %vm312_vm0, %v6190_v25, 0.0 }
 0xb06   : > { %v6244_v31 = vadd.f32 %v6243_v37, %v6242_v52  ;;  %v6121_v57 = vpop.permute.xlu1 %6120  ;;  %v6123_v19 = vpop.permute.xlu0 %6122 }
 0xb07   : > { %v6191_v16 = vmul.f32 %v15860_v22, %v6121_v57  ;;  %v6192_v21 = vmul.f32 %v6123_v19, %v15880_v24 }
 0xb08   : > { %v6246_v55 = vadd.f32 %v6245_v5, %v6244_v31 }
 0xb09   : > { %v6247_v17 = vsel %vm312_vm0, %v6191_v16, 0.0  ;;  %v6249_v41 = vsel %vm312_vm0, %v6192_v21, 0.0 }
 0xb0a   : > { %v6248_v30 = vadd.f32 %v6247_v17, %v6246_v55  ;;  %v6125_v54 = vpop.permute.xlu1 %6124  ;;  %v6127_v23 = vpop.permute.xlu0 %6126 }
 0xb0b   : > { %v6193_v59 = vmul.f32 %v15878_v62, %v6125_v54  ;;  %v6194_v35 = vmul.f32 %v6127_v23, %v15898_v60 }
 0xb0c   : > { %v6250_v47 = vadd.f32 %v6249_v41, %v6248_v30  ;;  %v6294_v30 = vsel %vm1196_vm11, %v15936_v32, 0.0 }
 0xb0d   : > { %v6251_v14 = vsel %vm312_vm0, %v6193_v59, 0.0  ;;  %v6253_v36 = vsel %vm312_vm0, %v6194_v35, 0.0 }
 0xb0e   : > { %v6252_v13 = vadd.f32 %v6251_v14, %v6250_v47  ;;  %v6129_v40 = vpop.permute.xlu1 %6128  ;;  %v6131_v44 = vpop.permute.xlu0 %6130 }
 0xb0f   : > { %v6195_v34 = vmul.f32 %v15896_v2, %v6129_v40  ;;  %v6196_v51 = vmul.f32 %v6131_v44, %v15916_v58 }
 0xb10   : > { %v6254_v39 = vadd.f32 %v6253_v36, %v6252_v13 }
 0xb11   : > { %v6255_v4 = vsel %vm312_vm0, %v6195_v34, 0.0  ;;  %v6257_v37 = vsel %vm312_vm0, %v6196_v51, 0.0 }
 0xb12   : > { %v6256_v25 = vadd.f32 %v6255_v4, %v6254_v39  ;;  %v6133_v52 = vpop.permute.xlu1 %6132 }
 0xb13   : > { %v6197_v31 = vmul.f32 %v15914_v50, %v6133_v52 }
 0xb14   : > { %v6258_v57 = vadd.f32 %v6257_v37, %v6256_v25 }
 0xb15   : > { %v6259_v19 = vsel %vm312_vm0, %v6197_v31, 0.0 }
 0xb16   : > { %v6260_v5 = vadd.f32 %v6259_v19, %v6258_v57 }
 0xb18   : > { %6261 = vadd.xlane.f32.xlu0 %v6260_v5 }
 0xb1f   : > { %v6282_v16 = vpop.permute.xlu0 %6281 }
 0xb20   : > { %v6284_v21 = vsel %vm1196_vm11, %v6282_v16, 0.0 }
 0xb21   : > { %v6306_v55 = vpop.permute.xlu1 %6305  ;;  %6285 = vadd.xlane.f32.xlu0 %v6284_v21 }
 0xb22   : > { %v6308_v17 = vsel %vm1196_vm11, %v6306_v55, 0.0  ;;  %vm6718_vm11 = vcmask 122880  }
 0xb23   : > { %6309 = vadd.xlane.f32.xlu1 %v6308_v17  ;;  %6719 = vst.msk [vmem:[#allocation3 + $0x27] sm:$0x1] %vm6718_vm11, %v17369_v61  ;;  %6720 = vst.msk [vmem:[#allocation3 + $0x47] sm:$0x1] %vm6718_vm11, %v17369_v61 }
 0xb24   : > { %6721 = vst.msk [vmem:[#allocation3 + $0x67] sm:$0x1] %vm6718_vm11, %v17369_v61  ;;  %6722 = vst.msk [vmem:[#allocation3 + $0x87] sm:$0x1] %vm6718_vm11, %v17369_v61 }
 0xb25   : > { %6295 = vadd.xlane.f32.xlu0 %v6294_v30  ;;  %6723 = vst.msk [vmem:[#allocation3 + $0xa7] sm:$0x1] %vm6718_vm11, %v17369_v61  ;;  %6724 = vst.msk [vmem:[#allocation3 + $0xc7] sm:$0x1] %vm6718_vm11, %v17369_v61 }
 0xb26   : > { %6725 = vst.msk [vmem:[#allocation3 + $0xe7] sm:$0x1] %vm6718_vm11, %v17369_v61  ;;  %6726 = vst.msk [vmem:[#allocation3 + $0x107] sm:$0x1] %vm6718_vm11, %v17369_v61 }
 0xb27   : > { %6727 = vst.msk [vmem:[#allocation3 + $0x127] sm:$0x1] %vm6718_vm11, %v17369_v61  ;;  %6728 = vst.msk [vmem:[#allocation3 + $0x147] sm:$0x1] %vm6718_vm11, %v17369_v61 }
 0xb28   : > { %6729 = vst.msk [vmem:[#allocation3 + $0x167] sm:$0x1] %vm6718_vm11, %v17369_v61  ;;  %6730 = vst.msk [vmem:[#allocation3 + $0x187] sm:$0x1] %vm6718_vm11, %v17369_v61 }
 0xb29   : > { %6731 = vst.msk [vmem:[#allocation3 + $0x1a7] sm:$0x1] %vm6718_vm11, %v17369_v61  ;;  %6732 = vst.msk [vmem:[#allocation3 + $0x1c7] sm:$0x1] %vm6718_vm11, %v17369_v61 }
 0xb2a   : > { %6733 = vst.msk [vmem:[#allocation3 + $0x1e7] sm:$0x1] %vm6718_vm11, %v17369_v61  ;;  %6734 = vst.msk [vmem:[#allocation3 + $0x207] sm:$0x1] %vm6718_vm11, %v17369_v61 }
 0xb2b   : > { %6735 = vst.msk [vmem:[#allocation3 + $0x38] sm:$0x1] %vm6718_vm11, %v17369_v61  ;;  %6736 = vst.msk [vmem:[#allocation3 + $0x58] sm:$0x1] %vm6718_vm11, %v17369_v61 }
 0xb2c   : > { %6737 = vst.msk [vmem:[#allocation3 + $0x78] sm:$0x1] %vm6718_vm11, %v17369_v61  ;;  %6738 = vst.msk [vmem:[#allocation3 + $0x98] sm:$0x1] %vm6718_vm11, %v17369_v61 }
 0xb2d   : > { %6739 = vst.msk [vmem:[#allocation3 + $0xb8] sm:$0x1] %vm6718_vm11, %v17369_v61  ;;  %6740 = vst.msk [vmem:[#allocation3 + $0xd8] sm:$0x1] %vm6718_vm11, %v17369_v61 }
 0xb2e   : > { %6741 = vst.msk [vmem:[#allocation3 + $0xf8] sm:$0x1] %vm6718_vm11, %v17369_v61  ;;  %6742 = vst.msk [vmem:[#allocation3 + $0x118] sm:$0x1] %vm6718_vm11, %v17369_v61 }
 0xb2f   : > { %6743 = vst.msk [vmem:[#allocation3 + $0x138] sm:$0x1] %vm6718_vm11, %v17369_v61  ;;  %6744 = vst.msk [vmem:[#allocation3 + $0x158] sm:$0x1] %vm6718_vm11, %v17369_v61 }
 0xb30   : > { %6745 = vst.msk [vmem:[#allocation3 + $0x178] sm:$0x1] %vm6718_vm11, %v17369_v61  ;;  %6746 = vst.msk [vmem:[#allocation3 + $0x198] sm:$0x1] %vm6718_vm11, %v17369_v61 }
 0xb31   : > { %6747 = vst.msk [vmem:[#allocation3 + $0x1b8] sm:$0x1] %vm6718_vm11, %v17369_v61  ;;  %6748 = vst.msk [vmem:[#allocation3 + $0x1d8] sm:$0x1] %vm6718_vm11, %v17369_v61 }
 0xb32   : > { %6749 = vst.msk [vmem:[#allocation3 + $0x1f8] sm:$0x1] %vm6718_vm11, %v17369_v61  ;;  %6750 = vst.msk [vmem:[#allocation3 + $0x218] sm:$0x1] %vm6718_vm11, %v17369_v61 }
 0xb60   : > { %v6272_v54 = vpop.xlane.xlu1 %6271 }
 0xb61   : > { %v6273_v23 = vrot.slane %v6272_v54, 4 }
 0xb63   : > { %v6274_v41 = vadd.f32 %v6273_v23, %v6272_v54 }
 0xb65   : > { %v6275_v59 = vrot.slane %v6274_v41, 2 }
 0xb67   : > { %v6276_v13 = vadd.f32 %v6275_v59, %v6274_v41 }
 0xb69   : > { %v6277_v36 = vrot.slane %v6276_v13, 1 }
 0xb6b   : > { %v6278_v32 = vadd.f32 %v6277_v36, %v6276_v13 }
 0xba5   : > { %v6262_v35 = vpop.xlane.xlu0 %6261 }
 0xba6   : > { %v6263_v47 = vrot.slane %v6262_v35, 4 }
 0xba8   : > { %v6264_v14 = vadd.f32 %v6263_v47, %v6262_v35 }
 0xbaa   : > { %v6265_v40 = vrot.slane %v6264_v14, 2 }
 0xbac   : > { %v6266_v44 = vadd.f32 %v6265_v40, %v6264_v14 }
 0xbae   : > { %v6286_v34 = vpop.xlane.xlu0 %6285  ;;  %v6267_v51 = vrot.slane %v6266_v44, 1 }
 0xbaf   : > { %v6287_v39 = vrot.slane %v6286_v34, 4 }
 0xbb0   : > { %v6310_v4 = vpop.xlane.xlu1 %6309  ;;  %v6268_v25 = vadd.f32 %v6267_v51, %v6266_v44 }
 0xbb1   : > { %v6288_v52 = vadd.f32 %v6287_v39, %v6286_v34  ;;  %v6311_v37 = vrot.slane %v6310_v4, 4 }
 0xbb2   : > { %13511 = vpush %v6268_v25  ;;  %v6296_v31 = vpop.xlane.xlu0 %6295 }
 0xbb3   : > { %v6289_v57 = vrot.slane %v6288_v52, 2  ;;  %v6312_v19 = vadd.f32 %v6311_v37, %v6310_v4  ;;  %v6297_v5 = vrot.slane %v6296_v31, 4  ;;  %13513 = vpush %v6278_v32 }
 0xbb5   : > { %v6313_v16 = vrot.slane %v6312_v19, 2  ;;  %v6298_v21 = vadd.f32 %v6297_v5, %v6296_v31  ;;  %v6290_v55 = vadd.f32 %v6289_v57, %v6288_v52 }
 0xbb7   : > { %v6314_v17 = vadd.f32 %v6313_v16, %v6312_v19  ;;  %v6299_v30 = vrot.slane %v6298_v21, 2  ;;  %v6291_v54 = vrot.slane %v6290_v55, 1 }
 0xbb9   : > { %v6300_v23 = vadd.f32 %v6299_v30, %v6298_v21  ;;  %v6292_v41 = vadd.f32 %v6291_v54, %v6290_v55  ;;  %v6315_v59 = vrot.slane %v6314_v17, 1  ;;  %v5866_v55 = vld [vmem:[%s17163_s6] sm:$0x7]  ;;  %v13604_v54 = vmov 4294967288  }
 0xbbb   : > { %13515 = vpush %v6292_v41  ;;  %v6301_v35 = vrot.slane %v6300_v23, 1  ;;  %v6316_v14 = vadd.f32 %v6315_v59, %v6314_v17 }
 0xbbd   : > { %v6302_v47 = vadd.f32 %v6301_v35, %v6300_v23  ;;  %v6397_v23 = vsel %vm6365_vm2, 8, %v13604_v54 }
 0xbbf   : > { %13517 = vpush %v6302_v47 }
 0xbc0   : > { %13519 = vpush %v6316_v14 }
 0xbe3   : > { %s13512_s21 = spop %13511 }
 0xbe4   : > { %s13514_s23 = spop %13513  ;;  %s6328_s17 = smul.f32 0.00048828125, %s13512_s21 }
 0xbe5   : > { %s6318_s28 = smul.f32 0.00048828125, %s13514_s23 }
 0xbe7   : > { %v6370_v13 = vstv %s6318_s28  ;;  %s6321_s13 = smul.f32 %s6318_s28, %s6318_s28 }
 0xbec   : > { %s13516_s11 = spop %13515 }
 0xbed   : > { %s6319_s12 = smul.f32 0.00048828125, %s13516_s11 }
 0xbef   : > { %v6371_v40 = vstv %s6319_s12  ;;  %s6329_s14 = smul.f32 %s6319_s12, %s6318_s28 }
 0xbf0   : > { %v16012_v44 = vsel %vm6365_vm2, %v6370_v13, %v6371_v40  ;;  %v16016_v36 = vsel %vm6365_vm2, %v6371_v40, %v6370_v13  ;;  %s13518_s15 = spop %13517  ;;  %s6325_s20 = smul.f32 %s6319_s12, %s6319_s12  ;;  %v6396_v40 = vadd.s32 8, %v17366_v53 }
 0xbf1   : > { %s6320_s16 = smul.f32 0.00048828125, %s13518_s15  ;;  %s13520_s18 = spop %13519 }
 0xbf2   : > { %s16018_s27 = ssub.f32 %s6328_s17, %s6329_s14  ;;  %s6324_s8 = smul.f32 0.00048828125, %s13520_s18  ;;  %vm6399_vm7 = vcmp.eq.s32.totalorder %v6396_v40, %v17364_v49 }
 0xbf3   : > { %s6322_s19 = ssub.f32 %s6320_s16, %s6321_s13 }
 0xbf4   : > { %s6326_s22 = ssub.f32 %s6324_s8, %s6325_s20  ;;  %s6332_s10 = smul.f32 %s16018_s27, %s16018_s27 }
 0xbf5   : > { %s16020_s30 = sadd.f32 0.0001, %s6322_s19 }
 0xbf6   : > { %s16022_s9 = sadd.f32 0.0001, %s6326_s22 }
 0xbf7   : > { %s6363_s20 = ssub.f32 0.0, %s16018_s27  ;;  %s17056_s27 = scalar_lea.vmem %s17164_s7, %s11069_s26 }
 0xbf8   : > { %s6331_s23 = smul.f32 %s16022_s9, %s16020_s30  ;;  %s6343_s11 = sadd.f32 %s16022_s9, %s16020_s30 }
 0xbfa   : > { %s6333_s21 = ssub.f32 %s6331_s23, %s6332_s10 }
 0xbfc   : > { %v6334_v34 = vstv %s6333_s21 }
 0xbfd   : > { %13552 = vrsqrt.f32 %v6334_v34  ;;  %vm6337_vm3 = vcmp.eq.f32.partialorder %v6334_v34, inf  ;;  %v6340_v4 = vand.u32 2147483648, %v6334_v34  ;;  %vm6339_vm4 = vcmp.eq.f32.partialorder %v6334_v34, 0.0 }
 0xc07   : > { %v13553_v51 = vpop.eup %13552 }
 0xc08   : > { %v6336_v39 = vmul.f32 %v13553_v51, %v6334_v34 }
 0xc0a   : > { %v6338_v25 = vsel %vm6337_vm3, %v6334_v34, %v6336_v39  ;;  %v6398_v34 = vadd.s32 %v6397_v23, %v17364_v49  ;;  %v10763_v49 = vld [vmem:[%s17160_s3 + $0x10] sm:$0xff] }
 0xc0b   : > { %v6341_v52 = vsel %vm6339_vm4, %v6340_v4, %v6338_v25 }
 0xc0c   : > { %13521 = vpush %v6341_v52  ;;  %vm6406_vm9 = vcmp.eq.s32.totalorder %v17366_v53, %v6398_v34  ;;  %vm6407_vm10 = vcmp.eq.s32.totalorder %v6396_v40, %v6398_v34 }
 0xc3d   : > { %s13522_s28 = spop %13521 }
 0xc3e   : > { %s6344_s12 = smul.f32 2.0, %s13522_s28  ;;  %s6359_s16 = sadd.f32 %s13522_s28, %s16022_s9 }
 0xc3f   : > { %s6361_s18 = sadd.f32 %s13522_s28, %s16020_s30 }
 0xc40   : > { %s6345_s13 = sadd.f32 %s6344_s12, %s6343_s11 }
 0xc42   : > { %v6346_v37 = vstv %s6345_s13 }
 0xc43   : > { %13554 = vrsqrt.f32 %v6346_v37  ;;  %vm6349_vm5 = vcmp.eq.f32.partialorder %v6346_v37, inf  ;;  %v6352_v57 = vand.u32 2147483648, %v6346_v37  ;;  %vm6351_vm6 = vcmp.eq.f32.partialorder %v6346_v37, 0.0 }
 0xc4d   : > { %v13555_v32 = vpop.eup %13554 }
 0xc4e   : > { %v6348_v31 = vmul.f32 %v13555_v32, %v6346_v37 }
 0xc50   : > { %v6350_v19 = vsel %vm6349_vm5, %v6346_v37, %v6348_v31 }
 0xc51   : > { %v6353_v5 = vsel %vm6351_vm6, %v6352_v57, %v6350_v19 }
 0xc52   : > { %13523 = vpush %v6353_v5 }
 0xc83   : > { %s13524_s14 = spop %13523 }
 0xc84   : > { %s6355_s15 = smul.f32 %s13524_s14, %s13522_s28 }
 0xc86   : > { %v6356_v16 = vstv %s6355_s15 }
 0xc87   : > { %13556 = vrcp.f32 %v6356_v16 }
 0xc91   : > { %v13557_v21 = vpop.eup %13556 }
 0xc92   : > { %13525 = vpush %v13557_v21 }
 0xcc3   : > { %s13526_s17 = spop %13525 }
 0xcc4   : > { %s6360_s19 = smul.f32 %s13526_s17, %s6359_s16 }
 0xcc5   : > { %s6362_s8 = smul.f32 %s13526_s17, %s6361_s18 }
 0xcc6   : > { %s6364_s23 = smul.f32 %s13526_s17, %s6363_s20  ;;  %v6366_v17 = vstv %s6360_s19 }
 0xcc7   : > { %v6367_v30 = vstv %s6362_s8 }
 0xcc8   : > { %v6368_v41 = vsel %vm6365_vm2, %v6366_v17, %v6367_v30  ;;  %v6369_v59 = vsel %vm6365_vm2, %v6367_v30, %v6366_v17  ;;  %v6375_v35 = vstv %s6364_s23 }
 0xcc9   : > { %v6374_v47 = vmul.f32 %v6368_v41, %v5866_v55  ;;  %v6376_v14 = vmul.f32 %v6375_v35, %v5866_v55  ;;  %v6381_v13 = vmul.f32 %v6369_v59, %v5866_v55 }
 0xccb   : > { %v6378_v51 = vrot.slane %v6376_v14, 1  ;;  %v6383_v39 = vrot.slane %v6381_v13, 1 }
 0xccd   : > { %v6380_v4 = vadd.f32 %v6378_v51, %v6374_v47  ;;  %v6385_v25 = vadd.f32 %v6383_v39, %v6376_v14 }
 0xccf   : > { %v6386_v52 = vmul.f32 %v6380_v4, %v16012_v44  ;;  %v6391_v37 = vmul.f32 %v6385_v25, %v16016_v36  ;;  %v6411_v32 = vrot.slane %v6385_v25, %v17365_v29  ;;  %v6403_v31 = vrot.slane %v6380_v4, %v17365_v29  ;;  %v10764_v29 = vld [vmem:[%s17160_s3 + $0x18] sm:$0xff] }
 0xcd0   : > { %v12931_v53 = vpack.c.bf16 %v10764_v29, %v10763_v49 }
 0xcd1   : > { %v6388_v57 = vrot.slane %v6386_v52, 6  ;;  %v6393_v19 = vrot.slane %v6391_v37, 6  ;;  %v6404_v5 = vsel %vm849_vm8, %v6403_v31, 0.0  ;;  %v6405_v16 = vsel %vm6399_vm7, %v6403_v31, 0.0 }
 0xcd2   : > { %v6412_v21 = vsel %vm6406_vm9, %v6411_v32, 0.0  ;;  %v6413_v17 = vsel %vm6407_vm10, %v6411_v32, 0.0  ;;  %vm6711_vm8 = vcmask 123904  }
 0xcd3   : > { %v6390_v30 = vsub.f32 %v5866_v55, %v6388_v57  ;;  %v6414_v54 = vadd.f32 %v6412_v21, %v6404_v5  ;;  %v6415_v23 = vadd.f32 %v6413_v17, %v6405_v16  ;;  %6712 = vst.msk [vmem:[#allocation3 + $0x17] sm:$0x3] %vm6711_vm8, %v17369_v61  ;;  %6716 = vst.msk [vmem:[#allocation3 + $0x237] sm:$0x3] %vm6711_vm8, %v17369_v61 }
 0xcd5   : > { %v16053_v41 = vsub.f32 %v6390_v30, %v6393_v19  ;;  %v12927_v44 = vpack.c.bf16 %v6415_v23, %v6414_v54 }
 0xcd7   : > { %12928 = vmatprep.subr.bf16.mxu0 %v12927_v44  ;;  %v16199_v61 = vrot.slane %v16053_v41, %v17368_v0 }
 0xcd8   : > { %12930 = vmatpush3.bf16.msra.mxu0 %v12927_v44 }
 0xcd9   : > { %12932 = vmatprep.subr.bf16.mxu0 %v12931_v53 }
 0xcdb   : > { %12412 = vmatmul.mubr.msk.f32.vlgmr.msra.gmra.mrb[32].mxu0 %vm5867_vm1, %v15645_v3  ;;  %v6817_v3 = vld [vmem:[#allocation3 + $0x8] sm:$0xff] }
 0xcdc   : > { %12414 = vmatprep.mubr.msk.f32.mxu0 %vm5867_vm1, %v15667_v63  ;;  %12934 = vmatpush3.bf16.msra.mxu0 %v12931_v53  ;;  %v6815_v63 = vld [vmem:[%s17160_s3] sm:$0xff] }
 0xcdf   : > { %12415 = vmatmul.mubr.msk.f32.gmra.mrb[34].mxu0 %vm5867_vm1, %v15665_v43  ;;  %v6818_v43 = vld [vmem:[#allocation3 + $0x10] sm:$0xff] }
 0xce0   : > { %12417 = vmatprep.mubr.msk.f32.mxu0 %vm5867_vm1, %v15682_v45 }
 0xce3   : > { %12418 = vmatmul.mubr.msk.f32.gmra.mrb[36].mxu0 %vm5867_vm1, %v15680_v8  ;;  %v6816_v8 = vld [vmem:[%s17160_s3 + $0x8] sm:$0xff] }
 0xce4   : > { %12420 = vmatprep.mubr.msk.f32.mxu0 %vm5867_vm1, %v15700_v42  ;;  %v12935_v45 = vpack.c.bf16 %v6816_v8, %v6815_v63 }
 0xce6   : > { %12936 = vmatprep.subr.bf16.mxu0 %v12935_v45 }
 0xce7   : > { %12421 = vmatmul.mubr.msk.f32.gmra.mrb[38].mxu0 %vm5867_vm1, %v15698_v18 }
 0xce8   : > { %12423 = vmatprep.mubr.msk.f32.mxu0 %vm5867_vm1, %v15718_v46 }
 0xceb   : > { %12424 = vmatmul.mubr.msk.f32.gmra.mrb[40].mxu0 %vm5867_vm1, %v15716_v56 }
 0xcec   : > { %12426 = vmatprep.mubr.msk.f32.mxu0 %vm5867_vm1, %v15736_v11  ;;  %v10830_v11 = vld [vmem:[%s17160_s3 + $0x28] sm:$0xff] }
 0xcef   : > { %12427 = vmatmul.mubr.msk.f32.gmra.mrb[42].mxu0 %vm5867_vm1, %v15734_v26  ;;  %v10829_v26 = vld [vmem:[%s17160_s3 + $0x20] sm:$0xff] }
 0xcf0   : > { %12429 = vmatprep.mubr.msk.f32.mxu0 %vm5867_vm1, %v15754_v38 }
 0xcf3   : > { %12430 = vmatmul.mubr.msk.f32.gmra.mrb[44].mxu0 %vm5867_vm1, %v15752_v6  ;;  %v16210_v6 = vpack.c.bf16 %v10830_v11, %v10829_v26 }
 0xcf4   : > { %12432 = vmatprep.mubr.msk.f32.mxu0 %vm5867_vm1, %v15772_v10 }
 0xcf7   : > { %12433 = vmatmul.mubr.msk.f32.gmra.mrb[46].mxu0 %vm5867_vm1, %v15770_v48 }
 0xcf8   : > { %12435 = vmatprep.mubr.msk.f32.mxu0 %vm5867_vm1, %v15790_v1 }
 0xcfb   : > { %12436 = vmatmul.mubr.msk.f32.gmra.mrb[48].mxu0 %vm5867_vm1, %v15788_v15 }
 0xcfc   : > { %12438 = vmatprep.mubr.msk.f32.mxu0 %vm5867_vm1, %v15808_v28 }
 0xcff   : > { %12439 = vmatmul.mubr.msk.f32.gmra.mrb[50].mxu0 %vm5867_vm1, %v15806_v9 }
 0xd00   : > { %12441 = vmatprep.mubr.msk.f32.mxu0 %vm5867_vm1, %v15826_v12 }
 0xd03   : > { %12442 = vmatmul.mubr.msk.f32.gmra.mrb[52].mxu0 %vm5867_vm1, %v15824_v27 }
 0xd04   : > { %12444 = vmatprep.mubr.msk.f32.mxu0 %vm5867_vm1, %v15844_v33 }
 0xd07   : > { %12445 = vmatmul.mubr.msk.f32.gmra.mrb[54].mxu0 %vm5867_vm1, %v15842_v20 }
 0xd08   : > { %12447 = vmatprep.mubr.msk.f32.mxu0 %vm5867_vm1, %v15862_v7 }
 0xd0b   : > { %12448 = vmatmul.mubr.msk.f32.gmra.mrb[56].mxu0 %vm5867_vm1, %v15860_v22 }
 0xd0c   : > { %12450 = vmatprep.mubr.msk.f32.mxu0 %vm5867_vm1, %v15880_v24 }
 0xd0f   : > { %12451 = vmatmul.mubr.msk.f32.gmra.mrb[58].mxu0 %vm5867_vm1, %v15878_v62 }
 0xd10   : > { %12453 = vmatprep.mubr.msk.f32.mxu0 %vm5867_vm1, %v15898_v60 }
 0xd13   : > { %12454 = vmatmul.mubr.msk.f32.gmra.mrb[60].mxu0 %vm5867_vm1, %v15896_v2 }
 0xd14   : > { %12456 = vmatprep.mubr.msk.f32.mxu0 %vm5867_vm1, %v15916_v58 }
 0xd17   : > { %12457 = vmatmul.mubr.msk.f32.gmra.mrb[62].mxu0 %vm5867_vm1, %v15914_v50 }
 0xd18   : > { %12463 = vmatprep.mubr.msk.f32.mxu0 %vm5867_vm1, %v6817_v3 }
 0xd1b   : > { %12464 = vmatmul.mubr.msk.f32.vlgmr.msra.gmra.mrb[64].mxu0 %vm5867_vm1, %v6818_v43 }
 0xd1c   : > { %12938 = vmatpush3.bf16.msra.mxu0 %v12935_v45 }
 0xd1d   : > { %12940 = vmatprep.subr.bf16.mxu0 %v16210_v6 }
 0xdae   : > { %v12413_v18 = vpop.f32.mrb[32].mxu0 }
 0xdaf   : > { %v6556_v42 = vadd.f32 %v12413_v18, %v16199_v61  ;;  %v6550_v56 = vpop.f32.mrb[33].mxu0 }
 0xdb0   : > { %v6551_v46 = vadd.f32 %v6550_v56, %v16199_v61 }
 0xdb1   : > { %6752 = vst.msk [vmem:[#allocation3 + $0x30] sm:$0xff] %vm5867_vm1, %v6556_v42 }
 0xdb2   : > { %6751 = vst.msk [vmem:[#allocation3 + $0x28] sm:$0xff] %vm5867_vm1, %v6551_v46  ;;  %v12416_v0 = vpop.f32.mrb[34].mxu0 }
 0xdb3   : > { %v6566_v38 = vadd.f32 %v12416_v0, %v16199_v61  ;;  %v6560_v48 = vpop.f32.mrb[35].mxu0 }
 0xdb4   : > { %v6561_v10 = vadd.f32 %v6560_v48, %v16199_v61 }
 0xdb5   : > { %6754 = vst.msk [vmem:[#allocation3 + $0x50] sm:$0xff] %vm5867_vm1, %v6566_v38 }
 0xdb6   : > { %6753 = vst.msk [vmem:[#allocation3 + $0x48] sm:$0xff] %vm5867_vm1, %v6561_v10  ;;  %v12419_v15 = vpop.f32.mrb[36].mxu0 }
 0xdb7   : > { %v6576_v1 = vadd.f32 %v12419_v15, %v16199_v61  ;;  %v6570_v9 = vpop.f32.mrb[37].mxu0 }
 0xdb8   : > { %v6571_v28 = vadd.f32 %v6570_v9, %v16199_v61  ;;  %v16226_v20 = vld [vmem:[#allocation3 + $0x30] sm:$0xff] }
 0xdb9   : > { %6756 = vst.msk [vmem:[#allocation3 + $0x70] sm:$0xff] %vm5867_vm1, %v6576_v1  ;;  %v16221_v27 = vld [vmem:[#allocation3 + $0x28] sm:$0xff] }
 0xdba   : > { %6755 = vst.msk [vmem:[#allocation3 + $0x68] sm:$0xff] %vm5867_vm1, %v6571_v28  ;;  %v12422_v12 = vpop.f32.mrb[38].mxu0  ;;  %12466 = vmatprep.mubr.msk.f32.mxu0 %vm5867_vm1, %v16221_v27 }
 0xdbb   : > { %v6586_v33 = vadd.f32 %v12422_v12, %v16199_v61  ;;  %v6580_v22 = vpop.f32.mrb[39].mxu0  ;;  %12467 = vmatmul.mubr.msk.f32.gmra.mrb[66].mxu0 %vm5867_vm1, %v16226_v20 }
 0xdbc   : > { %v6581_v7 = vadd.f32 %v6580_v22, %v16199_v61  ;;  %v16238_v2 = vld [vmem:[#allocation3 + $0x50] sm:$0xff] }
 0xdbd   : > { %6758 = vst.msk [vmem:[#allocation3 + $0x90] sm:$0xff] %vm5867_vm1, %v6586_v33  ;;  %v16233_v62 = vld [vmem:[#allocation3 + $0x48] sm:$0xff] }
 0xdbe   : > { %6757 = vst.msk [vmem:[#allocation3 + $0x88] sm:$0xff] %vm5867_vm1, %v6581_v7  ;;  %v12425_v24 = vpop.f32.mrb[40].mxu0  ;;  %12469 = vmatprep.mubr.msk.f32.mxu0 %vm5867_vm1, %v16233_v62 }
 0xdbf   : > { %v6596_v60 = vadd.f32 %v12425_v24, %v16199_v61  ;;  %v6590_v50 = vpop.f32.mrb[41].mxu0  ;;  %12470 = vmatmul.mubr.msk.f32.gmra.mrb[68].mxu0 %vm5867_vm1, %v16238_v2 }
 0xdc0   : > { %v6591_v58 = vadd.f32 %v6590_v50, %v16199_v61  ;;  %v16250_v59 = vld [vmem:[#allocation3 + $0x70] sm:$0xff] }
 0xdc1   : > { %6760 = vst.msk [vmem:[#allocation3 + $0xb0] sm:$0xff] %vm5867_vm1, %v6596_v60  ;;  %v16245_v36 = vld [vmem:[#allocation3 + $0x68] sm:$0xff] }
 0xdc2   : > { %6759 = vst.msk [vmem:[#allocation3 + $0xa8] sm:$0xff] %vm5867_vm1, %v6591_v58  ;;  %v12428_v55 = vpop.f32.mrb[42].mxu0  ;;  %12472 = vmatprep.mubr.msk.f32.mxu0 %vm5867_vm1, %v16245_v36 }
 0xdc3   : > { %v6606_v35 = vadd.f32 %v12428_v55, %v16199_v61  ;;  %v6600_v47 = vpop.f32.mrb[43].mxu0  ;;  %12473 = vmatmul.mubr.msk.f32.gmra.mrb[70].mxu0 %vm5867_vm1, %v16250_v59 }
 0xdc4   : > { %v6601_v14 = vadd.f32 %v6600_v47, %v16199_v61  ;;  %v16262_v34 = vld [vmem:[#allocation3 + $0x90] sm:$0xff] }
 0xdc5   : > { %6762 = vst.msk [vmem:[#allocation3 + $0xd0] sm:$0xff] %vm5867_vm1, %v6606_v35  ;;  %v16257_v13 = vld [vmem:[#allocation3 + $0x88] sm:$0xff] }
 0xdc6   : > { %6761 = vst.msk [vmem:[#allocation3 + $0xc8] sm:$0xff] %vm5867_vm1, %v6601_v14  ;;  %v12431_v40 = vpop.f32.mrb[44].mxu0  ;;  %12475 = vmatprep.mubr.msk.f32.mxu0 %vm5867_vm1, %v16257_v13 }
 0xdc7   : > { %v6616_v51 = vadd.f32 %v12431_v40, %v16199_v61  ;;  %v6610_v39 = vpop.f32.mrb[45].mxu0  ;;  %12476 = vmatmul.mubr.msk.f32.gmra.mrb[72].mxu0 %vm5867_vm1, %v16262_v34 }
 0xdc8   : > { %v6611_v4 = vadd.f32 %v6610_v39, %v16199_v61  ;;  %v16274_v37 = vld [vmem:[#allocation3 + $0xb0] sm:$0xff] }
 0xdc9   : > { %6764 = vst.msk [vmem:[#allocation3 + $0xf0] sm:$0xff] %vm5867_vm1, %v6616_v51  ;;  %v16269_v25 = vld [vmem:[#allocation3 + $0xa8] sm:$0xff] }
 0xdca   : > { %6763 = vst.msk [vmem:[#allocation3 + $0xe8] sm:$0xff] %vm5867_vm1, %v6611_v4  ;;  %v12434_v52 = vpop.f32.mrb[46].mxu0  ;;  %12478 = vmatprep.mubr.msk.f32.mxu0 %vm5867_vm1, %v16269_v25 }
 0xdcb   : > { %v6626_v32 = vadd.f32 %v12434_v52, %v16199_v61  ;;  %v6620_v31 = vpop.f32.mrb[47].mxu0  ;;  %12479 = vmatmul.mubr.msk.f32.gmra.mrb[74].mxu0 %vm5867_vm1, %v16274_v37 }
 0xdcc   : > { %v6621_v57 = vadd.f32 %v6620_v31, %v16199_v61  ;;  %v16286_v16 = vld [vmem:[#allocation3 + $0xd0] sm:$0xff] }
 0xdcd   : > { %6766 = vst.msk [vmem:[#allocation3 + $0x110] sm:$0xff] %vm5867_vm1, %v6626_v32  ;;  %v16281_v19 = vld [vmem:[#allocation3 + $0xc8] sm:$0xff] }
 0xdce   : > { %6765 = vst.msk [vmem:[#allocation3 + $0x108] sm:$0xff] %vm5867_vm1, %v6621_v57  ;;  %v12437_v5 = vpop.f32.mrb[48].mxu0  ;;  %12481 = vmatprep.mubr.msk.f32.mxu0 %vm5867_vm1, %v16281_v19  ;;  %v6783_v57 = vld [vmem:[#allocation3 + $0x7] sm:$0xff] }
 0xdcf   : > { %v6636_v21 = vadd.f32 %v12437_v5, %v16199_v61  ;;  %v6630_v17 = vpop.f32.mrb[49].mxu0  ;;  %12482 = vmatmul.mubr.msk.f32.gmra.mrb[76].mxu0 %vm5867_vm1, %v16286_v16  ;;  %v10863_v5 = vld [vmem:[%s17160_s3 + $0x30] sm:$0xff] }
 0xdd0   : > { %v6631_v30 = vadd.f32 %v6630_v17, %v16199_v61  ;;  %v16298_v41 = vld [vmem:[#allocation3 + $0xf0] sm:$0xff] }
 0xdd1   : > { %6768 = vst.msk [vmem:[#allocation3 + $0x130] sm:$0xff] %vm5867_vm1, %v6636_v21  ;;  %v16293_v54 = vld [vmem:[#allocation3 + $0xe8] sm:$0xff]  ;;  %v10864_v21 = vld [vmem:[%s17160_s3 + $0x38] sm:$0xff] }
 0xdd2   : > { %6767 = vst.msk [vmem:[#allocation3 + $0x128] sm:$0xff] %vm5867_vm1, %v6631_v30  ;;  %v12440_v23 = vpop.f32.mrb[50].mxu0  ;;  %12484 = vmatprep.mubr.msk.f32.mxu0 %vm5867_vm1, %v16293_v54  ;;  %v6784_v17 = vld [vmem:[#allocation3 + $0xf] sm:$0xff]  ;;  %v16401_v30 = vpack.c.bf16 %v10864_v21, %v10863_v5  ;;  %v10897_v21 = vld [vmem:[%s17160_s3 + $0x40] sm:$0xff] }
 0xdd3   : > { %v6646_v44 = vadd.f32 %v12440_v23, %v16199_v61  ;;  %v6640_v49 = vpop.f32.mrb[51].mxu0  ;;  %12485 = vmatmul.mubr.msk.f32.gmra.mrb[78].mxu0 %vm5867_vm1, %v16298_v41  ;;  %v16404_v23 = vld [vmem:[#allocation3 + $0x27] sm:$0xff] }
 0xdd4   : > { %v6641_v29 = vadd.f32 %v6640_v49, %v16199_v61  ;;  %v16310_v43 = vld [vmem:[#allocation3 + $0x110] sm:$0xff]  ;;  %v16414_v49 = vld [vmem:[#allocation3 + $0x47] sm:$0xff] }
 0xdd5   : > { %6770 = vst.msk [vmem:[#allocation3 + $0x150] sm:$0xff] %vm5867_vm1, %v6646_v44  ;;  %v16305_v53 = vld [vmem:[#allocation3 + $0x108] sm:$0xff] }
 0xdd6   : > { %6769 = vst.msk [vmem:[#allocation3 + $0x148] sm:$0xff] %vm5867_vm1, %v6641_v29  ;;  %v12443_v3 = vpop.f32.mrb[52].mxu0  ;;  %12487 = vmatprep.mubr.msk.f32.mxu0 %vm5867_vm1, %v16305_v53  ;;  %v16410_v44 = vld [vmem:[#allocation3 + $0x2f] sm:$0xff] }
 0xdd7   : > { %v6656_v63 = vadd.f32 %v12443_v3, %v16199_v61  ;;  %v6650_v8 = vpop.f32.mrb[53].mxu0  ;;  %12488 = vmatmul.mubr.msk.f32.gmra.mrb[80].mxu0 %vm5867_vm1, %v16310_v43  ;;  %v16418_v29 = vld [vmem:[#allocation3 + $0x4f] sm:$0xff]  ;;  %v16422_v3 = vld [vmem:[#allocation3 + $0x67] sm:$0xff] }
 0xdd8   : > { %v6651_v45 = vadd.f32 %v6650_v8, %v16199_v61  ;;  %v16322_v56 = vld [vmem:[#allocation3 + $0x130] sm:$0xff] }
 0xdd9   : > { %6772 = vst.msk [vmem:[#allocation3 + $0x170] sm:$0xff] %vm5867_vm1, %v6656_v63  ;;  %v16317_v18 = vld [vmem:[#allocation3 + $0x128] sm:$0xff] }
 0xdda   : > { %6771 = vst.msk [vmem:[#allocation3 + $0x168] sm:$0xff] %vm5867_vm1, %v6651_v45  ;;  %v12446_v42 = vpop.f32.mrb[54].mxu0  ;;  %12490 = vmatprep.mubr.msk.f32.mxu0 %vm5867_vm1, %v16317_v18  ;;  %v16430_v63 = vld [vmem:[#allocation3 + $0x87] sm:$0xff]  ;;  %v16434_v8 = vld [vmem:[#allocation3 + $0x8f] sm:$0xff] }
 0xddb   : > { %v6666_v46 = vadd.f32 %v12446_v42, %v16199_v61  ;;  %v6660_v26 = vpop.f32.mrb[55].mxu0  ;;  %12491 = vmatmul.mubr.msk.f32.gmra.mrb[82].mxu0 %vm5867_vm1, %v16322_v56  ;;  %v16438_v45 = vld [vmem:[#allocation3 + $0xa7] sm:$0xff]  ;;  %v16442_v42 = vld [vmem:[#allocation3 + $0xaf] sm:$0xff] }
 0xddc   : > { %v6661_v11 = vadd.f32 %v6660_v26, %v16199_v61  ;;  %v16334_v48 = vld [vmem:[#allocation3 + $0x150] sm:$0xff] }
 0xddd   : > { %6774 = vst.msk [vmem:[#allocation3 + $0x190] sm:$0xff] %vm5867_vm1, %v6666_v46  ;;  %v16329_v0 = vld [vmem:[#allocation3 + $0x148] sm:$0xff] }
 0xdde   : > { %6773 = vst.msk [vmem:[#allocation3 + $0x188] sm:$0xff] %vm5867_vm1, %v6661_v11  ;;  %v12449_v38 = vpop.f32.mrb[56].mxu0  ;;  %12493 = vmatprep.mubr.msk.f32.mxu0 %vm5867_vm1, %v16329_v0  ;;  %v16446_v46 = vld [vmem:[#allocation3 + $0xc7] sm:$0xff]  ;;  %v16450_v26 = vld [vmem:[#allocation3 + $0xcf] sm:$0xff] }
 0xddf   : > { %v6676_v10 = vadd.f32 %v12449_v38, %v16199_v61  ;;  %v6670_v15 = vpop.f32.mrb[57].mxu0  ;;  %12494 = vmatmul.mubr.msk.f32.gmra.mrb[84].mxu0 %vm5867_vm1, %v16334_v48  ;;  %v16454_v11 = vld [vmem:[#allocation3 + $0xe7] sm:$0xff]  ;;  %v16458_v38 = vld [vmem:[#allocation3 + $0xef] sm:$0xff] }
 0xde0   : > { %v6671_v1 = vadd.f32 %v6670_v15, %v16199_v61  ;;  %v16346_v12 = vld [vmem:[#allocation3 + $0x170] sm:$0xff] }
 0xde1   : > { %6776 = vst.msk [vmem:[#allocation3 + $0x1b0] sm:$0xff] %vm5867_vm1, %v6676_v10  ;;  %v16341_v9 = vld [vmem:[#allocation3 + $0x168] sm:$0xff] }
 0xde2   : > { %6775 = vst.msk [vmem:[#allocation3 + $0x1a8] sm:$0xff] %vm5867_vm1, %v6671_v1  ;;  %v12452_v28 = vpop.f32.mrb[58].mxu0  ;;  %12496 = vmatprep.mubr.msk.f32.mxu0 %vm5867_vm1, %v16341_v9  ;;  %v16462_v10 = vld [vmem:[#allocation3 + $0x107] sm:$0xff]  ;;  %v16466_v15 = vld [vmem:[#allocation3 + $0x10f] sm:$0xff] }
 0xde3   : > { %v6686_v33 = vadd.f32 %v12452_v28, %v16199_v61  ;;  %v6680_v22 = vpop.f32.mrb[59].mxu0  ;;  %12497 = vmatmul.mubr.msk.f32.gmra.mrb[86].mxu0 %vm5867_vm1, %v16346_v12  ;;  %v16470_v1 = vld [vmem:[#allocation3 + $0x127] sm:$0xff]  ;;  %v16474_v28 = vld [vmem:[#allocation3 + $0x12f] sm:$0xff] }
 0xde4   : > { %v6681_v7 = vadd.f32 %v6680_v22, %v16199_v61  ;;  %v16358_v50 = vld [vmem:[#allocation3 + $0x190] sm:$0xff] }
 0xde5   : > { %6778 = vst.msk [vmem:[#allocation3 + $0x1d0] sm:$0xff] %vm5867_vm1, %v6686_v33  ;;  %v16353_v24 = vld [vmem:[#allocation3 + $0x188] sm:$0xff] }
 0xde6   : > { %6777 = vst.msk [vmem:[#allocation3 + $0x1c8] sm:$0xff] %vm5867_vm1, %v6681_v7  ;;  %v12455_v60 = vpop.f32.mrb[60].mxu0  ;;  %12499 = vmatprep.mubr.msk.f32.mxu0 %vm5867_vm1, %v16353_v24  ;;  %v16478_v33 = vld [vmem:[#allocation3 + $0x147] sm:$0xff]  ;;  %v16482_v22 = vld [vmem:[#allocation3 + $0x14f] sm:$0xff] }
 0xde7   : > { %v6696_v58 = vadd.f32 %v12455_v60, %v16199_v61  ;;  %v6690_v55 = vpop.f32.mrb[61].mxu0  ;;  %12500 = vmatmul.mubr.msk.f32.gmra.mrb[88].mxu0 %vm5867_vm1, %v16358_v50  ;;  %v16486_v7 = vld [vmem:[#allocation3 + $0x167] sm:$0xff]  ;;  %v16490_v60 = vld [vmem:[#allocation3 + $0x16f] sm:$0xff] }
 0xde8   : > { %v6691_v35 = vadd.f32 %v6690_v55, %v16199_v61  ;;  %v16370_v40 = vld [vmem:[#allocation3 + $0x1b0] sm:$0xff] }
 0xde9   : > { %6780 = vst.msk [vmem:[#allocation3 + $0x1f0] sm:$0xff] %vm5867_vm1, %v6696_v58  ;;  %v16365_v47 = vld [vmem:[#allocation3 + $0x1a8] sm:$0xff] }
 0xdea   : > { %6779 = vst.msk [vmem:[#allocation3 + $0x1e8] sm:$0xff] %vm5867_vm1, %v6691_v35  ;;  %v12458_v14 = vpop.f32.mrb[62].mxu0  ;;  %12502 = vmatprep.mubr.msk.f32.mxu0 %vm5867_vm1, %v16365_v47  ;;  %v16494_v58 = vld [vmem:[#allocation3 + $0x187] sm:$0xff]  ;;  %v16498_v55 = vld [vmem:[#allocation3 + $0x18f] sm:$0xff] }
 0xdeb   : > { %v6706_v51 = vadd.f32 %v12458_v14, %v16199_v61  ;;  %v6700_v39 = vpop.f32.mrb[63].mxu0  ;;  %12503 = vmatmul.mubr.msk.f32.gmra.mrb[90].mxu0 %vm5867_vm1, %v16370_v40  ;;  %v16502_v35 = vld [vmem:[#allocation3 + $0x1a7] sm:$0xff]  ;;  %v16506_v14 = vld [vmem:[#allocation3 + $0x1af] sm:$0xff] }
 0xdec   : > { %v6701_v4 = vadd.f32 %v6700_v39, %v16199_v61  ;;  %v16382_v32 = vld [vmem:[#allocation3 + $0x1d0] sm:$0xff] }
 0xded   : > { %6782 = vst.msk [vmem:[#allocation3 + $0x210] sm:$0xff] %vm5867_vm1, %v6706_v51  ;;  %v16377_v52 = vld [vmem:[#allocation3 + $0x1c8] sm:$0xff]  ;;  %17371 = vst [vmem:[#allocation10_spill] sm:$0xff] %v16382_v32 }
 0xdee   : > { %17370 = vst [vmem:[#allocation9_spill] sm:$0xff] %v16377_v52  ;;  %6781 = vst.msk [vmem:[#allocation3 + $0x208] sm:$0xff] %vm5867_vm1, %v6701_v4  ;;  %12505 = vmatprep.mubr.msk.f32.mxu0 %vm5867_vm1, %v16377_v52  ;;  %v16510_v51 = vld [vmem:[#allocation3 + $0x1c7] sm:$0xff]  ;;  %v16514_v39 = vld [vmem:[#allocation3 + $0x1cf] sm:$0xff] }
 0xdef   : > { %12506 = vmatmul.mubr.msk.f32.gmra.mrb[92].mxu0 %vm5867_vm1, %v16382_v32  ;;  %v16536_v32 = vld [vmem:[#allocation3 + $0x29] sm:$0xff]  ;;  %v16542_v52 = vld [vmem:[#allocation3 + $0x31] sm:$0xff] }
 0xdf0   : > { %v16390_v61 = vld [vmem:[#allocation3 + $0x1f0] sm:$0xff] }
 0xdf1   : > { %v16386_v31 = vld [vmem:[#allocation3 + $0x1e8] sm:$0xff]  ;;  %17373 = vst [vmem:[#allocation12_spill] sm:$0xff] %v16390_v61 }
 0xdf2   : > { %17372 = vst [vmem:[#allocation11_spill] sm:$0xff] %v16386_v31  ;;  %12508 = vmatprep.mubr.msk.f32.mxu0 %vm5867_vm1, %v16386_v31  ;;  %v16518_v4 = vld [vmem:[#allocation3 + $0x1e7] sm:$0xff]  ;;  %v16522_v5 = vld [vmem:[#allocation3 + $0x1ef] sm:$0xff] }
 0xdf3   : > { %12509 = vmatmul.mubr.msk.f32.gmra.mrb[94].mxu0 %vm5867_vm1, %v16390_v61  ;;  %v7495_v61 = vld [vmem:[#allocation3 + $0x11] sm:$0xff] }
 0xdf4   : > { %12515 = vmatprep.mubr.msk.f32.mxu0 %vm5867_vm1, %v6783_v57  ;;  %v7494_v57 = vld [vmem:[#allocation3 + $0x9] sm:$0xff] }
 0xdf7   : > { %12516 = vmatmul.mubr.msk.f32.vlgmr.msra.gmra.mrb[64].mxu0 %vm5867_vm1, %v6784_v17  ;;  %v10898_v17 = vld [vmem:[%s17160_s3 + $0x48] sm:$0xff] }
 0xdf8   : > { %12518 = vmatprep.mubr.msk.f32.mxu0 %vm5867_vm1, %v16404_v23  ;;  %12942 = vmatpush3.bf16.msra.mxu0 %v16210_v6  ;;  %v16426_v6 = vld [vmem:[#allocation3 + $0x6f] sm:$0xff]  ;;  %v16533_v31 = vpack.c.bf16 %v10898_v17, %v10897_v21 }
 0xdf9   : > { %12944 = vmatprep.subr.bf16.mxu0 %v16401_v30  ;;  %v16554_v21 = vld [vmem:[#allocation3 + $0x69] sm:$0xff] }
 0xdfa   : > { %17376 = vst [vmem:[#allocation15_spill] sm:$0xff] %v16554_v21  ;;  %v16562_v17 = vld [vmem:[#allocation3 + $0x89] sm:$0xff] }
 0xdfb   : > { %12519 = vmatmul.mubr.msk.f32.gmra.mrb[66].mxu0 %vm5867_vm1, %v16410_v44  ;;  %17378 = vst [vmem:[#allocation17_spill] sm:$0xff] %v16562_v17 }
 0xdfc   : > { %12521 = vmatprep.mubr.msk.f32.mxu0 %vm5867_vm1, %v16414_v49 }
 0xdff   : > { %12522 = vmatmul.mubr.msk.f32.gmra.mrb[68].mxu0 %vm5867_vm1, %v16418_v29 }
 0xe00   : > { %12524 = vmatprep.mubr.msk.f32.mxu0 %vm5867_vm1, %v16422_v3 }
 0xe03   : > { %12525 = vmatmul.mubr.msk.f32.gmra.mrb[70].mxu0 %vm5867_vm1, %v16426_v6 }
 0xe04   : > { %12527 = vmatprep.mubr.msk.f32.mxu0 %vm5867_vm1, %v16430_v63 }
 0xe07   : > { %12528 = vmatmul.mubr.msk.f32.gmra.mrb[72].mxu0 %vm5867_vm1, %v16434_v8 }
 0xe08   : > { %12530 = vmatprep.mubr.msk.f32.mxu0 %vm5867_vm1, %v16438_v45 }
 0xe0b   : > { %12531 = vmatmul.mubr.msk.f32.gmra.mrb[74].mxu0 %vm5867_vm1, %v16442_v42 }
 0xe0c   : > { %12533 = vmatprep.mubr.msk.f32.mxu0 %vm5867_vm1, %v16446_v46 }
 0xe0f   : > { %12534 = vmatmul.mubr.msk.f32.gmra.mrb[76].mxu0 %vm5867_vm1, %v16450_v26 }
 0xe10   : > { %12536 = vmatprep.mubr.msk.f32.mxu0 %vm5867_vm1, %v16454_v11 }
 0xe13   : > { %12537 = vmatmul.mubr.msk.f32.gmra.mrb[78].mxu0 %vm5867_vm1, %v16458_v38 }
 0xe14   : > { %12539 = vmatprep.mubr.msk.f32.mxu0 %vm5867_vm1, %v16462_v10 }
 0xe17   : > { %12540 = vmatmul.mubr.msk.f32.gmra.mrb[80].mxu0 %vm5867_vm1, %v16466_v15 }
 0xe18   : > { %12542 = vmatprep.mubr.msk.f32.mxu0 %vm5867_vm1, %v16470_v1 }
 0xe1b   : > { %12543 = vmatmul.mubr.msk.f32.gmra.mrb[82].mxu0 %vm5867_vm1, %v16474_v28 }
 0xe1c   : > { %12545 = vmatprep.mubr.msk.f32.mxu0 %vm5867_vm1, %v16478_v33 }
 0xe1f   : > { %12546 = vmatmul.mubr.msk.f32.gmra.mrb[84].mxu0 %vm5867_vm1, %v16482_v22 }
 0xe20   : > { %12548 = vmatprep.mubr.msk.f32.mxu0 %vm5867_vm1, %v16486_v7 }
 0xe23   : > { %12549 = vmatmul.mubr.msk.f32.gmra.mrb[86].mxu0 %vm5867_vm1, %v16490_v60 }
 0xe24   : > { %12551 = vmatprep.mubr.msk.f32.mxu0 %vm5867_vm1, %v16494_v58 }
 0xe27   : > { %12552 = vmatmul.mubr.msk.f32.gmra.mrb[88].mxu0 %vm5867_vm1, %v16498_v55 }
 0xe28   : > { %12554 = vmatprep.mubr.msk.f32.mxu0 %vm5867_vm1, %v16502_v35 }
 0xe2b   : > { %12555 = vmatmul.mubr.msk.f32.gmra.mrb[90].mxu0 %vm5867_vm1, %v16506_v14 }
 0xe2c   : > { %12557 = vmatprep.mubr.msk.f32.mxu0 %vm5867_vm1, %v16510_v51 }
 0xe2f   : > { %12558 = vmatmul.mubr.msk.f32.gmra.mrb[92].mxu0 %vm5867_vm1, %v16514_v39 }
 0xe30   : > { %12560 = vmatprep.mubr.msk.f32.mxu0 %vm5867_vm1, %v16518_v4 }
 0xe33   : > { %12561 = vmatmul.mubr.msk.f32.gmra.mrb[94].mxu0 %vm5867_vm1, %v16522_v5 }
 0xe34   : > { %12567 = vmatprep.mubr.msk.f32.mxu0 %vm5867_vm1, %v7494_v57  ;;  %v16546_v57 = vld [vmem:[#allocation3 + $0x49] sm:$0xff] }
 0xe35   : > { %17374 = vst [vmem:[#allocation13_spill] sm:$0xff] %v16546_v57 }
 0xe37   : > { %12568 = vmatmul.mubr.msk.f32.vlgmr.msra.gmra.mrb[64].mxu0 %vm5867_vm1, %v7495_v61  ;;  %v16550_v61 = vld [vmem:[#allocation3 + $0x51] sm:$0xff] }
 0xe38   : > { %12570 = vmatprep.mubr.msk.f32.mxu0 %vm5867_vm1, %v16536_v32  ;;  %12946 = vmatpush3.bf16.msra.mxu0 %v16401_v30  ;;  %17375 = vst [vmem:[#allocation14_spill] sm:$0xff] %v16550_v61  ;;  %v16558_v30 = vld [vmem:[#allocation3 + $0x71] sm:$0xff] }
 0xe39   : > { %12948 = vmatprep.subr.bf16.mxu0 %v16533_v31  ;;  %17377 = vst [vmem:[#allocation16_spill] sm:$0xff] %v16558_v30 }
 0xe3b   : > { %12571 = vmatmul.mubr.msk.f32.gmra.mrb[66].mxu0 %vm5867_vm1, %v16542_v52 }
 0xe3c   : > { %12573 = vmatprep.mubr.msk.f32.mxu0 %vm5867_vm1, %v16546_v57  ;;  %v16566_v57 = vld [vmem:[#allocation3 + $0x91] sm:$0xff] }
 0xe3d   : > { %17379 = vst [vmem:[#allocation18_spill] sm:$0xff] %v16566_v57 }
 0xe3f   : > { %12574 = vmatmul.mubr.msk.f32.gmra.mrb[68].mxu0 %vm5867_vm1, %v16550_v61  ;;  %v16570_v61 = vld [vmem:[#allocation3 + $0xa9] sm:$0xff] }
 0xe40   : > { %12576 = vmatprep.mubr.msk.f32.mxu0 %vm5867_vm1, %v16554_v21  ;;  %17380 = vst [vmem:[#allocation19_spill] sm:$0xff] %v16570_v61  ;;  %v16574_v21 = vld [vmem:[#allocation3 + $0xb1] sm:$0xff] }
 0xe41   : > { %17381 = vst [vmem:[#allocation20_spill] sm:$0xff] %v16574_v21 }
 0xe43   : > { %12577 = vmatmul.mubr.msk.f32.gmra.mrb[70].mxu0 %vm5867_vm1, %v16558_v30  ;;  %v16578_v30 = vld [vmem:[#allocation3 + $0xc9] sm:$0xff] }
 0xe44   : > { %12579 = vmatprep.mubr.msk.f32.mxu0 %vm5867_vm1, %v16562_v17  ;;  %17382 = vst [vmem:[#allocation21_spill] sm:$0xff] %v16578_v30  ;;  %v16582_v17 = vld [vmem:[#allocation3 + $0xd1] sm:$0xff] }
 0xe45   : > { %17383 = vst [vmem:[#allocation28_spill] sm:$0xff] %v16582_v17 }
 0xe47   : > { %12580 = vmatmul.mubr.msk.f32.gmra.mrb[72].mxu0 %vm5867_vm1, %v16566_v57  ;;  %v16586_v57 = vld [vmem:[#allocation3 + $0xe9] sm:$0xff] }
 0xe48   : > { %12582 = vmatprep.mubr.msk.f32.mxu0 %vm5867_vm1, %v16570_v61  ;;  %17384 = vst [vmem:[#allocation30_spill] sm:$0xff] %v16586_v57  ;;  %v16590_v61 = vld [vmem:[#allocation3 + $0xf1] sm:$0xff] }
 0xe49   : > { %17385 = vst [vmem:[#allocation31_spill] sm:$0xff] %v16590_v61 }
 0xe4b   : > { %12583 = vmatmul.mubr.msk.f32.gmra.mrb[74].mxu0 %vm5867_vm1, %v16574_v21  ;;  %v16594_v21 = vld [vmem:[#allocation3 + $0x109] sm:$0xff] }
 0xe4c   : > { %12585 = vmatprep.mubr.msk.f32.mxu0 %vm5867_vm1, %v16578_v30  ;;  %17386 = vst [vmem:[#allocation32_spill] sm:$0xff] %v16594_v21  ;;  %v16598_v30 = vld [vmem:[#allocation3 + $0x111] sm:$0xff] }
 0xe4d   : > { %17387 = vst [vmem:[#allocation34_spill] sm:$0xff] %v16598_v30 }
 0xe4f   : > { %12586 = vmatmul.mubr.msk.f32.gmra.mrb[76].mxu0 %vm5867_vm1, %v16582_v17  ;;  %v16602_v17 = vld [vmem:[#allocation3 + $0x129] sm:$0xff] }
 0xe50   : > { %12588 = vmatprep.mubr.msk.f32.mxu0 %vm5867_vm1, %v16586_v57  ;;  %17388 = vst [vmem:[#allocation36_spill] sm:$0xff] %v16602_v17  ;;  %v16606_v57 = vld [vmem:[#allocation3 + $0x131] sm:$0xff] }
 0xe51   : > { %17389 = vst [vmem:[#allocation22_spill] sm:$0xff] %v16606_v57 }
 0xe53   : > { %12589 = vmatmul.mubr.msk.f32.gmra.mrb[78].mxu0 %vm5867_vm1, %v16590_v61  ;;  %v16610_v61 = vld [vmem:[#allocation3 + $0x149] sm:$0xff] }
 0xe54   : > { %12591 = vmatprep.mubr.msk.f32.mxu0 %vm5867_vm1, %v16594_v21  ;;  %17390 = vst [vmem:[#allocation23_spill] sm:$0xff] %v16610_v61  ;;  %v16614_v21 = vld [vmem:[#allocation3 + $0x151] sm:$0xff] }
 0xe55   : > { %17391 = vst [vmem:[#allocation24_spill] sm:$0xff] %v16614_v21 }
 0xe57   : > { %12592 = vmatmul.mubr.msk.f32.gmra.mrb[80].mxu0 %vm5867_vm1, %v16598_v30  ;;  %v16618_v30 = vld [vmem:[#allocation3 + $0x169] sm:$0xff] }
 0xe58   : > { %12594 = vmatprep.mubr.msk.f32.mxu0 %vm5867_vm1, %v16602_v17  ;;  %17392 = vst [vmem:[#allocation25_spill] sm:$0xff] %v16618_v30  ;;  %v16622_v17 = vld [vmem:[#allocation3 + $0x171] sm:$0xff] }
 0xe59   : > { %17393 = vst [vmem:[#allocation26_spill] sm:$0xff] %v16622_v17 }
 0xe5b   : > { %12595 = vmatmul.mubr.msk.f32.gmra.mrb[82].mxu0 %vm5867_vm1, %v16606_v57  ;;  %v16626_v57 = vld [vmem:[#allocation3 + $0x189] sm:$0xff] }
 0xe5c   : > { %12597 = vmatprep.mubr.msk.f32.mxu0 %vm5867_vm1, %v16610_v61  ;;  %17394 = vst [vmem:[#allocation27_spill] sm:$0xff] %v16626_v57  ;;  %v16630_v61 = vld [vmem:[#allocation3 + $0x191] sm:$0xff] }
 0xe5d   : > { %17395 = vst [vmem:[#allocation29_spill] sm:$0xff] %v16630_v61 }
 0xe5f   : > { %12598 = vmatmul.mubr.msk.f32.gmra.mrb[84].mxu0 %vm5867_vm1, %v16614_v21  ;;  %v16634_v21 = vld [vmem:[#allocation3 + $0x1a9] sm:$0xff] }
 0xe60   : > { %12600 = vmatprep.mubr.msk.f32.mxu0 %vm5867_vm1, %v16618_v30  ;;  %17396 = vst [vmem:[#allocation33_spill] sm:$0xff] %v16634_v21  ;;  %v16638_v30 = vld [vmem:[#allocation3 + $0x1b1] sm:$0xff] }
 0xe61   : > { %17397 = vst [vmem:[#allocation35_spill] sm:$0xff] %v16638_v30 }
 0xe63   : > { %12601 = vmatmul.mubr.msk.f32.gmra.mrb[86].mxu0 %vm5867_vm1, %v16622_v17  ;;  %v16642_v17 = vld [vmem:[#allocation3 + $0x1c9] sm:$0xff] }
 0xe64   : > { %12603 = vmatprep.mubr.msk.f32.mxu0 %vm5867_vm1, %v16626_v57  ;;  %17398 = vst [vmem:[#allocation37_spill] sm:$0xff] %v16642_v17  ;;  %v16646_v57 = vld [vmem:[#allocation3 + $0x1d1] sm:$0xff] }
 0xe65   : > { %17399 = vst [vmem:[#allocation4_spill] sm:$0xff] %v16646_v57 }
 0xe67   : > { %12604 = vmatmul.mubr.msk.f32.gmra.mrb[88].mxu0 %vm5867_vm1, %v16630_v61  ;;  %v16650_v61 = vld [vmem:[#allocation3 + $0x1e9] sm:$0xff] }
 0xe68   : > { %12606 = vmatprep.mubr.msk.f32.mxu0 %vm5867_vm1, %v16634_v21  ;;  %v16654_v21 = vld [vmem:[#allocation3 + $0x1f1] sm:$0xff] }
 0xe69   : > { %17400 = vst [vmem:[#allocation7_spill] sm:$0xff] %v16654_v21 }
 0xe6b   : > { %12607 = vmatmul.mubr.msk.f32.gmra.mrb[90].mxu0 %vm5867_vm1, %v16638_v30  ;;  %v10931_v30 = vld [vmem:[%s17160_s3 + $0x50] sm:$0xff] }
 0xe6c   : > { %12609 = vmatprep.mubr.msk.f32.mxu0 %vm5867_vm1, %v16642_v17  ;;  %v10932_v17 = vld [vmem:[%s17160_s3 + $0x58] sm:$0xff] }
 0xe6f   : > { %12610 = vmatmul.mubr.msk.f32.gmra.mrb[92].mxu0 %vm5867_vm1, %v16646_v57  ;;  %v12951_v57 = vpack.c.bf16 %v10932_v17, %v10931_v30  ;;  %v10966_v30 = vld [vmem:[%s17160_s3 + $0x68] sm:$0xff] }
 0xe70   : > { %12612 = vmatprep.mubr.msk.f32.mxu0 %vm5867_vm1, %v16650_v61 }
 0xe73   : > { %12613 = vmatmul.mubr.msk.f32.gmra.mrb[94].mxu0 %vm5867_vm1, %v16654_v21 }
 0xe74   : > { %12619 = vmatprep.mubr.msk.f32.mxu0 %vm5867_vm1, %v16404_v23  ;;  %v16729_v23 = vld [vmem:[#allocation3 + $0x20f] sm:$0xff] }
 0xe77   : > { %12620 = vmatmul.mubr.msk.f32.vlgmr.msra.gmra.mrb[64].mxu0 %vm5867_vm1, %v16410_v44  ;;  %v10965_v44 = vld [vmem:[%s17160_s3 + $0x60] sm:$0xff] }
 0xe78   : > { %12622 = vmatprep.mubr.msk.f32.mxu0 %vm5867_vm1, %v16414_v49  ;;  %12950 = vmatpush3.bf16.msra.mxu0 %v16533_v31  ;;  %v16725_v31 = vld [vmem:[#allocation3 + $0x207] sm:$0xff]  ;;  %v12955_v17 = vpack.c.bf16 %v10966_v30, %v10965_v44  ;;  %v17424_v30 = vld [vmem:[#allocation26_spill] sm:$0xff] }
 0xe79   : > { %12952 = vmatprep.subr.bf16.mxu0 %v12951_v57  ;;  %v17423_v44 = vld [vmem:[#allocation25_spill] sm:$0xff] }
 0xe7b   : > { %12623 = vmatmul.mubr.msk.f32.gmra.mrb[66].mxu0 %vm5867_vm1, %v16418_v29 }
 0xe7c   : > { %12625 = vmatprep.mubr.msk.f32.mxu0 %vm5867_vm1, %v16422_v3 }
 0xe7f   : > { %12626 = vmatmul.mubr.msk.f32.gmra.mrb[68].mxu0 %vm5867_vm1, %v16426_v6 }
 0xe80   : > { %12628 = vmatprep.mubr.msk.f32.mxu0 %vm5867_vm1, %v16430_v63 }
 0xe83   : > { %12629 = vmatmul.mubr.msk.f32.gmra.mrb[70].mxu0 %vm5867_vm1, %v16434_v8 }
 0xe84   : > { %12631 = vmatprep.mubr.msk.f32.mxu0 %vm5867_vm1, %v16438_v45 }
 0xe87   : > { %12632 = vmatmul.mubr.msk.f32.gmra.mrb[72].mxu0 %vm5867_vm1, %v16442_v42 }
 0xe88   : > { %12634 = vmatprep.mubr.msk.f32.mxu0 %vm5867_vm1, %v16446_v46 }
 0xe8b   : > { %12635 = vmatmul.mubr.msk.f32.gmra.mrb[74].mxu0 %vm5867_vm1, %v16450_v26 }
 0xe8c   : > { %12637 = vmatprep.mubr.msk.f32.mxu0 %vm5867_vm1, %v16454_v11 }
 0xe8f   : > { %12638 = vmatmul.mubr.msk.f32.gmra.mrb[76].mxu0 %vm5867_vm1, %v16458_v38 }
 0xe90   : > { %12640 = vmatprep.mubr.msk.f32.mxu0 %vm5867_vm1, %v16462_v10 }
 0xe93   : > { %12641 = vmatmul.mubr.msk.f32.gmra.mrb[78].mxu0 %vm5867_vm1, %v16466_v15 }
 0xe94   : > { %12643 = vmatprep.mubr.msk.f32.mxu0 %vm5867_vm1, %v16470_v1 }
 0xe97   : > { %12644 = vmatmul.mubr.msk.f32.gmra.mrb[80].mxu0 %vm5867_vm1, %v16474_v28 }
 0xe98   : > { %12646 = vmatprep.mubr.msk.f32.mxu0 %vm5867_vm1, %v16478_v33 }
 0xe9b   : > { %12647 = vmatmul.mubr.msk.f32.gmra.mrb[82].mxu0 %vm5867_vm1, %v16482_v22 }
 0xe9c   : > { %12649 = vmatprep.mubr.msk.f32.mxu0 %vm5867_vm1, %v16486_v7 }
 0xe9f   : > { %12650 = vmatmul.mubr.msk.f32.gmra.mrb[84].mxu0 %vm5867_vm1, %v16490_v60 }
 0xea0   : > { %12652 = vmatprep.mubr.msk.f32.mxu0 %vm5867_vm1, %v16494_v58 }
 0xea3   : > { %12653 = vmatmul.mubr.msk.f32.gmra.mrb[86].mxu0 %vm5867_vm1, %v16498_v55 }
 0xea4   : > { %12655 = vmatprep.mubr.msk.f32.mxu0 %vm5867_vm1, %v16502_v35 }
 0xea7   : > { %12656 = vmatmul.mubr.msk.f32.gmra.mrb[88].mxu0 %vm5867_vm1, %v16506_v14 }
 0xea8   : > { %12658 = vmatprep.mubr.msk.f32.mxu0 %vm5867_vm1, %v16510_v51 }
 0xeab   : > { %12659 = vmatmul.mubr.msk.f32.gmra.mrb[90].mxu0 %vm5867_vm1, %v16514_v39 }
 0xeac   : > { %12661 = vmatprep.mubr.msk.f32.mxu0 %vm5867_vm1, %v16518_v4 }
 0xeaf   : > { %12662 = vmatmul.mubr.msk.f32.gmra.mrb[92].mxu0 %vm5867_vm1, %v16522_v5 }
 0xeb0   : > { %12664 = vmatprep.mubr.msk.f32.mxu0 %vm5867_vm1, %v16725_v31 }
 0xeb3   : > { %12665 = vmatmul.mubr.msk.f32.gmra.mrb[94].mxu0 %vm5867_vm1, %v16729_v23 }
 0xeb4   : > { %12671 = vmatprep.mubr.msk.f32.mxu0 %vm5867_vm1, %v16221_v27  ;;  %v17401_v27 = vld [vmem:[#allocation9_spill] sm:$0xff] }
 0xeb7   : > { %12672 = vmatmul.mubr.msk.f32.vlgmr.msra.gmra.mrb[64].mxu0 %vm5867_vm1, %v16226_v20  ;;  %v17402_v20 = vld [vmem:[#allocation10_spill] sm:$0xff] }
 0xeb8   : > { %12674 = vmatprep.mubr.msk.f32.mxu0 %vm5867_vm1, %v16233_v62  ;;  %12954 = vmatpush3.bf16.msra.mxu0 %v12951_v57  ;;  %v17403_v62 = vld [vmem:[#allocation11_spill] sm:$0xff]  ;;  %v17422_v57 = vld [vmem:[#allocation24_spill] sm:$0xff] }
 0xeb9   : > { %12956 = vmatprep.subr.bf16.mxu0 %v12955_v17 }
 0xebb   : > { %12675 = vmatmul.mubr.msk.f32.gmra.mrb[66].mxu0 %vm5867_vm1, %v16238_v2  ;;  %v17404_v2 = vld [vmem:[#allocation12_spill] sm:$0xff] }
 0xebc   : > { %12677 = vmatprep.mubr.msk.f32.mxu0 %vm5867_vm1, %v16245_v36  ;;  %v16799_v36 = vld [vmem:[#allocation3 + $0x208] sm:$0xff] }
 0xebf   : > { %12678 = vmatmul.mubr.msk.f32.gmra.mrb[68].mxu0 %vm5867_vm1, %v16250_v59  ;;  %v16803_v59 = vld [vmem:[#allocation3 + $0x210] sm:$0xff] }
 0xec0   : > { %12680 = vmatprep.mubr.msk.f32.mxu0 %vm5867_vm1, %v16257_v13  ;;  %v10999_v13 = vld [vmem:[%s17160_s3 + $0x70] sm:$0xff] }
 0xec3   : > { %12681 = vmatmul.mubr.msk.f32.gmra.mrb[70].mxu0 %vm5867_vm1, %v16262_v34  ;;  %v11000_v34 = vld [vmem:[%s17160_s3 + $0x78] sm:$0xff] }
 0xec4   : > { %12683 = vmatprep.mubr.msk.f32.mxu0 %vm5867_vm1, %v16269_v25  ;;  %v12959_v25 = vpack.c.bf16 %v11000_v34, %v10999_v13  ;;  %v17426_v13 = vld [vmem:[#allocation29_spill] sm:$0xff] }
 0xec5   : > { %v17427_v34 = vld [vmem:[#allocation33_spill] sm:$0xff] }
 0xec7   : > { %12684 = vmatmul.mubr.msk.f32.gmra.mrb[72].mxu0 %vm5867_vm1, %v16274_v37  ;;  %v17405_v37 = vld [vmem:[#allocation13_spill] sm:$0xff] }
 0xec8   : > { %12686 = vmatprep.mubr.msk.f32.mxu0 %vm5867_vm1, %v16281_v19  ;;  %v17406_v19 = vld [vmem:[#allocation14_spill] sm:$0xff] }
 0xecb   : > { %12687 = vmatmul.mubr.msk.f32.gmra.mrb[74].mxu0 %vm5867_vm1, %v16286_v16  ;;  %v17407_v16 = vld [vmem:[#allocation15_spill] sm:$0xff] }
 0xecc   : > { %12689 = vmatprep.mubr.msk.f32.mxu0 %vm5867_vm1, %v16293_v54  ;;  %v17408_v54 = vld [vmem:[#allocation16_spill] sm:$0xff] }
 0xecf   : > { %12690 = vmatmul.mubr.msk.f32.gmra.mrb[76].mxu0 %vm5867_vm1, %v16298_v41  ;;  %v17409_v41 = vld [vmem:[#allocation17_spill] sm:$0xff] }
 0xed0   : > { %12692 = vmatprep.mubr.msk.f32.mxu0 %vm5867_vm1, %v16305_v53  ;;  %v17410_v53 = vld [vmem:[#allocation18_spill] sm:$0xff] }
 0xed3   : > { %12693 = vmatmul.mubr.msk.f32.gmra.mrb[78].mxu0 %vm5867_vm1, %v16310_v43  ;;  %v17411_v43 = vld [vmem:[#allocation19_spill] sm:$0xff] }
 0xed4   : > { %12695 = vmatprep.mubr.msk.f32.mxu0 %vm5867_vm1, %v16317_v18  ;;  %v17412_v18 = vld [vmem:[#allocation20_spill] sm:$0xff] }
 0xed7   : > { %12696 = vmatmul.mubr.msk.f32.gmra.mrb[80].mxu0 %vm5867_vm1, %v16322_v56  ;;  %v17413_v56 = vld [vmem:[#allocation21_spill] sm:$0xff] }
 0xed8   : > { %12698 = vmatprep.mubr.msk.f32.mxu0 %vm5867_vm1, %v16329_v0  ;;  %v17414_v0 = vld [vmem:[#allocation28_spill] sm:$0xff] }
 0xedb   : > { %12699 = vmatmul.mubr.msk.f32.gmra.mrb[82].mxu0 %vm5867_vm1, %v16334_v48  ;;  %v17415_v48 = vld [vmem:[#allocation30_spill] sm:$0xff] }
 0xedc   : > { %12701 = vmatprep.mubr.msk.f32.mxu0 %vm5867_vm1, %v16341_v9  ;;  %v17416_v9 = vld [vmem:[#allocation31_spill] sm:$0xff] }
 0xedf   : > { %12702 = vmatmul.mubr.msk.f32.gmra.mrb[84].mxu0 %vm5867_vm1, %v16346_v12  ;;  %v17417_v12 = vld [vmem:[#allocation32_spill] sm:$0xff] }
 0xee0   : > { %12704 = vmatprep.mubr.msk.f32.mxu0 %vm5867_vm1, %v16353_v24  ;;  %v17418_v24 = vld [vmem:[#allocation34_spill] sm:$0xff] }
 0xee3   : > { %12705 = vmatmul.mubr.msk.f32.gmra.mrb[86].mxu0 %vm5867_vm1, %v16358_v50  ;;  %v17419_v50 = vld [vmem:[#allocation36_spill] sm:$0xff] }
 0xee4   : > { %12707 = vmatprep.mubr.msk.f32.mxu0 %vm5867_vm1, %v16365_v47 }
 0xee7   : > { %12708 = vmatmul.mubr.msk.f32.gmra.mrb[88].mxu0 %vm5867_vm1, %v16370_v40 }
 0xee8   : > { %12710 = vmatprep.mubr.msk.f32.mxu0 %vm5867_vm1, %v17401_v27 }
 0xeeb   : > { %12711 = vmatmul.mubr.msk.f32.gmra.mrb[90].mxu0 %vm5867_vm1, %v17402_v20 }
 0xeec   : > { %12713 = vmatprep.mubr.msk.f32.mxu0 %vm5867_vm1, %v17403_v62 }
 0xeef   : > { %12714 = vmatmul.mubr.msk.f32.gmra.mrb[92].mxu0 %vm5867_vm1, %v17404_v2 }
 0xef0   : > { %12716 = vmatprep.mubr.msk.f32.mxu0 %vm5867_vm1, %v16799_v36 }
 0xef3   : > { %12717 = vmatmul.mubr.msk.f32.gmra.mrb[94].mxu0 %vm5867_vm1, %v16803_v59 }
 0xef4   : > { %12723 = vmatprep.mubr.msk.f32.mxu0 %vm5867_vm1, %v16536_v32  ;;  %v17421_v32 = vld [vmem:[#allocation23_spill] sm:$0xff] }
 0xef7   : > { %12724 = vmatmul.mubr.msk.f32.vlgmr.msra.gmra.mrb[64].mxu0 %vm5867_vm1, %v16542_v52  ;;  %v17420_v52 = vld [vmem:[#allocation22_spill] sm:$0xff] }
 0xef8   : > { %12726 = vmatprep.mubr.msk.f32.mxu0 %vm5867_vm1, %v17405_v37  ;;  %12958 = vmatpush3.bf16.msra.mxu0 %v12955_v17  ;;  %v17425_v17 = vld [vmem:[#allocation27_spill] sm:$0xff] }
 0xef9   : > { %12960 = vmatprep.subr.bf16.mxu0 %v12959_v25 }
 0xefb   : > { %12727 = vmatmul.mubr.msk.f32.gmra.mrb[66].mxu0 %vm5867_vm1, %v17406_v19 }
 0xefc   : > { %12729 = vmatprep.mubr.msk.f32.mxu0 %vm5867_vm1, %v17407_v16 }
 0xeff   : > { %12730 = vmatmul.mubr.msk.f32.gmra.mrb[68].mxu0 %vm5867_vm1, %v17408_v54 }
 0xf00   : > { %12732 = vmatprep.mubr.msk.f32.mxu0 %vm5867_vm1, %v17409_v41 }
 0xf03   : > { %12733 = vmatmul.mubr.msk.f32.gmra.mrb[70].mxu0 %vm5867_vm1, %v17410_v53 }
 0xf04   : > { %12735 = vmatprep.mubr.msk.f32.mxu0 %vm5867_vm1, %v17411_v43 }
 0xf07   : > { %12736 = vmatmul.mubr.msk.f32.gmra.mrb[72].mxu0 %vm5867_vm1, %v17412_v18 }
 0xf08   : > { %12738 = vmatprep.mubr.msk.f32.mxu0 %vm5867_vm1, %v17413_v56 }
 0xf0b   : > { %12739 = vmatmul.mubr.msk.f32.gmra.mrb[74].mxu0 %vm5867_vm1, %v17414_v0 }
 0xf0c   : > { %12741 = vmatprep.mubr.msk.f32.mxu0 %vm5867_vm1, %v17415_v48 }
 0xf0f   : > { %12742 = vmatmul.mubr.msk.f32.gmra.mrb[76].mxu0 %vm5867_vm1, %v17416_v9 }
 0xf10   : > { %12744 = vmatprep.mubr.msk.f32.mxu0 %vm5867_vm1, %v17417_v12 }
 0xf13   : > { %12745 = vmatmul.mubr.msk.f32.gmra.mrb[78].mxu0 %vm5867_vm1, %v17418_v24 }
 0xf14   : > { %12747 = vmatprep.mubr.msk.f32.mxu0 %vm5867_vm1, %v17419_v50 }
 0xf17   : > { %12748 = vmatmul.mubr.msk.f32.gmra.mrb[80].mxu0 %vm5867_vm1, %v17420_v52  ;;  %v17428_v52 = vld [vmem:[#allocation35_spill] sm:$0xff] }
 0xf18   : > { %12750 = vmatprep.mubr.msk.f32.mxu0 %vm5867_vm1, %v17421_v32  ;;  %v17429_v32 = vld [vmem:[#allocation37_spill] sm:$0xff] }
 0xf1b   : > { %12751 = vmatmul.mubr.msk.f32.gmra.mrb[82].mxu0 %vm5867_vm1, %v17422_v57  ;;  %v17430_v57 = vld [vmem:[#allocation4_spill] sm:$0xff] }
 0xf1c   : > { %12753 = vmatprep.mubr.msk.f32.mxu0 %vm5867_vm1, %v17423_v44 }
 0xf1f   : > { %12754 = vmatmul.mubr.msk.f32.gmra.mrb[84].mxu0 %vm5867_vm1, %v17424_v30 }
 0xf20   : > { %12756 = vmatprep.mubr.msk.f32.mxu0 %vm5867_vm1, %v17425_v17  ;;  %v16873_v17 = vld [vmem:[#allocation3 + $0x209] sm:$0xff] }
 0xf23   : > { %12757 = vmatmul.mubr.msk.f32.gmra.mrb[86].mxu0 %vm5867_vm1, %v17426_v13 }
 0xf24   : > { %12759 = vmatprep.mubr.msk.f32.mxu0 %vm5867_vm1, %v17427_v34  ;;  %v16877_v34 = vld [vmem:[#allocation3 + $0x211] sm:$0xff] }
 0xf27   : > { %12760 = vmatmul.mubr.msk.f32.gmra.mrb[88].mxu0 %vm5867_vm1, %v17428_v52 }
 0xf28   : > { %12762 = vmatprep.mubr.msk.f32.mxu0 %vm5867_vm1, %v17429_v32  ;;  %v11033_v32 = vld [vmem:[%s17160_s3 + $0x80] sm:$0xff] }
 0xf2b   : > { %12763 = vmatmul.mubr.msk.f32.gmra.mrb[90].mxu0 %vm5867_vm1, %v17430_v57  ;;  %v11034_v57 = vld [vmem:[%s17160_s3 + $0x88] sm:$0xff] }
 0xf2c   : > { %12765 = vmatprep.mubr.msk.f32.mxu0 %vm5867_vm1, %v16650_v61 }
 0xf2f   : > { %12766 = vmatmul.mubr.msk.f32.gmra.mrb[92].mxu0 %vm5867_vm1, %v16654_v21  ;;  %v12963_v21 = vpack.c.bf16 %v11034_v57, %v11033_v32  ;;  %v13567_v57 = vld [vmem:[%s13661_s29 + $0x30] sm:$0xff] }
 0xf30   : > { %12768 = vmatprep.mubr.msk.f32.mxu0 %vm5867_vm1, %v16873_v17 }
 0xf33   : > { %12769 = vmatmul.mubr.msk.f32.gmra.mrb[94].mxu0 %vm5867_vm1, %v16877_v34 }
 0xf34   : > { %12775 = vmatprep.mubr.msk.f32.mxu0 %vm5867_vm1, %v16414_v49  ;;  %v9077_v49 = vld [vmem:[#allocation3 + $0x227] sm:$0xff] }
 0xf37   : > { %12776 = vmatmul.mubr.msk.f32.vlgmr.msra.gmra.mrb[64].mxu0 %vm5867_vm1, %v16418_v29  ;;  %v9078_v29 = vld [vmem:[#allocation3 + $0x22f] sm:$0xff] }
 0xf38   : > { %12778 = vmatprep.mubr.msk.f32.mxu0 %vm5867_vm1, %v16422_v3  ;;  %12962 = vmatpush3.bf16.msra.mxu0 %v12959_v25  ;;  %v9435_v3 = vld [vmem:[#allocation3 + $0x48] sm:$0xff]  ;;  %v13561_v25 = vld [vmem:[%s13661_s29] sm:$0xff] }
 0xf39   : > { %12964 = vmatprep.subr.bf16.mxu0 %v12963_v21 }
 0xf3b   : > { %12779 = vmatmul.mubr.msk.f32.gmra.mrb[66].mxu0 %vm5867_vm1, %v16426_v6  ;;  %v9436_v6 = vld [vmem:[#allocation3 + $0x50] sm:$0xff] }
 0xf3c   : > { %12781 = vmatprep.mubr.msk.f32.mxu0 %vm5867_vm1, %v16430_v63  ;;  %v9437_v63 = vld [vmem:[#allocation3 + $0x68] sm:$0xff] }
 0xf3f   : > { %12782 = vmatmul.mubr.msk.f32.gmra.mrb[68].mxu0 %vm5867_vm1, %v16434_v8  ;;  %v9438_v8 = vld [vmem:[#allocation3 + $0x70] sm:$0xff] }
 0xf40   : > { %12784 = vmatprep.mubr.msk.f32.mxu0 %vm5867_vm1, %v16438_v45  ;;  %v9439_v45 = vld [vmem:[#allocation3 + $0x88] sm:$0xff] }
 0xf43   : > { %12785 = vmatmul.mubr.msk.f32.gmra.mrb[70].mxu0 %vm5867_vm1, %v16442_v42  ;;  %v9440_v42 = vld [vmem:[#allocation3 + $0x90] sm:$0xff] }
 0xf44   : > { %12787 = vmatprep.mubr.msk.f32.mxu0 %vm5867_vm1, %v16446_v46  ;;  %v9441_v46 = vld [vmem:[#allocation3 + $0xa8] sm:$0xff] }
 0xf47   : > { %12788 = vmatmul.mubr.msk.f32.gmra.mrb[72].mxu0 %vm5867_vm1, %v16450_v26  ;;  %v9442_v26 = vld [vmem:[#allocation3 + $0xb0] sm:$0xff] }
 0xf48   : > { %12790 = vmatprep.mubr.msk.f32.mxu0 %vm5867_vm1, %v16454_v11  ;;  %v9443_v11 = vld [vmem:[#allocation3 + $0xc8] sm:$0xff] }
 0xf4b   : > { %12791 = vmatmul.mubr.msk.f32.gmra.mrb[74].mxu0 %vm5867_vm1, %v16458_v38  ;;  %v9444_v38 = vld [vmem:[#allocation3 + $0xd0] sm:$0xff] }
 0xf4c   : > { %12793 = vmatprep.mubr.msk.f32.mxu0 %vm5867_vm1, %v16462_v10  ;;  %v9445_v10 = vld [vmem:[#allocation3 + $0xe8] sm:$0xff] }
 0xf4f   : > { %12794 = vmatmul.mubr.msk.f32.gmra.mrb[76].mxu0 %vm5867_vm1, %v16466_v15  ;;  %v9446_v15 = vld [vmem:[#allocation3 + $0xf0] sm:$0xff] }
 0xf50   : > { %12796 = vmatprep.mubr.msk.f32.mxu0 %vm5867_vm1, %v16470_v1  ;;  %v9447_v1 = vld [vmem:[#allocation3 + $0x108] sm:$0xff] }
 0xf53   : > { %12797 = vmatmul.mubr.msk.f32.gmra.mrb[78].mxu0 %vm5867_vm1, %v16474_v28  ;;  %v9448_v28 = vld [vmem:[#allocation3 + $0x110] sm:$0xff] }
 0xf54   : > { %12799 = vmatprep.mubr.msk.f32.mxu0 %vm5867_vm1, %v16478_v33  ;;  %v9449_v33 = vld [vmem:[#allocation3 + $0x128] sm:$0xff] }
 0xf57   : > { %12800 = vmatmul.mubr.msk.f32.gmra.mrb[80].mxu0 %vm5867_vm1, %v16482_v22  ;;  %v9450_v22 = vld [vmem:[#allocation3 + $0x130] sm:$0xff] }
 0xf58   : > { %12802 = vmatprep.mubr.msk.f32.mxu0 %vm5867_vm1, %v16486_v7  ;;  %v9451_v7 = vld [vmem:[#allocation3 + $0x148] sm:$0xff] }
 0xf5b   : > { %12803 = vmatmul.mubr.msk.f32.gmra.mrb[82].mxu0 %vm5867_vm1, %v16490_v60  ;;  %v9452_v60 = vld [vmem:[#allocation3 + $0x150] sm:$0xff] }
 0xf5c   : > { %12805 = vmatprep.mubr.msk.f32.mxu0 %vm5867_vm1, %v16494_v58  ;;  %v9453_v58 = vld [vmem:[#allocation3 + $0x168] sm:$0xff] }
 0xf5f   : > { %12806 = vmatmul.mubr.msk.f32.gmra.mrb[84].mxu0 %vm5867_vm1, %v16498_v55  ;;  %v9454_v55 = vld [vmem:[#allocation3 + $0x170] sm:$0xff] }
 0xf60   : > { %12808 = vmatprep.mubr.msk.f32.mxu0 %vm5867_vm1, %v16502_v35  ;;  %v9455_v35 = vld [vmem:[#allocation3 + $0x188] sm:$0xff] }
 0xf63   : > { %12809 = vmatmul.mubr.msk.f32.gmra.mrb[86].mxu0 %vm5867_vm1, %v16506_v14  ;;  %v9456_v14 = vld [vmem:[#allocation3 + $0x190] sm:$0xff] }
 0xf64   : > { %12811 = vmatprep.mubr.msk.f32.mxu0 %vm5867_vm1, %v16510_v51  ;;  %v9465_v51 = vld [vmem:[#allocation3 + $0x228] sm:$0xff] }
 0xf67   : > { %12812 = vmatmul.mubr.msk.f32.gmra.mrb[88].mxu0 %vm5867_vm1, %v16514_v39  ;;  %v17432_v39 = vld [vmem:[#allocation23_spill] sm:$0xff] }
 0xf68   : > { %12814 = vmatprep.mubr.msk.f32.mxu0 %vm5867_vm1, %v16518_v4  ;;  %v17433_v4 = vld [vmem:[#allocation24_spill] sm:$0xff] }
 0xf6b   : > { %12815 = vmatmul.mubr.msk.f32.gmra.mrb[90].mxu0 %vm5867_vm1, %v16522_v5  ;;  %v17434_v5 = vld [vmem:[#allocation27_spill] sm:$0xff] }
 0xf6c   : > { %12817 = vmatprep.mubr.msk.f32.mxu0 %vm5867_vm1, %v16725_v31  ;;  %v17436_v31 = vld [vmem:[#allocation37_spill] sm:$0xff] }
 0xf6f   : > { %12818 = vmatmul.mubr.msk.f32.gmra.mrb[92].mxu0 %vm5867_vm1, %v16729_v23  ;;  %v17437_v23 = vld [vmem:[#allocation4_spill] sm:$0xff] }
 0xf70   : > { %12820 = vmatprep.mubr.msk.f32.mxu0 %vm5867_vm1, %v9077_v49  ;;  %v13569_v49 = vld [vmem:[%s13661_s29 + $0x40] sm:$0xff] }
 0xf73   : > { %12821 = vmatmul.mubr.msk.f32.gmra.mrb[94].mxu0 %vm5867_vm1, %v9078_v29 }
 0xf74   : > { %12827 = vmatprep.mubr.msk.f32.mxu0 %vm5867_vm1, %v9435_v3 }
 0xf77   : > { %12828 = vmatmul.mubr.msk.f32.vlgmr.msra.gmra.mrb[64].mxu0 %vm5867_vm1, %v9436_v6  ;;  %v13570_v6 = vld [vmem:[%s13661_s29 + $0x58] sm:$0xff] }
 0xf78   : > { %12830 = vmatprep.mubr.msk.f32.mxu0 %vm5867_vm1, %v9437_v63  ;;  %12966 = vmatpush3.bf16.msra.mxu0 %v12963_v21  ;;  %v17435_v21 = vld [vmem:[#allocation33_spill] sm:$0xff] }
 0xf7b   : > { %12831 = vmatmul.mubr.msk.f32.gmra.mrb[66].mxu0 %vm5867_vm1, %v9438_v8 }
 0xf7c   : > { %12833 = vmatprep.mubr.msk.f32.mxu0 %vm5867_vm1, %v9439_v45  ;;  %v13571_v45 = vld [vmem:[%s13661_s29 + $0x50] sm:$0xff] }
 0xf7f   : > { %12834 = vmatmul.mubr.msk.f32.gmra.mrb[68].mxu0 %vm5867_vm1, %v9440_v42 }
 0xf80   : > { %12836 = vmatprep.mubr.msk.f32.mxu0 %vm5867_vm1, %v9441_v46 }
 0xf83   : > { %12837 = vmatmul.mubr.msk.f32.gmra.mrb[70].mxu0 %vm5867_vm1, %v9442_v26  ;;  %v13572_v26 = vld [vmem:[%s13661_s29 + $0x68] sm:$0xff] }
 0xf84   : > { %12839 = vmatprep.mubr.msk.f32.mxu0 %vm5867_vm1, %v9443_v11 }
 0xf87   : > { %12840 = vmatmul.mubr.msk.f32.gmra.mrb[72].mxu0 %vm5867_vm1, %v9444_v38 }
 0xf88   : > { %12842 = vmatprep.mubr.msk.f32.mxu0 %vm5867_vm1, %v9445_v10  ;;  %v13573_v10 = vld [vmem:[%s13661_s29 + $0x60] sm:$0xff] }
 0xf8b   : > { %12843 = vmatmul.mubr.msk.f32.gmra.mrb[74].mxu0 %vm5867_vm1, %v9446_v15 }
 0xf8c   : > { %12845 = vmatprep.mubr.msk.f32.mxu0 %vm5867_vm1, %v9447_v1 }
 0xf8f   : > { %12846 = vmatmul.mubr.msk.f32.gmra.mrb[76].mxu0 %vm5867_vm1, %v9448_v28  ;;  %v13574_v28 = vld [vmem:[%s13661_s29 + $0x78] sm:$0xff] }
 0xf90   : > { %12848 = vmatprep.mubr.msk.f32.mxu0 %vm5867_vm1, %v9449_v33 }
 0xf93   : > { %12849 = vmatmul.mubr.msk.f32.gmra.mrb[78].mxu0 %vm5867_vm1, %v9450_v22 }
 0xf94   : > { %12851 = vmatprep.mubr.msk.f32.mxu0 %vm5867_vm1, %v9451_v7  ;;  %v13575_v7 = vld [vmem:[%s13661_s29 + $0x70] sm:$0xff] }
 0xf97   : > { %12852 = vmatmul.mubr.msk.f32.gmra.mrb[80].mxu0 %vm5867_vm1, %v9452_v60 }
 0xf98   : > { %12854 = vmatprep.mubr.msk.f32.mxu0 %vm5867_vm1, %v9453_v58 }
 0xf9b   : > { %12855 = vmatmul.mubr.msk.f32.gmra.mrb[82].mxu0 %vm5867_vm1, %v9454_v55  ;;  %v13576_v55 = vld [vmem:[%s13661_s29 + $0x88] sm:$0xff] }
 0xf9c   : > { %12857 = vmatprep.mubr.msk.f32.mxu0 %vm5867_vm1, %v9455_v35 }
 0xf9f   : > { %12858 = vmatmul.mubr.msk.f32.gmra.mrb[84].mxu0 %vm5867_vm1, %v9456_v14 }
 0xfa0   : > { %12860 = vmatprep.mubr.msk.f32.mxu0 %vm5867_vm1, %v16365_v47  ;;  %v9466_v47 = vld [vmem:[#allocation3 + $0x230] sm:$0xff] }
 0xfa3   : > { %12861 = vmatmul.mubr.msk.f32.gmra.mrb[86].mxu0 %vm5867_vm1, %v16370_v40  ;;  %v17431_v40 = vld [vmem:[#allocation22_spill] sm:$0xff] }
 0xfa4   : > { %12863 = vmatprep.mubr.msk.f32.mxu0 %vm5867_vm1, %v17401_v27  ;;  %v17438_v27 = vld [vmem:[#allocation7_spill] sm:$0xff] }
 0xfa7   : > { %12864 = vmatmul.mubr.msk.f32.gmra.mrb[88].mxu0 %vm5867_vm1, %v17402_v20  ;;  %v9853_v20 = vld [vmem:[#allocation3 + $0x229] sm:$0xff] }
 0xfa8   : > { %12866 = vmatprep.mubr.msk.f32.mxu0 %vm5867_vm1, %v17403_v62  ;;  %v9854_v62 = vld [vmem:[#allocation3 + $0x231] sm:$0xff] }
 0xfab   : > { %12867 = vmatmul.mubr.msk.f32.gmra.mrb[90].mxu0 %vm5867_vm1, %v17404_v2  ;;  %v13560_v2 = vld [vmem:[%s13661_s29 + $0x8] sm:$0xff] }
 0xfac   : > { %12869 = vmatprep.mubr.msk.f32.mxu0 %vm5867_vm1, %v16799_v36 }
 0xfaf   : > { %12870 = vmatmul.mubr.msk.f32.gmra.mrb[92].mxu0 %vm5867_vm1, %v16803_v59 }
 0xfb0   : > { %12872 = vmatprep.mubr.msk.f32.mxu0 %vm5867_vm1, %v9465_v51  ;;  %v13577_v51 = vld [vmem:[%s13661_s29 + $0x80] sm:$0xff] }
 0xfb3   : > { %12873 = vmatmul.mubr.msk.f32.gmra.mrb[94].mxu0 %vm5867_vm1, %v9466_v47 }
 0xfb4   : > { %12879 = vmatprep.mubr.msk.f32.mxu0 %vm5867_vm1, %v17405_v37 }
 0xfb7   : > { %12880 = vmatmul.mubr.msk.f32.vlgmr.msra.gmra.mrb[64].mxu0 %vm5867_vm1, %v17406_v19 }
 0xfb8   : > { %12882 = vmatprep.mubr.msk.f32.mxu0 %vm5867_vm1, %v17407_v16  ;;  %v13562_v16 = vld [vmem:[%s13661_s29 + $0x18] sm:$0xff] }
 0xfbb   : > { %12883 = vmatmul.mubr.msk.f32.gmra.mrb[66].mxu0 %vm5867_vm1, %v17408_v54 }
 0xfbc   : > { %12885 = vmatprep.mubr.msk.f32.mxu0 %vm5867_vm1, %v17409_v41 }
 0xfbf   : > { %12886 = vmatmul.mubr.msk.f32.gmra.mrb[68].mxu0 %vm5867_vm1, %v17410_v53  ;;  %v13563_v53 = vld [vmem:[%s13661_s29 + $0x10] sm:$0xff] }
 0xfc0   : > { %12888 = vmatprep.mubr.msk.f32.mxu0 %vm5867_vm1, %v17411_v43 }
 0xfc3   : > { %12889 = vmatmul.mubr.msk.f32.gmra.mrb[70].mxu0 %vm5867_vm1, %v17412_v18 }
 0xfc4   : > { %12891 = vmatprep.mubr.msk.f32.mxu0 %vm5867_vm1, %v17413_v56  ;;  %v13564_v56 = vld [vmem:[%s13661_s29 + $0x28] sm:$0xff] }
 0xfc7   : > { %12892 = vmatmul.mubr.msk.f32.gmra.mrb[72].mxu0 %vm5867_vm1, %v17414_v0 }
 0xfc8   : > { %12894 = vmatprep.mubr.msk.f32.mxu0 %vm5867_vm1, %v17415_v48 }
 0xfcb   : > { %12895 = vmatmul.mubr.msk.f32.gmra.mrb[74].mxu0 %vm5867_vm1, %v17416_v9  ;;  %v13565_v9 = vld [vmem:[%s13661_s29 + $0x20] sm:$0xff] }
 0xfcc   : > { %12897 = vmatprep.mubr.msk.f32.mxu0 %vm5867_vm1, %v17417_v12 }
 0xfcf   : > { %12898 = vmatmul.mubr.msk.f32.gmra.mrb[76].mxu0 %vm5867_vm1, %v17418_v24 }
 0xfd0   : > { %12900 = vmatprep.mubr.msk.f32.mxu0 %vm5867_vm1, %v17419_v50  ;;  %v13566_v50 = vld [vmem:[%s13661_s29 + $0x38] sm:$0xff] }
 0xfd3   : > { %12901 = vmatmul.mubr.msk.f32.gmra.mrb[78].mxu0 %vm5867_vm1, %v17431_v40 }
 0xfd4   : > { %12903 = vmatprep.mubr.msk.f32.mxu0 %vm5867_vm1, %v17432_v39  ;;  %v13578_v39 = vld [vmem:[%s13661_s29 + $0x98] sm:$0xff] }
 0xfd7   : > { %12904 = vmatmul.mubr.msk.f32.gmra.mrb[80].mxu0 %vm5867_vm1, %v17433_v4 }
 0xfd8   : > { %12906 = vmatprep.mubr.msk.f32.mxu0 %vm5867_vm1, %v17423_v44 }
 0xfdb   : > { %12907 = vmatmul.mubr.msk.f32.gmra.mrb[82].mxu0 %vm5867_vm1, %v17424_v30 }
 0xfdc   : > { %12909 = vmatprep.mubr.msk.f32.mxu0 %vm5867_vm1, %v17434_v5 }
 0xfdf   : > { %12910 = vmatmul.mubr.msk.f32.gmra.mrb[84].mxu0 %vm5867_vm1, %v17426_v13 }
 0xfe0   : > { %12912 = vmatprep.mubr.msk.f32.mxu0 %vm5867_vm1, %v17435_v21  ;;  %v13579_v21 = vld [vmem:[%s13661_s29 + $0x90] sm:$0xff] }
 0xfe3   : > { %12913 = vmatmul.mubr.msk.f32.gmra.mrb[86].mxu0 %vm5867_vm1, %v17428_v52 }
 0xfe4   : > { %12915 = vmatprep.mubr.msk.f32.mxu0 %vm5867_vm1, %v17436_v31 }
 0xfe7   : > { %12916 = vmatmul.mubr.msk.f32.gmra.mrb[88].mxu0 %vm5867_vm1, %v17437_v23 }
 0xfe8   : > { %12918 = vmatprep.mubr.msk.f32.mxu0 %vm5867_vm1, %v16650_v61 }
 0xfeb   : > { %12919 = vmatmul.mubr.msk.f32.gmra.mrb[90].mxu0 %vm5867_vm1, %v17438_v27  ;;  %v13580_v27 = vld [vmem:[%s13661_s29 + $0xa8] sm:$0xff] }
 0xfec   : > { %12921 = vmatprep.mubr.msk.f32.mxu0 %vm5867_vm1, %v16873_v17  ;;  %v13568_v17 = vld [vmem:[%s13661_s29 + $0x48] sm:$0xff] }
 0xfef   : > { %12922 = vmatmul.mubr.msk.f32.gmra.mrb[92].mxu0 %vm5867_vm1, %v16877_v34 }
 0xff0   : > { %12924 = vmatprep.mubr.msk.f32.mxu0 %vm5867_vm1, %v9853_v20 }
 0xff3   : > { %12925 = vmatmul.mubr.msk.f32.gmra.mrb[94].mxu0 %vm5867_vm1, %v9854_v62 }
0x108a   : > { %v12881_v61 = vpop.f32.mrb[64].mxu0 }
0x108b   : > { %v10212_v36 = vadd.f32 %v13560_v2, %v12881_v61  ;;  %v10020_v59 = vpop.f32.mrb[65].mxu0  ;;  %v13581_v61 = vld [vmem:[%s13661_s29 + $0xa0] sm:$0xff] }
0x108c   : > { %v10211_v37 = vadd.f32 %v13561_v25, %v10020_v59  ;;  %v13582_v59 = vld [vmem:[%s13661_s29 + $0xb8] sm:$0xff] }
0x108d   : > { %10244 = vst.msk [vmem:[%s17056_s27 + $0x8] sm:$0xff] %vm312_vm0, %v10212_v36 }
0x108e   : > { %10243 = vst.msk [vmem:[%s17056_s27] sm:$0xff] %vm312_vm0, %v10211_v37  ;;  %v12884_v19 = vpop.f32.mrb[66].mxu0 }
0x108f   : > { %v10214_v54 = vadd.f32 %v13562_v16, %v12884_v19  ;;  %v10030_v41 = vpop.f32.mrb[67].mxu0  ;;  %v13583_v19 = vld [vmem:[%s13661_s29 + $0xb0] sm:$0xff] }
0x1090   : > { %v10213_v43 = vadd.f32 %v13563_v53, %v10030_v41  ;;  %v13584_v41 = vld [vmem:[%s13661_s29 + $0xc8] sm:$0xff] }
0x1091   : > { %10246 = vst.msk [vmem:[%s17056_s27 + $0x18] sm:$0xff] %vm312_vm0, %v10214_v54 }
0x1092   : > { %10245 = vst.msk [vmem:[%s17056_s27 + $0x10] sm:$0xff] %vm312_vm0, %v10213_v43  ;;  %v12887_v18 = vpop.f32.mrb[68].mxu0 }
0x1093   : > { %v10216_v0 = vadd.f32 %v13564_v56, %v12887_v18  ;;  %v10040_v48 = vpop.f32.mrb[69].mxu0  ;;  %v13585_v18 = vld [vmem:[%s13661_s29 + $0xc0] sm:$0xff] }
0x1094   : > { %v10215_v12 = vadd.f32 %v13565_v9, %v10040_v48  ;;  %v13586_v48 = vld [vmem:[%s13661_s29 + $0xd8] sm:$0xff] }
0x1095   : > { %10248 = vst.msk [vmem:[%s17056_s27 + $0x28] sm:$0xff] %vm312_vm0, %v10216_v0 }
0x1096   : > { %10247 = vst.msk [vmem:[%s17056_s27 + $0x20] sm:$0xff] %vm312_vm0, %v10215_v12  ;;  %v12890_v24 = vpop.f32.mrb[70].mxu0 }
0x1097   : > { %v10218_v52 = vadd.f32 %v13566_v50, %v12890_v24  ;;  %v10050_v32 = vpop.f32.mrb[71].mxu0  ;;  %v13587_v24 = vld [vmem:[%s13661_s29 + $0xd0] sm:$0xff] }
0x1098   : > { %v10217_v44 = vadd.f32 %v13567_v57, %v10050_v32  ;;  %v13588_v32 = vld [vmem:[%s13661_s29 + $0xe8] sm:$0xff] }
0x1099   : > { %10250 = vst.msk [vmem:[%s17056_s27 + $0x38] sm:$0xff] %vm312_vm0, %v10218_v52 }
0x109a   : > { %10249 = vst.msk [vmem:[%s17056_s27 + $0x30] sm:$0xff] %vm312_vm0, %v10217_v44  ;;  %v12893_v30 = vpop.f32.mrb[72].mxu0 }
0x109b   : > { %v10220_v13 = vadd.f32 %v13568_v17, %v12893_v30  ;;  %v10060_v34 = vpop.f32.mrb[73].mxu0  ;;  %v13589_v30 = vld [vmem:[%s13661_s29 + $0xe0] sm:$0xff] }
0x109c   : > { %v10219_v29 = vadd.f32 %v13569_v49, %v10060_v34  ;;  %v13590_v34 = vld [vmem:[%s13661_s29 + $0xf8] sm:$0xff] }
0x109d   : > { %10252 = vst.msk [vmem:[%s17056_s27 + $0x48] sm:$0xff] %vm312_vm0, %v10220_v13 }
0x109e   : > { %10251 = vst.msk [vmem:[%s17056_s27 + $0x40] sm:$0xff] %vm312_vm0, %v10219_v29  ;;  %v12896_v3 = vpop.f32.mrb[74].mxu0 }
0x109f   : > { %v10222_v63 = vadd.f32 %v13570_v6, %v12896_v3  ;;  %v10070_v8 = vpop.f32.mrb[75].mxu0  ;;  %v13591_v3 = vld [vmem:[%s13661_s29 + $0xf0] sm:$0xff] }
0x10a0   : > { %v10221_v42 = vadd.f32 %v13571_v45, %v10070_v8 }
0x10a1   : > { %10254 = vst.msk [vmem:[%s17056_s27 + $0x58] sm:$0xff] %vm312_vm0, %v10222_v63 }
0x10a2   : > { %10253 = vst.msk [vmem:[%s17056_s27 + $0x50] sm:$0xff] %vm312_vm0, %v10221_v42  ;;  %v12899_v46 = vpop.f32.mrb[76].mxu0 }
0x10a3   : > { %v10224_v11 = vadd.f32 %v13572_v26, %v12899_v46  ;;  %v10080_v38 = vpop.f32.mrb[77].mxu0 }
0x10a4   : > { %v10223_v15 = vadd.f32 %v13573_v10, %v10080_v38 }
0x10a5   : > { %10256 = vst.msk [vmem:[%s17056_s27 + $0x68] sm:$0xff] %vm312_vm0, %v10224_v11 }
0x10a6   : > { %10255 = vst.msk [vmem:[%s17056_s27 + $0x60] sm:$0xff] %vm312_vm0, %v10223_v15  ;;  %v12902_v1 = vpop.f32.mrb[78].mxu0 }
0x10a7   : > { %v10226_v33 = vadd.f32 %v13574_v28, %v12902_v1  ;;  %v10090_v22 = vpop.f32.mrb[79].mxu0 }
0x10a8   : > { %v10225_v60 = vadd.f32 %v13575_v7, %v10090_v22 }
0x10a9   : > { %10258 = vst.msk [vmem:[%s17056_s27 + $0x78] sm:$0xff] %vm312_vm0, %v10226_v33 }
0x10aa   : > { %10257 = vst.msk [vmem:[%s17056_s27 + $0x70] sm:$0xff] %vm312_vm0, %v10225_v60  ;;  %v12905_v58 = vpop.f32.mrb[80].mxu0 }
0x10ab   : > { %v10228_v35 = vadd.f32 %v13576_v55, %v12905_v58  ;;  %v10100_v14 = vpop.f32.mrb[81].mxu0 }
0x10ac   : > { %v10227_v47 = vadd.f32 %v13577_v51, %v10100_v14 }
0x10ad   : > { %10260 = vst.msk [vmem:[%s17056_s27 + $0x88] sm:$0xff] %vm312_vm0, %v10228_v35 }
0x10ae   : > { %10259 = vst.msk [vmem:[%s17056_s27 + $0x80] sm:$0xff] %vm312_vm0, %v10227_v47  ;;  %v12908_v40 = vpop.f32.mrb[82].mxu0 }
0x10af   : > { %v10230_v4 = vadd.f32 %v13578_v39, %v12908_v40  ;;  %v10110_v5 = vpop.f32.mrb[83].mxu0 }
0x10b0   : > { %v10229_v31 = vadd.f32 %v13579_v21, %v10110_v5 }
0x10b1   : > { %10262 = vst.msk [vmem:[%s17056_s27 + $0x98] sm:$0xff] %vm312_vm0, %v10230_v4 }
0x10b2   : > { %10261 = vst.msk [vmem:[%s17056_s27 + $0x90] sm:$0xff] %vm312_vm0, %v10229_v31  ;;  %v12911_v23 = vpop.f32.mrb[84].mxu0 }
0x10b3   : > { %v10232_v20 = vadd.f32 %v13580_v27, %v12911_v23  ;;  %v10120_v62 = vpop.f32.mrb[85].mxu0 }
0x10b4   : > { %v10231_v2 = vadd.f32 %v13581_v61, %v10120_v62 }
0x10b5   : > { %10264 = vst.msk [vmem:[%s17056_s27 + $0xa8] sm:$0xff] %vm312_vm0, %v10232_v20 }
0x10b6   : > { %10263 = vst.msk [vmem:[%s17056_s27 + $0xa0] sm:$0xff] %vm312_vm0, %v10231_v2  ;;  %v12914_v36 = vpop.f32.mrb[86].mxu0 }
0x10b7   : > { %v10234_v25 = vadd.f32 %v13582_v59, %v12914_v36  ;;  %v10130_v37 = vpop.f32.mrb[87].mxu0 }
0x10b8   : > { %v10233_v16 = vadd.f32 %v13583_v19, %v10130_v37 }
0x10b9   : > { %10266 = vst.msk [vmem:[%s17056_s27 + $0xb8] sm:$0xff] %vm312_vm0, %v10234_v25 }
0x10ba   : > { %10265 = vst.msk [vmem:[%s17056_s27 + $0xb0] sm:$0xff] %vm312_vm0, %v10233_v16  ;;  %v12917_v54 = vpop.f32.mrb[88].mxu0 }
0x10bb   : > { %v10236_v53 = vadd.f32 %v13584_v41, %v12917_v54  ;;  %v10140_v43 = vpop.f32.mrb[89].mxu0 }
0x10bc   : > { %v10235_v56 = vadd.f32 %v13585_v18, %v10140_v43 }
0x10bd   : > { %10268 = vst.msk [vmem:[%s17056_s27 + $0xc8] sm:$0xff] %vm312_vm0, %v10236_v53 }
0x10be   : > { %10267 = vst.msk [vmem:[%s17056_s27 + $0xc0] sm:$0xff] %vm312_vm0, %v10235_v56  ;;  %v12920_v0 = vpop.f32.mrb[90].mxu0 }
0x10bf   : > { %v10238_v9 = vadd.f32 %v13586_v48, %v12920_v0  ;;  %v10150_v12 = vpop.f32.mrb[91].mxu0 }
0x10c0   : > { %v10237_v50 = vadd.f32 %v13587_v24, %v10150_v12 }
0x10c1   : > { %10270 = vst.msk [vmem:[%s17056_s27 + $0xd8] sm:$0xff] %vm312_vm0, %v10238_v9 }
0x10c2   : > { %10269 = vst.msk [vmem:[%s17056_s27 + $0xd0] sm:$0xff] %vm312_vm0, %v10237_v50  ;;  %v12923_v52 = vpop.f32.mrb[92].mxu0 }
0x10c3   : > { %v10240_v57 = vadd.f32 %v13588_v32, %v12923_v52  ;;  %v10160_v44 = vpop.f32.mrb[93].mxu0 }
0x10c4   : > { %v10239_v17 = vadd.f32 %v13589_v30, %v10160_v44 }
0x10c5   : > { %10272 = vst.msk [vmem:[%s17056_s27 + $0xe8] sm:$0xff] %vm312_vm0, %v10240_v57 }
0x10c6   : > { %10271 = vst.msk [vmem:[%s17056_s27 + $0xe0] sm:$0xff] %vm312_vm0, %v10239_v17  ;;  %v12926_v13 = vpop.f32.mrb[94].mxu0 }
0x10c7   : > { %v10242_v49 = vadd.f32 %v13590_v34, %v12926_v13  ;;  %v10170_v29 = vpop.f32.mrb[95].mxu0 }
0x10c8   : > { %v10241_v6 = vadd.f32 %v13591_v3, %v10170_v29 }
0x10c9   : > { %10274 = vst.msk [vmem:[%s17056_s27 + $0xf8] sm:$0xff] %vm312_vm0, %v10242_v49 }
0x10ca   : > { %10273 = vst.msk [vmem:[%s17056_s27 + $0xf0] sm:$0xff] %vm312_vm0, %v10241_v6 }
0x10cb PF: > { %s17_s24 = sadd.s32 1, %s13598_s24  }
0x10cc   : > { %p14_p4 = scmp.ge.s32.totalorder %s17_s24, 4  }
0x10ce   :  { %16 = sbr.rel (!%p14_p4) target bundleno = 1 (0x1), region = 100 }

</bundles_post_ra>
